<compile_context>
chip_gen: v7x
topology: tpu7x:2x2x1
jax: 0.10.0
libtpu: 0.0.40
codegen_flags: <defaults>
</compile_context>

<pallas_src>
import math

import jax
import jax.numpy as jnp
from jax.experimental import pallas as pl
from jax.experimental.pallas import tpu as pltpu

# ---- hyperparameters (match the PyTorch module defaults) --------------------
BATCH_SIZE = 1
EMBED_DIM = 400          # real embedding dim
NUM_CLASSES = 27
IN_CHANNELS = 1
PATCH_SIZE = 20
IMG_H = 20
IMG_W = 160
NUM_PATCHES = 8
ENC_MLP = 64
DEC_MLP = 64
ENC_LAYERS = 4
DEC_LAYERS = 4
NUM_QUERIES = 10
LN_EPS = 1e-5

# ---- lane-aligned padded dims ------------------------------------------------
DP = 512                 # 400 -> 512   (4 * 128 lanes)
HP = 128                 # 64  -> 128   (MLP hidden)
CP = 128                 # 27  -> 128   (classifier, lane-dense output)

_INV_SQRT2 = 1.0 / math.sqrt(2.0)


# ---------------------------- in-kernel helpers -------------------------------
def _gelu(y):
    # exact (erf) GELU — matches torch.nn.GELU / F.gelu default
    return 0.5 * y * (1.0 + jax.lax.erf(y * _INV_SQRT2))


def _softmax(s):
    m = jnp.max(s, axis=-1, keepdims=True)
    e = jnp.exp(s - m)
    return e * pl.reciprocal(jnp.sum(e, axis=-1, keepdims=True), approx=True)


def _ln(x, g, b, mask):
    """LayerNorm over the real EMBED_DIM features of a zero-padded (M, DP) tile.

    Relies on the invariant that padded lanes of `x` are zero (maintained by
    zero-padded weights/biases everywhere), so sums over DP equal sums over 400.
    """
    mean = jnp.sum(x, axis=-1, keepdims=True) * (1.0 / EMBED_DIM)
    c = (x - mean) * mask                      # zero the padded lanes
    var = jnp.sum(c * c, axis=-1, keepdims=True) * (1.0 / EMBED_DIM)
    return (c * jax.lax.rsqrt(var + LN_EPS)) * g + b


# ------------------------------ Pallas kernels --------------------------------
def _encoder_kernel(patches_ref, wp_ref, bp_ref, pos_ref,
                    wqkv_ref, bqkv_ref, wo_ref, bo_ref,
                    ln1g_ref, ln1b_ref, ln2g_ref, ln2b_ref,
                    w1_ref, b1_ref, w2_ref, b2_ref,
                    pe_ref, x_ref):
    """grid=(ENC_LAYERS,).  Step 0: patch embedding + pos add.  Every step: one
    pre-LN transformer encoder layer.  Activation lives in the resident x_ref."""
    @pl.when(pl.program_id(0) == 0)
    def _():
        pe = jnp.dot(patches_ref[...], wp_ref[...],
                     preferred_element_type=jnp.float32) + bp_ref[...]
        pe_ref[...] = pe                        # raw patch embedding (decoder needs it)
        x_ref[...] = pe + pos_ref[...]          # embedding dropout == identity (eval)

    mask = (jax.lax.broadcasted_iota(jnp.int32, (NUM_PATCHES, DP), 1)
            < EMBED_DIM).astype(jnp.float32)
    x = x_ref[...]

    # --- pre-LN single-head self-attention, fused QKV (scale folded into Q) ---
    h = _ln(x, ln1g_ref[...], ln1b_ref[...], mask)
    qkv = jnp.dot(h, wqkv_ref[...], preferred_element_type=jnp.float32) + bqkv_ref[...]
    q = qkv[:, :DP]
    k = qkv[:, DP:2 * DP]
    v = qkv[:, 2 * DP:]
    s = jax.lax.dot_general(q, k, (((1,), (1,)), ((), ())),
                            preferred_element_type=jnp.float32)
    ctx = jnp.dot(_softmax(s), v, preferred_element_type=jnp.float32)
    x = x + jnp.dot(ctx, wo_ref[...], preferred_element_type=jnp.float32) + bo_ref[...]

    # --- pre-LN feed-forward (GELU) ---
    h2 = _ln(x, ln2g_ref[...], ln2b_ref[...], mask)
    ff = _gelu(jnp.dot(h2, w1_ref[...], preferred_element_type=jnp.float32) + b1_ref[...])
    ff = jnp.dot(ff, w2_ref[...], preferred_element_type=jnp.float32) + b2_ref[...]
    x_ref[...] = x + ff


def _decoder_kernel(ln1_ref, enc_ref, pe_ref,
                    wq_ref, bq_ref, wk_ref, bk_ref, wv_ref, bv_ref,
                    wo_ref, bo_ref, lng_ref, lnb_ref,
                    w1_ref, b1_ref, w2_ref, b2_ref,
                    wc_ref, bc_ref, out_ref):
    """Last decoder layer (cross-attention + MLP, shared LN) + classifier, fused.
    ln1_ref is the host-folded constant from the zero object-query self-attention."""
    mask = (jax.lax.broadcasted_iota(jnp.int32, (NUM_QUERIES, DP), 1)
            < EMBED_DIM).astype(jnp.float32)
    g = lng_ref[...]
    b = lnb_ref[...]
    ln1 = ln1_ref[...]
    enc = enc_ref[...]

    # cross-attention: query = ln1 (+0), key = pos_enc + enc_out, value = enc_out
    q = jnp.dot(ln1, wq_ref[...], preferred_element_type=jnp.float32) + bq_ref[...]
    k = jnp.dot(pe_ref[...] + enc, wk_ref[...],
                preferred_element_type=jnp.float32) + bk_ref[...]
    v = jnp.dot(enc, wv_ref[...], preferred_element_type=jnp.float32) + bv_ref[...]
    s = jax.lax.dot_general(q, k, (((1,), (1,)), ((), ())),
                            preferred_element_type=jnp.float32)
    ctx = jnp.dot(_softmax(s), v, preferred_element_type=jnp.float32)
    mha2 = jnp.dot(ctx, wo_ref[...], preferred_element_type=jnp.float32) + bo_ref[...]
    ln2 = _ln(mha2, g, b, mask) + ln1

    m = _gelu(jnp.dot(ln2, w1_ref[...], preferred_element_type=jnp.float32) + b1_ref[...])
    m = jnp.dot(m, w2_ref[...], preferred_element_type=jnp.float32) + b2_ref[...]
    feat = _ln(m, g, b, mask) + ln2

    out_ref[...] = jnp.dot(feat, wc_ref[...],
                           preferred_element_type=jnp.float32) + bc_ref[...]


# ------------------------------ pallas_call wrappers ---------------------------
def run_encoder(patches, prep):
    e = prep["enc"]
    c2 = lambda l: (0, 0)          # constant (resident) inputs / outputs
    s3 = lambda l: (l, 0, 0)       # per-layer stacked weights

    return pl.pallas_call(
        _encoder_kernel,
        out_shape=(jax.ShapeDtypeStruct((NUM_PATCHES, DP), jnp.float32),   # patch_emb
                   jax.ShapeDtypeStruct((NUM_PATCHES, DP), jnp.float32)),  # encoder out
        grid=(ENC_LAYERS,),
        in_specs=[
            pl.BlockSpec((NUM_PATCHES, DP), c2),      # patches
            pl.BlockSpec((DP, DP), c2),               # w_patch
            pl.BlockSpec((1, DP), c2),                # b_patch
            pl.BlockSpec((NUM_PATCHES, DP), c2),      # positional embedding
            pl.BlockSpec((None, DP, 3 * DP), s3),     # wqkv (stacked per layer)
            pl.BlockSpec((None, 1, 3 * DP), s3),      # bqkv
            pl.BlockSpec((None, DP, DP), s3),         # wo
            pl.BlockSpec((None, 1, DP), s3),          # bo
            pl.BlockSpec((None, 1, DP), s3),          # ln1_g
            pl.BlockSpec((None, 1, DP), s3),          # ln1_b
            pl.BlockSpec((None, 1, DP), s3),          # ln2_g
            pl.BlockSpec((None, 1, DP), s3),          # ln2_b
            pl.BlockSpec((None, DP, HP), s3),         # w1
            pl.BlockSpec((None, 1, HP), s3),          # b1
            pl.BlockSpec((None, HP, DP), s3),         # w2
            pl.BlockSpec((None, 1, DP), s3),          # b2
        ],
        out_specs=(pl.BlockSpec((NUM_PATCHES, DP), c2),
                   pl.BlockSpec((NUM_PATCHES, DP), c2)),
        compiler_params=pltpu.CompilerParams(
            dimension_semantics=("arbitrary",),
            vmem_limit_bytes=48 * 1024 * 1024),
    )(patches, prep["w_patch"], prep["b_patch"], prep["pos"],
      e["wqkv"], e["bqkv"], e["wo"], e["bo"],
      e["ln1_g"], e["ln1_b"], e["ln2_g"], e["ln2_b"],
      e["w1"], e["b1"], e["w2"], e["b2"])


def run_decoder(enc_out, patch_emb, prep):
    d = prep["dec"]
    c2 = lambda i: (0, 0)
    return pl.pallas_call(
        _decoder_kernel,
        out_shape=jax.ShapeDtypeStruct((NUM_QUERIES, CP), jnp.float32),
        grid=(1,),
        in_specs=[
            pl.BlockSpec((NUM_QUERIES, DP), c2),                          # ln1 (folded const)
            pl.BlockSpec((NUM_PATCHES, DP), c2),                          # encoder output
            pl.BlockSpec((NUM_PATCHES, DP), c2),                          # positional encoding
            pl.BlockSpec((DP, DP), c2), pl.BlockSpec((1, DP), c2),        # wq, bq (scale folded)
            pl.BlockSpec((DP, DP), c2), pl.BlockSpec((1, DP), c2),        # wk, bk
            pl.BlockSpec((DP, DP), c2), pl.BlockSpec((1, DP), c2),        # wv, bv
            pl.BlockSpec((DP, DP), c2), pl.BlockSpec((1, DP), c2),        # wo, bo
            pl.BlockSpec((1, DP), c2), pl.BlockSpec((1, DP), c2),         # ln_g, ln_b (shared)
            pl.BlockSpec((DP, HP), c2), pl.BlockSpec((1, HP), c2),        # w1, b1
            pl.BlockSpec((HP, DP), c2), pl.BlockSpec((1, DP), c2),        # w2, b2
            pl.BlockSpec((DP, CP), c2), pl.BlockSpec((1, CP), c2),        # w_cls, b_cls
        ],
        out_specs=pl.BlockSpec((NUM_QUERIES, CP), c2),
        compiler_params=pltpu.CompilerParams(
            dimension_semantics=("arbitrary",),
            vmem_limit_bytes=48 * 1024 * 1024),
    )(d["ln1"], enc_out, patch_emb,
      d["wq"], d["bq"], d["wk"], d["bk"], d["wv"], d["bv"], d["wo"], d["bo"],
      d["ln_g"], d["ln_b"], d["w1"], d["b1"], d["w2"], d["b2"],
      d["w_cls"], d["b_cls"])


# ------------------------------ forward pass -----------------------------------
@jax.jit
def model_forward(x_nchw, prep):
    B, C, H, W = x_nchw.shape
    n_p = W // PATCH_SIZE
    # Conv2d(k=20, stride=20) == per-patch flatten in (c, h, w) order + matmul
    # (the matmul itself runs inside the encoder kernel at grid step 0).
    patches = x_nchw.reshape(B, C, H, n_p, PATCH_SIZE)
    patches = jnp.transpose(patches, (0, 3, 1, 2, 4)).reshape(B * n_p, C * H * PATCH_SIZE)
    patches = jnp.pad(patches, ((0, 0), (0, DP - patches.shape[1])))
    # TODO(synk): dropout layers (p=0.1) are treated as identity (inference mode).
    patch_emb, enc_out = run_encoder(patches, prep)
    logits = run_decoder(enc_out, patch_emb, prep)            # (10, 128) lane-dense
    return logits[:, :NUM_CLASSES][None]                      # (1, 10, 27)


# ------------------------------ parameter handling ------------------------------
def _pad2(w, rows, cols):
    return jnp.pad(w, ((0, rows - w.shape[0]), (0, cols - w.shape[1])))


def _pad1(v, n):
    return jnp.pad(v, (0, n - v.shape[0]))


def prepare_params(params):
    """One-time host-side prep: zero-pad to lane-aligned shapes, concat QKV,
    fold the 1/sqrt(d) attention scale into Q, stack encoder layers for the
    grid=(4,) kernel, fold the constant zero-object-query self-attention, and
    keep only the last decoder layer (the only one whose output is used)."""
    scale = 1.0 / math.sqrt(EMBED_DIM)

    prep = {
        "w_patch": _pad2(params["w_patch"], DP, DP),
        "b_patch": _pad1(params["b_patch"], DP).reshape(1, DP),
        "pos": _pad2(params["pos_emb"], NUM_PATCHES, DP),
    }

    keys = ("wqkv", "bqkv", "wo", "bo", "ln1_g", "ln1_b", "ln2_g", "ln2_b",
            "w1", "b1", "w2", "b2")
    enc = {k: [] for k in keys}
    for p in params["encoder"]:
        a = p["attn"]
        enc["wqkv"].append(jnp.concatenate(
            [_pad2(a["wq"] * scale, DP, DP), _pad2(a["wk"], DP, DP),
             _pad2(a["wv"], DP, DP)], axis=1))
        enc["bqkv"].append(jnp.concatenate(
            [_pad1(a["bq"] * scale, DP), _pad1(a["bk"], DP),
             _pad1(a["bv"], DP)]).reshape(1, 3 * DP))
        enc["wo"].append(_pad2(a["wo"], DP, DP))
        enc["bo"].append(_pad1(a["bo"], DP).reshape(1, DP))
        enc["ln1_g"].append(_pad1(p["ln1_g"], DP).reshape(1, DP))
        enc["ln1_b"].append(_pad1(p["ln1_b"], DP).reshape(1, DP))
        enc["ln2_g"].append(_pad1(p["ln2_g"], DP).reshape(1, DP))
        enc["ln2_b"].append(_pad1(p["ln2_b"], DP).reshape(1, DP))
        enc["w1"].append(_pad2(p["w1"], DP, HP))
        enc["b1"].append(_pad1(p["b1"], HP).reshape(1, HP))
        enc["w2"].append(_pad2(p["w2"], HP, DP))
        enc["b2"].append(_pad1(p["b2"], DP).reshape(1, DP))
    prep["enc"] = {k: jnp.stack(v) for k, v in enc.items()}

    # Decoder: the PyTorch loop overwrites x each iteration, so only the LAST
    # layer's output feeds the classifier — earlier layers are dead work.
    d = params["decoder"]["layers"][-1]
    a1, a2 = d["attn1"], d["attn2"]
    # Zero object queries => q = k = 0 => uniform softmax => context row == bv,
    # so mha1 == bv @ Wo + bo and ln1 == LayerNorm(mha1): an input-independent constant.
    mha1_row = a1["bv"] @ a1["wo"] + a1["bo"]
    mean = jnp.mean(mha1_row)
    var = jnp.mean((mha1_row - mean) ** 2)
    ln1_row = (mha1_row - mean) * jax.lax.rsqrt(var + LN_EPS) * d["ln_g"] + d["ln_b"]

    prep["dec"] = {
        "ln1": jnp.broadcast_to(_pad1(ln1_row, DP), (NUM_QUERIES, DP)),
        "wq": _pad2(a2["wq"] * scale, DP, DP),
        "bq": _pad1(a2["bq"] * scale, DP).reshape(1, DP),
        "wk": _pad2(a2["wk"], DP, DP), "bk": _pad1(a2["bk"], DP).reshape(1, DP),
        "wv": _pad2(a2["wv"], DP, DP), "bv": _pad1(a2["bv"], DP).reshape(1, DP),
        "wo": _pad2(a2["wo"], DP, DP), "bo": _pad1(a2["bo"], DP).reshape(1, DP),
        "ln_g": _pad1(d["ln_g"], DP).reshape(1, DP),
        "ln_b": _pad1(d["ln_b"], DP).reshape(1, DP),
        "w1": _pad2(d["w1"], DP, HP), "b1": _pad1(d["b1"], HP).reshape(1, HP),
        "w2": _pad2(d["w2"], HP, DP), "b2": _pad1(d["b2"], DP).reshape(1, DP),
        "w_cls": _pad2(params["decoder"]["w_out"], DP, CP),
        "b_cls": _pad1(params["decoder"]["b_out"], CP).reshape(1, CP),
    }
    return prep


class _KeyGen:
    def __init__(self, key):
        self.key = key

    def __call__(self):
        self.key, sub = jax.random.split(self.key)
        return sub


def _nrm(key, shape, scale=0.02):
    return scale * jax.random.normal(key, shape, dtype=jnp.float32)


def _init_mha(kg, dim):
    return dict(
        wq=_nrm(kg(), (dim, dim)), bq=_nrm(kg(), (dim,)),
        wk=_nrm(kg(), (dim, dim)), bk=_nrm(kg(), (dim,)),
        wv=_nrm(kg(), (dim, dim)), bv=_nrm(kg(), (dim,)),
        wo=_nrm(kg(), (dim, dim)), bo=_nrm(kg(), (dim,)),
    )


def init_params(key):
    kg = _KeyGen(key)
    params = dict(
        w_patch=_nrm(kg(), (IN_CHANNELS * PATCH_SIZE * PATCH_SIZE, EMBED_DIM)),
        b_patch=_nrm(kg(), (EMBED_DIM,)),
        pos_emb=jax.random.normal(kg(), (NUM_PATCHES, EMBED_DIM), dtype=jnp.float32),
        encoder=[],
        decoder=dict(layers=[]),
    )
    for _ in range(ENC_LAYERS):
        params["encoder"].append(dict(
            ln1_g=jnp.ones((EMBED_DIM,), jnp.float32),
            ln1_b=jnp.zeros((EMBED_DIM,), jnp.float32),
            attn=_init_mha(kg, EMBED_DIM),
            ln2_g=jnp.ones((EMBED_DIM,), jnp.float32),
            ln2_b=jnp.zeros((EMBED_DIM,), jnp.float32),
            w1=_nrm(kg(), (EMBED_DIM, ENC_MLP)), b1=_nrm(kg(), (ENC_MLP,)),
            w2=_nrm(kg(), (ENC_MLP, EMBED_DIM)), b2=_nrm(kg(), (EMBED_DIM,)),
        ))
    for _ in range(DEC_LAYERS):
        params["decoder"]["layers"].append(dict(
            attn1=_init_mha(kg, EMBED_DIM),
            attn2=_init_mha(kg, EMBED_DIM),
            ln_g=jnp.ones((EMBED_DIM,), jnp.float32),
            ln_b=jnp.zeros((EMBED_DIM,), jnp.float32),
            w1=_nrm(kg(), (EMBED_DIM, DEC_MLP)), b1=_nrm(kg(), (DEC_MLP,)),
            w2=_nrm(kg(), (DEC_MLP, EMBED_DIM)), b2=_nrm(kg(), (EMBED_DIM,)),
        ))
    params["decoder"]["w_out"] = _nrm(kg(), (EMBED_DIM, NUM_CLASSES))
    params["decoder"]["b_out"] = _nrm(kg(), (NUM_CLASSES,))
    return params


# ------------------------------------ main ------------------------------------
if __name__ == "__main__":
    root = jax.random.PRNGKey(0)
    k_in, k_par = jax.random.split(root)

    # deterministic example input, PyTorch NCHW: (1, 1, 20, 160)
    x = jax.random.normal(k_in, (BATCH_SIZE, IN_CHANNELS, IMG_H, IMG_W), dtype=jnp.float32)
    params = init_params(k_par)
    prep = prepare_params(params)   # one-time host-side padding / fusion prep

    out = model_forward(x, prep)
    out = jax.block_until_ready(out)

    assert out.shape == (BATCH_SIZE, NUM_QUERIES, NUM_CLASSES), out.shape
    assert out.dtype == jnp.float32
    print("KERNEL_OK")
</pallas_src>

<mosaic_0001>
module attributes {stable_mosaic.version = 11 : i64} {
  func.func @_encoder_kernel(%arg0: i32, %arg1: memref<8x512xf32, #tpu.memory_space<vmem>>, %arg2: memref<512x512xf32, #tpu.memory_space<vmem>>, %arg3: memref<1x512xf32, #tpu.memory_space<vmem>>, %arg4: memref<8x512xf32, #tpu.memory_space<vmem>>, %arg5: memref<1x512x1536xf32, #tpu.memory_space<vmem>>, %arg6: memref<1x1x1536xf32, #tpu.memory_space<vmem>>, %arg7: memref<1x512x512xf32, #tpu.memory_space<vmem>>, %arg8: memref<1x1x512xf32, #tpu.memory_space<vmem>>, %arg9: memref<1x1x512xf32, #tpu.memory_space<vmem>>, %arg10: memref<1x1x512xf32, #tpu.memory_space<vmem>>, %arg11: memref<1x1x512xf32, #tpu.memory_space<vmem>>, %arg12: memref<1x1x512xf32, #tpu.memory_space<vmem>>, %arg13: memref<1x512x128xf32, #tpu.memory_space<vmem>>, %arg14: memref<1x1x128xf32, #tpu.memory_space<vmem>>, %arg15: memref<1x128x512xf32, #tpu.memory_space<vmem>>, %arg16: memref<1x1x512xf32, #tpu.memory_space<vmem>>, %arg17: memref<8x512xf32, #tpu.memory_space<vmem>>, %arg18: memref<8x512xf32, #tpu.memory_space<vmem>>) attributes {dimension_semantics = [#tpu.dimension_semantics<arbitrary>], iteration_bounds = array<i64: 4>, scalar_prefetch = 0 : i64, scratch_operands = 0 : i64, tpu.core_type = #tpu.core_type<tc>, window_params = [{pipeline_mode = #tpu.pipeline_mode<synchronous>, transform_indices = @transform_0, window_bounds = array<i64: 8, 512>}, {pipeline_mode = #tpu.pipeline_mode<synchronous>, transform_indices = @transform_1, window_bounds = array<i64: 512, 512>}, {pipeline_mode = #tpu.pipeline_mode<synchronous>, transform_indices = @transform_2, window_bounds = array<i64: 1, 512>}, {pipeline_mode = #tpu.pipeline_mode<synchronous>, transform_indices = @transform_3, window_bounds = array<i64: 8, 512>}, {transform_indices = @transform_4, window_bounds = array<i64: 1, 512, 1536>}, {transform_indices = @transform_5, window_bounds = array<i64: 1, 1, 1536>}, {transform_indices = @transform_6, window_bounds = array<i64: 1, 512, 512>}, {transform_indices = @transform_7, window_bounds = array<i64: 1, 1, 512>}, {transform_indices = @transform_8, window_bounds = array<i64: 1, 1, 512>}, {transform_indices = @transform_9, window_bounds = array<i64: 1, 1, 512>}, {transform_indices = @transform_10, window_bounds = array<i64: 1, 1, 512>}, {transform_indices = @transform_11, window_bounds = array<i64: 1, 1, 512>}, {transform_indices = @transform_12, window_bounds = array<i64: 1, 512, 128>}, {transform_indices = @transform_13, window_bounds = array<i64: 1, 1, 128>}, {transform_indices = @transform_14, window_bounds = array<i64: 1, 128, 512>}, {transform_indices = @transform_15, window_bounds = array<i64: 1, 1, 512>}, {pipeline_mode = #tpu.pipeline_mode<synchronous>, transform_indices = @transform_16, window_bounds = array<i64: 8, 512>}, {pipeline_mode = #tpu.pipeline_mode<synchronous>, transform_indices = @transform_17, window_bounds = array<i64: 8, 512>}]} {
    %c0_i32 = arith.constant 0 : i32
    %0 = arith.cmpi eq, %arg0, %c0_i32 : i32
    %1 = arith.extui %0 : i1 to i32
    %c0_i32_0 = arith.constant 0 : i32
    %2 = arith.cmpi ne, %1, %c0_i32_0 : i32
    scf.if %2 {
      %c0_60 = arith.constant 0 : index
      %c0_61 = arith.constant 0 : index
      %113 = vector.load %arg1[%c0_60, %c0_61] : memref<8x512xf32, #tpu.memory_space<vmem>>, vector<8x512xf32>
      %c0_62 = arith.constant 0 : index
      %c0_63 = arith.constant 0 : index
      %114 = vector.load %arg2[%c0_62, %c0_63] : memref<512x512xf32, #tpu.memory_space<vmem>>, vector<512x512xf32>
      %cst_64 = arith.constant dense<0.000000e+00> : vector<8x512xf32>
      %115 = tpu.matmul %113, %114, %cst_64 {dimension_numbers = #tpu.dot_dimension_numbers<[1], [0], [0], [1], [0, 0, 1, 1], [], []>} : vector<8x512xf32>, vector<512x512xf32>, vector<8x512xf32> -> vector<8x512xf32>
      %c0_65 = arith.constant 0 : index
      %c0_66 = arith.constant 0 : index
      %116 = vector.load %arg3[%c0_65, %c0_66] : memref<1x512xf32, #tpu.memory_space<vmem>>, vector<1x512xf32>
      %117 = vector.broadcast %116 : vector<1x512xf32> to vector<8x512xf32>
      %118 = arith.addf %115, %117 : vector<8x512xf32>
      %c0_67 = arith.constant 0 : index
      %c0_68 = arith.constant 0 : index
      %119 = vector.load %arg17[%c0_67, %c0_68] : memref<8x512xf32, #tpu.memory_space<vmem>>, vector<8x512xf32>
      tpu.vector_store %arg17[%c0_67, %c0_68], %118 {strides = array<i32>} : memref<8x512xf32, #tpu.memory_space<vmem>>, vector<8x512xf32>,
      %c0_69 = arith.constant 0 : index
      %c0_70 = arith.constant 0 : index
      %120 = vector.load %arg4[%c0_69, %c0_70] : memref<8x512xf32, #tpu.memory_space<vmem>>, vector<8x512xf32>
      %121 = arith.addf %118, %120 : vector<8x512xf32>
      %c0_71 = arith.constant 0 : index
      %c0_72 = arith.constant 0 : index
      %122 = vector.load %arg18[%c0_71, %c0_72] : memref<8x512xf32, #tpu.memory_space<vmem>>, vector<8x512xf32>
      tpu.vector_store %arg18[%c0_71, %c0_72], %121 {strides = array<i32>} : memref<8x512xf32, #tpu.memory_space<vmem>>, vector<8x512xf32>,
    } else {
    }
    %3 = tpu.iota {dimensions = array<i32: 1>} : vector<8x512xi32>
    %c400_i32 = arith.constant 400 : i32
    %4 = vector.broadcast %c400_i32 : i32 to vector<8x512xi32>
    %5 = arith.cmpi slt, %3, %4 : vector<8x512xi32>
    %6 = arith.extui %5 : vector<8x512xi1> to vector<8x512xi32>
    %7 = arith.sitofp %6 : vector<8x512xi32> to vector<8x512xf32>
    %c0 = arith.constant 0 : index
    %c0_1 = arith.constant 0 : index
    %8 = vector.load %arg18[%c0, %c0_1] : memref<8x512xf32, #tpu.memory_space<vmem>>, vector<8x512xf32>
    %c0_2 = arith.constant 0 : index
    %c0_3 = arith.constant 0 : index
    %c0_4 = arith.constant 0 : index
    %9 = vector.load %arg9[%c0_2, %c0_3, %c0_4] : memref<1x1x512xf32, #tpu.memory_space<vmem>>, vector<1x1x512xf32>
    %10 = vector.shape_cast %9 : vector<1x1x512xf32> to vector<1x512xf32>
    %c0_5 = arith.constant 0 : index
    %c0_6 = arith.constant 0 : index
    %c0_7 = arith.constant 0 : index
    %11 = vector.load %arg10[%c0_5, %c0_6, %c0_7] : memref<1x1x512xf32, #tpu.memory_space<vmem>>, vector<1x1x512xf32>
    %12 = vector.shape_cast %11 : vector<1x1x512xf32> to vector<1x512xf32>
    %cst = arith.constant dense<0.000000e+00> : vector<8xf32>
    %13 = vector.multi_reduction <add>, %8, %cst [1] : vector<8x512xf32> to vector<8xf32>
    %14 = vector.shape_cast %13 : vector<8xf32> to vector<8x1xf32>
    %cst_8 = arith.constant 2.500000e-03 : f32
    %15 = vector.broadcast %cst_8 : f32 to vector<8x1xf32>
    %16 = arith.mulf %14, %15 : vector<8x1xf32>
    %17 = vector.broadcast %16 : vector<8x1xf32> to vector<8x512xf32>
    %18 = arith.subf %8, %17 : vector<8x512xf32>
    %19 = arith.mulf %18, %7 : vector<8x512xf32>
    %20 = arith.mulf %19, %19 : vector<8x512xf32>
    %cst_9 = arith.constant dense<0.000000e+00> : vector<8xf32>
    %21 = vector.multi_reduction <add>, %20, %cst_9 [1] : vector<8x512xf32> to vector<8xf32>
    %22 = vector.shape_cast %21 : vector<8xf32> to vector<8x1xf32>
    %cst_10 = arith.constant 2.500000e-03 : f32
    %23 = vector.broadcast %cst_10 : f32 to vector<8x1xf32>
    %24 = arith.mulf %22, %23 : vector<8x1xf32>
    %cst_11 = arith.constant 9.99999974E-6 : f32
    %25 = vector.broadcast %cst_11 : f32 to vector<8x1xf32>
    %26 = arith.addf %24, %25 : vector<8x1xf32>
    %27 = math.rsqrt %26 : vector<8x1xf32>
    %28 = vector.broadcast %27 : vector<8x1xf32> to vector<8x512xf32>
    %29 = arith.mulf %19, %28 : vector<8x512xf32>
    %30 = vector.broadcast %10 : vector<1x512xf32> to vector<8x512xf32>
    %31 = arith.mulf %29, %30 : vector<8x512xf32>
    %32 = vector.broadcast %12 : vector<1x512xf32> to vector<8x512xf32>
    %33 = arith.addf %31, %32 : vector<8x512xf32>
    %c0_12 = arith.constant 0 : index
    %c0_13 = arith.constant 0 : index
    %c0_14 = arith.constant 0 : index
    %34 = vector.load %arg5[%c0_12, %c0_13, %c0_14] : memref<1x512x1536xf32, #tpu.memory_space<vmem>>, vector<1x512x1536xf32>
    %35 = vector.shape_cast %34 : vector<1x512x1536xf32> to vector<512x1536xf32>
    %cst_15 = arith.constant dense<0.000000e+00> : vector<8x1536xf32>
    %36 = tpu.matmul %33, %35, %cst_15 {dimension_numbers = #tpu.dot_dimension_numbers<[1], [0], [0], [1], [0, 0, 1, 1], [], []>} : vector<8x512xf32>, vector<512x1536xf32>, vector<8x1536xf32> -> vector<8x1536xf32>
    %c0_16 = arith.constant 0 : index
    %c0_17 = arith.constant 0 : index
    %c0_18 = arith.constant 0 : index
    %37 = vector.load %arg6[%c0_16, %c0_17, %c0_18] : memref<1x1x1536xf32, #tpu.memory_space<vmem>>, vector<1x1x1536xf32>
    %38 = vector.shape_cast %37 : vector<1x1x1536xf32> to vector<1x1536xf32>
    %39 = vector.broadcast %38 : vector<1x1536xf32> to vector<8x1536xf32>
    %40 = arith.addf %36, %39 : vector<8x1536xf32>
    %41 = vector.extract_strided_slice %40 {offsets = [0, 0], sizes = [8, 512], strides = [1, 1]} : vector<8x1536xf32> to vector<8x512xf32>
    %42 = vector.extract_strided_slice %40 {offsets = [0, 512], sizes = [8, 512], strides = [1, 1]} : vector<8x1536xf32> to vector<8x512xf32>
    %43 = vector.extract_strided_slice %40 {offsets = [0, 1024], sizes = [8, 512], strides = [1, 1]} : vector<8x1536xf32> to vector<8x512xf32>
    %cst_19 = arith.constant dense<0.000000e+00> : vector<8x8xf32>
    %44 = tpu.matmul %41, %42, %cst_19 {dimension_numbers = #tpu.dot_dimension_numbers<[1], [1], [0], [0], [0, 0, 1, 0], [], []>} : vector<8x512xf32>, vector<8x512xf32>, vector<8x8xf32> -> vector<8x8xf32>
    %cst_20 = arith.constant dense<0xFF800000> : vector<8xf32>
    %45 = vector.multi_reduction <maximumf>, %44, %cst_20 [1] : vector<8x8xf32> to vector<8xf32>
    %46 = vector.shape_cast %45 : vector<8xf32> to vector<8x1xf32>
    %47 = vector.broadcast %46 : vector<8x1xf32> to vector<8x8xf32>
    %48 = arith.subf %44, %47 : vector<8x8xf32>
    %49 = math.exp %48 : vector<8x8xf32>
    %cst_21 = arith.constant dense<0.000000e+00> : vector<8xf32>
    %50 = vector.multi_reduction <add>, %49, %cst_21 [1] : vector<8x8xf32> to vector<8xf32>
    %51 = vector.shape_cast %50 : vector<8xf32> to vector<8x1xf32>
    %52 = tpu.reciprocal %51 {approx = true} : vector<8x1xf32> -> vector<8x1xf32>
    %53 = vector.broadcast %52 : vector<8x1xf32> to vector<8x8xf32>
    %54 = arith.mulf %49, %53 : vector<8x8xf32>
    %cst_22 = arith.constant dense<0.000000e+00> : vector<8x512xf32>
    %55 = tpu.matmul %54, %43, %cst_22 {dimension_numbers = #tpu.dot_dimension_numbers<[1], [0], [0], [1], [0, 0, 1, 1], [], []>} : vector<8x8xf32>, vector<8x512xf32>, vector<8x512xf32> -> vector<8x512xf32>
    %c0_23 = arith.constant 0 : index
    %c0_24 = arith.constant 0 : index
    %c0_25 = arith.constant 0 : index
    %56 = vector.load %arg7[%c0_23, %c0_24, %c0_25] : memref<1x512x512xf32, #tpu.memory_space<vmem>>, vector<1x512x512xf32>
    %57 = vector.shape_cast %56 : vector<1x512x512xf32> to vector<512x512xf32>
    %cst_26 = arith.constant dense<0.000000e+00> : vector<8x512xf32>
    %58 = tpu.matmul %55, %57, %cst_26 {dimension_numbers = #tpu.dot_dimension_numbers<[1], [0], [0], [1], [0, 0, 1, 1], [], []>} : vector<8x512xf32>, vector<512x512xf32>, vector<8x512xf32> -> vector<8x512xf32>
    %59 = arith.addf %8, %58 : vector<8x512xf32>
    %c0_27 = arith.constant 0 : index
    %c0_28 = arith.constant 0 : index
    %c0_29 = arith.constant 0 : index
    %60 = vector.load %arg8[%c0_27, %c0_28, %c0_29] : memref<1x1x512xf32, #tpu.memory_space<vmem>>, vector<1x1x512xf32>
    %61 = vector.shape_cast %60 : vector<1x1x512xf32> to vector<1x512xf32>
    %62 = vector.broadcast %61 : vector<1x512xf32> to vector<8x512xf32>
    %63 = arith.addf %59, %62 : vector<8x512xf32>
    %c0_30 = arith.constant 0 : index
    %c0_31 = arith.constant 0 : index
    %c0_32 = arith.constant 0 : index
    %64 = vector.load %arg11[%c0_30, %c0_31, %c0_32] : memref<1x1x512xf32, #tpu.memory_space<vmem>>, vector<1x1x512xf32>
    %65 = vector.shape_cast %64 : vector<1x1x512xf32> to vector<1x512xf32>
    %c0_33 = arith.constant 0 : index
    %c0_34 = arith.constant 0 : index
    %c0_35 = arith.constant 0 : index
    %66 = vector.load %arg12[%c0_33, %c0_34, %c0_35] : memref<1x1x512xf32, #tpu.memory_space<vmem>>, vector<1x1x512xf32>
    %67 = vector.shape_cast %66 : vector<1x1x512xf32> to vector<1x512xf32>
    %cst_36 = arith.constant dense<0.000000e+00> : vector<8xf32>
    %68 = vector.multi_reduction <add>, %63, %cst_36 [1] : vector<8x512xf32> to vector<8xf32>
    %69 = vector.shape_cast %68 : vector<8xf32> to vector<8x1xf32>
    %cst_37 = arith.constant 2.500000e-03 : f32
    %70 = vector.broadcast %cst_37 : f32 to vector<8x1xf32>
    %71 = arith.mulf %69, %70 : vector<8x1xf32>
    %72 = vector.broadcast %71 : vector<8x1xf32> to vector<8x512xf32>
    %73 = arith.subf %63, %72 : vector<8x512xf32>
    %74 = arith.mulf %73, %7 : vector<8x512xf32>
    %75 = arith.mulf %74, %74 : vector<8x512xf32>
    %cst_38 = arith.constant dense<0.000000e+00> : vector<8xf32>
    %76 = vector.multi_reduction <add>, %75, %cst_38 [1] : vector<8x512xf32> to vector<8xf32>
    %77 = vector.shape_cast %76 : vector<8xf32> to vector<8x1xf32>
    %cst_39 = arith.constant 2.500000e-03 : f32
    %78 = vector.broadcast %cst_39 : f32 to vector<8x1xf32>
    %79 = arith.mulf %77, %78 : vector<8x1xf32>
    %cst_40 = arith.constant 9.99999974E-6 : f32
    %80 = vector.broadcast %cst_40 : f32 to vector<8x1xf32>
    %81 = arith.addf %79, %80 : vector<8x1xf32>
    %82 = math.rsqrt %81 : vector<8x1xf32>
    %83 = vector.broadcast %82 : vector<8x1xf32> to vector<8x512xf32>
    %84 = arith.mulf %74, %83 : vector<8x512xf32>
    %85 = vector.broadcast %65 : vector<1x512xf32> to vector<8x512xf32>
    %86 = arith.mulf %84, %85 : vector<8x512xf32>
    %87 = vector.broadcast %67 : vector<1x512xf32> to vector<8x512xf32>
    %88 = arith.addf %86, %87 : vector<8x512xf32>
    %c0_41 = arith.constant 0 : index
    %c0_42 = arith.constant 0 : index
    %c0_43 = arith.constant 0 : index
    %89 = vector.load %arg13[%c0_41, %c0_42, %c0_43] : memref<1x512x128xf32, #tpu.memory_space<vmem>>, vector<1x512x128xf32>
    %90 = vector.shape_cast %89 : vector<1x512x128xf32> to vector<512x128xf32>
    %cst_44 = arith.constant dense<0.000000e+00> : vector<8x128xf32>
    %91 = tpu.matmul %88, %90, %cst_44 {dimension_numbers = #tpu.dot_dimension_numbers<[1], [0], [0], [1], [0, 0, 1, 1], [], []>} : vector<8x512xf32>, vector<512x128xf32>, vector<8x128xf32> -> vector<8x128xf32>
    %c0_45 = arith.constant 0 : index
    %c0_46 = arith.constant 0 : index
    %c0_47 = arith.constant 0 : index
    %92 = vector.load %arg14[%c0_45, %c0_46, %c0_47] : memref<1x1x128xf32, #tpu.memory_space<vmem>>, vector<1x1x128xf32>
    %93 = vector.shape_cast %92 : vector<1x1x128xf32> to vector<1x128xf32>
    %94 = vector.broadcast %93 : vector<1x128xf32> to vector<8x128xf32>
    %95 = arith.addf %91, %94 : vector<8x128xf32>
    %cst_48 = arith.constant 5.000000e-01 : f32
    %96 = vector.broadcast %cst_48 : f32 to vector<8x128xf32>
    %97 = arith.mulf %96, %95 : vector<8x128xf32>
    %cst_49 = arith.constant 0.707106769 : f32
    %98 = vector.broadcast %cst_49 : f32 to vector<8x128xf32>
    %99 = arith.mulf %95, %98 : vector<8x128xf32>
    %100 = math.erf %99 : vector<8x128xf32>
    %cst_50 = arith.constant 1.000000e+00 : f32
    %101 = vector.broadcast %cst_50 : f32 to vector<8x128xf32>
    %102 = arith.addf %101, %100 : vector<8x128xf32>
    %103 = arith.mulf %97, %102 : vector<8x128xf32>
    %c0_51 = arith.constant 0 : index
    %c0_52 = arith.constant 0 : index
    %c0_53 = arith.constant 0 : index
    %104 = vector.load %arg15[%c0_51, %c0_52, %c0_53] : memref<1x128x512xf32, #tpu.memory_space<vmem>>, vector<1x128x512xf32>
    %105 = vector.shape_cast %104 : vector<1x128x512xf32> to vector<128x512xf32>
    %cst_54 = arith.constant dense<0.000000e+00> : vector<8x512xf32>
    %106 = tpu.matmul %103, %105, %cst_54 {dimension_numbers = #tpu.dot_dimension_numbers<[1], [0], [0], [1], [0, 0, 1, 1], [], []>} : vector<8x128xf32>, vector<128x512xf32>, vector<8x512xf32> -> vector<8x512xf32>
    %c0_55 = arith.constant 0 : index
    %c0_56 = arith.constant 0 : index
    %c0_57 = arith.constant 0 : index
    %107 = vector.load %arg16[%c0_55, %c0_56, %c0_57] : memref<1x1x512xf32, #tpu.memory_space<vmem>>, vector<1x1x512xf32>
    %108 = vector.shape_cast %107 : vector<1x1x512xf32> to vector<1x512xf32>
    %109 = vector.broadcast %108 : vector<1x512xf32> to vector<8x512xf32>
    %110 = arith.addf %106, %109 : vector<8x512xf32>
    %111 = arith.addf %63, %110 : vector<8x512xf32>
    %c0_58 = arith.constant 0 : index
    %c0_59 = arith.constant 0 : index
    %112 = vector.load %arg18[%c0_58, %c0_59] : memref<8x512xf32, #tpu.memory_space<vmem>>, vector<8x512xf32>
    tpu.vector_store %arg18[%c0_58, %c0_59], %111 {strides = array<i32>} : memref<8x512xf32, #tpu.memory_space<vmem>>, vector<8x512xf32>,
    return
  }
  func.func @transform_0(%arg0: i32) -> (i32, i32) {
    %c0_i32 = arith.constant 0 : i32
    %c0_i32_0 = arith.constant 0 : i32
    %c0_i32_1 = arith.constant 0 : i32
    return %c0_i32, %c0_i32_0 : i32, i32
  }
  func.func @transform_1(%arg0: i32) -> (i32, i32) {
    %c0_i32 = arith.constant 0 : i32
    %c0_i32_0 = arith.constant 0 : i32
    %c0_i32_1 = arith.constant 0 : i32
    return %c0_i32, %c0_i32_0 : i32, i32
  }
  func.func @transform_2(%arg0: i32) -> (i32, i32) {
    %c0_i32 = arith.constant 0 : i32
    %c0_i32_0 = arith.constant 0 : i32
    %c0_i32_1 = arith.constant 0 : i32
    return %c0_i32, %c0_i32_0 : i32, i32
  }
  func.func @transform_3(%arg0: i32) -> (i32, i32) {
    %c0_i32 = arith.constant 0 : i32
    %c0_i32_0 = arith.constant 0 : i32
    %c0_i32_1 = arith.constant 0 : i32
    return %c0_i32, %c0_i32_0 : i32, i32
  }
  func.func @transform_4(%arg0: i32) -> (i32, i32, i32) {
    %c0_i32 = arith.constant 0 : i32
    %c0_i32_0 = arith.constant 0 : i32
    %c0_i32_1 = arith.constant 0 : i32
    return %arg0, %c0_i32, %c0_i32_0 : i32, i32, i32
  }
  func.func @transform_5(%arg0: i32) -> (i32, i32, i32) {
    %c0_i32 = arith.constant 0 : i32
    %c0_i32_0 = arith.constant 0 : i32
    %c0_i32_1 = arith.constant 0 : i32
    return %arg0, %c0_i32, %c0_i32_0 : i32, i32, i32
  }
  func.func @transform_6(%arg0: i32) -> (i32, i32, i32) {
    %c0_i32 = arith.constant 0 : i32
    %c0_i32_0 = arith.constant 0 : i32
    %c0_i32_1 = arith.constant 0 : i32
    return %arg0, %c0_i32, %c0_i32_0 : i32, i32, i32
  }
  func.func @transform_7(%arg0: i32) -> (i32, i32, i32) {
    %c0_i32 = arith.constant 0 : i32
    %c0_i32_0 = arith.constant 0 : i32
    %c0_i32_1 = arith.constant 0 : i32
    return %arg0, %c0_i32, %c0_i32_0 : i32, i32, i32
  }
  func.func @transform_8(%arg0: i32) -> (i32, i32, i32) {
    %c0_i32 = arith.constant 0 : i32
    %c0_i32_0 = arith.constant 0 : i32
    %c0_i32_1 = arith.constant 0 : i32
    return %arg0, %c0_i32, %c0_i32_0 : i32, i32, i32
  }
  func.func @transform_9(%arg0: i32) -> (i32, i32, i32) {
    %c0_i32 = arith.constant 0 : i32
    %c0_i32_0 = arith.constant 0 : i32
    %c0_i32_1 = arith.constant 0 : i32
    return %arg0, %c0_i32, %c0_i32_0 : i32, i32, i32
  }
  func.func @transform_10(%arg0: i32) -> (i32, i32, i32) {
    %c0_i32 = arith.constant 0 : i32
    %c0_i32_0 = arith.constant 0 : i32
    %c0_i32_1 = arith.constant 0 : i32
    return %arg0, %c0_i32, %c0_i32_0 : i32, i32, i32
  }
  func.func @transform_11(%arg0: i32) -> (i32, i32, i32) {
    %c0_i32 = arith.constant 0 : i32
    %c0_i32_0 = arith.constant 0 : i32
    %c0_i32_1 = arith.constant 0 : i32
    return %arg0, %c0_i32, %c0_i32_0 : i32, i32, i32
  }
  func.func @transform_12(%arg0: i32) -> (i32, i32, i32) {
    %c0_i32 = arith.constant 0 : i32
    %c0_i32_0 = arith.constant 0 : i32
    %c0_i32_1 = arith.constant 0 : i32
    return %arg0, %c0_i32, %c0_i32_0 : i32, i32, i32
  }
  func.func @transform_13(%arg0: i32) -> (i32, i32, i32) {
    %c0_i32 = arith.constant 0 : i32
    %c0_i32_0 = arith.constant 0 : i32
    %c0_i32_1 = arith.constant 0 : i32
    return %arg0, %c0_i32, %c0_i32_0 : i32, i32, i32
  }
  func.func @transform_14(%arg0: i32) -> (i32, i32, i32) {
    %c0_i32 = arith.constant 0 : i32
    %c0_i32_0 = arith.constant 0 : i32
    %c0_i32_1 = arith.constant 0 : i32
    return %arg0, %c0_i32, %c0_i32_0 : i32, i32, i32
  }
  func.func @transform_15(%arg0: i32) -> (i32, i32, i32) {
    %c0_i32 = arith.constant 0 : i32
    %c0_i32_0 = arith.constant 0 : i32
    %c0_i32_1 = arith.constant 0 : i32
    return %arg0, %c0_i32, %c0_i32_0 : i32, i32, i32
  }
  func.func @transform_16(%arg0: i32) -> (i32, i32) {
    %c0_i32 = arith.constant 0 : i32
    %c0_i32_0 = arith.constant 0 : i32
    %c0_i32_1 = arith.constant 0 : i32
    return %c0_i32, %c0_i32_0 : i32, i32
  }
  func.func @transform_17(%arg0: i32) -> (i32, i32) {
    %c0_i32 = arith.constant 0 : i32
    %c0_i32_0 = arith.constant 0 : i32
    %c0_i32_1 = arith.constant 0 : i32
    return %c0_i32, %c0_i32_0 : i32, i32
  }
}

module attributes {stable_mosaic.version = 11 : i64} {
  func.func @_decoder_kernel(%arg0: i32, %arg1: memref<10x512xf32, #tpu.memory_space<vmem>>, %arg2: memref<8x512xf32, #tpu.memory_space<vmem>>, %arg3: memref<8x512xf32, #tpu.memory_space<vmem>>, %arg4: memref<512x512xf32, #tpu.memory_space<vmem>>, %arg5: memref<1x512xf32, #tpu.memory_space<vmem>>, %arg6: memref<512x512xf32, #tpu.memory_space<vmem>>, %arg7: memref<1x512xf32, #tpu.memory_space<vmem>>, %arg8: memref<512x512xf32, #tpu.memory_space<vmem>>, %arg9: memref<1x512xf32, #tpu.memory_space<vmem>>, %arg10: memref<512x512xf32, #tpu.memory_space<vmem>>, %arg11: memref<1x512xf32, #tpu.memory_space<vmem>>, %arg12: memref<1x512xf32, #tpu.memory_space<vmem>>, %arg13: memref<1x512xf32, #tpu.memory_space<vmem>>, %arg14: memref<512x128xf32, #tpu.memory_space<vmem>>, %arg15: memref<1x128xf32, #tpu.memory_space<vmem>>, %arg16: memref<128x512xf32, #tpu.memory_space<vmem>>, %arg17: memref<1x512xf32, #tpu.memory_space<vmem>>, %arg18: memref<512x128xf32, #tpu.memory_space<vmem>>, %arg19: memref<1x128xf32, #tpu.memory_space<vmem>>, %arg20: memref<10x128xf32, #tpu.memory_space<vmem>>) attributes {dimension_semantics = [#tpu.dimension_semantics<arbitrary>], iteration_bounds = array<i64: 1>, scalar_prefetch = 0 : i64, scratch_operands = 0 : i64, tpu.core_type = #tpu.core_type<tc>, window_params = [{pipeline_mode = #tpu.pipeline_mode<synchronous>, transform_indices = @transform_0, window_bounds = array<i64: 10, 512>}, {pipeline_mode = #tpu.pipeline_mode<synchronous>, transform_indices = @transform_1, window_bounds = array<i64: 8, 512>}, {pipeline_mode = #tpu.pipeline_mode<synchronous>, transform_indices = @transform_2, window_bounds = array<i64: 8, 512>}, {pipeline_mode = #tpu.pipeline_mode<synchronous>, transform_indices = @transform_3, window_bounds = array<i64: 512, 512>}, {pipeline_mode = #tpu.pipeline_mode<synchronous>, transform_indices = @transform_4, window_bounds = array<i64: 1, 512>}, {pipeline_mode = #tpu.pipeline_mode<synchronous>, transform_indices = @transform_5, window_bounds = array<i64: 512, 512>}, {pipeline_mode = #tpu.pipeline_mode<synchronous>, transform_indices = @transform_6, window_bounds = array<i64: 1, 512>}, {pipeline_mode = #tpu.pipeline_mode<synchronous>, transform_indices = @transform_7, window_bounds = array<i64: 512, 512>}, {pipeline_mode = #tpu.pipeline_mode<synchronous>, transform_indices = @transform_8, window_bounds = array<i64: 1, 512>}, {pipeline_mode = #tpu.pipeline_mode<synchronous>, transform_indices = @transform_9, window_bounds = array<i64: 512, 512>}, {pipeline_mode = #tpu.pipeline_mode<synchronous>, transform_indices = @transform_10, window_bounds = array<i64: 1, 512>}, {pipeline_mode = #tpu.pipeline_mode<synchronous>, transform_indices = @transform_11, window_bounds = array<i64: 1, 512>}, {pipeline_mode = #tpu.pipeline_mode<synchronous>, transform_indices = @transform_12, window_bounds = array<i64: 1, 512>}, {pipeline_mode = #tpu.pipeline_mode<synchronous>, transform_indices = @transform_13, window_bounds = array<i64: 512, 128>}, {pipeline_mode = #tpu.pipeline_mode<synchronous>, transform_indices = @transform_14, window_bounds = array<i64: 1, 128>}, {pipeline_mode = #tpu.pipeline_mode<synchronous>, transform_indices = @transform_15, window_bounds = array<i64: 128, 512>}, {pipeline_mode = #tpu.pipeline_mode<synchronous>, transform_indices = @transform_16, window_bounds = array<i64: 1, 512>}, {pipeline_mode = #tpu.pipeline_mode<synchronous>, transform_indices = @transform_17, window_bounds = array<i64: 512, 128>}, {pipeline_mode = #tpu.pipeline_mode<synchronous>, transform_indices = @transform_18, window_bounds = array<i64: 1, 128>}, {pipeline_mode = #tpu.pipeline_mode<synchronous>, transform_indices = @transform_19, window_bounds = array<i64: 10, 128>}]} {
    %0 = tpu.iota {dimensions = array<i32: 1>} : vector<10x512xi32>
    %c400_i32 = arith.constant 400 : i32
    %1 = vector.broadcast %c400_i32 : i32 to vector<10x512xi32>
    %2 = arith.cmpi slt, %0, %1 : vector<10x512xi32>
    %3 = arith.extui %2 : vector<10x512xi1> to vector<10x512xi32>
    %4 = arith.sitofp %3 : vector<10x512xi32> to vector<10x512xf32>
    %c0 = arith.constant 0 : index
    %c0_0 = arith.constant 0 : index
    %5 = vector.load %arg12[%c0, %c0_0] : memref<1x512xf32, #tpu.memory_space<vmem>>, vector<1x512xf32>
    %c0_1 = arith.constant 0 : index
    %c0_2 = arith.constant 0 : index
    %6 = vector.load %arg13[%c0_1, %c0_2] : memref<1x512xf32, #tpu.memory_space<vmem>>, vector<1x512xf32>
    %c0_3 = arith.constant 0 : index
    %c0_4 = arith.constant 0 : index
    %7 = vector.load %arg1[%c0_3, %c0_4] : memref<10x512xf32, #tpu.memory_space<vmem>>, vector<10x512xf32>
    %c0_5 = arith.constant 0 : index
    %c0_6 = arith.constant 0 : index
    %8 = vector.load %arg2[%c0_5, %c0_6] : memref<8x512xf32, #tpu.memory_space<vmem>>, vector<8x512xf32>
    %c0_7 = arith.constant 0 : index
    %c0_8 = arith.constant 0 : index
    %9 = vector.load %arg4[%c0_7, %c0_8] : memref<512x512xf32, #tpu.memory_space<vmem>>, vector<512x512xf32>
    %cst = arith.constant dense<0.000000e+00> : vector<10x512xf32>
    %10 = tpu.matmul %7, %9, %cst {dimension_numbers = #tpu.dot_dimension_numbers<[1], [0], [0], [1], [0, 0, 1, 1], [], []>} : vector<10x512xf32>, vector<512x512xf32>, vector<10x512xf32> -> vector<10x512xf32>
    %c0_9 = arith.constant 0 : index
    %c0_10 = arith.constant 0 : index
    %11 = vector.load %arg5[%c0_9, %c0_10] : memref<1x512xf32, #tpu.memory_space<vmem>>, vector<1x512xf32>
    %12 = vector.broadcast %11 : vector<1x512xf32> to vector<10x512xf32>
    %13 = arith.addf %10, %12 : vector<10x512xf32>
    %c0_11 = arith.constant 0 : index
    %c0_12 = arith.constant 0 : index
    %14 = vector.load %arg3[%c0_11, %c0_12] : memref<8x512xf32, #tpu.memory_space<vmem>>, vector<8x512xf32>
    %15 = arith.addf %14, %8 : vector<8x512xf32>
    %c0_13 = arith.constant 0 : index
    %c0_14 = arith.constant 0 : index
    %16 = vector.load %arg6[%c0_13, %c0_14] : memref<512x512xf32, #tpu.memory_space<vmem>>, vector<512x512xf32>
    %cst_15 = arith.constant dense<0.000000e+00> : vector<8x512xf32>
    %17 = tpu.matmul %15, %16, %cst_15 {dimension_numbers = #tpu.dot_dimension_numbers<[1], [0], [0], [1], [0, 0, 1, 1], [], []>} : vector<8x512xf32>, vector<512x512xf32>, vector<8x512xf32> -> vector<8x512xf32>
    %c0_16 = arith.constant 0 : index
    %c0_17 = arith.constant 0 : index
    %18 = vector.load %arg7[%c0_16, %c0_17] : memref<1x512xf32, #tpu.memory_space<vmem>>, vector<1x512xf32>
    %19 = vector.broadcast %18 : vector<1x512xf32> to vector<8x512xf32>
    %20 = arith.addf %17, %19 : vector<8x512xf32>
    %c0_18 = arith.constant 0 : index
    %c0_19 = arith.constant 0 : index
    %21 = vector.load %arg8[%c0_18, %c0_19] : memref<512x512xf32, #tpu.memory_space<vmem>>, vector<512x512xf32>
    %cst_20 = arith.constant dense<0.000000e+00> : vector<8x512xf32>
    %22 = tpu.matmul %8, %21, %cst_20 {dimension_numbers = #tpu.dot_dimension_numbers<[1], [0], [0], [1], [0, 0, 1, 1], [], []>} : vector<8x512xf32>, vector<512x512xf32>, vector<8x512xf32> -> vector<8x512xf32>
    %c0_21 = arith.constant 0 : index
    %c0_22 = arith.constant 0 : index
    %23 = vector.load %arg9[%c0_21, %c0_22] : memref<1x512xf32, #tpu.memory_space<vmem>>, vector<1x512xf32>
    %24 = vector.broadcast %23 : vector<1x512xf32> to vector<8x512xf32>
    %25 = arith.addf %22, %24 : vector<8x512xf32>
    %cst_23 = arith.constant dense<0.000000e+00> : vector<10x8xf32>
    %26 = tpu.matmul %13, %20, %cst_23 {dimension_numbers = #tpu.dot_dimension_numbers<[1], [1], [0], [0], [0, 0, 1, 0], [], []>} : vector<10x512xf32>, vector<8x512xf32>, vector<10x8xf32> -> vector<10x8xf32>
    %cst_24 = arith.constant dense<0xFF800000> : vector<10xf32>
    %27 = vector.multi_reduction <maximumf>, %26, %cst_24 [1] : vector<10x8xf32> to vector<10xf32>
    %28 = vector.shape_cast %27 : vector<10xf32> to vector<10x1xf32>
    %29 = vector.broadcast %28 : vector<10x1xf32> to vector<10x8xf32>
    %30 = arith.subf %26, %29 : vector<10x8xf32>
    %31 = math.exp %30 : vector<10x8xf32>
    %cst_25 = arith.constant dense<0.000000e+00> : vector<10xf32>
    %32 = vector.multi_reduction <add>, %31, %cst_25 [1] : vector<10x8xf32> to vector<10xf32>
    %33 = vector.shape_cast %32 : vector<10xf32> to vector<10x1xf32>
    %34 = tpu.reciprocal %33 {approx = true} : vector<10x1xf32> -> vector<10x1xf32>
    %35 = vector.broadcast %34 : vector<10x1xf32> to vector<10x8xf32>
    %36 = arith.mulf %31, %35 : vector<10x8xf32>
    %cst_26 = arith.constant dense<0.000000e+00> : vector<10x512xf32>
    %37 = tpu.matmul %36, %25, %cst_26 {dimension_numbers = #tpu.dot_dimension_numbers<[1], [0], [0], [1], [0, 0, 1, 1], [], []>} : vector<10x8xf32>, vector<8x512xf32>, vector<10x512xf32> -> vector<10x512xf32>
    %c0_27 = arith.constant 0 : index
    %c0_28 = arith.constant 0 : index
    %38 = vector.load %arg10[%c0_27, %c0_28] : memref<512x512xf32, #tpu.memory_space<vmem>>, vector<512x512xf32>
    %cst_29 = arith.constant dense<0.000000e+00> : vector<10x512xf32>
    %39 = tpu.matmul %37, %38, %cst_29 {dimension_numbers = #tpu.dot_dimension_numbers<[1], [0], [0], [1], [0, 0, 1, 1], [], []>} : vector<10x512xf32>, vector<512x512xf32>, vector<10x512xf32> -> vector<10x512xf32>
    %c0_30 = arith.constant 0 : index
    %c0_31 = arith.constant 0 : index
    %40 = vector.load %arg11[%c0_30, %c0_31] : memref<1x512xf32, #tpu.memory_space<vmem>>, vector<1x512xf32>
    %41 = vector.broadcast %40 : vector<1x512xf32> to vector<10x512xf32>
    %42 = arith.addf %39, %41 : vector<10x512xf32>
    %cst_32 = arith.constant dense<0.000000e+00> : vector<10xf32>
    %43 = vector.multi_reduction <add>, %42, %cst_32 [1] : vector<10x512xf32> to vector<10xf32>
    %44 = vector.shape_cast %43 : vector<10xf32> to vector<10x1xf32>
    %cst_33 = arith.constant 2.500000e-03 : f32
    %45 = vector.broadcast %cst_33 : f32 to vector<10x1xf32>
    %46 = arith.mulf %44, %45 : vector<10x1xf32>
    %47 = vector.broadcast %46 : vector<10x1xf32> to vector<10x512xf32>
    %48 = arith.subf %42, %47 : vector<10x512xf32>
    %49 = arith.mulf %48, %4 : vector<10x512xf32>
    %50 = arith.mulf %49, %49 : vector<10x512xf32>
    %cst_34 = arith.constant dense<0.000000e+00> : vector<10xf32>
    %51 = vector.multi_reduction <add>, %50, %cst_34 [1] : vector<10x512xf32> to vector<10xf32>
    %52 = vector.shape_cast %51 : vector<10xf32> to vector<10x1xf32>
    %cst_35 = arith.constant 2.500000e-03 : f32
    %53 = vector.broadcast %cst_35 : f32 to vector<10x1xf32>
    %54 = arith.mulf %52, %53 : vector<10x1xf32>
    %cst_36 = arith.constant 9.99999974E-6 : f32
    %55 = vector.broadcast %cst_36 : f32 to vector<10x1xf32>
    %56 = arith.addf %54, %55 : vector<10x1xf32>
    %57 = math.rsqrt %56 : vector<10x1xf32>
    %58 = vector.broadcast %57 : vector<10x1xf32> to vector<10x512xf32>
    %59 = arith.mulf %49, %58 : vector<10x512xf32>
    %60 = vector.broadcast %5 : vector<1x512xf32> to vector<10x512xf32>
    %61 = arith.mulf %59, %60 : vector<10x512xf32>
    %62 = vector.broadcast %6 : vector<1x512xf32> to vector<10x512xf32>
    %63 = arith.addf %61, %62 : vector<10x512xf32>
    %64 = arith.addf %63, %7 : vector<10x512xf32>
    %c0_37 = arith.constant 0 : index
    %c0_38 = arith.constant 0 : index
    %65 = vector.load %arg14[%c0_37, %c0_38] : memref<512x128xf32, #tpu.memory_space<vmem>>, vector<512x128xf32>
    %cst_39 = arith.constant dense<0.000000e+00> : vector<10x128xf32>
    %66 = tpu.matmul %64, %65, %cst_39 {dimension_numbers = #tpu.dot_dimension_numbers<[1], [0], [0], [1], [0, 0, 1, 1], [], []>} : vector<10x512xf32>, vector<512x128xf32>, vector<10x128xf32> -> vector<10x128xf32>
    %c0_40 = arith.constant 0 : index
    %c0_41 = arith.constant 0 : index
    %67 = vector.load %arg15[%c0_40, %c0_41] : memref<1x128xf32, #tpu.memory_space<vmem>>, vector<1x128xf32>
    %68 = vector.broadcast %67 : vector<1x128xf32> to vector<10x128xf32>
    %69 = arith.addf %66, %68 : vector<10x128xf32>
    %cst_42 = arith.constant 5.000000e-01 : f32
    %70 = vector.broadcast %cst_42 : f32 to vector<10x128xf32>
    %71 = arith.mulf %70, %69 : vector<10x128xf32>
    %cst_43 = arith.constant 0.707106769 : f32
    %72 = vector.broadcast %cst_43 : f32 to vector<10x128xf32>
    %73 = arith.mulf %69, %72 : vector<10x128xf32>
    %74 = math.erf %73 : vector<10x128xf32>
    %cst_44 = arith.constant 1.000000e+00 : f32
    %75 = vector.broadcast %cst_44 : f32 to vector<10x128xf32>
    %76 = arith.addf %75, %74 : vector<10x128xf32>
    %77 = arith.mulf %71, %76 : vector<10x128xf32>
    %c0_45 = arith.constant 0 : index
    %c0_46 = arith.constant 0 : index
    %78 = vector.load %arg16[%c0_45, %c0_46] : memref<128x512xf32, #tpu.memory_space<vmem>>, vector<128x512xf32>
    %cst_47 = arith.constant dense<0.000000e+00> : vector<10x512xf32>
    %79 = tpu.matmul %77, %78, %cst_47 {dimension_numbers = #tpu.dot_dimension_numbers<[1], [0], [0], [1], [0, 0, 1, 1], [], []>} : vector<10x128xf32>, vector<128x512xf32>, vector<10x512xf32> -> vector<10x512xf32>
    %c0_48 = arith.constant 0 : index
    %c0_49 = arith.constant 0 : index
    %80 = vector.load %arg17[%c0_48, %c0_49] : memref<1x512xf32, #tpu.memory_space<vmem>>, vector<1x512xf32>
    %81 = vector.broadcast %80 : vector<1x512xf32> to vector<10x512xf32>
    %82 = arith.addf %79, %81 : vector<10x512xf32>
    %cst_50 = arith.constant dense<0.000000e+00> : vector<10xf32>
    %83 = vector.multi_reduction <add>, %82, %cst_50 [1] : vector<10x512xf32> to vector<10xf32>
    %84 = vector.shape_cast %83 : vector<10xf32> to vector<10x1xf32>
    %cst_51 = arith.constant 2.500000e-03 : f32
    %85 = vector.broadcast %cst_51 : f32 to vector<10x1xf32>
    %86 = arith.mulf %84, %85 : vector<10x1xf32>
    %87 = vector.broadcast %86 : vector<10x1xf32> to vector<10x512xf32>
    %88 = arith.subf %82, %87 : vector<10x512xf32>
    %89 = arith.mulf %88, %4 : vector<10x512xf32>
    %90 = arith.mulf %89, %89 : vector<10x512xf32>
    %cst_52 = arith.constant dense<0.000000e+00> : vector<10xf32>
    %91 = vector.multi_reduction <add>, %90, %cst_52 [1] : vector<10x512xf32> to vector<10xf32>
    %92 = vector.shape_cast %91 : vector<10xf32> to vector<10x1xf32>
    %cst_53 = arith.constant 2.500000e-03 : f32
    %93 = vector.broadcast %cst_53 : f32 to vector<10x1xf32>
    %94 = arith.mulf %92, %93 : vector<10x1xf32>
    %cst_54 = arith.constant 9.99999974E-6 : f32
    %95 = vector.broadcast %cst_54 : f32 to vector<10x1xf32>
    %96 = arith.addf %94, %95 : vector<10x1xf32>
    %97 = math.rsqrt %96 : vector<10x1xf32>
    %98 = vector.broadcast %97 : vector<10x1xf32> to vector<10x512xf32>
    %99 = arith.mulf %89, %98 : vector<10x512xf32>
    %100 = vector.broadcast %5 : vector<1x512xf32> to vector<10x512xf32>
    %101 = arith.mulf %99, %100 : vector<10x512xf32>
    %102 = vector.broadcast %6 : vector<1x512xf32> to vector<10x512xf32>
    %103 = arith.addf %101, %102 : vector<10x512xf32>
    %104 = arith.addf %103, %64 : vector<10x512xf32>
    %c0_55 = arith.constant 0 : index
    %c0_56 = arith.constant 0 : index
    %105 = vector.load %arg18[%c0_55, %c0_56] : memref<512x128xf32, #tpu.memory_space<vmem>>, vector<512x128xf32>
    %cst_57 = arith.constant dense<0.000000e+00> : vector<10x128xf32>
    %106 = tpu.matmul %104, %105, %cst_57 {dimension_numbers = #tpu.dot_dimension_numbers<[1], [0], [0], [1], [0, 0, 1, 1], [], []>} : vector<10x512xf32>, vector<512x128xf32>, vector<10x128xf32> -> vector<10x128xf32>
    %c0_58 = arith.constant 0 : index
    %c0_59 = arith.constant 0 : index
    %107 = vector.load %arg19[%c0_58, %c0_59] : memref<1x128xf32, #tpu.memory_space<vmem>>, vector<1x128xf32>
    %108 = vector.broadcast %107 : vector<1x128xf32> to vector<10x128xf32>
    %109 = arith.addf %106, %108 : vector<10x128xf32>
    %c0_60 = arith.constant 0 : index
    %c0_61 = arith.constant 0 : index
    %110 = vector.load %arg20[%c0_60, %c0_61] : memref<10x128xf32, #tpu.memory_space<vmem>>, vector<10x128xf32>
    tpu.vector_store %arg20[%c0_60, %c0_61], %109 {strides = array<i32>} : memref<10x128xf32, #tpu.memory_space<vmem>>, vector<10x128xf32>,
    return
  }
  func.func @transform_0(%arg0: i32) -> (i32, i32) {
    %c0_i32 = arith.constant 0 : i32
    %c0_i32_0 = arith.constant 0 : i32
    %c0_i32_1 = arith.constant 0 : i32
    return %c0_i32, %c0_i32_0 : i32, i32
  }
  func.func @transform_1(%arg0: i32) -> (i32, i32) {
    %c0_i32 = arith.constant 0 : i32
    %c0_i32_0 = arith.constant 0 : i32
    %c0_i32_1 = arith.constant 0 : i32
    return %c0_i32, %c0_i32_0 : i32, i32
  }
  func.func @transform_2(%arg0: i32) -> (i32, i32) {
    %c0_i32 = arith.constant 0 : i32
    %c0_i32_0 = arith.constant 0 : i32
    %c0_i32_1 = arith.constant 0 : i32
    return %c0_i32, %c0_i32_0 : i32, i32
  }
  func.func @transform_3(%arg0: i32) -> (i32, i32) {
    %c0_i32 = arith.constant 0 : i32
    %c0_i32_0 = arith.constant 0 : i32
    %c0_i32_1 = arith.constant 0 : i32
    return %c0_i32, %c0_i32_0 : i32, i32
  }
  func.func @transform_4(%arg0: i32) -> (i32, i32) {
    %c0_i32 = arith.constant 0 : i32
    %c0_i32_0 = arith.constant 0 : i32
    %c0_i32_1 = arith.constant 0 : i32
    return %c0_i32, %c0_i32_0 : i32, i32
  }
  func.func @transform_5(%arg0: i32) -> (i32, i32) {
    %c0_i32 = arith.constant 0 : i32
    %c0_i32_0 = arith.constant 0 : i32
    %c0_i32_1 = arith.constant 0 : i32
    return %c0_i32, %c0_i32_0 : i32, i32
  }
  func.func @transform_6(%arg0: i32) -> (i32, i32) {
    %c0_i32 = arith.constant 0 : i32
    %c0_i32_0 = arith.constant 0 : i32
    %c0_i32_1 = arith.constant 0 : i32
    return %c0_i32, %c0_i32_0 : i32, i32
  }
  func.func @transform_7(%arg0: i32) -> (i32, i32) {
    %c0_i32 = arith.constant 0 : i32
    %c0_i32_0 = arith.constant 0 : i32
    %c0_i32_1 = arith.constant 0 : i32
    return %c0_i32, %c0_i32_0 : i32, i32
  }
  func.func @transform_8(%arg0: i32) -> (i32, i32) {
    %c0_i32 = arith.constant 0 : i32
    %c0_i32_0 = arith.constant 0 : i32
    %c0_i32_1 = arith.constant 0 : i32
    return %c0_i32, %c0_i32_0 : i32, i32
  }
  func.func @transform_9(%arg0: i32) -> (i32, i32) {
    %c0_i32 = arith.constant 0 : i32
    %c0_i32_0 = arith.constant 0 : i32
    %c0_i32_1 = arith.constant 0 : i32
    return %c0_i32, %c0_i32_0 : i32, i32
  }
  func.func @transform_10(%arg0: i32) -> (i32, i32) {
    %c0_i32 = arith.constant 0 : i32
    %c0_i32_0 = arith.constant 0 : i32
    %c0_i32_1 = arith.constant 0 : i32
    return %c0_i32, %c0_i32_0 : i32, i32
  }
  func.func @transform_11(%arg0: i32) -> (i32, i32) {
    %c0_i32 = arith.constant 0 : i32
    %c0_i32_0 = arith.constant 0 : i32
    %c0_i32_1 = arith.constant 0 : i32
    return %c0_i32, %c0_i32_0 : i32, i32
  }
  func.func @transform_12(%arg0: i32) -> (i32, i32) {
    %c0_i32 = arith.constant 0 : i32
    %c0_i32_0 = arith.constant 0 : i32
    %c0_i32_1 = arith.constant 0 : i32
    return %c0_i32, %c0_i32_0 : i32, i32
  }
  func.func @transform_13(%arg0: i32) -> (i32, i32) {
    %c0_i32 = arith.constant 0 : i32
    %c0_i32_0 = arith.constant 0 : i32
    %c0_i32_1 = arith.constant 0 : i32
    return %c0_i32, %c0_i32_0 : i32, i32
  }
  func.func @transform_14(%arg0: i32) -> (i32, i32) {
    %c0_i32 = arith.constant 0 : i32
    %c0_i32_0 = arith.constant 0 : i32
    %c0_i32_1 = arith.constant 0 : i32
    return %c0_i32, %c0_i32_0 : i32, i32
  }
  func.func @transform_15(%arg0: i32) -> (i32, i32) {
    %c0_i32 = arith.constant 0 : i32
    %c0_i32_0 = arith.constant 0 : i32
    %c0_i32_1 = arith.constant 0 : i32
    return %c0_i32, %c0_i32_0 : i32, i32
  }
  func.func @transform_16(%arg0: i32) -> (i32, i32) {
    %c0_i32 = arith.constant 0 : i32
    %c0_i32_0 = arith.constant 0 : i32
    %c0_i32_1 = arith.constant 0 : i32
    return %c0_i32, %c0_i32_0 : i32, i32
  }
  func.func @transform_17(%arg0: i32) -> (i32, i32) {
    %c0_i32 = arith.constant 0 : i32
    %c0_i32_0 = arith.constant 0 : i32
    %c0_i32_1 = arith.constant 0 : i32
    return %c0_i32, %c0_i32_0 : i32, i32
  }
  func.func @transform_18(%arg0: i32) -> (i32, i32) {
    %c0_i32 = arith.constant 0 : i32
    %c0_i32_0 = arith.constant 0 : i32
    %c0_i32_1 = arith.constant 0 : i32
    return %c0_i32, %c0_i32_0 : i32, i32
  }
  func.func @transform_19(%arg0: i32) -> (i32, i32) {
    %c0_i32 = arith.constant 0 : i32
    %c0_i32_0 = arith.constant 0 : i32
    %c0_i32_1 = arith.constant 0 : i32
    return %c0_i32, %c0_i32_0 : i32, i32
  }
}

</mosaic_0001>

<bundles_post_ra>
// kernel: model_forward.3
= control target key start
LH: loop header
LB: loop body
LE: loop exit
PB: predicated region body
PF: predicated region fallthrough
CT: control target
= control target key end

     0   :  { %vm1961_vm0 = vcmask 64512   ;;  %vm1965_vm1 = vcmask 58368   ;;  %vm2736_vm2 = vcmask 1041408   ;;  %s9328_s3 = inlined_call_operand.vmem [shape: f32[512,512], index: 3, kind: input, shape index: {}]   ;;  %s9329_s0 = inlined_call_operand.vmem [shape: f32[10,512], index: 0, kind: input, shape index: {}]   ;;  %s9330_s5 = inlined_call_operand.vmem [shape: f32[512,512], index: 5, kind: input, shape index: {}]   ;;  %s9331_s1 = inlined_call_operand.vmem [shape: f32[8,512], index: 1, kind: input, shape index: {}]   ;;  %s9332_s2 = inlined_call_operand.vmem [shape: f32[8,512], index: 2, kind: input, shape index: {}]   ;;  %s9333_s7 = inlined_call_operand.vmem [shape: f32[512,512], index: 7, kind: input, shape index: {}]   ;;  %s9334_s4 = inlined_call_operand.vmem [shape: f32[1,512], index: 4, kind: input, shape index: {}]   ;;  %s9335_s6 = inlined_call_operand.vmem [shape: f32[1,512], index: 6, kind: input, shape index: {}]   ;;  %s9336_s8 = inlined_call_operand.vmem [shape: f32[1,512], index: 8, kind: input, shape index: {}]   ;;  %s9337_s9 = inlined_call_operand.vmem [shape: f32[512,512], index: 9, kind: input, shape index: {}]   ;;  %s9338_s10 = inlined_call_operand.vmem [shape: f32[1,512], index: 10, kind: input, shape index: {}]   ;;  %s9339_s13 = inlined_call_operand.vmem [shape: f32[512,128], index: 13, kind: input, shape index: {}]   ;;  %s9340_s15 = inlined_call_operand.vmem [shape: f32[128,512], index: 15, kind: input, shape index: {}]   ;;  %s9341_s11 = inlined_call_operand.vmem [shape: f32[1,512], index: 11, kind: input, shape index: {}]   ;;  %s9342_s12 = inlined_call_operand.vmem [shape: f32[1,512], index: 12, kind: input, shape index: {}]   ;;  %s9343_s14 = inlined_call_operand.vmem [shape: f32[1,128], index: 14, kind: input, shape index: {}]   ;;  %s9344_s16 = inlined_call_operand.vmem [shape: f32[1,512], index: 16, kind: input, shape index: {}]   ;;  %s9345_s17 = inlined_call_operand.vmem [shape: f32[512,128], index: 17, kind: input, shape index: {}]   ;;  %s9346_s18 = inlined_call_operand.vmem [shape: f32[1,128], index: 18, kind: input, shape index: {}]   ;;  %s9347_s19 = inlined_call_operand.vmem [shape: f32[10,128], index: 19, kind: output, shape index: {}]  }
   0x1   :  { %9352 = sst [smem:[#allocation2_spill]] %s9328_s3 }
   0x2   :  { %9353 = sst [smem:[#allocation3_spill]] %s9329_s0  ;;  %s9356_s20 = sld [smem:[#allocation2_spill]] }
   0x3   :  { %9354 = sst [smem:[#allocation4_spill]] %s9330_s5  ;;  %s9357_s21 = sld [smem:[#allocation3_spill]] }
   0x4   :  { %9355 = sst [smem:[#allocation5_spill]] %s9331_s1  ;;  %s9358_s22 = sld [smem:[#allocation4_spill]] }
   0x5   :  { %s9359_s26 = sld [smem:[#allocation5_spill]] }
   0x8   :  { %v94_v0 = vld [vmem:[%s9356_s20 + $0x8] sm:$0xff]  ;;  %v96_v2 = vld [vmem:[%s9356_s20 + $0x18] sm:$0xff]  ;;  %v93_v5 = vld [vmem:[%s9356_s20] sm:$0xff] }
   0x9   :  { %v98_v1 = vld [vmem:[%s9356_s20 + $0x28] sm:$0xff]  ;;  %v100_v4 = vld [vmem:[%s9356_s20 + $0x38] sm:$0xff]  ;;  %v97_v6 = vld [vmem:[%s9356_s20 + $0x20] sm:$0xff] }
   0xa   :  { %v3815_v3 = vpack.c.bf16 %v98_v1, %v94_v0  ;;  %v3943_v7 = vpack.c.bf16 %v100_v4, %v96_v2  ;;  %v3817_v8 = vpack.c.bf16 %v97_v6, %v93_v5  ;;  %v95_v9 = vld [vmem:[%s9356_s20 + $0x10] sm:$0xff]  ;;  %v102_v11 = vld [vmem:[%s9356_s20 + $0x48] sm:$0xff]  ;;  %v104_v14 = vld [vmem:[%s9356_s20 + $0x58] sm:$0xff] }
   0xb   :  { %v99_v10 = vld [vmem:[%s9356_s20 + $0x30] sm:$0xff]  ;;  %v106_v13 = vld [vmem:[%s9356_s20 + $0x68] sm:$0xff]  ;;  %v108_v15 = vld [vmem:[%s9356_s20 + $0x78] sm:$0xff] }
   0xc   :  { %3816 = vmatprep.subr.bf16.mxu0 %v3815_v3  ;;  %v3945_v12 = vpack.c.bf16 %v99_v10, %v95_v9  ;;  %3944 = vmatprep.subr.bf16.mxu1 %v3943_v7  ;;  %v3819_v16 = vpack.c.bf16 %v106_v13, %v102_v11  ;;  %v3947_v17 = vpack.c.bf16 %v108_v15, %v104_v14  ;;  %v101_v18 = vld [vmem:[%s9356_s20 + $0x40] sm:$0xff]  ;;  %v103_v20 = vld [vmem:[%s9356_s20 + $0x50] sm:$0xff]  ;;  %v110_v23 = vld [vmem:[%s9356_s20 + $0x88] sm:$0xff] }
   0xd   :  { %3818 = vmatpush1.bf16.msra.mxu0 %v3817_v8  ;;  %v105_v19 = vld [vmem:[%s9356_s20 + $0x60] sm:$0xff]  ;;  %v107_v22 = vld [vmem:[%s9356_s20 + $0x70] sm:$0xff]  ;;  %v114_v24 = vld [vmem:[%s9356_s20 + $0xa8] sm:$0xff] }
   0xe   :  { %3946 = vmatpush1.bf16.msra.mxu1 %v3945_v12  ;;  %v3821_v21 = vpack.c.bf16 %v105_v19, %v101_v18  ;;  %3820 = vmatprep.subr.bf16.mxu0 %v3819_v16  ;;  %v3949_v25 = vpack.c.bf16 %v107_v22, %v103_v20  ;;  %v3823_v26 = vpack.c.bf16 %v114_v24, %v110_v23  ;;  %v112_v27 = vld [vmem:[%s9356_s20 + $0x98] sm:$0xff]  ;;  %v109_v29 = vld [vmem:[%s9356_s20 + $0x80] sm:$0xff]  ;;  %v111_v32 = vld [vmem:[%s9356_s20 + $0x90] sm:$0xff] }
   0xf   :  { %3948 = vmatprep.subr.bf16.mxu1 %v3947_v17  ;;  %v116_v28 = vld [vmem:[%s9356_s20 + $0xb8] sm:$0xff]  ;;  %v113_v31 = vld [vmem:[%s9356_s20 + $0xa0] sm:$0xff]  ;;  %v115_v33 = vld [vmem:[%s9356_s20 + $0xb0] sm:$0xff] }
  0x10   :  { %v3951_v30 = vpack.c.bf16 %v116_v28, %v112_v27  ;;  %v3825_v34 = vpack.c.bf16 %v113_v31, %v109_v29  ;;  %v118_v35 = vld [vmem:[%s9356_s20 + $0xc8] sm:$0xff]  ;;  %v120_v37 = vld [vmem:[%s9356_s20 + $0xd8] sm:$0xff]  ;;  %v3953_v38 = vpack.c.bf16 %v115_v33, %v111_v32  ;;  %v117_v41 = vld [vmem:[%s9356_s20 + $0xc0] sm:$0xff] }
  0x11   :  { %3822 = vmatpush1.bf16.msra.mxu0 %v3821_v21  ;;  %v122_v36 = vld [vmem:[%s9356_s20 + $0xe8] sm:$0xff]  ;;  %v124_v40 = vld [vmem:[%s9356_s20 + $0xf8] sm:$0xff]  ;;  %v121_v42 = vld [vmem:[%s9356_s20 + $0xe0] sm:$0xff] }
  0x12   :  { %3950 = vmatpush1.bf16.msra.mxu1 %v3949_v25  ;;  %3824 = vmatprep.subr.bf16.mxu0 %v3823_v26  ;;  %v3827_v39 = vpack.c.bf16 %v122_v36, %v118_v35  ;;  %v3955_v43 = vpack.c.bf16 %v124_v40, %v120_v37  ;;  %v119_v44 = vld [vmem:[%s9356_s20 + $0xd0] sm:$0xff]  ;;  %v126_v46 = vld [vmem:[%s9356_s20 + $0x108] sm:$0xff]  ;;  %v128_v48 = vld [vmem:[%s9356_s20 + $0x118] sm:$0xff]  ;;  %v3829_v50 = vpack.c.bf16 %v121_v42, %v117_v41 }
  0x13   :  { %3952 = vmatprep.subr.bf16.mxu1 %v3951_v30  ;;  %v123_v45 = vld [vmem:[%s9356_s20 + $0xf0] sm:$0xff]  ;;  %v130_v47 = vld [vmem:[%s9356_s20 + $0x128] sm:$0xff]  ;;  %v132_v49 = vld [vmem:[%s9356_s20 + $0x138] sm:$0xff] }
  0x14   :  { %v3957_v51 = vpack.c.bf16 %v123_v45, %v119_v44  ;;  %v3831_v52 = vpack.c.bf16 %v130_v47, %v126_v46  ;;  %v125_v53 = vld [vmem:[%s9356_s20 + $0x100] sm:$0xff]  ;;  %v127_v55 = vld [vmem:[%s9356_s20 + $0x110] sm:$0xff]  ;;  %v3959_v56 = vpack.c.bf16 %v132_v49, %v128_v48  ;;  %v134_v58 = vld [vmem:[%s9356_s20 + $0x148] sm:$0xff] }
  0x15   :  { %3826 = vmatpush1.bf16.msra.mxu0 %v3825_v34  ;;  %v129_v54 = vld [vmem:[%s9356_s20 + $0x120] sm:$0xff]  ;;  %v131_v57 = vld [vmem:[%s9356_s20 + $0x130] sm:$0xff]  ;;  %v138_v59 = vld [vmem:[%s9356_s20 + $0x168] sm:$0xff] }
  0x16   :  { %3954 = vmatpush1.bf16.msra.mxu1 %v3953_v38  ;;  %3828 = vmatprep.subr.bf16.mxu0 %v3827_v39  ;;  %v136_v60 = vld [vmem:[%s9356_s20 + $0x158] sm:$0xff]  ;;  %v3833_v62 = vpack.c.bf16 %v129_v54, %v125_v53  ;;  %v3961_v63 = vpack.c.bf16 %v131_v57, %v127_v55  ;;  %v3835_v0 = vpack.c.bf16 %v138_v59, %v134_v58  ;;  %v133_v1 = vld [vmem:[%s9356_s20 + $0x140] sm:$0xff]  ;;  %v135_v3 = vld [vmem:[%s9356_s20 + $0x150] sm:$0xff] }
  0x17   :  { %3956 = vmatprep.subr.bf16.mxu1 %v3955_v43  ;;  %v140_v61 = vld [vmem:[%s9356_s20 + $0x178] sm:$0xff]  ;;  %v137_v2 = vld [vmem:[%s9356_s20 + $0x160] sm:$0xff]  ;;  %v139_v5 = vld [vmem:[%s9356_s20 + $0x170] sm:$0xff] }
  0x18   :  { %v3963_v4 = vpack.c.bf16 %v140_v61, %v136_v60  ;;  %v142_v6 = vld [vmem:[%s9356_s20 + $0x188] sm:$0xff]  ;;  %v144_v8 = vld [vmem:[%s9356_s20 + $0x198] sm:$0xff]  ;;  %v3837_v10 = vpack.c.bf16 %v137_v2, %v133_v1  ;;  %v3965_v11 = vpack.c.bf16 %v139_v5, %v135_v3  ;;  %v141_v13 = vld [vmem:[%s9356_s20 + $0x180] sm:$0xff] }
  0x19   :  { %3830 = vmatpush1.bf16.msra.mxu0 %v3829_v50  ;;  %v146_v7 = vld [vmem:[%s9356_s20 + $0x1a8] sm:$0xff]  ;;  %v148_v9 = vld [vmem:[%s9356_s20 + $0x1b8] sm:$0xff]  ;;  %v145_v14 = vld [vmem:[%s9356_s20 + $0x1a0] sm:$0xff] }
  0x1a   :  { %3958 = vmatpush1.bf16.msra.mxu1 %v3957_v51  ;;  %3832 = vmatprep.subr.bf16.mxu0 %v3831_v52  ;;  %v3839_v12 = vpack.c.bf16 %v146_v7, %v142_v6  ;;  %v143_v15 = vld [vmem:[%s9356_s20 + $0x190] sm:$0xff]  ;;  %v3967_v16 = vpack.c.bf16 %v148_v9, %v144_v8  ;;  %v150_v18 = vld [vmem:[%s9356_s20 + $0x1c8] sm:$0xff]  ;;  %v152_v20 = vld [vmem:[%s9356_s20 + $0x1d8] sm:$0xff]  ;;  %v3841_v22 = vpack.c.bf16 %v145_v14, %v141_v13 }
  0x1b   :  { %3960 = vmatprep.subr.bf16.mxu1 %v3959_v56  ;;  %v147_v17 = vld [vmem:[%s9356_s20 + $0x1b0] sm:$0xff]  ;;  %v154_v19 = vld [vmem:[%s9356_s20 + $0x1e8] sm:$0xff]  ;;  %v156_v21 = vld [vmem:[%s9356_s20 + $0x1f8] sm:$0xff] }
  0x1c   :  { %v3969_v23 = vpack.c.bf16 %v147_v17, %v143_v15  ;;  %v3843_v24 = vpack.c.bf16 %v154_v19, %v150_v18  ;;  %v149_v25 = vld [vmem:[%s9356_s20 + $0x1c0] sm:$0xff]  ;;  %v151_v27 = vld [vmem:[%s9356_s20 + $0x1d0] sm:$0xff]  ;;  %v3971_v28 = vpack.c.bf16 %v156_v21, %v152_v20  ;;  %v158_v30 = vld [vmem:[%s9356_s20 + $0x208] sm:$0xff] }
  0x1d   :  { %3834 = vmatpush1.bf16.msra.mxu0 %v3833_v62  ;;  %v153_v26 = vld [vmem:[%s9356_s20 + $0x1e0] sm:$0xff]  ;;  %v155_v29 = vld [vmem:[%s9356_s20 + $0x1f0] sm:$0xff]  ;;  %v162_v31 = vld [vmem:[%s9356_s20 + $0x228] sm:$0xff] }
  0x1e   :  { %3962 = vmatpush1.bf16.msra.mxu1 %v3961_v63  ;;  %3836 = vmatprep.subr.bf16.mxu0 %v3835_v0  ;;  %v160_v32 = vld [vmem:[%s9356_s20 + $0x218] sm:$0xff]  ;;  %v3845_v34 = vpack.c.bf16 %v153_v26, %v149_v25  ;;  %v3973_v35 = vpack.c.bf16 %v155_v29, %v151_v27  ;;  %v3847_v36 = vpack.c.bf16 %v162_v31, %v158_v30  ;;  %v157_v37 = vld [vmem:[%s9356_s20 + $0x200] sm:$0xff]  ;;  %v159_v39 = vld [vmem:[%s9356_s20 + $0x210] sm:$0xff] }
  0x1f   :  { %3964 = vmatprep.subr.bf16.mxu1 %v3963_v4  ;;  %v164_v33 = vld [vmem:[%s9356_s20 + $0x238] sm:$0xff]  ;;  %v161_v38 = vld [vmem:[%s9356_s20 + $0x220] sm:$0xff]  ;;  %v163_v41 = vld [vmem:[%s9356_s20 + $0x230] sm:$0xff] }
  0x20   :  { %v3975_v40 = vpack.c.bf16 %v164_v33, %v160_v32  ;;  %v166_v42 = vld [vmem:[%s9356_s20 + $0x248] sm:$0xff]  ;;  %v168_v44 = vld [vmem:[%s9356_s20 + $0x258] sm:$0xff]  ;;  %v3849_v46 = vpack.c.bf16 %v161_v38, %v157_v37  ;;  %v3977_v47 = vpack.c.bf16 %v163_v41, %v159_v39  ;;  %v165_v49 = vld [vmem:[%s9356_s20 + $0x240] sm:$0xff] }
  0x21   :  { %3838 = vmatpush1.bf16.msra.mxu0 %v3837_v10  ;;  %v170_v43 = vld [vmem:[%s9356_s20 + $0x268] sm:$0xff]  ;;  %v172_v45 = vld [vmem:[%s9356_s20 + $0x278] sm:$0xff]  ;;  %v169_v50 = vld [vmem:[%s9356_s20 + $0x260] sm:$0xff] }
  0x22   :  { %3966 = vmatpush1.bf16.msra.mxu1 %v3965_v11  ;;  %3840 = vmatprep.subr.bf16.mxu0 %v3839_v12  ;;  %v3851_v48 = vpack.c.bf16 %v170_v43, %v166_v42  ;;  %v167_v51 = vld [vmem:[%s9356_s20 + $0x250] sm:$0xff]  ;;  %v3979_v52 = vpack.c.bf16 %v172_v45, %v168_v44  ;;  %v174_v54 = vld [vmem:[%s9356_s20 + $0x288] sm:$0xff]  ;;  %v176_v56 = vld [vmem:[%s9356_s20 + $0x298] sm:$0xff]  ;;  %v3853_v58 = vpack.c.bf16 %v169_v50, %v165_v49 }
  0x23   :  { %3968 = vmatprep.subr.bf16.mxu1 %v3967_v16  ;;  %v171_v53 = vld [vmem:[%s9356_s20 + $0x270] sm:$0xff]  ;;  %v178_v55 = vld [vmem:[%s9356_s20 + $0x2a8] sm:$0xff]  ;;  %v180_v57 = vld [vmem:[%s9356_s20 + $0x2b8] sm:$0xff] }
  0x24   :  { %v3981_v59 = vpack.c.bf16 %v171_v53, %v167_v51  ;;  %v3855_v60 = vpack.c.bf16 %v178_v55, %v174_v54  ;;  %v173_v61 = vld [vmem:[%s9356_s20 + $0x280] sm:$0xff]  ;;  %v175_v63 = vld [vmem:[%s9356_s20 + $0x290] sm:$0xff]  ;;  %v3983_v0 = vpack.c.bf16 %v180_v57, %v176_v56  ;;  %v182_v2 = vld [vmem:[%s9356_s20 + $0x2c8] sm:$0xff] }
  0x25   :  { %3842 = vmatpush1.bf16.msra.mxu0 %v3841_v22  ;;  %v177_v62 = vld [vmem:[%s9356_s20 + $0x2a0] sm:$0xff]  ;;  %v179_v1 = vld [vmem:[%s9356_s20 + $0x2b0] sm:$0xff]  ;;  %v186_v3 = vld [vmem:[%s9356_s20 + $0x2e8] sm:$0xff] }
  0x26   :  { %3970 = vmatpush1.bf16.msra.mxu1 %v3969_v23  ;;  %3844 = vmatprep.subr.bf16.mxu0 %v3843_v24  ;;  %v184_v4 = vld [vmem:[%s9356_s20 + $0x2d8] sm:$0xff]  ;;  %v3857_v6 = vpack.c.bf16 %v177_v62, %v173_v61  ;;  %v181_v7 = vld [vmem:[%s9356_s20 + $0x2c0] sm:$0xff]  ;;  %v3985_v8 = vpack.c.bf16 %v179_v1, %v175_v63  ;;  %v3859_v9 = vpack.c.bf16 %v186_v3, %v182_v2  ;;  %v183_v11 = vld [vmem:[%s9356_s20 + $0x2d0] sm:$0xff] }
  0x27   :  { %3972 = vmatprep.subr.bf16.mxu1 %v3971_v28  ;;  %v188_v5 = vld [vmem:[%s9356_s20 + $0x2f8] sm:$0xff]  ;;  %v185_v10 = vld [vmem:[%s9356_s20 + $0x2e0] sm:$0xff]  ;;  %v187_v12 = vld [vmem:[%s9356_s20 + $0x2f0] sm:$0xff] }
  0x28   :  { %v3987_v13 = vpack.c.bf16 %v188_v5, %v184_v4  ;;  %v190_v14 = vld [vmem:[%s9356_s20 + $0x308] sm:$0xff]  ;;  %v192_v17 = vld [vmem:[%s9356_s20 + $0x318] sm:$0xff]  ;;  %v3861_v19 = vpack.c.bf16 %v185_v10, %v181_v7  ;;  %v3989_v20 = vpack.c.bf16 %v187_v12, %v183_v11  ;;  %v189_v22 = vld [vmem:[%s9356_s20 + $0x300] sm:$0xff] }
  0x29   :  { %3846 = vmatpush1.bf16.msra.mxu0 %v3845_v34  ;;  %v194_v15 = vld [vmem:[%s9356_s20 + $0x328] sm:$0xff]  ;;  %v196_v18 = vld [vmem:[%s9356_s20 + $0x338] sm:$0xff]  ;;  %v193_v23 = vld [vmem:[%s9356_s20 + $0x320] sm:$0xff] }
  0x2a   :  { %3974 = vmatpush1.bf16.msra.mxu1 %v3973_v35  ;;  %3848 = vmatprep.subr.bf16.mxu0 %v3847_v36  ;;  %v82_v16 = vld [vmem:[%s9357_s21 + $0x8] sm:$0xff]  ;;  %v3863_v21 = vpack.c.bf16 %v194_v15, %v190_v14  ;;  %v191_v24 = vld [vmem:[%s9356_s20 + $0x310] sm:$0xff]  ;;  %v3991_v25 = vpack.c.bf16 %v196_v18, %v192_v17  ;;  %v200_v29 = vld [vmem:[%s9356_s20 + $0x358] sm:$0xff]  ;;  %v3865_v31 = vpack.c.bf16 %v193_v23, %v189_v22 }
  0x2b   :  { %3976 = vmatprep.subr.bf16.mxu1 %v3975_v40  ;;  %435 = vmatprep.mubr.f32.mxu0 %v82_v16  ;;  %v195_v26 = vld [vmem:[%s9356_s20 + $0x330] sm:$0xff]  ;;  %v198_v27 = vld [vmem:[%s9356_s20 + $0x348] sm:$0xff]  ;;  %v204_v30 = vld [vmem:[%s9356_s20 + $0x378] sm:$0xff] }
  0x2c   :  { %589 = vmatprep.mubr.f32.mxu1 %v82_v16  ;;  %v202_v28 = vld [vmem:[%s9356_s20 + $0x368] sm:$0xff]  ;;  %v3993_v32 = vpack.c.bf16 %v195_v26, %v191_v24  ;;  %v197_v34 = vld [vmem:[%s9356_s20 + $0x340] sm:$0xff]  ;;  %v199_v36 = vld [vmem:[%s9356_s20 + $0x350] sm:$0xff]  ;;  %v3995_v37 = vpack.c.bf16 %v204_v30, %v200_v29 }
  0x2d   :  { %3850 = vmatpush1.bf16.msra.mxu0 %v3849_v46  ;;  %v3867_v33 = vpack.c.bf16 %v202_v28, %v198_v27  ;;  %v201_v35 = vld [vmem:[%s9356_s20 + $0x360] sm:$0xff]  ;;  %v203_v38 = vld [vmem:[%s9356_s20 + $0x370] sm:$0xff]  ;;  %v206_v39 = vld [vmem:[%s9356_s20 + $0x388] sm:$0xff] }
  0x2e   :  { %3978 = vmatpush1.bf16.msra.mxu1 %v3977_v47  ;;  %3852 = vmatprep.subr.bf16.mxu0 %v3851_v48  ;;  %v210_v40 = vld [vmem:[%s9356_s20 + $0x3a8] sm:$0xff]  ;;  %v208_v41 = vld [vmem:[%s9356_s20 + $0x398] sm:$0xff]  ;;  %v3869_v43 = vpack.c.bf16 %v201_v35, %v197_v34  ;;  %v3997_v44 = vpack.c.bf16 %v203_v38, %v199_v36  ;;  %v205_v46 = vld [vmem:[%s9356_s20 + $0x380] sm:$0xff] }
  0x2f   :  { %3980 = vmatprep.subr.bf16.mxu1 %v3979_v52  ;;  %v212_v42 = vld [vmem:[%s9356_s20 + $0x3b8] sm:$0xff]  ;;  %v3871_v45 = vpack.c.bf16 %v210_v40, %v206_v39  ;;  %v209_v47 = vld [vmem:[%s9356_s20 + $0x3a0] sm:$0xff]  ;;  %v207_v48 = vld [vmem:[%s9356_s20 + $0x390] sm:$0xff] }
  0x30   :  { %v3999_v49 = vpack.c.bf16 %v212_v42, %v208_v41  ;;  %v211_v50 = vld [vmem:[%s9356_s20 + $0x3b0] sm:$0xff]  ;;  %v214_v51 = vld [vmem:[%s9356_s20 + $0x3c8] sm:$0xff]  ;;  %v216_v53 = vld [vmem:[%s9356_s20 + $0x3d8] sm:$0xff]  ;;  %v3873_v55 = vpack.c.bf16 %v209_v47, %v205_v46 }
  0x31   :  { %3854 = vmatpush1.bf16.msra.mxu0 %v3853_v58  ;;  %v218_v52 = vld [vmem:[%s9356_s20 + $0x3e8] sm:$0xff]  ;;  %v220_v54 = vld [vmem:[%s9356_s20 + $0x3f8] sm:$0xff]  ;;  %v4001_v56 = vpack.c.bf16 %v211_v50, %v207_v48  ;;  %v213_v58 = vld [vmem:[%s9356_s20 + $0x3c0] sm:$0xff] }
  0x32   :  { %3982 = vmatpush1.bf16.msra.mxu1 %v3981_v59  ;;  %3856 = vmatprep.subr.bf16.mxu0 %v3855_v60  ;;  %v3875_v57 = vpack.c.bf16 %v218_v52, %v214_v51  ;;  %v217_v59 = vld [vmem:[%s9356_s20 + $0x3e0] sm:$0xff]  ;;  %v215_v60 = vld [vmem:[%s9356_s20 + $0x3d0] sm:$0xff]  ;;  %v4003_v61 = vpack.c.bf16 %v220_v54, %v216_v53  ;;  %v222_v63 = vld [vmem:[%s9356_s20 + $0x408] sm:$0xff] }
  0x33   :  { %3984 = vmatprep.subr.bf16.mxu1 %v3983_v0  ;;  %v219_v62 = vld [vmem:[%s9356_s20 + $0x3f0] sm:$0xff]  ;;  %v226_v0 = vld [vmem:[%s9356_s20 + $0x428] sm:$0xff]  ;;  %v224_v1 = vld [vmem:[%s9356_s20 + $0x418] sm:$0xff]  ;;  %v3877_v3 = vpack.c.bf16 %v217_v59, %v213_v58 }
  0x34   :  { %v228_v2 = vld [vmem:[%s9356_s20 + $0x438] sm:$0xff]  ;;  %v4005_v4 = vpack.c.bf16 %v219_v62, %v215_v60  ;;  %v3879_v5 = vpack.c.bf16 %v226_v0, %v222_v63  ;;  %v225_v7 = vld [vmem:[%s9356_s20 + $0x420] sm:$0xff]  ;;  %v227_v10 = vld [vmem:[%s9356_s20 + $0x430] sm:$0xff] }
  0x35   :  { %3858 = vmatpush1.bf16.msra.mxu0 %v3857_v6  ;;  %v221_v6 = vld [vmem:[%s9356_s20 + $0x400] sm:$0xff]  ;;  %v230_v11 = vld [vmem:[%s9356_s20 + $0x448] sm:$0xff]  ;;  %v236_v14 = vld [vmem:[%s9356_s20 + $0x478] sm:$0xff] }
  0x36   :  { %3986 = vmatpush1.bf16.msra.mxu1 %v3985_v8  ;;  %3860 = vmatprep.subr.bf16.mxu0 %v3859_v9  ;;  %v223_v8 = vld [vmem:[%s9356_s20 + $0x410] sm:$0xff]  ;;  %v4007_v9 = vpack.c.bf16 %v228_v2, %v224_v1  ;;  %v234_v12 = vld [vmem:[%s9356_s20 + $0x468] sm:$0xff]  ;;  %v81_v15 = vld [vmem:[%s9357_s21] sm:$0xff]  ;;  %v3881_v16 = vpack.c.bf16 %v225_v7, %v221_v6 }
  0x37   :  { %3988 = vmatprep.subr.bf16.mxu1 %v3987_v13  ;;  %v232_v13 = vld [vmem:[%s9356_s20 + $0x458] sm:$0xff]  ;;  %v4009_v17 = vpack.c.bf16 %v227_v10, %v223_v8  ;;  %v3883_v18 = vpack.c.bf16 %v234_v12, %v230_v11  ;;  %v235_v23 = vld [vmem:[%s9356_s20 + $0x470] sm:$0xff]  ;;  %v238_v24 = vld [vmem:[%s9356_s20 + $0x488] sm:$0xff] }
  0x38   :  { %v4011_v22 = vpack.c.bf16 %v236_v14, %v232_v13  ;;  %v240_v26 = vld [vmem:[%s9356_s20 + $0x498] sm:$0xff]  ;;  %v243_v35 = vld [vmem:[%s9356_s20 + $0x4b0] sm:$0xff]  ;;  %v246_v36 = vld [vmem:[%s9356_s20 + $0x4c8] sm:$0xff] }
  0x39   :  { %3862 = vmatpush1.bf16.msra.mxu0 %v3861_v19  ;;  %v229_v19 = vld [vmem:[%s9356_s20 + $0x440] sm:$0xff]  ;;  %v244_v27 = vld [vmem:[%s9356_s20 + $0x4b8] sm:$0xff]  ;;  %v251_v47 = vld [vmem:[%s9356_s20 + $0x4f0] sm:$0xff] }
  0x3a   :  { %3990 = vmatpush1.bf16.msra.mxu1 %v3989_v20  ;;  %3864 = vmatprep.subr.bf16.mxu0 %v3863_v21  ;;  %v233_v20 = vld [vmem:[%s9356_s20 + $0x460] sm:$0xff]  ;;  %v231_v21 = vld [vmem:[%s9356_s20 + $0x450] sm:$0xff]  ;;  %v4015_v34 = vpack.c.bf16 %v244_v27, %v240_v26  ;;  %v248_v38 = vld [vmem:[%s9356_s20 + $0x4d8] sm:$0xff] }
  0x3b   :  { %3992 = vmatprep.subr.bf16.mxu1 %v3991_v25  ;;  %v242_v25 = vld [vmem:[%s9356_s20 + $0x4a8] sm:$0xff]  ;;  %v3885_v28 = vpack.c.bf16 %v233_v20, %v229_v19  ;;  %v4013_v29 = vpack.c.bf16 %v235_v23, %v231_v21  ;;  %v252_v39 = vld [vmem:[%s9356_s20 + $0x4f8] sm:$0xff]  ;;  %v259_v59 = vld [vmem:[%s9356_s20 + $0x530] sm:$0xff] }
  0x3c   :  { %v3887_v30 = vpack.c.bf16 %v242_v25, %v238_v24  ;;  %v4019_v46 = vpack.c.bf16 %v252_v39, %v248_v38  ;;  %v254_v48 = vld [vmem:[%s9356_s20 + $0x508] sm:$0xff]  ;;  %v256_v50 = vld [vmem:[%s9356_s20 + $0x518] sm:$0xff]  ;;  %v267_v7 = vld [vmem:[%s9356_s20 + $0x570] sm:$0xff] }
  0x3d   :  { %3866 = vmatpush1.bf16.msra.mxu0 %v3865_v31  ;;  %v237_v31 = vld [vmem:[%s9356_s20 + $0x480] sm:$0xff]  ;;  %v260_v51 = vld [vmem:[%s9356_s20 + $0x538] sm:$0xff]  ;;  %v262_v60 = vld [vmem:[%s9356_s20 + $0x548] sm:$0xff] }
  0x3e   :  { %3994 = vmatpush1.bf16.msra.mxu1 %v3993_v32  ;;  %3868 = vmatprep.subr.bf16.mxu0 %v3867_v33  ;;  %v241_v32 = vld [vmem:[%s9356_s20 + $0x4a0] sm:$0xff]  ;;  %v239_v33 = vld [vmem:[%s9356_s20 + $0x490] sm:$0xff]  ;;  %v4023_v58 = vpack.c.bf16 %v260_v51, %v256_v50  ;;  %v264_v62 = vld [vmem:[%s9356_s20 + $0x558] sm:$0xff] }
  0x3f   :  { %3996 = vmatprep.subr.bf16.mxu1 %v3995_v37  ;;  %v250_v37 = vld [vmem:[%s9356_s20 + $0x4e8] sm:$0xff]  ;;  %v3889_v40 = vpack.c.bf16 %v241_v32, %v237_v31  ;;  %v4017_v41 = vpack.c.bf16 %v243_v35, %v239_v33  ;;  %v268_v63 = vld [vmem:[%s9356_s20 + $0x578] sm:$0xff]  ;;  %v269_v14 = vld [vmem:[%s9356_s20 + $0x580] sm:$0xff] }
  0x40   :  { %v3891_v42 = vpack.c.bf16 %v250_v37, %v246_v36  ;;  %v4027_v6 = vpack.c.bf16 %v268_v63, %v264_v62  ;;  %v270_v8 = vld [vmem:[%s9356_s20 + $0x588] sm:$0xff]  ;;  %v272_v10 = vld [vmem:[%s9356_s20 + $0x598] sm:$0xff]  ;;  %v271_v19 = vld [vmem:[%s9356_s20 + $0x590] sm:$0xff] }
  0x41   :  { %3870 = vmatpush1.bf16.msra.mxu0 %v3869_v43  ;;  %v245_v43 = vld [vmem:[%s9356_s20 + $0x4c0] sm:$0xff]  ;;  %v276_v11 = vld [vmem:[%s9356_s20 + $0x5b8] sm:$0xff]  ;;  %v86_v12 = vld [vmem:[%s9357_s21 + $0x28] sm:$0x3] }
  0x42   :  { %3998 = vmatpush1.bf16.msra.mxu1 %v3997_v44  ;;  %3872 = vmatprep.subr.bf16.mxu0 %v3871_v45  ;;  %v249_v44 = vld [vmem:[%s9356_s20 + $0x4e0] sm:$0xff]  ;;  %v247_v45 = vld [vmem:[%s9356_s20 + $0x4d0] sm:$0xff]  ;;  %v4031_v21 = vpack.c.bf16 %v276_v11, %v272_v10  ;;  %v282_v23 = vld [vmem:[%s9356_s20 + $0x5e8] sm:$0xff] }
  0x43   :  { %4000 = vmatprep.subr.bf16.mxu1 %v3999_v49  ;;  %v258_v49 = vld [vmem:[%s9356_s20 + $0x528] sm:$0xff]  ;;  %v3893_v52 = vpack.c.bf16 %v249_v44, %v245_v43  ;;  %v4021_v53 = vpack.c.bf16 %v251_v47, %v247_v45  ;;  %v275_v20 = vld [vmem:[%s9356_s20 + $0x5b0] sm:$0xff]  ;;  %v84_v24 = vld [vmem:[%s9357_s21 + $0x18] sm:$0xff] }
  0x44   :  { %v3895_v54 = vpack.c.bf16 %v258_v49, %v254_v48  ;;  %v280_v25 = vld [vmem:[%s9356_s20 + $0x5d8] sm:$0xff]  ;;  %v281_v31 = vld [vmem:[%s9356_s20 + $0x5e0] sm:$0xff]  ;;  %v279_v32 = vld [vmem:[%s9356_s20 + $0x5d0] sm:$0xff] }
  0x45   :  { %3874 = vmatpush1.bf16.msra.mxu0 %v3873_v55  ;;  %v253_v55 = vld [vmem:[%s9356_s20 + $0x500] sm:$0xff]  ;;  %v284_v26 = vld [vmem:[%s9356_s20 + $0x5f8] sm:$0xff]  ;;  %v286_v35 = vld [vmem:[%s9356_s20 + $0x608] sm:$0xff] }
  0x46   :  { %4002 = vmatpush1.bf16.msra.mxu1 %v4001_v56  ;;  %3876 = vmatprep.subr.bf16.mxu0 %v3875_v57  ;;  %v257_v56 = vld [vmem:[%s9356_s20 + $0x520] sm:$0xff]  ;;  %v255_v57 = vld [vmem:[%s9356_s20 + $0x510] sm:$0xff]  ;;  %v4035_v33 = vpack.c.bf16 %v284_v26, %v280_v25  ;;  %v290_v36 = vld [vmem:[%s9356_s20 + $0x628] sm:$0xff] }
  0x47   :  { %4004 = vmatprep.subr.bf16.mxu1 %v4003_v61  ;;  %v266_v61 = vld [vmem:[%s9356_s20 + $0x568] sm:$0xff]  ;;  %v3897_v0 = vpack.c.bf16 %v257_v56, %v253_v55  ;;  %v4025_v1 = vpack.c.bf16 %v259_v59, %v255_v57  ;;  %v288_v37 = vld [vmem:[%s9356_s20 + $0x618] sm:$0xff]  ;;  %v289_v43 = vld [vmem:[%s9356_s20 + $0x620] sm:$0xff] }
  0x48   :  { %v3899_v2 = vpack.c.bf16 %v266_v61, %v262_v60  ;;  %v292_v38 = vld [vmem:[%s9356_s20 + $0x638] sm:$0xff]  ;;  %v287_v44 = vld [vmem:[%s9356_s20 + $0x610] sm:$0xff]  ;;  %v294_v47 = vld [vmem:[%s9356_s20 + $0x648] sm:$0xff] }
  0x49   :  { %3878 = vmatpush1.bf16.msra.mxu0 %v3877_v3  ;;  %v261_v3 = vld [vmem:[%s9356_s20 + $0x540] sm:$0xff]  ;;  %v4039_v45 = vpack.c.bf16 %v292_v38, %v288_v37  ;;  %v298_v48 = vld [vmem:[%s9356_s20 + $0x668] sm:$0xff]  ;;  %v296_v49 = vld [vmem:[%s9356_s20 + $0x658] sm:$0xff] }
  0x4a   :  { %4006 = vmatpush1.bf16.msra.mxu1 %v4005_v4  ;;  %3880 = vmatprep.subr.bf16.mxu0 %v3879_v5  ;;  %v265_v4 = vld [vmem:[%s9356_s20 + $0x560] sm:$0xff]  ;;  %v263_v5 = vld [vmem:[%s9356_s20 + $0x550] sm:$0xff]  ;;  %v300_v50 = vld [vmem:[%s9356_s20 + $0x678] sm:$0xff] }
  0x4b   :  { %4008 = vmatprep.subr.bf16.mxu1 %v4007_v9  ;;  %v274_v9 = vld [vmem:[%s9356_s20 + $0x5a8] sm:$0xff]  ;;  %v3901_v13 = vpack.c.bf16 %v265_v4, %v261_v3  ;;  %v297_v55 = vld [vmem:[%s9356_s20 + $0x660] sm:$0xff]  ;;  %v295_v56 = vld [vmem:[%s9356_s20 + $0x650] sm:$0xff]  ;;  %v4043_v57 = vpack.c.bf16 %v300_v50, %v296_v49 }
  0x4c   :  { %436 = vmatmul.mubr.f32.vlgmr.msra.gmra.mrb[0].mxu0 %v81_v15  ;;  %v302_v59 = vld [vmem:[%s9356_s20 + $0x688] sm:$0xff]  ;;  %v304_v61 = vld [vmem:[%s9356_s20 + $0x698] sm:$0xff]  ;;  %v305_v3 = vld [vmem:[%s9356_s20 + $0x6a0] sm:$0xff] }
  0x4d   :  { %3882 = vmatpush1.bf16.msra.mxu0 %v3881_v16  ;;  %590 = vmatmul.mubr.f32.vlgmr.msra.gmra.mrb[0].mxu1 %v81_v15  ;;  %v85_v15 = vld [vmem:[%s9357_s21 + $0x20] sm:$0x3]  ;;  %v4029_v16 = vpack.c.bf16 %v267_v7, %v263_v5  ;;  %v306_v60 = vld [vmem:[%s9356_s20 + $0x6a8] sm:$0xff]  ;;  %v308_v62 = vld [vmem:[%s9356_s20 + $0x6b8] sm:$0xff] }
  0x4e   :  { %4010 = vmatpush1.bf16.msra.mxu1 %v4009_v17  ;;  %3884 = vmatprep.subr.bf16.mxu0 %v3883_v18  ;;  %v3903_v17 = vpack.c.bf16 %v274_v9, %v270_v8  ;;  %v273_v18 = vld [vmem:[%s9356_s20 + $0x5a0] sm:$0xff]  ;;  %v303_v4 = vld [vmem:[%s9356_s20 + $0x690] sm:$0xff]  ;;  %v4047_v5 = vpack.c.bf16 %v308_v62, %v304_v61  ;;  %v310_v7 = vld [vmem:[%s9356_s20 + $0x6c8] sm:$0xff] }
  0x4f   :  { %4012 = vmatprep.subr.bf16.mxu1 %v4011_v22  ;;  %441 = vmatprep.mubr.f32.mxu0 %v86_v12  ;;  %v278_v22 = vld [vmem:[%s9356_s20 + $0x5c8] sm:$0xff]  ;;  %v3905_v27 = vpack.c.bf16 %v273_v18, %v269_v14  ;;  %v312_v9 = vld [vmem:[%s9356_s20 + $0x6d8] sm:$0xff]  ;;  %v309_v14 = vld [vmem:[%s9356_s20 + $0x6c0] sm:$0xff] }
  0x50   :  { %595 = vmatprep.mubr.f32.mxu1 %v86_v12  ;;  %442 = vmatmul.mubr.f32.gmra.mrb[2].mxu0 %v85_v15  ;;  %v314_v8 = vld [vmem:[%s9356_s20 + $0x6e8] sm:$0xff]  ;;  %v316_v10 = vld [vmem:[%s9356_s20 + $0x6f8] sm:$0xff]  ;;  %v315_v18 = vld [vmem:[%s9356_s20 + $0x6f0] sm:$0xff] }
  0x51   :  { %3886 = vmatpush1.bf16.msra.mxu0 %v3885_v28  ;;  %596 = vmatmul.mubr.f32.gmra.mrb[2].mxu1 %v85_v15  ;;  %v4033_v28 = vpack.c.bf16 %v275_v20, %v271_v19  ;;  %v313_v15 = vld [vmem:[%s9356_s20 + $0x6e0] sm:$0xff]  ;;  %v318_v19 = vld [vmem:[%s9356_s20 + $0x708] sm:$0xff] }
  0x52   :  { %4014 = vmatpush1.bf16.msra.mxu1 %v4013_v29  ;;  %3888 = vmatprep.subr.bf16.mxu0 %v3887_v30  ;;  %v3907_v29 = vpack.c.bf16 %v282_v23, %v278_v22  ;;  %v277_v30 = vld [vmem:[%s9356_s20 + $0x5c0] sm:$0xff]  ;;  %v322_v20 = vld [vmem:[%s9356_s20 + $0x728] sm:$0xff]  ;;  %v324_v22 = vld [vmem:[%s9356_s20 + $0x738] sm:$0xff]  ;;  %v3925_v23 = vpack.c.bf16 %v313_v15, %v309_v14 }
  0x53   :  { %4016 = vmatprep.subr.bf16.mxu1 %v4015_v34  ;;  %512 = vmatprep.mubr.f32.mxu0 %v84_v24  ;;  %v283_v34 = vld [vmem:[%s9356_s20 + $0x5f0] sm:$0xff]  ;;  %v3909_v39 = vpack.c.bf16 %v281_v31, %v277_v30  ;;  %v3927_v25 = vpack.c.bf16 %v322_v20, %v318_v19  ;;  %v317_v26 = vld [vmem:[%s9356_s20 + $0x700] sm:$0xff]  ;;  %v326_v31 = vld [vmem:[%s9356_s20 + $0x748] sm:$0xff] }
  0x54   :  { %666 = vmatprep.mubr.f32.mxu1 %v84_v24  ;;  %v323_v30 = vld [vmem:[%s9356_s20 + $0x730] sm:$0xff]  ;;  %v325_v38 = vld [vmem:[%s9356_s20 + $0x740] sm:$0xff]  ;;  %v88_v19 = vld [vmem:[%s9357_s21 + $0x38] sm:$0x3] }
  0x55   :  { %3890 = vmatpush1.bf16.msra.mxu0 %v3889_v40  ;;  %v4037_v40 = vpack.c.bf16 %v283_v34, %v279_v32  ;;  %v330_v32 = vld [vmem:[%s9356_s20 + $0x768] sm:$0xff]  ;;  %v332_v34 = vld [vmem:[%s9356_s20 + $0x778] sm:$0xff]  ;;  %v333_v50 = vld [vmem:[%s9356_s20 + $0x780] sm:$0xff] }
  0x56   :  { %4018 = vmatpush1.bf16.msra.mxu1 %v4017_v41  ;;  %3892 = vmatprep.subr.bf16.mxu0 %v3891_v42  ;;  %v3911_v41 = vpack.c.bf16 %v290_v36, %v286_v35  ;;  %v285_v42 = vld [vmem:[%s9356_s20 + $0x600] sm:$0xff]  ;;  %v3931_v37 = vpack.c.bf16 %v330_v32, %v326_v31  ;;  %v693_v14 = vld [vmem:[%s9358_s22 + $0x30] sm:$0xff]  ;;  %v698_v20 = vld [vmem:[%s9358_s22 + $0x58] sm:$0xff] }
  0x57   :  { %4020 = vmatprep.subr.bf16.mxu1 %v4019_v46  ;;  %v291_v46 = vld [vmem:[%s9356_s20 + $0x630] sm:$0xff]  ;;  %v3913_v51 = vpack.c.bf16 %v289_v43, %v285_v42  ;;  %v334_v43 = vld [vmem:[%s9356_s20 + $0x788] sm:$0xff]  ;;  %v341_v62 = vld [vmem:[%s9356_s20 + $0x7c0] sm:$0xff] }
  0x58   :  { %v331_v42 = vld [vmem:[%s9356_s20 + $0x770] sm:$0xff]  ;;  %v710_v32 = vld [vmem:[%s9358_s22 + $0xb8] sm:$0xff] }
  0x59   :  { %3894 = vmatpush1.bf16.msra.mxu0 %v3893_v52  ;;  %v4041_v52 = vpack.c.bf16 %v291_v46, %v287_v44  ;;  %v338_v44 = vld [vmem:[%s9356_s20 + $0x7a8] sm:$0xff]  ;;  %v340_v46 = vld [vmem:[%s9356_s20 + $0x7b8] sm:$0xff]  ;;  %v83_v15 = vld [vmem:[%s9357_s21 + $0x10] sm:$0xff] }
  0x5a   :  { %4022 = vmatpush1.bf16.msra.mxu1 %v4021_v53  ;;  %3896 = vmatprep.subr.bf16.mxu0 %v3895_v54  ;;  %v3915_v53 = vpack.c.bf16 %v298_v48, %v294_v47  ;;  %v293_v54 = vld [vmem:[%s9356_s20 + $0x640] sm:$0xff]  ;;  %v3935_v49 = vpack.c.bf16 %v338_v44, %v334_v43  ;;  %v709_v43 = vld [vmem:[%s9358_s22 + $0xb0] sm:$0xff]  ;;  %v712_v44 = vld [vmem:[%s9358_s22 + $0xc8] sm:$0xff] }
  0x5b   :  { %4024 = vmatprep.subr.bf16.mxu1 %v4023_v58  ;;  %v299_v58 = vld [vmem:[%s9356_s20 + $0x670] sm:$0xff]  ;;  %v3917_v63 = vpack.c.bf16 %v297_v55, %v293_v54  ;;  %v342_v55 = vld [vmem:[%s9356_s20 + $0x7c8] sm:$0xff] }
  0x5c   :  { %v339_v54 = vld [vmem:[%s9356_s20 + $0x7b0] sm:$0xff] }
  0x5d   :  { %3898 = vmatpush1.bf16.msra.mxu0 %v3897_v0  ;;  %v4045_v0 = vpack.c.bf16 %v299_v58, %v295_v56  ;;  %v346_v56 = vld [vmem:[%s9356_s20 + $0x7e8] sm:$0xff]  ;;  %v348_v58 = vld [vmem:[%s9356_s20 + $0x7f8] sm:$0xff] }
  0x5e   :  { %4026 = vmatpush1.bf16.msra.mxu1 %v4025_v1  ;;  %3900 = vmatprep.subr.bf16.mxu0 %v3899_v2  ;;  %v3919_v1 = vpack.c.bf16 %v306_v60, %v302_v59  ;;  %v301_v2 = vld [vmem:[%s9356_s20 + $0x680] sm:$0xff]  ;;  %v3939_v61 = vpack.c.bf16 %v346_v56, %v342_v55  ;;  %v717_v56 = vld [vmem:[%s9358_s22 + $0xf0] sm:$0xff] }
  0x5f   :  { %4028 = vmatprep.subr.bf16.mxu1 %v4027_v6  ;;  %v307_v6 = vld [vmem:[%s9356_s20 + $0x6b0] sm:$0xff]  ;;  %v3921_v11 = vpack.c.bf16 %v305_v3, %v301_v2  ;;  %v688_v3 = vld [vmem:[%s9358_s22 + $0x8] sm:$0xff] }
  0x60   :  { %v4049_v12 = vpack.c.bf16 %v307_v6, %v303_v4  ;;  %v347_v2 = vld [vmem:[%s9356_s20 + $0x7f0] sm:$0xff]  ;;  %v692_v4 = vld [vmem:[%s9358_s22 + $0x28] sm:$0xff]  ;;  %v694_v6 = vld [vmem:[%s9358_s22 + $0x38] sm:$0xff] }
  0x61   :  { %3902 = vmatpush1.bf16.msra.mxu0 %v3901_v13  ;;  %v3923_v13 = vpack.c.bf16 %v314_v8, %v310_v7 }
  0x62   :  { %4030 = vmatpush1.bf16.msra.mxu1 %v4029_v16  ;;  %3904 = vmatprep.subr.bf16.mxu0 %v3903_v17  ;;  %v311_v16 = vld [vmem:[%s9356_s20 + $0x6d0] sm:$0xff]  ;;  %v4051_v17 = vpack.c.bf16 %v316_v10, %v312_v9  ;;  %v4071_v9 = vpack.c.bf16 %v692_v4, %v688_v3  ;;  %v687_v10 = vld [vmem:[%s9358_s22] sm:$0xff] }
  0x63   :  { %4032 = vmatprep.subr.bf16.mxu1 %v4031_v21  ;;  %v320_v21 = vld [vmem:[%s9356_s20 + $0x718] sm:$0xff]  ;;  %v4053_v24 = vpack.c.bf16 %v315_v18, %v311_v16  ;;  %v696_v16 = vld [vmem:[%s9358_s22 + $0x48] sm:$0xff]  ;;  %v725_v4 = vld [vmem:[%s9358_s22 + $0x130] sm:$0xff] }
  0x65   :  { %3906 = vmatpush1.bf16.msra.mxu0 %v3905_v27  ;;  %v321_v27 = vld [vmem:[%s9356_s20 + $0x720] sm:$0xff] }
  0x66   :  { %4034 = vmatpush1.bf16.msra.mxu1 %v4033_v28  ;;  %3908 = vmatprep.subr.bf16.mxu0 %v3907_v29  ;;  %v319_v28 = vld [vmem:[%s9356_s20 + $0x710] sm:$0xff]  ;;  %v4055_v29 = vpack.c.bf16 %v324_v22, %v320_v21  ;;  %v3929_v35 = vpack.c.bf16 %v321_v27, %v317_v26  ;;  %v702_v21 = vld [vmem:[%s9358_s22 + $0x78] sm:$0xff]  ;;  %v695_v22 = vld [vmem:[%s9358_s22 + $0x40] sm:$0xff] }
  0x67   :  { %4036 = vmatprep.subr.bf16.mxu1 %v4035_v33  ;;  %v328_v33 = vld [vmem:[%s9356_s20 + $0x758] sm:$0xff]  ;;  %v4057_v36 = vpack.c.bf16 %v323_v30, %v319_v28  ;;  %v701_v26 = vld [vmem:[%s9358_s22 + $0x70] sm:$0xff]  ;;  %v704_v28 = vld [vmem:[%s9358_s22 + $0x88] sm:$0xff]  ;;  %v4203_v31 = vpack.c.bf16 %v702_v21, %v698_v20 }
  0x68   :  { %v706_v30 = vld [vmem:[%s9358_s22 + $0x98] sm:$0xff] }
  0x69   :  { %3910 = vmatpush1.bf16.msra.mxu0 %v3909_v39  ;;  %v329_v39 = vld [vmem:[%s9356_s20 + $0x760] sm:$0xff]  ;;  %v742_v20 = vld [vmem:[%s9358_s22 + $0x1b8] sm:$0xff] }
  0x6a   :  { %4038 = vmatpush1.bf16.msra.mxu1 %v4037_v40  ;;  %3912 = vmatprep.subr.bf16.mxu0 %v3911_v41  ;;  %v327_v40 = vld [vmem:[%s9356_s20 + $0x750] sm:$0xff]  ;;  %v4059_v41 = vpack.c.bf16 %v332_v34, %v328_v33  ;;  %v3933_v47 = vpack.c.bf16 %v329_v39, %v325_v38  ;;  %v90_v33 = vld [vmem:[%s9359_s26 + $0x8] sm:$0xff]  ;;  %v703_v39 = vld [vmem:[%s9358_s22 + $0x80] sm:$0xff] }
  0x6b   :  { %4040 = vmatprep.subr.bf16.mxu1 %v4039_v45  ;;  %v336_v45 = vld [vmem:[%s9356_s20 + $0x798] sm:$0xff]  ;;  %v4061_v48 = vpack.c.bf16 %v331_v42, %v327_v40  ;;  %v680_v34 = vld [vmem:[%s9332_s2 + $0x8] sm:$0xff]  ;;  %v707_v40 = vld [vmem:[%s9358_s22 + $0xa0] sm:$0xff]  ;;  %v4207_v42 = vpack.c.bf16 %v710_v32, %v706_v30 }
  0x6c   :  { %v748_v30 = vld [vmem:[%s9358_s22 + $0x1e8] sm:$0xff]  ;;  %v750_v32 = vld [vmem:[%s9358_s22 + $0x1f8] sm:$0xff] }
  0x6d   :  { %3914 = vmatpush1.bf16.msra.mxu0 %v3913_v51  ;;  %v337_v51 = vld [vmem:[%s9356_s20 + $0x7a0] sm:$0xff] }
  0x6e   :  { %4042 = vmatpush1.bf16.msra.mxu1 %v4041_v52  ;;  %3916 = vmatprep.subr.bf16.mxu0 %v3915_v53  ;;  %v335_v52 = vld [vmem:[%s9356_s20 + $0x790] sm:$0xff]  ;;  %v4063_v53 = vpack.c.bf16 %v340_v46, %v336_v45  ;;  %v3937_v59 = vpack.c.bf16 %v337_v51, %v333_v50  ;;  %v716_v45 = vld [vmem:[%s9358_s22 + $0xe8] sm:$0xff]  ;;  %v684_v46 = vadd.f32 %v680_v34, %v90_v33 }
  0x6f   :  { %4044 = vmatprep.subr.bf16.mxu1 %v4043_v57  ;;  %v344_v57 = vld [vmem:[%s9356_s20 + $0x7d8] sm:$0xff]  ;;  %v4065_v60 = vpack.c.bf16 %v339_v54, %v335_v52  ;;  %v4083_v51 = vpack.c.bf16 %v716_v45, %v712_v44  ;;  %v711_v52 = vld [vmem:[%s9358_s22 + $0xc0] sm:$0xff]  ;;  %v713_v54 = vld [vmem:[%s9358_s22 + $0xd0] sm:$0xff] }
  0x70   :  { %v758_v44 = vld [vmem:[%s9358_s22 + $0x238] sm:$0xff] }
  0x71   :  { %3918 = vmatpush1.bf16.msra.mxu0 %v3917_v63  ;;  %v345_v63 = vld [vmem:[%s9356_s20 + $0x7e0] sm:$0xff] }
  0x72   :  { %4046 = vmatpush1.bf16.msra.mxu1 %v4045_v0  ;;  %3920 = vmatprep.subr.bf16.mxu0 %v3919_v1  ;;  %v343_v0 = vld [vmem:[%s9356_s20 + $0x7d0] sm:$0xff]  ;;  %v4067_v1 = vpack.c.bf16 %v348_v58, %v344_v57  ;;  %v3941_v7 = vpack.c.bf16 %v345_v63, %v341_v62  ;;  %v720_v57 = vld [vmem:[%s9358_s22 + $0x108] sm:$0xff]  ;;  %v4213_v62 = vpack.c.bf16 %v717_v56, %v713_v54  ;;  %v766_v56 = vld [vmem:[%s9358_s22 + $0x278] sm:$0xff] }
  0x73   :  { %4048 = vmatprep.subr.bf16.mxu1 %v4047_v5  ;;  %v690_v5 = vld [vmem:[%s9358_s22 + $0x18] sm:$0xff]  ;;  %v4069_v8 = vpack.c.bf16 %v347_v2, %v343_v0  ;;  %v724_v58 = vld [vmem:[%s9358_s22 + $0x128] sm:$0xff]  ;;  %v719_v0 = vld [vmem:[%s9358_s22 + $0x100] sm:$0xff] }
  0x74   :  { %v4087_v63 = vpack.c.bf16 %v724_v58, %v720_v57  ;;  %v721_v2 = vld [vmem:[%s9358_s22 + $0x110] sm:$0xff]  ;;  %v764_v54 = vld [vmem:[%s9358_s22 + $0x268] sm:$0xff] }
  0x75   :  { %3922 = vmatpush1.bf16.msra.mxu0 %v3921_v11  ;;  %v691_v11 = vld [vmem:[%s9358_s22 + $0x20] sm:$0xff] }
  0x76   :  { %4050 = vmatpush1.bf16.msra.mxu1 %v4049_v12  ;;  %3924 = vmatprep.subr.bf16.mxu0 %v3923_v13  ;;  %v4199_v12 = vpack.c.bf16 %v694_v6, %v690_v5  ;;  %v689_v13 = vld [vmem:[%s9358_s22 + $0x10] sm:$0xff]  ;;  %v4073_v18 = vpack.c.bf16 %v691_v11, %v687_v10  ;;  %v728_v5 = vld [vmem:[%s9358_s22 + $0x148] sm:$0xff]  ;;  %v4217_v10 = vpack.c.bf16 %v725_v4, %v721_v2  ;;  %v774_v4 = vld [vmem:[%s9358_s22 + $0x2b8] sm:$0xff] }
  0x77   :  { %4052 = vmatprep.subr.bf16.mxu1 %v4051_v17  ;;  %v700_v17 = vld [vmem:[%s9358_s22 + $0x68] sm:$0xff] }
  0x78   :  { %v4075_v27 = vpack.c.bf16 %v700_v17, %v696_v16  ;;  %v732_v6 = vld [vmem:[%s9358_s22 + $0x168] sm:$0xff]  ;;  %v733_v16 = vld [vmem:[%s9358_s22 + $0x170] sm:$0xff] }
  0x79   :  { %3926 = vmatpush1.bf16.msra.mxu0 %v3925_v23  ;;  %v4201_v23 = vpack.c.bf16 %v693_v14, %v689_v13  ;;  %v4091_v11 = vpack.c.bf16 %v732_v6, %v728_v5  ;;  %v731_v13 = vld [vmem:[%s9358_s22 + $0x160] sm:$0xff]  ;;  %v729_v14 = vld [vmem:[%s9358_s22 + $0x150] sm:$0xff]  ;;  %v736_v17 = vld [vmem:[%s9358_s22 + $0x188] sm:$0xff] }
  0x7a   :  { %4054 = vmatpush1.bf16.msra.mxu1 %v4053_v24  ;;  %3928 = vmatprep.subr.bf16.mxu0 %v3927_v25  ;;  %v699_v24 = vld [vmem:[%s9358_s22 + $0x60] sm:$0xff]  ;;  %v697_v25 = vld [vmem:[%s9358_s22 + $0x50] sm:$0xff]  ;;  %v772_v2 = vld [vmem:[%s9358_s22 + $0x2a8] sm:$0xff] }
  0x7b   :  { %4056 = vmatprep.subr.bf16.mxu1 %v4055_v29  ;;  %v708_v29 = vld [vmem:[%s9358_s22 + $0xa8] sm:$0xff] }
  0x7c   :  { %v4079_v38 = vpack.c.bf16 %v708_v29, %v704_v28  ;;  %v741_v28 = vld [vmem:[%s9358_s22 + $0x1b0] sm:$0xff]  ;;  %v744_v29 = vld [vmem:[%s9358_s22 + $0x1c8] sm:$0xff] }
  0x7d   :  { %3930 = vmatpush1.bf16.msra.mxu0 %v3929_v35  ;;  %v87_v35 = vld [vmem:[%s9357_s21 + $0x30] sm:$0x3] }
  0x7e   :  { %4058 = vmatpush1.bf16.msra.mxu1 %v4057_v36  ;;  %3932 = vmatprep.subr.bf16.mxu0 %v3931_v37  ;;  %v4077_v36 = vpack.c.bf16 %v699_v24, %v695_v22  ;;  %v4205_v37 = vpack.c.bf16 %v701_v26, %v697_v25  ;;  %v4221_v22 = vpack.c.bf16 %v733_v16, %v729_v14  ;;  %v735_v24 = vld [vmem:[%s9358_s22 + $0x180] sm:$0xff]  ;;  %v737_v26 = vld [vmem:[%s9358_s22 + $0x190] sm:$0xff]  ;;  %v780_v14 = vld [vmem:[%s9358_s22 + $0x2e8] sm:$0xff] }
  0x7f   :  { %4060 = vmatprep.subr.bf16.mxu1 %v4059_v41  ;;  %v705_v41 = vld [vmem:[%s9358_s22 + $0x90] sm:$0xff]  ;;  %v739_v25 = vld [vmem:[%s9358_s22 + $0x1a0] sm:$0xff]  ;;  %v4225_v34 = vpack.c.bf16 %v741_v28, %v737_v26  ;;  %v782_v16 = vld [vmem:[%s9358_s22 + $0x2f8] sm:$0xff] }
  0x80   :  { %v4209_v50 = vpack.c.bf16 %v709_v43, %v705_v41  ;;  %v4097_v33 = vpack.c.bf16 %v739_v25, %v735_v24  ;;  %v752_v41 = vld [vmem:[%s9358_s22 + $0x208] sm:$0xff]  ;;  %v754_v43 = vld [vmem:[%s9358_s22 + $0x218] sm:$0xff]  ;;  %v781_v24 = vld [vmem:[%s9358_s22 + $0x2f0] sm:$0xff] }
  0x81   :  { %3934 = vmatpush1.bf16.msra.mxu0 %v3933_v47  ;;  %v714_v47 = vld [vmem:[%s9358_s22 + $0xd8] sm:$0xff]  ;;  %v784_v25 = vld [vmem:[%s9358_s22 + $0x308] sm:$0xff] }
  0x82   :  { %4062 = vmatpush1.bf16.msra.mxu1 %v4061_v48  ;;  %3936 = vmatprep.subr.bf16.mxu0 %v3935_v49  ;;  %v718_v48 = vld [vmem:[%s9358_s22 + $0xf8] sm:$0xff]  ;;  %v4081_v49 = vpack.c.bf16 %v707_v40, %v703_v39  ;;  %v749_v40 = vld [vmem:[%s9358_s22 + $0x1f0] sm:$0xff]  ;;  %v788_v26 = vld [vmem:[%s9358_s22 + $0x328] sm:$0xff] }
  0x83   :  { %4064 = vmatprep.subr.bf16.mxu1 %v4063_v53  ;;  %v715_v53 = vld [vmem:[%s9358_s22 + $0xe0] sm:$0xff]  ;;  %v4211_v55 = vpack.c.bf16 %v718_v48, %v714_v47  ;;  %v790_v28 = vld [vmem:[%s9358_s22 + $0x338] sm:$0xff] }
  0x84   :  { %v751_v48 = vld [vmem:[%s9358_s22 + $0x200] sm:$0xff] }
  0x85   :  { %3938 = vmatpush1.bf16.msra.mxu0 %v3937_v59  ;;  %v722_v59 = vld [vmem:[%s9358_s22 + $0x118] sm:$0xff] }
  0x86   :  { %4066 = vmatpush1.bf16.msra.mxu1 %v4065_v60  ;;  %3940 = vmatprep.subr.bf16.mxu0 %v3939_v61  ;;  %v726_v60 = vld [vmem:[%s9358_s22 + $0x138] sm:$0xff]  ;;  %v4085_v61 = vpack.c.bf16 %v715_v53, %v711_v52  ;;  %v757_v52 = vld [vmem:[%s9358_s22 + $0x230] sm:$0xff]  ;;  %v760_v53 = vld [vmem:[%s9358_s22 + $0x248] sm:$0xff] }
  0x87   :  { %4068 = vmatprep.subr.bf16.mxu1 %v4067_v1  ;;  %v723_v1 = vld [vmem:[%s9358_s22 + $0x120] sm:$0xff]  ;;  %v4215_v3 = vpack.c.bf16 %v726_v60, %v722_v59  ;;  %v4107_v59 = vpack.c.bf16 %v764_v54, %v760_v53 }
  0x88   :  { %v759_v60 = vld [vmem:[%s9358_s22 + $0x240] sm:$0xff] }
  0x89   :  { %3942 = vmatpush1.bf16.msra.mxu0 %v3941_v7  ;;  %v730_v7 = vld [vmem:[%s9358_s22 + $0x158] sm:$0xff] }
  0x8a   :  { %4070 = vmatpush1.bf16.msra.mxu1 %v4069_v8  ;;  %4072 = vmatprep.subr.bf16.mxu0 %v4071_v9  ;;  %v734_v8 = vld [vmem:[%s9358_s22 + $0x178] sm:$0xff]  ;;  %v4089_v9 = vpack.c.bf16 %v723_v1, %v719_v0  ;;  %v765_v0 = vld [vmem:[%s9358_s22 + $0x270] sm:$0xff]  ;;  %v768_v1 = vld [vmem:[%s9358_s22 + $0x288] sm:$0xff] }
  0x8b   :  { %4200 = vmatprep.subr.bf16.mxu1 %v4199_v12  ;;  %v727_v12 = vld [vmem:[%s9358_s22 + $0x140] sm:$0xff] }
  0x8c   :  { %513 = vmatmul.mubr.f32.vlgmr.msra.gmra.mrb[0].mxu0 %v83_v15  ;;  %v4093_v21 = vpack.c.bf16 %v731_v13, %v727_v12  ;;  %v773_v12 = vld [vmem:[%s9358_s22 + $0x2b0] sm:$0xff]  ;;  %v776_v13 = vld [vmem:[%s9358_s22 + $0x2c8] sm:$0xff] }
  0x8d   :  { %667 = vmatmul.mubr.f32.vlgmr.msra.gmra.mrb[0].mxu1 %v83_v15  ;;  %4074 = vmatpush1.bf16.msra.mxu0 %v4073_v18  ;;  %v4219_v15 = vpack.c.bf16 %v734_v8, %v730_v7  ;;  %v740_v18 = vld [vmem:[%s9358_s22 + $0x1a8] sm:$0xff]  ;;  %v4111_v7 = vpack.c.bf16 %v772_v2, %v768_v1  ;;  %v767_v8 = vld [vmem:[%s9358_s22 + $0x280] sm:$0xff] }
  0x8e   :  { %4202 = vmatpush1.bf16.msra.mxu1 %v4201_v23  ;;  %518 = vmatprep.mubr.f32.mxu0 %v88_v19  ;;  %v4095_v23 = vpack.c.bf16 %v740_v18, %v736_v17 }
  0x8f   :  { %672 = vmatprep.mubr.f32.mxu1 %v88_v19  ;;  %4076 = vmatprep.subr.bf16.mxu0 %v4075_v27  ;;  %v738_v19 = vld [vmem:[%s9358_s22 + $0x198] sm:$0xff] }
  0x90   :  { %519 = vmatmul.mubr.f32.gmra.mrb[2].mxu0 %v87_v35  ;;  %4204 = vmatprep.subr.bf16.mxu1 %v4203_v31  ;;  %v4223_v27 = vpack.c.bf16 %v742_v20, %v738_v19  ;;  %v746_v31 = vld [vmem:[%s9358_s22 + $0x1d8] sm:$0xff]  ;;  %v4115_v19 = vpack.c.bf16 %v780_v14, %v776_v13  ;;  %v775_v20 = vld [vmem:[%s9358_s22 + $0x2c0] sm:$0xff] }
  0x91   :  { %673 = vmatmul.mubr.f32.gmra.mrb[2].mxu1 %v87_v35  ;;  %4078 = vmatpush1.bf16.msra.mxu0 %v4077_v36  ;;  %v4099_v35 = vpack.c.bf16 %v748_v30, %v744_v29  ;;  %v743_v36 = vld [vmem:[%s9358_s22 + $0x1c0] sm:$0xff]  ;;  %v4227_v39 = vpack.c.bf16 %v750_v32, %v746_v31  ;;  %v4119_v31 = vpack.c.bf16 %v788_v26, %v784_v25  ;;  %v826_v25 = vld [vmem:[%s9358_s22 + $0x458] sm:$0xff] }
  0x92   :  { %4206 = vmatpush1.bf16.msra.mxu1 %v4205_v37  ;;  %4080 = vmatprep.subr.bf16.mxu0 %v4079_v38  ;;  %v747_v37 = vld [vmem:[%s9358_s22 + $0x1e0] sm:$0xff]  ;;  %v745_v38 = vld [vmem:[%s9358_s22 + $0x1d0] sm:$0xff] }
  0x93   :  { %4208 = vmatprep.subr.bf16.mxu1 %v4207_v42  ;;  %1029 = vmatprep.mubr.f32.mxu0 %v684_v46  ;;  %v756_v42 = vld [vmem:[%s9358_s22 + $0x228] sm:$0xff]  ;;  %v4101_v45 = vpack.c.bf16 %v747_v37, %v743_v36  ;;  %v783_v32 = vld [vmem:[%s9358_s22 + $0x300] sm:$0xff]  ;;  %v789_v36 = vld [vmem:[%s9358_s22 + $0x330] sm:$0xff] }
  0x94   :  { %1171 = vmatprep.mubr.f32.mxu1 %v684_v46  ;;  %v4229_v46 = vpack.c.bf16 %v749_v40, %v745_v38  ;;  %v4103_v47 = vpack.c.bf16 %v756_v42, %v752_v41  ;;  %v792_v37 = vld [vmem:[%s9358_s22 + $0x348] sm:$0xff]  ;;  %v798_v40 = vld [vmem:[%s9358_s22 + $0x378] sm:$0xff]  ;;  %v6414_v14 = vld [vmem:[%s9359_s26] sm:$0xff] }
  0x95   :  { %4082 = vmatpush1.bf16.msra.mxu0 %v4081_v49  ;;  %v755_v49 = vld [vmem:[%s9358_s22 + $0x220] sm:$0xff]  ;;  %v796_v38 = vld [vmem:[%s9358_s22 + $0x368] sm:$0xff] }
  0x96   :  { %4210 = vmatpush1.bf16.msra.mxu1 %v4209_v50  ;;  %4084 = vmatprep.subr.bf16.mxu0 %v4083_v51  ;;  %v753_v50 = vld [vmem:[%s9358_s22 + $0x210] sm:$0xff]  ;;  %v4231_v51 = vpack.c.bf16 %v758_v44, %v754_v43  ;;  %v4105_v57 = vpack.c.bf16 %v755_v49, %v751_v48  ;;  %v4123_v43 = vpack.c.bf16 %v796_v38, %v792_v37  ;;  %v791_v44 = vld [vmem:[%s9358_s22 + $0x340] sm:$0xff]  ;;  %v800_v49 = vld [vmem:[%s9358_s22 + $0x388] sm:$0xff] }
  0x97   :  { %4212 = vmatprep.subr.bf16.mxu1 %v4211_v55  ;;  %v762_v55 = vld [vmem:[%s9358_s22 + $0x258] sm:$0xff]  ;;  %v4233_v58 = vpack.c.bf16 %v757_v52, %v753_v50  ;;  %v797_v48 = vld [vmem:[%s9358_s22 + $0x370] sm:$0xff]  ;;  %v804_v50 = vld [vmem:[%s9358_s22 + $0x3a8] sm:$0xff] }
  0x98   :  { %v806_v52 = vld [vmem:[%s9358_s22 + $0x3b8] sm:$0xff]  ;;  %v829_v37 = vld [vmem:[%s9358_s22 + $0x470] sm:$0xff]  ;;  %v832_v38 = vld [vmem:[%s9358_s22 + $0x488] sm:$0xff] }
  0x99   :  { %4086 = vmatpush1.bf16.msra.mxu0 %v4085_v61  ;;  %v763_v61 = vld [vmem:[%s9358_s22 + $0x260] sm:$0xff] }
  0x9a   :  { %4214 = vmatpush1.bf16.msra.mxu1 %v4213_v62  ;;  %4088 = vmatprep.subr.bf16.mxu0 %v4087_v63  ;;  %v761_v62 = vld [vmem:[%s9358_s22 + $0x250] sm:$0xff]  ;;  %v4235_v63 = vpack.c.bf16 %v766_v56, %v762_v55  ;;  %v4109_v5 = vpack.c.bf16 %v763_v61, %v759_v60  ;;  %v4127_v55 = vpack.c.bf16 %v804_v50, %v800_v49  ;;  %v799_v56 = vld [vmem:[%s9358_s22 + $0x380] sm:$0xff]  ;;  %v808_v61 = vld [vmem:[%s9358_s22 + $0x3c8] sm:$0xff] }
  0x9b   :  { %4216 = vmatprep.subr.bf16.mxu1 %v4215_v3  ;;  %v770_v3 = vld [vmem:[%s9358_s22 + $0x298] sm:$0xff]  ;;  %v4237_v6 = vpack.c.bf16 %v765_v0, %v761_v62  ;;  %v805_v60 = vld [vmem:[%s9358_s22 + $0x3b0] sm:$0xff]  ;;  %v812_v62 = vld [vmem:[%s9358_s22 + $0x3e8] sm:$0xff] }
  0x9c   :  { %v814_v0 = vld [vmem:[%s9358_s22 + $0x3f8] sm:$0xff]  ;;  %v837_v50 = vld [vmem:[%s9358_s22 + $0x4b0] sm:$0xff] }
  0x9d   :  { %4090 = vmatpush1.bf16.msra.mxu0 %v4089_v9  ;;  %v771_v9 = vld [vmem:[%s9358_s22 + $0x2a0] sm:$0xff] }
  0x9e   :  { %4218 = vmatpush1.bf16.msra.mxu1 %v4217_v10  ;;  %4092 = vmatprep.subr.bf16.mxu0 %v4091_v11  ;;  %v769_v10 = vld [vmem:[%s9358_s22 + $0x290] sm:$0xff]  ;;  %v4239_v11 = vpack.c.bf16 %v774_v4, %v770_v3  ;;  %v4113_v17 = vpack.c.bf16 %v771_v9, %v767_v8  ;;  %v4131_v3 = vpack.c.bf16 %v812_v62, %v808_v61  ;;  %v807_v4 = vld [vmem:[%s9358_s22 + $0x3c0] sm:$0xff]  ;;  %v816_v9 = vld [vmem:[%s9358_s22 + $0x408] sm:$0xff] }
  0x9f   :  { %4220 = vmatprep.subr.bf16.mxu1 %v4219_v15  ;;  %v778_v15 = vld [vmem:[%s9358_s22 + $0x2d8] sm:$0xff]  ;;  %v4241_v18 = vpack.c.bf16 %v773_v12, %v769_v10  ;;  %v813_v8 = vld [vmem:[%s9358_s22 + $0x3f0] sm:$0xff]  ;;  %v820_v10 = vld [vmem:[%s9358_s22 + $0x428] sm:$0xff] }
  0xa0   :  { %v822_v12 = vld [vmem:[%s9358_s22 + $0x438] sm:$0xff]  ;;  %v845_v62 = vld [vmem:[%s9358_s22 + $0x4f0] sm:$0xff] }
  0xa1   :  { %4094 = vmatpush1.bf16.msra.mxu0 %v4093_v21  ;;  %v779_v21 = vld [vmem:[%s9358_s22 + $0x2e0] sm:$0xff] }
  0xa2   :  { %4222 = vmatpush1.bf16.msra.mxu1 %v4221_v22  ;;  %4096 = vmatprep.subr.bf16.mxu0 %v4095_v23  ;;  %v777_v22 = vld [vmem:[%s9358_s22 + $0x2d0] sm:$0xff]  ;;  %v4243_v23 = vpack.c.bf16 %v782_v16, %v778_v15  ;;  %v4117_v29 = vpack.c.bf16 %v779_v21, %v775_v20  ;;  %v679_v15 = vld [vmem:[%s9332_s2] sm:$0xff] }
  0xa3   :  { %4224 = vmatprep.subr.bf16.mxu1 %v4223_v27  ;;  %v786_v27 = vld [vmem:[%s9358_s22 + $0x318] sm:$0xff]  ;;  %v4245_v30 = vpack.c.bf16 %v781_v24, %v777_v22  ;;  %v815_v16 = vld [vmem:[%s9358_s22 + $0x400] sm:$0xff]  ;;  %v817_v20 = vld [vmem:[%s9358_s22 + $0x410] sm:$0xff]  ;;  %v683_v26 = vadd.f32 %v679_v15, %v6414_v14 }
  0xa4   :  { %v821_v21 = vld [vmem:[%s9358_s22 + $0x430] sm:$0xff]  ;;  %v828_v24 = vld [vmem:[%s9358_s22 + $0x468] sm:$0xff]  ;;  %v862_v15 = vld [vmem:[%s9358_s22 + $0x578] sm:$0xff] }
  0xa5   :  { %4098 = vmatpush1.bf16.msra.mxu0 %v4097_v33  ;;  %v787_v33 = vld [vmem:[%s9358_s22 + $0x320] sm:$0xff] }
  0xa6   :  { %4226 = vmatpush1.bf16.msra.mxu1 %v4225_v34  ;;  %4100 = vmatprep.subr.bf16.mxu0 %v4099_v35  ;;  %v785_v34 = vld [vmem:[%s9358_s22 + $0x310] sm:$0xff]  ;;  %v4247_v35 = vpack.c.bf16 %v790_v28, %v786_v27  ;;  %v4121_v41 = vpack.c.bf16 %v787_v33, %v783_v32  ;;  %v830_v27 = vld [vmem:[%s9358_s22 + $0x478] sm:$0xff]  ;;  %v823_v33 = vld [vmem:[%s9358_s22 + $0x440] sm:$0xff] }
  0xa7   :  { %4228 = vmatprep.subr.bf16.mxu1 %v4227_v39  ;;  %v794_v39 = vld [vmem:[%s9358_s22 + $0x358] sm:$0xff]  ;;  %v4249_v42 = vpack.c.bf16 %v789_v36, %v785_v34  ;;  %v827_v34 = vld [vmem:[%s9358_s22 + $0x460] sm:$0xff]  ;;  %v4267_v36 = vpack.c.bf16 %v830_v27, %v826_v25  ;;  %v868_v25 = vld [vmem:[%s9358_s22 + $0x5a8] sm:$0xff] }
  0xa8   :  { %v6447_v28 = vld [vmem:[%s9359_s26 + $0x18] sm:$0xff] }
  0xa9   :  { %4102 = vmatpush1.bf16.msra.mxu0 %v4101_v45  ;;  %v795_v45 = vld [vmem:[%s9358_s22 + $0x360] sm:$0xff]  ;;  %v870_v27 = vld [vmem:[%s9358_s22 + $0x5b8] sm:$0xff] }
  0xaa   :  { %4230 = vmatpush1.bf16.msra.mxu1 %v4229_v46  ;;  %4104 = vmatprep.subr.bf16.mxu0 %v4103_v47  ;;  %v793_v46 = vld [vmem:[%s9358_s22 + $0x350] sm:$0xff]  ;;  %v4251_v47 = vpack.c.bf16 %v798_v40, %v794_v39  ;;  %v4125_v53 = vpack.c.bf16 %v795_v45, %v791_v44  ;;  %v836_v39 = vld [vmem:[%s9358_s22 + $0x4a8] sm:$0xff] }
  0xab   :  { %4232 = vmatprep.subr.bf16.mxu1 %v4231_v51  ;;  %v802_v51 = vld [vmem:[%s9358_s22 + $0x398] sm:$0xff]  ;;  %v4253_v54 = vpack.c.bf16 %v797_v48, %v793_v46  ;;  %v4143_v45 = vpack.c.bf16 %v836_v39, %v832_v38  ;;  %v831_v46 = vld [vmem:[%s9358_s22 + $0x480] sm:$0xff]  ;;  %v833_v48 = vld [vmem:[%s9358_s22 + $0x490] sm:$0xff] }
  0xac   :  { %v876_v38 = vld [vmem:[%s9358_s22 + $0x5e8] sm:$0xff]  ;;  %v874_v39 = vld [vmem:[%s9358_s22 + $0x5d8] sm:$0xff] }
  0xad   :  { %4106 = vmatpush1.bf16.msra.mxu0 %v4105_v57  ;;  %v803_v57 = vld [vmem:[%s9358_s22 + $0x3a0] sm:$0xff] }
  0xae   :  { %4234 = vmatpush1.bf16.msra.mxu1 %v4233_v58  ;;  %4108 = vmatprep.subr.bf16.mxu0 %v4107_v59  ;;  %v801_v58 = vld [vmem:[%s9358_s22 + $0x390] sm:$0xff]  ;;  %v4255_v59 = vpack.c.bf16 %v806_v52, %v802_v51  ;;  %v4129_v1 = vpack.c.bf16 %v803_v57, %v799_v56  ;;  %v840_v51 = vld [vmem:[%s9358_s22 + $0x4c8] sm:$0xff]  ;;  %v4273_v56 = vpack.c.bf16 %v837_v50, %v833_v48 }
  0xaf   :  { %4236 = vmatprep.subr.bf16.mxu1 %v4235_v63  ;;  %v810_v63 = vld [vmem:[%s9358_s22 + $0x3d8] sm:$0xff]  ;;  %v4257_v2 = vpack.c.bf16 %v805_v60, %v801_v58  ;;  %v844_v52 = vld [vmem:[%s9358_s22 + $0x4e8] sm:$0xff]  ;;  %v839_v58 = vld [vmem:[%s9358_s22 + $0x4c0] sm:$0xff] }
  0xb0   :  { %v4147_v57 = vpack.c.bf16 %v844_v52, %v840_v51  ;;  %v841_v60 = vld [vmem:[%s9358_s22 + $0x4d0] sm:$0xff]  ;;  %v884_v50 = vld [vmem:[%s9358_s22 + $0x628] sm:$0xff]  ;;  %v882_v51 = vld [vmem:[%s9358_s22 + $0x618] sm:$0xff] }
  0xb1   :  { %4110 = vmatpush1.bf16.msra.mxu0 %v4109_v5  ;;  %v811_v5 = vld [vmem:[%s9358_s22 + $0x3e0] sm:$0xff]  ;;  %v877_v48 = vld [vmem:[%s9358_s22 + $0x5f0] sm:$0xff]  ;;  %v886_v52 = vld [vmem:[%s9358_s22 + $0x638] sm:$0xff] }
  0xb2   :  { %4238 = vmatpush1.bf16.msra.mxu1 %v4237_v6  ;;  %4112 = vmatprep.subr.bf16.mxu0 %v4111_v7  ;;  %v809_v6 = vld [vmem:[%s9358_s22 + $0x3d0] sm:$0xff]  ;;  %v4259_v7 = vpack.c.bf16 %v814_v0, %v810_v63  ;;  %v4133_v13 = vpack.c.bf16 %v811_v5, %v807_v4  ;;  %v848_v63 = vld [vmem:[%s9358_s22 + $0x508] sm:$0xff]  ;;  %v4277_v4 = vpack.c.bf16 %v845_v62, %v841_v60 }
  0xb3   :  { %4240 = vmatprep.subr.bf16.mxu1 %v4239_v11  ;;  %v818_v11 = vld [vmem:[%s9358_s22 + $0x418] sm:$0xff]  ;;  %v852_v0 = vld [vmem:[%s9358_s22 + $0x528] sm:$0xff]  ;;  %v885_v60 = vld [vmem:[%s9358_s22 + $0x630] sm:$0xff] }
  0xb4   :  { %v4263_v22 = vpack.c.bf16 %v822_v12, %v818_v11  ;;  %v4151_v5 = vpack.c.bf16 %v852_v0, %v848_v63  ;;  %v856_v11 = vld [vmem:[%s9358_s22 + $0x548] sm:$0xff]  ;;  %v890_v63 = vld [vmem:[%s9358_s22 + $0x658] sm:$0xff] }
  0xb5   :  { %4114 = vmatpush1.bf16.msra.mxu0 %v4113_v17  ;;  %v4261_v17 = vpack.c.bf16 %v813_v8, %v809_v6  ;;  %v847_v6 = vld [vmem:[%s9358_s22 + $0x500] sm:$0xff]  ;;  %v849_v8 = vld [vmem:[%s9358_s22 + $0x510] sm:$0xff]  ;;  %v860_v12 = vld [vmem:[%s9358_s22 + $0x568] sm:$0xff] }
  0xb6   :  { %4242 = vmatpush1.bf16.msra.mxu1 %v4241_v18  ;;  %4116 = vmatprep.subr.bf16.mxu0 %v4115_v19  ;;  %v4135_v18 = vpack.c.bf16 %v820_v10, %v816_v9  ;;  %v819_v19 = vld [vmem:[%s9358_s22 + $0x420] sm:$0xff]  ;;  %v853_v10 = vld [vmem:[%s9358_s22 + $0x530] sm:$0xff]  ;;  %v892_v62 = vld [vmem:[%s9358_s22 + $0x668] sm:$0xff] }
  0xb7   :  { %4244 = vmatprep.subr.bf16.mxu1 %v4243_v23  ;;  %v824_v23 = vld [vmem:[%s9358_s22 + $0x448] sm:$0xff]  ;;  %v894_v0 = vld [vmem:[%s9358_s22 + $0x678] sm:$0xff] }
  0xb8   :  { %v4139_v32 = vpack.c.bf16 %v828_v24, %v824_v23  ;;  %v861_v23 = vld [vmem:[%s9358_s22 + $0x570] sm:$0xff]  ;;  %v864_v24 = vld [vmem:[%s9358_s22 + $0x588] sm:$0xff] }
  0xb9   :  { %4118 = vmatpush1.bf16.msra.mxu0 %v4117_v29  ;;  %v682_v29 = vld [vmem:[%s9332_s2 + $0x18] sm:$0xff] }
  0xba   :  { %4246 = vmatpush1.bf16.msra.mxu1 %v4245_v30  ;;  %4120 = vmatprep.subr.bf16.mxu0 %v4119_v31  ;;  %v4137_v30 = vpack.c.bf16 %v819_v19, %v815_v16  ;;  %v4265_v31 = vpack.c.bf16 %v821_v21, %v817_v20  ;;  %v686_v40 = vadd.f32 %v682_v29, %v6447_v28  ;;  %v855_v19 = vld [vmem:[%s9358_s22 + $0x540] sm:$0xff]  ;;  %v857_v21 = vld [vmem:[%s9358_s22 + $0x550] sm:$0xff] }
  0xbb   :  { %4248 = vmatprep.subr.bf16.mxu1 %v4247_v35  ;;  %v825_v35 = vld [vmem:[%s9358_s22 + $0x450] sm:$0xff]  ;;  %v859_v20 = vld [vmem:[%s9358_s22 + $0x560] sm:$0xff] }
  0xbc   :  { %v4269_v44 = vpack.c.bf16 %v829_v37, %v825_v35  ;;  %v4157_v29 = vpack.c.bf16 %v859_v20, %v855_v19  ;;  %v872_v37 = vld [vmem:[%s9358_s22 + $0x5c8] sm:$0xff]  ;;  %v897_v19 = vld [vmem:[%s9358_s22 + $0x690] sm:$0xff] }
  0xbd   :  { %4122 = vmatpush1.bf16.msra.mxu0 %v4121_v41  ;;  %v834_v41 = vld [vmem:[%s9358_s22 + $0x498] sm:$0xff] }
  0xbe   :  { %4250 = vmatpush1.bf16.msra.mxu1 %v4249_v42  ;;  %4124 = vmatprep.subr.bf16.mxu0 %v4123_v43  ;;  %v838_v42 = vld [vmem:[%s9358_s22 + $0x4b8] sm:$0xff]  ;;  %v4141_v43 = vpack.c.bf16 %v827_v34, %v823_v33  ;;  %v867_v33 = vld [vmem:[%s9358_s22 + $0x5a0] sm:$0xff]  ;;  %v865_v34 = vld [vmem:[%s9358_s22 + $0x590] sm:$0xff] }
  0xbf   :  { %4252 = vmatprep.subr.bf16.mxu1 %v4251_v47  ;;  %v835_v47 = vld [vmem:[%s9358_s22 + $0x4a0] sm:$0xff]  ;;  %v4271_v49 = vpack.c.bf16 %v838_v42, %v834_v41 }
  0xc1   :  { %4126 = vmatpush1.bf16.msra.mxu0 %v4125_v53  ;;  %v842_v53 = vld [vmem:[%s9358_s22 + $0x4d8] sm:$0xff] }
  0xc2   :  { %4254 = vmatpush1.bf16.msra.mxu1 %v4253_v54  ;;  %4128 = vmatprep.subr.bf16.mxu0 %v4127_v55  ;;  %v846_v54 = vld [vmem:[%s9358_s22 + $0x4f8] sm:$0xff]  ;;  %v4145_v55 = vpack.c.bf16 %v835_v47, %v831_v46  ;;  %v873_v46 = vld [vmem:[%s9358_s22 + $0x5d0] sm:$0xff] }
  0xc3   :  { %4256 = vmatprep.subr.bf16.mxu1 %v4255_v59  ;;  %v843_v59 = vld [vmem:[%s9358_s22 + $0x4e0] sm:$0xff]  ;;  %v4275_v61 = vpack.c.bf16 %v846_v54, %v842_v53  ;;  %v4293_v54 = vpack.c.bf16 %v877_v48, %v873_v46  ;;  %v917_v46 = vld [vmem:[%s9358_s22 + $0x730] sm:$0xff]  ;;  %v924_v48 = vld [vmem:[%s9358_s22 + $0x768] sm:$0xff] }
  0xc5   :  { %4130 = vmatpush1.bf16.msra.mxu0 %v4129_v1  ;;  %v850_v1 = vld [vmem:[%s9358_s22 + $0x518] sm:$0xff] }
  0xc6   :  { %4258 = vmatpush1.bf16.msra.mxu1 %v4257_v2  ;;  %4132 = vmatprep.subr.bf16.mxu0 %v4131_v3  ;;  %v854_v2 = vld [vmem:[%s9358_s22 + $0x538] sm:$0xff]  ;;  %v4149_v3 = vpack.c.bf16 %v843_v59, %v839_v58  ;;  %v881_v58 = vld [vmem:[%s9358_s22 + $0x610] sm:$0xff]  ;;  %v4295_v59 = vpack.c.bf16 %v886_v52, %v882_v51 }
  0xc7   :  { %4260 = vmatprep.subr.bf16.mxu1 %v4259_v7  ;;  %v851_v7 = vld [vmem:[%s9358_s22 + $0x520] sm:$0xff]  ;;  %v4279_v9 = vpack.c.bf16 %v854_v2, %v850_v1  ;;  %v4297_v2 = vpack.c.bf16 %v885_v60, %v881_v58  ;;  %v925_v58 = vld [vmem:[%s9358_s22 + $0x770] sm:$0xff]  ;;  %v932_v60 = vld [vmem:[%s9358_s22 + $0x7a8] sm:$0xff] }
  0xc8   :  { %v4153_v16 = vpack.c.bf16 %v851_v7, %v847_v6  ;;  %v889_v6 = vld [vmem:[%s9358_s22 + $0x650] sm:$0xff]  ;;  %v4299_v7 = vpack.c.bf16 %v894_v0, %v890_v63 }
  0xc9   :  { %4134 = vmatpush1.bf16.msra.mxu0 %v4133_v13  ;;  %v858_v13 = vld [vmem:[%s9358_s22 + $0x558] sm:$0xff] }
  0xca   :  { %4262 = vmatpush1.bf16.msra.mxu1 %v4261_v17  ;;  %4136 = vmatprep.subr.bf16.mxu0 %v4135_v18  ;;  %v4281_v17 = vpack.c.bf16 %v853_v10, %v849_v8  ;;  %v4155_v18 = vpack.c.bf16 %v860_v12, %v856_v11  ;;  %v893_v8 = vld [vmem:[%s9358_s22 + $0x670] sm:$0xff]  ;;  %v900_v10 = vld [vmem:[%s9358_s22 + $0x6a8] sm:$0xff]  ;;  %v898_v11 = vld [vmem:[%s9358_s22 + $0x698] sm:$0xff] }
  0xcb   :  { %4264 = vmatprep.subr.bf16.mxu1 %v4263_v22  ;;  %v4283_v22 = vpack.c.bf16 %v862_v15, %v858_v13  ;;  %v902_v12 = vld [vmem:[%s9358_s22 + $0x6b8] sm:$0xff]  ;;  %v4301_v15 = vpack.c.bf16 %v893_v8, %v889_v6  ;;  %v933_v6 = vld [vmem:[%s9358_s22 + $0x7b0] sm:$0xff]  ;;  %v940_v8 = vld [vmem:[%s9358_s22 + $0x7e8] sm:$0xff] }
  0xcc   :  { %1030 = vmatmul.mubr.f32.vlgmr.msra.gmra.mrb[4].mxu0 %v683_v26  ;;  %v4303_v20 = vpack.c.bf16 %v902_v12, %v898_v11 }
  0xcd   :  { %4138 = vmatpush1.bf16.msra.mxu0 %v4137_v30  ;;  %1172 = vmatmul.mubr.f32.vlgmr.msra.gmra.mrb[4].mxu1 %v683_v26  ;;  %v866_v26 = vld [vmem:[%s9358_s22 + $0x598] sm:$0xff]  ;;  %v4285_v30 = vpack.c.bf16 %v861_v23, %v857_v21  ;;  %v901_v21 = vld [vmem:[%s9358_s22 + $0x6b0] sm:$0xff]  ;;  %v908_v23 = vld [vmem:[%s9358_s22 + $0x6e8] sm:$0xff] }
  0xce   :  { %4266 = vmatpush1.bf16.msra.mxu1 %v4265_v31  ;;  %4140 = vmatprep.subr.bf16.mxu0 %v4139_v32  ;;  %v4159_v31 = vpack.c.bf16 %v868_v25, %v864_v24  ;;  %v863_v32 = vld [vmem:[%s9358_s22 + $0x580] sm:$0xff]  ;;  %v4287_v35 = vpack.c.bf16 %v870_v27, %v866_v26  ;;  %v906_v24 = vld [vmem:[%s9358_s22 + $0x6d8] sm:$0xff]  ;;  %v4305_v27 = vpack.c.bf16 %v901_v21, %v897_v19  ;;  %v941_v19 = vld [vmem:[%s9358_s22 + $0x7f0] sm:$0xff] }
  0xcf   :  { %4268 = vmatprep.subr.bf16.mxu1 %v4267_v36  ;;  %1100 = vmatprep.mubr.f32.mxu0 %v686_v40  ;;  %v869_v36 = vld [vmem:[%s9358_s22 + $0x5b0] sm:$0xff]  ;;  %v4161_v41 = vpack.c.bf16 %v867_v33, %v863_v32  ;;  %v910_v25 = vld [vmem:[%s9358_s22 + $0x6f8] sm:$0xff]  ;;  %v1254_v21 = vld [vmem:[%s9333_s7 + $0x28] sm:$0xff] }
  0xd0   :  { %1242 = vmatprep.mubr.f32.mxu1 %v686_v40  ;;  %v878_v40 = vld [vmem:[%s9358_s22 + $0x5f8] sm:$0xff]  ;;  %v4289_v42 = vpack.c.bf16 %v869_v36, %v865_v34  ;;  %v905_v32 = vld [vmem:[%s9358_s22 + $0x6d0] sm:$0xff]  ;;  %v4307_v33 = vpack.c.bf16 %v910_v25, %v906_v24  ;;  %v916_v36 = vld [vmem:[%s9358_s22 + $0x728] sm:$0xff] }
  0xd1   :  { %4142 = vmatpush1.bf16.msra.mxu0 %v4141_v43  ;;  %v4163_v43 = vpack.c.bf16 %v876_v38, %v872_v37  ;;  %v4291_v47 = vpack.c.bf16 %v878_v40, %v874_v39  ;;  %v909_v34 = vld [vmem:[%s9358_s22 + $0x6f0] sm:$0xff]  ;;  %v914_v37 = vld [vmem:[%s9358_s22 + $0x718] sm:$0xff] }
  0xd2   :  { %4270 = vmatpush1.bf16.msra.mxu1 %v4269_v44  ;;  %4144 = vmatprep.subr.bf16.mxu0 %v4143_v45  ;;  %v871_v44 = vld [vmem:[%s9358_s22 + $0x5c0] sm:$0xff]  ;;  %v918_v38 = vld [vmem:[%s9358_s22 + $0x738] sm:$0xff]  ;;  %v4309_v40 = vpack.c.bf16 %v909_v34, %v905_v32  ;;  %v681_v24 = vld [vmem:[%s9332_s2 + $0x10] sm:$0xff] }
  0xd3   :  { %4272 = vmatprep.subr.bf16.mxu1 %v4271_v49  ;;  %v875_v45 = vld [vmem:[%s9358_s22 + $0x5e0] sm:$0xff]  ;;  %v880_v49 = vld [vmem:[%s9358_s22 + $0x608] sm:$0xff] }
  0xd4   :  { %v4165_v53 = vpack.c.bf16 %v875_v45, %v871_v44  ;;  %v913_v44 = vld [vmem:[%s9358_s22 + $0x710] sm:$0xff]  ;;  %v4311_v45 = vpack.c.bf16 %v918_v38, %v914_v37  ;;  %v1266_v37 = vld [vmem:[%s9333_s7 + $0x88] sm:$0xff] }
  0xd5   :  { %4146 = vmatpush1.bf16.msra.mxu0 %v4145_v55  ;;  %v4167_v55 = vpack.c.bf16 %v884_v50, %v880_v49  ;;  %v922_v49 = vld [vmem:[%s9358_s22 + $0x758] sm:$0xff]  ;;  %v4313_v52 = vpack.c.bf16 %v917_v46, %v913_v44  ;;  %v1270_v38 = vld [vmem:[%s9333_s7 + $0xa8] sm:$0xff] }
  0xd6   :  { %4274 = vmatpush1.bf16.msra.mxu1 %v4273_v56  ;;  %4148 = vmatprep.subr.bf16.mxu0 %v4147_v57  ;;  %v879_v56 = vld [vmem:[%s9358_s22 + $0x600] sm:$0xff]  ;;  %v926_v50 = vld [vmem:[%s9358_s22 + $0x778] sm:$0xff]  ;;  %v1274_v44 = vld [vmem:[%s9333_s7 + $0xc8] sm:$0xff] }
  0xd7   :  { %4276 = vmatprep.subr.bf16.mxu1 %v4275_v61  ;;  %v883_v57 = vld [vmem:[%s9358_s22 + $0x620] sm:$0xff]  ;;  %v888_v61 = vld [vmem:[%s9358_s22 + $0x648] sm:$0xff] }
  0xd8   :  { %v4169_v1 = vpack.c.bf16 %v883_v57, %v879_v56  ;;  %v921_v56 = vld [vmem:[%s9358_s22 + $0x750] sm:$0xff]  ;;  %v4315_v57 = vpack.c.bf16 %v926_v50, %v922_v49  ;;  %v1277_v49 = vld [vmem:[%s9333_s7 + $0xe0] sm:$0xff]  ;;  %v1282_v50 = vld [vmem:[%s9333_s7 + $0x108] sm:$0xff] }
  0xd9   :  { %4150 = vmatpush1.bf16.msra.mxu0 %v4149_v3  ;;  %v4171_v3 = vpack.c.bf16 %v892_v62, %v888_v61  ;;  %v930_v61 = vld [vmem:[%s9358_s22 + $0x798] sm:$0xff]  ;;  %v4317_v0 = vpack.c.bf16 %v925_v58, %v921_v56  ;;  %v1290_v56 = vld [vmem:[%s9333_s7 + $0x148] sm:$0xff] }
  0xda   :  { %4278 = vmatpush1.bf16.msra.mxu1 %v4277_v4  ;;  %4152 = vmatprep.subr.bf16.mxu0 %v4151_v5  ;;  %v887_v4 = vld [vmem:[%s9358_s22 + $0x640] sm:$0xff]  ;;  %v934_v62 = vld [vmem:[%s9358_s22 + $0x7b8] sm:$0xff] }
  0xdb   :  { %4280 = vmatprep.subr.bf16.mxu1 %v4279_v9  ;;  %v891_v5 = vld [vmem:[%s9358_s22 + $0x660] sm:$0xff]  ;;  %v896_v9 = vld [vmem:[%s9358_s22 + $0x688] sm:$0xff] }
  0xdc   :  { %v4173_v13 = vpack.c.bf16 %v891_v5, %v887_v4  ;;  %v929_v4 = vld [vmem:[%s9358_s22 + $0x790] sm:$0xff]  ;;  %v4319_v5 = vpack.c.bf16 %v934_v62, %v930_v61  ;;  %v1293_v61 = vld [vmem:[%s9333_s7 + $0x160] sm:$0xff]  ;;  %v1298_v62 = vld [vmem:[%s9333_s7 + $0x188] sm:$0xff] }
  0xdd   :  { %4154 = vmatpush1.bf16.msra.mxu0 %v4153_v16  ;;  %v4175_v16 = vpack.c.bf16 %v900_v10, %v896_v9  ;;  %v938_v9 = vld [vmem:[%s9358_s22 + $0x7d8] sm:$0xff]  ;;  %v4321_v12 = vpack.c.bf16 %v933_v6, %v929_v4  ;;  %v1306_v4 = vld [vmem:[%s9333_s7 + $0x1c8] sm:$0xff] }
  0xde   :  { %4282 = vmatpush1.bf16.msra.mxu1 %v4281_v17  ;;  %4156 = vmatprep.subr.bf16.mxu0 %v4155_v18  ;;  %v895_v17 = vld [vmem:[%s9358_s22 + $0x680] sm:$0xff]  ;;  %v942_v10 = vld [vmem:[%s9358_s22 + $0x7f8] sm:$0xff] }
  0xdf   :  { %4284 = vmatprep.subr.bf16.mxu1 %v4283_v22  ;;  %v899_v18 = vld [vmem:[%s9358_s22 + $0x6a0] sm:$0xff]  ;;  %v904_v22 = vld [vmem:[%s9358_s22 + $0x6c8] sm:$0xff] }
  0xe0   :  { %v4177_v26 = vpack.c.bf16 %v899_v18, %v895_v17  ;;  %v937_v17 = vld [vmem:[%s9358_s22 + $0x7d0] sm:$0xff]  ;;  %v4323_v18 = vpack.c.bf16 %v942_v10, %v938_v9  ;;  %v1309_v9 = vld [vmem:[%s9333_s7 + $0x1e0] sm:$0xff]  ;;  %v1314_v10 = vld [vmem:[%s9333_s7 + $0x208] sm:$0xff] }
  0xe1   :  { %4158 = vmatpush1.bf16.msra.mxu0 %v4157_v29  ;;  %v4179_v29 = vpack.c.bf16 %v908_v23, %v904_v22  ;;  %v6810_v23 = vld [vmem:[%s9359_s26 + $0x10] sm:$0xff]  ;;  %v4325_v25 = vpack.c.bf16 %v941_v19, %v937_v17  ;;  %v1322_v17 = vld [vmem:[%s9333_s7 + $0x248] sm:$0xff] }
  0xe2   :  { %4286 = vmatpush1.bf16.msra.mxu1 %v4285_v30  ;;  %4160 = vmatprep.subr.bf16.mxu0 %v4159_v31  ;;  %v903_v30 = vld [vmem:[%s9358_s22 + $0x6c0] sm:$0xff]  ;;  %v685_v32 = vadd.f32 %v681_v24, %v6810_v23  ;;  %v1330_v24 = vld [vmem:[%s9333_s7 + $0x288] sm:$0xff] }
  0xe3   :  { %4288 = vmatprep.subr.bf16.mxu1 %v4287_v35  ;;  %v907_v31 = vld [vmem:[%s9358_s22 + $0x6e0] sm:$0xff]  ;;  %v912_v35 = vld [vmem:[%s9358_s22 + $0x708] sm:$0xff] }
  0xe4   :  { %v4181_v39 = vpack.c.bf16 %v907_v31, %v903_v30  ;;  %v1258_v30 = vld [vmem:[%s9333_s7 + $0x48] sm:$0xff] }
  0xe5   :  { %4162 = vmatpush1.bf16.msra.mxu0 %v4161_v41  ;;  %v4183_v41 = vpack.c.bf16 %v916_v36, %v912_v35  ;;  %v1262_v31 = vld [vmem:[%s9333_s7 + $0x68] sm:$0xff]  ;;  %v1257_v35 = vld [vmem:[%s9333_s7 + $0x40] sm:$0xff] }
  0xe6   :  { %4290 = vmatpush1.bf16.msra.mxu1 %v4289_v42  ;;  %4164 = vmatprep.subr.bf16.mxu0 %v4163_v43  ;;  %v911_v42 = vld [vmem:[%s9358_s22 + $0x700] sm:$0xff]  ;;  %v4331_v34 = vpack.c.bf16 %v1262_v31, %v1258_v30  ;;  %v1338_v31 = vld [vmem:[%s9333_s7 + $0x2c8] sm:$0xff] }
  0xe7   :  { %4292 = vmatprep.subr.bf16.mxu1 %v4291_v47  ;;  %v915_v43 = vld [vmem:[%s9358_s22 + $0x720] sm:$0xff]  ;;  %v920_v47 = vld [vmem:[%s9358_s22 + $0x748] sm:$0xff] }
  0xe8   :  { %v4185_v51 = vpack.c.bf16 %v915_v43, %v911_v42  ;;  %v1261_v36 = vld [vmem:[%s9333_s7 + $0x60] sm:$0xff]  ;;  %v5104_v43 = vld [vmem:[%s9359_s26 + $0x8] sm:$0xff] }
  0xe9   :  { %4166 = vmatpush1.bf16.msra.mxu0 %v4165_v53  ;;  %v4187_v53 = vpack.c.bf16 %v924_v48, %v920_v47  ;;  %v1269_v42 = vld [vmem:[%s9333_s7 + $0xa0] sm:$0xff] }
  0xea   :  { %4294 = vmatpush1.bf16.msra.mxu1 %v4293_v54  ;;  %4168 = vmatprep.subr.bf16.mxu0 %v4167_v55  ;;  %v919_v54 = vld [vmem:[%s9358_s22 + $0x740] sm:$0xff] }
  0xeb   :  { %4296 = vmatprep.subr.bf16.mxu1 %v4295_v59  ;;  %v923_v55 = vld [vmem:[%s9358_s22 + $0x760] sm:$0xff]  ;;  %v928_v59 = vld [vmem:[%s9358_s22 + $0x788] sm:$0xff] }
  0xec   :  { %v4189_v63 = vpack.c.bf16 %v923_v55, %v919_v54  ;;  %v1273_v48 = vld [vmem:[%s9333_s7 + $0xc0] sm:$0xff] }
  0xed   :  { %4170 = vmatpush1.bf16.msra.mxu0 %v4169_v1  ;;  %v4191_v1 = vpack.c.bf16 %v932_v60, %v928_v59  ;;  %v1281_v54 = vld [vmem:[%s9333_s7 + $0x100] sm:$0xff] }
  0xee   :  { %4298 = vmatpush1.bf16.msra.mxu1 %v4297_v2  ;;  %4172 = vmatprep.subr.bf16.mxu0 %v4171_v3  ;;  %v927_v2 = vld [vmem:[%s9358_s22 + $0x780] sm:$0xff] }
  0xef   :  { %4300 = vmatprep.subr.bf16.mxu1 %v4299_v7  ;;  %v931_v3 = vld [vmem:[%s9358_s22 + $0x7a0] sm:$0xff]  ;;  %v936_v7 = vld [vmem:[%s9358_s22 + $0x7c8] sm:$0xff] }
  0xf0   :  { %v4193_v11 = vpack.c.bf16 %v931_v3, %v927_v2  ;;  %v1285_v55 = vld [vmem:[%s9333_s7 + $0x120] sm:$0xff] }
  0xf1   :  { %4174 = vmatpush1.bf16.msra.mxu0 %v4173_v13  ;;  %v4195_v13 = vpack.c.bf16 %v940_v8, %v936_v7  ;;  %v4345_v58 = vpack.c.bf16 %v1285_v55, %v1281_v54  ;;  %v1289_v60 = vld [vmem:[%s9333_s7 + $0x140] sm:$0xff]  ;;  %v1370_v55 = vld [vmem:[%s9333_s7 + $0x3c8] sm:$0xff] }
  0xf2   :  { %4302 = vmatpush1.bf16.msra.mxu1 %v4301_v15  ;;  %4176 = vmatprep.subr.bf16.mxu0 %v4175_v16  ;;  %v935_v15 = vld [vmem:[%s9358_s22 + $0x7c0] sm:$0xff] }
  0xf3   :  { %4304 = vmatprep.subr.bf16.mxu1 %v4303_v20  ;;  %v939_v16 = vld [vmem:[%s9358_s22 + $0x7e0] sm:$0xff]  ;;  %v1250_v20 = vld [vmem:[%s9333_s7 + $0x8] sm:$0xff] }
  0xf4   :  { %v4197_v22 = vpack.c.bf16 %v939_v16, %v935_v15  ;;  %v1297_v2 = vld [vmem:[%s9333_s7 + $0x180] sm:$0xff] }
  0xf5   :  { %4178 = vmatpush1.bf16.msra.mxu0 %v4177_v26  ;;  %v4327_v26 = vpack.c.bf16 %v1254_v21, %v1250_v20  ;;  %v1301_v3 = vld [vmem:[%s9333_s7 + $0x1a0] sm:$0xff] }
  0xf6   :  { %4306 = vmatpush1.bf16.msra.mxu1 %v4305_v27  ;;  %4180 = vmatprep.subr.bf16.mxu0 %v4179_v29  ;;  %v1249_v27 = vld [vmem:[%s9333_s7] sm:$0xff]  ;;  %v4353_v6 = vpack.c.bf16 %v1301_v3, %v1297_v2  ;;  %v1386_v3 = vld [vmem:[%s9333_s7 + $0x448] sm:$0xff] }
  0xf7   :  { %4308 = vmatprep.subr.bf16.mxu1 %v4307_v33  ;;  %v1253_v29 = vld [vmem:[%s9333_s7 + $0x20] sm:$0xff] }
  0xf8   :  { %v4329_v33 = vpack.c.bf16 %v1253_v29, %v1249_v27  ;;  %v1305_v8 = vld [vmem:[%s9333_s7 + $0x1c0] sm:$0xff] }
  0xf9   :  { %4182 = vmatpush1.bf16.msra.mxu0 %v4181_v39  ;;  %v4333_v39 = vpack.c.bf16 %v1261_v36, %v1257_v35  ;;  %v1313_v15 = vld [vmem:[%s9333_s7 + $0x200] sm:$0xff] }
  0xfa   :  { %4310 = vmatpush1.bf16.msra.mxu1 %v4309_v40  ;;  %4184 = vmatprep.subr.bf16.mxu0 %v4183_v41  ;;  %v4335_v40 = vpack.c.bf16 %v1270_v38, %v1266_v37  ;;  %v1265_v41 = vld [vmem:[%s9333_s7 + $0x80] sm:$0xff]  ;;  %v1346_v37 = vld [vmem:[%s9333_s7 + $0x308] sm:$0xff] }
  0xfb   :  { %4312 = vmatprep.subr.bf16.mxu1 %v4311_v45  ;;  %v1278_v45 = vld [vmem:[%s9333_s7 + $0xe8] sm:$0xff]  ;;  %v4337_v46 = vpack.c.bf16 %v1269_v42, %v1265_v41  ;;  %v1317_v16 = vld [vmem:[%s9333_s7 + $0x220] sm:$0xff] }
  0xfc   :  { %v4339_v47 = vpack.c.bf16 %v1278_v45, %v1274_v44  ;;  %v4361_v19 = vpack.c.bf16 %v1317_v16, %v1313_v15  ;;  %v1321_v21 = vld [vmem:[%s9333_s7 + $0x240] sm:$0xff]  ;;  %v1350_v38 = vld [vmem:[%s9333_s7 + $0x328] sm:$0xff] }
  0xfd   :  { %4186 = vmatpush1.bf16.msra.mxu0 %v4185_v51  ;;  %v1286_v51 = vld [vmem:[%s9333_s7 + $0x128] sm:$0xff]  ;;  %v1329_v29 = vld [vmem:[%s9333_s7 + $0x280] sm:$0xff] }
  0xfe   :  { %4314 = vmatpush1.bf16.msra.mxu1 %v4313_v52  ;;  %4188 = vmatprep.subr.bf16.mxu0 %v4187_v53  ;;  %v4341_v52 = vpack.c.bf16 %v1277_v49, %v1273_v48  ;;  %v4343_v53 = vpack.c.bf16 %v1286_v51, %v1282_v50  ;;  %v1333_v30 = vld [vmem:[%s9333_s7 + $0x2a0] sm:$0xff]  ;;  %v1358_v44 = vld [vmem:[%s9333_s7 + $0x368] sm:$0xff] }
  0xff   :  { %4316 = vmatprep.subr.bf16.mxu1 %v4315_v57  ;;  %v1294_v57 = vld [vmem:[%s9333_s7 + $0x168] sm:$0xff]  ;;  %v1337_v35 = vld [vmem:[%s9333_s7 + $0x2c0] sm:$0xff] }
 0x100   :  { %v4347_v59 = vpack.c.bf16 %v1294_v57, %v1290_v56  ;;  %v1341_v36 = vld [vmem:[%s9333_s7 + $0x2e0] sm:$0xff]  ;;  %v1362_v49 = vld [vmem:[%s9333_s7 + $0x388] sm:$0xff] }
 0x101   :  { %4190 = vmatpush1.bf16.msra.mxu0 %v4189_v63  ;;  %v1302_v63 = vld [vmem:[%s9333_s7 + $0x1a8] sm:$0xff]  ;;  %v1345_v41 = vld [vmem:[%s9333_s7 + $0x300] sm:$0xff] }
 0x102   :  { %4318 = vmatpush1.bf16.msra.mxu1 %v4317_v0  ;;  %4192 = vmatprep.subr.bf16.mxu0 %v4191_v1  ;;  %v4349_v0 = vpack.c.bf16 %v1293_v61, %v1289_v60  ;;  %v4351_v1 = vpack.c.bf16 %v1302_v63, %v1298_v62  ;;  %v1349_v42 = vld [vmem:[%s9333_s7 + $0x320] sm:$0xff]  ;;  %v1366_v50 = vld [vmem:[%s9333_s7 + $0x3a8] sm:$0xff] }
 0x103   :  { %4320 = vmatprep.subr.bf16.mxu1 %v4319_v5  ;;  %v1310_v5 = vld [vmem:[%s9333_s7 + $0x1e8] sm:$0xff]  ;;  %v4377_v45 = vpack.c.bf16 %v1349_v42, %v1345_v41  ;;  %v1357_v48 = vld [vmem:[%s9333_s7 + $0x360] sm:$0xff] }
 0x104   :  { %v4355_v7 = vpack.c.bf16 %v1310_v5, %v1306_v4  ;;  %v1365_v54 = vld [vmem:[%s9333_s7 + $0x3a0] sm:$0xff]  ;;  %v1374_v56 = vld [vmem:[%s9333_s7 + $0x3e8] sm:$0xff] }
 0x105   :  { %4194 = vmatpush1.bf16.msra.mxu0 %v4193_v11  ;;  %v1318_v11 = vld [vmem:[%s9333_s7 + $0x228] sm:$0xff]  ;;  %v1373_v60 = vld [vmem:[%s9333_s7 + $0x3e0] sm:$0xff] }
 0x106   :  { %4322 = vmatpush1.bf16.msra.mxu1 %v4321_v12  ;;  %4196 = vmatprep.subr.bf16.mxu0 %v4195_v13  ;;  %v4357_v12 = vpack.c.bf16 %v1309_v9, %v1305_v8  ;;  %v4359_v13 = vpack.c.bf16 %v1318_v11, %v1314_v10  ;;  %v1378_v61 = vld [vmem:[%s9333_s7 + $0x408] sm:$0xff]  ;;  %v1381_v2 = vld [vmem:[%s9333_s7 + $0x420] sm:$0xff] }
 0x107   :  { %4324 = vmatprep.subr.bf16.mxu1 %v4323_v18  ;;  %v1326_v18 = vld [vmem:[%s9333_s7 + $0x268] sm:$0xff]  ;;  %v1389_v8 = vld [vmem:[%s9333_s7 + $0x460] sm:$0xff] }
 0x108   :  { %v4363_v20 = vpack.c.bf16 %v1326_v18, %v1322_v17  ;;  %v1382_v62 = vld [vmem:[%s9333_s7 + $0x428] sm:$0xff]  ;;  %v1397_v15 = vld [vmem:[%s9333_s7 + $0x4a0] sm:$0xff]  ;;  %v62_v17 = vlaneseq }
 0x109   :  { %4198 = vmatpush1.bf16.msra.mxu0 %v4197_v22  ;;  %v1325_v22 = vld [vmem:[%s9333_s7 + $0x260] sm:$0xff]  ;;  %v1390_v4 = vld [vmem:[%s9333_s7 + $0x468] sm:$0xff] }
 0x10a   :  { %4326 = vmatpush1.bf16.msra.mxu1 %v4325_v25  ;;  %4328 = vmatprep.subr.bf16.mxu0 %v4327_v26  ;;  %v1334_v25 = vld [vmem:[%s9333_s7 + $0x2a8] sm:$0xff]  ;;  %v4365_v26 = vpack.c.bf16 %v1325_v22, %v1321_v21 }
 0x10b   :  { %v4367_v27 = vpack.c.bf16 %v1334_v25, %v1330_v24  ;;  %v1394_v9 = vld [vmem:[%s9333_s7 + $0x488] sm:$0xff]  ;;  %v352_v24 = vshrl.u32 %v62_v17, 7 }
 0x10c   :  { %1101 = vmatmul.mubr.f32.vlgmr.msra.gmra.mrb[4].mxu0 %v685_v32  ;;  %v1398_v10 = vld [vmem:[%s9333_s7 + $0x4a8] sm:$0xff] }
 0x10d   :  { %1243 = vmatmul.mubr.f32.vlgmr.msra.gmra.mrb[4].mxu1 %v685_v32  ;;  %4330 = vmatpush1.bf16.msra.mxu0 %v4329_v33  ;;  %v1342_v32 = vld [vmem:[%s9333_s7 + $0x2e8] sm:$0xff]  ;;  %v4369_v33 = vpack.c.bf16 %v1333_v30, %v1329_v29  ;;  %v1413_v29 = vld [vmem:[%s9333_s7 + $0x520] sm:$0xff] }
 0x10e   :  { %4332 = vmatprep.subr.bf16.mxu0 %v4331_v34  ;;  %1591 = vmatprep.mubr.f32.mxu0 %v5104_v43  ;;  %v4371_v34 = vpack.c.bf16 %v1342_v32, %v1338_v31  ;;  %v1402_v16 = vld [vmem:[%s9333_s7 + $0x4c8] sm:$0xff]  ;;  %v7074_v32 = vsub.s32 0, %v352_v24 }
 0x10f   :  { %1733 = vmatprep.mubr.f32.mxu1 %v5104_v43  ;;  %v1354_v43 = vld [vmem:[%s9333_s7 + $0x348] sm:$0xff] }
 0x110   :  { %v1410_v21 = vld [vmem:[%s9333_s7 + $0x508] sm:$0xff] }
 0x111   :  { %4334 = vmatpush1.bf16.msra.mxu0 %v4333_v39  ;;  %v4373_v39 = vpack.c.bf16 %v1341_v36, %v1337_v35  ;;  %v1414_v22 = vld [vmem:[%s9333_s7 + $0x528] sm:$0xff]  ;;  %v7079_v35 = vsub.s32 2, %v352_v24  ;;  %v7081_v36 = vsub.s32 3, %v352_v24 }
 0x112   :  { %4336 = vmatprep.subr.bf16.mxu0 %v4335_v40  ;;  %v4375_v40 = vpack.c.bf16 %v1350_v38, %v1346_v37  ;;  %v1418_v30 = vld [vmem:[%s9333_s7 + $0x548] sm:$0xff]  ;;  %v1417_v38 = vld [vmem:[%s9333_s7 + $0x540] sm:$0xff] }
 0x113   :  { %v1422_v31 = vld [vmem:[%s9333_s7 + $0x568] sm:$0xff] }
 0x114   :  { %v4411_v37 = vpack.c.bf16 %v1422_v31, %v1418_v30  ;;  %v1430_v41 = vld [vmem:[%s9333_s7 + $0x5a8] sm:$0xff]  ;;  %v1465_v31 = vld [vmem:[%s9333_s7 + $0x6c0] sm:$0xff] }
 0x115   :  { %4338 = vmatpush1.bf16.msra.mxu0 %v4337_v46  ;;  %v4379_v46 = vpack.c.bf16 %v1358_v44, %v1354_v43 }
 0x116   :  { %4340 = vmatprep.subr.bf16.mxu0 %v4339_v47  ;;  %v1353_v47 = vld [vmem:[%s9333_s7 + $0x340] sm:$0xff] }
 0x117   :  { %v4381_v51 = vpack.c.bf16 %v1357_v48, %v1353_v47  ;;  %v1425_v47 = vld [vmem:[%s9333_s7 + $0x580] sm:$0xff] }
 0x118   :  { %v1429_v48 = vld [vmem:[%s9333_s7 + $0x5a0] sm:$0xff] }
 0x119   :  { %4342 = vmatpush1.bf16.msra.mxu0 %v4341_v52  ;;  %v4383_v52 = vpack.c.bf16 %v1366_v50, %v1362_v49  ;;  %v7104_v50 = vsub.s32 1, %v352_v24 }
 0x11a   :  { %4344 = vmatprep.subr.bf16.mxu0 %v4343_v53  ;;  %v1361_v53 = vld [vmem:[%s9333_s7 + $0x380] sm:$0xff] }
 0x11b   :  { %v4385_v57 = vpack.c.bf16 %v1365_v54, %v1361_v53 }
 0x11d   :  { %4346 = vmatpush1.bf16.msra.mxu0 %v4345_v58  ;;  %v4387_v58 = vpack.c.bf16 %v1374_v56, %v1370_v55 }
 0x11e   :  { %4348 = vmatprep.subr.bf16.mxu0 %v4347_v59  ;;  %v1369_v59 = vld [vmem:[%s9333_s7 + $0x3c0] sm:$0xff] }
 0x11f   :  { %v4389_v63 = vpack.c.bf16 %v1373_v60, %v1369_v59 }
 0x121   :  { %4350 = vmatpush1.bf16.msra.mxu0 %v4349_v0  ;;  %v4391_v0 = vpack.c.bf16 %v1382_v62, %v1378_v61  ;;  %v1433_v61 = vld [vmem:[%s9333_s7 + $0x5c0] sm:$0xff] }
 0x122   :  { %4352 = vmatprep.subr.bf16.mxu0 %v4351_v1  ;;  %v1377_v1 = vld [vmem:[%s9333_s7 + $0x400] sm:$0xff] }
 0x123   :  { %v4393_v5 = vpack.c.bf16 %v1381_v2, %v1377_v1  ;;  %v1437_v62 = vld [vmem:[%s9333_s7 + $0x5e0] sm:$0xff]  ;;  %v1442_v1 = vld [vmem:[%s9333_s7 + $0x608] sm:$0xff] }
 0x124   :  { %v1446_v2 = vld [vmem:[%s9333_s7 + $0x628] sm:$0xff] }
 0x125   :  { %4354 = vmatpush1.bf16.msra.mxu0 %v4353_v6  ;;  %v4395_v6 = vpack.c.bf16 %v1390_v4, %v1386_v3 }
 0x126   :  { %4356 = vmatprep.subr.bf16.mxu0 %v4355_v7  ;;  %v1385_v7 = vld [vmem:[%s9333_s7 + $0x440] sm:$0xff] }
 0x127   :  { %v4397_v11 = vpack.c.bf16 %v1389_v8, %v1385_v7 }
 0x129   :  { %4358 = vmatpush1.bf16.msra.mxu0 %v4357_v12  ;;  %v4399_v12 = vpack.c.bf16 %v1398_v10, %v1394_v9  ;;  %v4421_v9 = vpack.c.bf16 %v1437_v62, %v1433_v61  ;;  %v1482_v61 = vld [vmem:[%s9333_s7 + $0x748] sm:$0xff] }
 0x12a   :  { %4360 = vmatprep.subr.bf16.mxu0 %v4359_v13  ;;  %v1393_v13 = vld [vmem:[%s9333_s7 + $0x480] sm:$0xff] }
 0x12d   :  { %4362 = vmatpush1.bf16.msra.mxu0 %v4361_v19  ;;  %v1401_v19 = vld [vmem:[%s9333_s7 + $0x4c0] sm:$0xff] }
 0x12e   :  { %4364 = vmatprep.subr.bf16.mxu0 %v4363_v20  ;;  %v1405_v20 = vld [vmem:[%s9333_s7 + $0x4e0] sm:$0xff] }
 0x12f   :  { %v4405_v25 = vpack.c.bf16 %v1405_v20, %v1401_v19  ;;  %v1453_v19 = vld [vmem:[%s9333_s7 + $0x660] sm:$0xff]  ;;  %v1458_v20 = vld [vmem:[%s9333_s7 + $0x688] sm:$0xff] }
 0x131   :  { %4366 = vmatpush1.bf16.msra.mxu0 %v4365_v26  ;;  %v4407_v26 = vpack.c.bf16 %v1414_v22, %v1410_v21  ;;  %v1462_v21 = vld [vmem:[%s9333_s7 + $0x6a8] sm:$0xff] }
 0x132   :  { %4368 = vmatprep.subr.bf16.mxu0 %v4367_v27  ;;  %v1409_v27 = vld [vmem:[%s9333_s7 + $0x500] sm:$0xff]  ;;  %v4431_v24 = vpack.c.bf16 %v1462_v21, %v1458_v20  ;;  %v1284_v20 = vld [vmem:[%s9333_s7 + $0x118] sm:$0xff] }
 0x133   :  { %v1288_v21 = vld [vmem:[%s9333_s7 + $0x138] sm:$0xff] }
 0x135   :  { %4370 = vmatpush1.bf16.msra.mxu0 %v4369_v33  ;;  %v4409_v33 = vpack.c.bf16 %v1413_v29, %v1409_v27  ;;  %v1466_v27 = vld [vmem:[%s9333_s7 + $0x6c8] sm:$0xff] }
 0x136   :  { %4372 = vmatprep.subr.bf16.mxu0 %v4371_v34  ;;  %v349_v34 = vld [vmem:[%s9334_s4] sm:$0xf]  ;;  %v1470_v29 = vld [vmem:[%s9333_s7 + $0x6e8] sm:$0xff] }
 0x137   :  { %v354_v42 = vrot.slane %v349_v34, %v7074_v32  ;;  %v362_v43 = vrot.slane %v349_v34, %v7079_v35 }
 0x139   :  { %4374 = vmatpush1.bf16.msra.mxu0 %v4373_v39  ;;  %v1421_v39 = vld [vmem:[%s9333_s7 + $0x560] sm:$0xff] }
 0x13a   :  { %4376 = vmatprep.subr.bf16.mxu0 %v4375_v40  ;;  %v1426_v40 = vld [vmem:[%s9333_s7 + $0x588] sm:$0xff]  ;;  %v4413_v44 = vpack.c.bf16 %v1421_v39, %v1417_v38  ;;  %v1252_v39 = vld [vmem:[%s9333_s7 + $0x18] sm:$0xff] }
 0x13b   :  { %v1478_v38 = vld [vmem:[%s9333_s7 + $0x728] sm:$0xff] }
 0x13d   :  { %4378 = vmatpush1.bf16.msra.mxu0 %v4377_v45  ;;  %v366_v45 = vrot.slane %v349_v34, %v7081_v36 }
 0x13e   :  { %4380 = vmatprep.subr.bf16.mxu0 %v4379_v46  ;;  %v4415_v46 = vpack.c.bf16 %v1430_v41, %v1426_v40  ;;  %v1256_v40 = vld [vmem:[%s9333_s7 + $0x38] sm:$0xff] }
 0x13f   :  { %v4455_v41 = vpack.c.bf16 %v1256_v40, %v1252_v39 }
 0x141   :  { %4382 = vmatpush1.bf16.msra.mxu0 %v4381_v51  ;;  %v1434_v51 = vld [vmem:[%s9333_s7 + $0x5c8] sm:$0xff]  ;;  %4456 = vmatprep.subr.bf16.mxu1 %v4455_v41  ;;  %v1497_v41 = vld [vmem:[%s9333_s7 + $0x7c0] sm:$0xff] }
 0x142   :  { %4384 = vmatprep.subr.bf16.mxu0 %v4383_v52  ;;  %v1438_v52 = vld [vmem:[%s9333_s7 + $0x5e8] sm:$0xff] }
 0x143   :  { %v4419_v60 = vpack.c.bf16 %v1438_v52, %v1434_v51  ;;  %v1268_v52 = vld [vmem:[%s9333_s7 + $0x98] sm:$0xff] }
 0x145   :  { %4386 = vmatpush1.bf16.msra.mxu0 %v4385_v57 }
 0x146   :  { %4388 = vmatprep.subr.bf16.mxu0 %v4387_v58  ;;  %v4417_v58 = vpack.c.bf16 %v1429_v48, %v1425_v47  ;;  %v1259_v47 = vld [vmem:[%s9333_s7 + $0x50] sm:$0xff] }
 0x147   :  { %v1263_v48 = vld [vmem:[%s9333_s7 + $0x70] sm:$0xff] }
 0x148   :  { %v4461_v62 = vpack.c.bf16 %v1263_v48, %v1259_v47  ;;  %v1300_v47 = vld [vmem:[%s9333_s7 + $0x198] sm:$0xff] }
 0x149   :  { %4390 = vmatpush1.bf16.msra.mxu0 %v4389_v63  ;;  %v7127_v63 = vrot.slane %v349_v34, %v7104_v50  ;;  %v1474_v34 = vld [vmem:[%s9333_s7 + $0x708] sm:$0xff]  ;;  %v1304_v48 = vld [vmem:[%s9333_s7 + $0x1b8] sm:$0xff] }
 0x14a   :  { %4392 = vmatprep.subr.bf16.mxu0 %v4391_v0 }
 0x14c   :  { %1592 = vmatmul.mubr.f32.vlgmr.msra.gmra.mrb[6].mxu0 %v6414_v14  ;;  %v1406_v14 = vld [vmem:[%s9333_s7 + $0x4e8] sm:$0xff] }
 0x14d   :  { %4394 = vmatpush1.bf16.msra.mxu0 %v4393_v5  ;;  %1662 = vmatprep.mubr.f32.mxu0 %v6447_v28  ;;  %v4401_v28 = vpack.c.bf16 %v1397_v15, %v1393_v13  ;;  %v4403_v18 = vpack.c.bf16 %v1406_v14, %v1402_v16  ;;  %v1445_v13 = vld [vmem:[%s9333_s7 + $0x620] sm:$0xff]  ;;  %v1450_v15 = vld [vmem:[%s9333_s7 + $0x648] sm:$0xff] }
 0x14e   :  { %4396 = vmatprep.subr.bf16.mxu0 %v4395_v6  ;;  %v1454_v16 = vld [vmem:[%s9333_s7 + $0x668] sm:$0xff] }
 0x151   :  { %4398 = vmatpush1.bf16.msra.mxu0 %v4397_v11  ;;  %v4423_v11 = vpack.c.bf16 %v1446_v2, %v1442_v1  ;;  %v1267_v2 = vld [vmem:[%s9333_s7 + $0x90] sm:$0xff] }
 0x152   :  { %4400 = vmatprep.subr.bf16.mxu0 %v4399_v12  ;;  %v1441_v12 = vld [vmem:[%s9333_s7 + $0x600] sm:$0xff] }
 0x153   :  { %v4425_v14 = vpack.c.bf16 %v1445_v13, %v1441_v12  ;;  %v1481_v12 = vld [vmem:[%s9333_s7 + $0x740] sm:$0xff] }
 0x154   :  { %v1485_v13 = vld [vmem:[%s9333_s7 + $0x760] sm:$0xff] }
 0x155   :  { %4402 = vmatpush1.bf16.msra.mxu0 %v4401_v28  ;;  %v4427_v28 = vpack.c.bf16 %v1454_v16, %v1450_v15  ;;  %v1490_v15 = vld [vmem:[%s9333_s7 + $0x788] sm:$0xff] }
 0x156   :  { %4404 = vmatprep.subr.bf16.mxu0 %v4403_v18  ;;  %v1449_v18 = vld [vmem:[%s9333_s7 + $0x640] sm:$0xff] }
 0x157   :  { %v4429_v22 = vpack.c.bf16 %v1453_v19, %v1449_v18  ;;  %v1275_v18 = vld [vmem:[%s9333_s7 + $0xd0] sm:$0xff] }
 0x158   :  { %v1279_v19 = vld [vmem:[%s9333_s7 + $0xf0] sm:$0xff] }
 0x159   :  { %4406 = vmatpush1.bf16.msra.mxu0 %v4405_v25  ;;  %v1457_v25 = vld [vmem:[%s9333_s7 + $0x680] sm:$0xff] }
 0x15a   :  { %4408 = vmatprep.subr.bf16.mxu0 %v4407_v26  ;;  %v1461_v26 = vld [vmem:[%s9333_s7 + $0x6a0] sm:$0xff] }
 0x15b   :  { %v4433_v30 = vpack.c.bf16 %v1461_v26, %v1457_v25  ;;  %v1489_v25 = vld [vmem:[%s9333_s7 + $0x780] sm:$0xff] }
 0x15c   :  { %v1493_v26 = vld [vmem:[%s9333_s7 + $0x7a0] sm:$0xff] }
 0x15d   :  { %4410 = vmatpush1.bf16.msra.mxu0 %v4409_v33  ;;  %v1469_v33 = vld [vmem:[%s9333_s7 + $0x6e0] sm:$0xff]  ;;  %v4449_v39 = vpack.c.bf16 %v1493_v26, %v1489_v25 }
 0x15e   :  { %4412 = vmatprep.subr.bf16.mxu0 %v4411_v37  ;;  %v4435_v37 = vpack.c.bf16 %v1470_v29, %v1466_v27  ;;  %v1498_v27 = vld [vmem:[%s9333_s7 + $0x7c8] sm:$0xff]  ;;  %v4469_v29 = vpack.c.bf16 %v1279_v19, %v1275_v18 }
 0x15f   :  { %v514_v49 = vpop.f32.mrb[0].mxu0 }
 0x160   :  { %v7112_v53 = vadd.f32 %v514_v49, %v354_v42  ;;  %v668_v54 = vpop.f32.mrb[0].mxu1  ;;  %v7114_v55 = vpop.f32.mrb[1].mxu0  ;;  %v4437_v49 = vpack.c.bf16 %v1469_v33, %v1465_v31  ;;  %v4471_v31 = vpack.c.bf16 %v1288_v21, %v1284_v20  ;;  %v1283_v33 = vld [vmem:[%s9333_s7 + $0x110] sm:$0xff] }
 0x161   :  { %v7116_v56 = vadd.f32 %v668_v54, %v362_v43  ;;  %v670_v57 = vpop.f32.mrb[1].mxu1  ;;  %4414 = vmatpush1.bf16.msra.mxu0 %v4413_v44  ;;  %v1260_v44 = vld [vmem:[%s9333_s7 + $0x58] sm:$0xff]  ;;  %v1331_v20 = vld [vmem:[%s9333_s7 + $0x290] sm:$0xff] }
 0x162   :  { %v7118_v59 = vadd.f32 %v670_v57, %v366_v45  ;;  %4416 = vmatprep.subr.bf16.mxu0 %v4415_v46  ;;  %v1264_v46 = vld [vmem:[%s9333_s7 + $0x78] sm:$0xff]  ;;  %v4439_v57 = vpack.c.bf16 %v1478_v38, %v1474_v34  ;;  %v1287_v34 = vld [vmem:[%s9333_s7 + $0x130] sm:$0xff] }
 0x163   :  { %v520_v0 = vpop.f32.mrb[2].mxu0  ;;  %v4459_v51 = vpack.c.bf16 %v1264_v46, %v1260_v44  ;;  %v1272_v54 = vld [vmem:[%s9333_s7 + $0xb8] sm:$0xff]  ;;  %v1295_v46 = vld [vmem:[%s9333_s7 + $0x170] sm:$0xff] }
 0x164   :  { %v7135_v3 = vadd.f32 %v520_v0, %v354_v42  ;;  %v674_v4 = vpop.f32.mrb[2].mxu1  ;;  %v522_v5 = vpop.f32.mrb[3].mxu0  ;;  %v1251_v42 = vld [vmem:[%s9333_s7 + $0x10] sm:$0xff]  ;;  %v1486_v0 = vld [vmem:[%s9333_s7 + $0x768] sm:$0xff]  ;;  %v4463_v1 = vpack.c.bf16 %v1272_v54, %v1268_v52  ;;  %v1296_v38 = vld [vmem:[%s9333_s7 + $0x178] sm:$0xff]  ;;  %v4479_v52 = vpack.c.bf16 %v1304_v48, %v1300_v47 }
 0x165   :  { %v7137_v6 = vadd.f32 %v674_v4, %v362_v43  ;;  %v7140_v7 = vadd.f32 %v522_v5, %v7127_v63  ;;  %v676_v8 = vpop.f32.mrb[3].mxu1  ;;  %4418 = vmatpush1.bf16.msra.mxu0 %v4417_v58  ;;  %v1255_v43 = vld [vmem:[%s9333_s7 + $0x30] sm:$0xff]  ;;  %v1473_v58 = vld [vmem:[%s9333_s7 + $0x700] sm:$0xff]  ;;  %v1276_v5 = vld [vmem:[%s9333_s7 + $0xd8] sm:$0xff] }
 0x166   :  { %v7142_v10 = vadd.f32 %v676_v8, %v366_v45  ;;  %4420 = vmatprep.subr.bf16.mxu0 %v4419_v60  ;;  %v4457_v45 = vpack.c.bf16 %v1255_v43, %v1251_v42  ;;  %v1477_v60 = vld [vmem:[%s9333_s7 + $0x720] sm:$0xff]  ;;  %v1271_v4 = vld [vmem:[%s9333_s7 + $0xb0] sm:$0xff]  ;;  %v1280_v8 = vld [vmem:[%s9333_s7 + $0xf8] sm:$0xff]  ;;  %v4473_v43 = vpack.c.bf16 %v1287_v34, %v1283_v33 }
 0x167   :  { %v4465_v16 = vpack.c.bf16 %v1271_v4, %v1267_v2  ;;  %v1501_v42 = vld [vmem:[%s9333_s7 + $0x7e0] sm:$0xff]  ;;  %v1299_v54 = vld [vmem:[%s9333_s7 + $0x190] sm:$0xff]  ;;  %v1316_v4 = vld [vmem:[%s9333_s7 + $0x218] sm:$0xff] }
 0x168   :  { %4458 = vmatpush1.bf16.msra.mxu1 %v4457_v45  ;;  %v1291_v45 = vld [vmem:[%s9333_s7 + $0x150] sm:$0xff] }
 0x169   :  { %4422 = vmatpush1.bf16.msra.mxu0 %v4421_v9  ;;  %4460 = vmatprep.subr.bf16.mxu1 %v4459_v51  ;;  %v4441_v9 = vpack.c.bf16 %v1477_v60, %v1473_v58  ;;  %v4477_v51 = vpack.c.bf16 %v1295_v46, %v1291_v45  ;;  %v1308_v58 = vld [vmem:[%s9333_s7 + $0x1d8] sm:$0xff]  ;;  %v1311_v2 = vld [vmem:[%s9333_s7 + $0x1f0] sm:$0xff] }
 0x16a   :  { %4424 = vmatprep.subr.bf16.mxu0 %v4423_v11  ;;  %v4443_v11 = vpack.c.bf16 %v1486_v0, %v1482_v61  ;;  %v1312_v60 = vld [vmem:[%s9333_s7 + $0x1f8] sm:$0xff]  ;;  %v1335_v21 = vld [vmem:[%s9333_s7 + $0x2b0] sm:$0xff] }
 0x16b   :  { %v4483_v0 = vpack.c.bf16 %v1312_v60, %v1308_v58  ;;  %v4497_v25 = vpack.c.bf16 %v1335_v21, %v1331_v20  ;;  %v1364_v45 = vld [vmem:[%s9333_s7 + $0x398] sm:$0xff]  ;;  %v1371_v60 = vld [vmem:[%s9333_s7 + $0x3d0] sm:$0xff] }
 0x16c   :  { %4462 = vmatpush1.bf16.msra.mxu1 %v4461_v62  ;;  %v5032_v62 = vadd.f32 %v7114_v55, %v7127_v63  ;;  %v1320_v55 = vld [vmem:[%s9333_s7 + $0x238] sm:$0xff] }
 0x16d   :  { %4426 = vmatpush1.bf16.msra.mxu0 %v4425_v14  ;;  %v1494_v14 = vld [vmem:[%s9333_s7 + $0x7a8] sm:$0xff]  ;;  %4464 = vmatprep.subr.bf16.mxu1 %v4463_v1  ;;  %v1307_v1 = vld [vmem:[%s9333_s7 + $0x1d0] sm:$0xff]  ;;  %v1368_v46 = vld [vmem:[%s9333_s7 + $0x3b8] sm:$0xff] }
 0x16e   :  { %4428 = vmatprep.subr.bf16.mxu0 %v4427_v28  ;;  %v4467_v28 = vpack.c.bf16 %v1280_v8, %v1276_v5  ;;  %v4485_v63 = vpack.c.bf16 %v1311_v2, %v1307_v1  ;;  %v4487_v5 = vpack.c.bf16 %v1320_v55, %v1316_v4  ;;  %v1315_v8 = vld [vmem:[%s9333_s7 + $0x210] sm:$0xff]  ;;  %v4511_v48 = vpack.c.bf16 %v1368_v46, %v1364_v45  ;;  %v1404_v20 = vld [vmem:[%s9333_s7 + $0x4d8] sm:$0xff] }
 0x16f   :  { %v1379_v4 = vld [vmem:[%s9333_s7 + $0x410] sm:$0xff]  ;;  %v1408_v21 = vld [vmem:[%s9333_s7 + $0x4f8] sm:$0xff] }
 0x170   :  { %4466 = vmatpush1.bf16.msra.mxu1 %v4465_v16  ;;  %v1327_v16 = vld [vmem:[%s9333_s7 + $0x270] sm:$0xff] }
 0x171   :  { %4430 = vmatpush1.bf16.msra.mxu0 %v4429_v22  ;;  %v4445_v22 = vpack.c.bf16 %v1485_v13, %v1481_v12  ;;  %4468 = vmatprep.subr.bf16.mxu1 %v4467_v28  ;;  %v1336_v28 = vld [vmem:[%s9333_s7 + $0x2b8] sm:$0xff]  ;;  %v1383_v55 = vld [vmem:[%s9333_s7 + $0x430] sm:$0xff] }
 0x172   :  { %4432 = vmatprep.subr.bf16.mxu0 %v4431_v24  ;;  %v4447_v24 = vpack.c.bf16 %v1494_v14, %v1490_v15  ;;  %v1323_v15 = vld [vmem:[%s9333_s7 + $0x250] sm:$0xff]  ;;  %v1332_v14 = vld [vmem:[%s9333_s7 + $0x298] sm:$0xff] }
 0x173   :  { %v4493_v18 = vpack.c.bf16 %v1327_v16, %v1323_v15  ;;  %v4495_v19 = vpack.c.bf16 %v1336_v28, %v1332_v14  ;;  %v5105_v15 = vld [vmem:[%s9359_s26] sm:$0xff]  ;;  %v5106_v14 = vld [vmem:[%s9359_s26 + $0x18] sm:$0xff] }
 0x174   :  { %4470 = vmatpush1.bf16.msra.mxu1 %v4469_v29  ;;  %v1343_v29 = vld [vmem:[%s9333_s7 + $0x2f0] sm:$0xff] }
 0x175   :  { %4434 = vmatpush1.bf16.msra.mxu0 %v4433_v30  ;;  %v1502_v30 = vld [vmem:[%s9333_s7 + $0x7e8] sm:$0xff]  ;;  %4472 = vmatprep.subr.bf16.mxu1 %v4471_v31  ;;  %v1352_v31 = vld [vmem:[%s9333_s7 + $0x338] sm:$0xff] }
 0x176   :  { %4436 = vmatprep.subr.bf16.mxu0 %v4435_v37  ;;  %v1292_v37 = vld [vmem:[%s9333_s7 + $0x158] sm:$0xff]  ;;  %v4451_v40 = vpack.c.bf16 %v1502_v30, %v1498_v27  ;;  %v1339_v27 = vld [vmem:[%s9333_s7 + $0x2d0] sm:$0xff] }
 0x177   :  { %v4475_v44 = vpack.c.bf16 %v1296_v38, %v1292_v37  ;;  %v1348_v30 = vld [vmem:[%s9333_s7 + $0x318] sm:$0xff]  ;;  %v4501_v33 = vpack.c.bf16 %v1343_v29, %v1339_v27  ;;  %v1347_v37 = vld [vmem:[%s9333_s7 + $0x310] sm:$0xff] }
 0x178   :  { %4474 = vmatpush1.bf16.msra.mxu1 %v4473_v43  ;;  %v4503_v34 = vpack.c.bf16 %v1352_v31, %v1348_v30  ;;  %v1351_v38 = vld [vmem:[%s9333_s7 + $0x330] sm:$0xff]  ;;  %v1412_v27 = vld [vmem:[%s9333_s7 + $0x518] sm:$0xff] }
 0x179   :  { %4438 = vmatpush1.bf16.msra.mxu0 %v4437_v49  ;;  %v4453_v49 = vpack.c.bf16 %v1501_v42, %v1497_v41  ;;  %4476 = vmatprep.subr.bf16.mxu1 %v4475_v44  ;;  %v4505_v41 = vpack.c.bf16 %v1351_v38, %v1347_v37  ;;  %v1355_v43 = vld [vmem:[%s9333_s7 + $0x350] sm:$0xff]  ;;  %v1416_v29 = vld [vmem:[%s9333_s7 + $0x538] sm:$0xff] }
 0x17a   :  { %4440 = vmatprep.subr.bf16.mxu0 %v4439_v57  ;;  %v1303_v57 = vld [vmem:[%s9333_s7 + $0x1b0] sm:$0xff]  ;;  %v4535_v31 = vpack.c.bf16 %v1416_v29, %v1412_v27  ;;  %v1420_v37 = vld [vmem:[%s9333_s7 + $0x558] sm:$0xff] }
 0x17b   :  { %v4481_v61 = vpack.c.bf16 %v1303_v57, %v1299_v54  ;;  %v1359_v44 = vld [vmem:[%s9333_s7 + $0x370] sm:$0xff]  ;;  %v1376_v54 = vld [vmem:[%s9333_s7 + $0x3f8] sm:$0xff] }
 0x17c   :  { %4478 = vmatpush1.bf16.msra.mxu1 %v4477_v51  ;;  %v4509_v47 = vpack.c.bf16 %v1359_v44, %v1355_v43  ;;  %v1367_v51 = vld [vmem:[%s9333_s7 + $0x3b0] sm:$0xff]  ;;  %v1424_v38 = vld [vmem:[%s9333_s7 + $0x578] sm:$0xff] }
 0x17d   :  { %4442 = vmatpush1.bf16.msra.mxu0 %v4441_v9  ;;  %4480 = vmatprep.subr.bf16.mxu1 %v4479_v52  ;;  %v1324_v9 = vld [vmem:[%s9333_s7 + $0x258] sm:$0xff] }
 0x17e   :  { %4444 = vmatprep.subr.bf16.mxu0 %v4443_v11  ;;  %v1328_v11 = vld [vmem:[%s9333_s7 + $0x278] sm:$0xff] }
 0x17f   :  { %v4491_v13 = vpack.c.bf16 %v1328_v11, %v1324_v9  ;;  %v1372_v52 = vld [vmem:[%s9333_s7 + $0x3d8] sm:$0xff]  ;;  %v1387_v9 = vld [vmem:[%s9333_s7 + $0x450] sm:$0xff] }
 0x180   :  { %4482 = vmatpush1.bf16.msra.mxu1 %v4481_v61  ;;  %v4515_v58 = vpack.c.bf16 %v1376_v54, %v1372_v52  ;;  %v1375_v61 = vld [vmem:[%s9333_s7 + $0x3f0] sm:$0xff]  ;;  %v1428_v43 = vld [vmem:[%s9333_s7 + $0x598] sm:$0xff] }
 0x181   :  { %4446 = vmatpush1.bf16.msra.mxu0 %v4445_v22  ;;  %4484 = vmatprep.subr.bf16.mxu1 %v4483_v0  ;;  %v1340_v22 = vld [vmem:[%s9333_s7 + $0x2d8] sm:$0xff]  ;;  %v4517_v1 = vpack.c.bf16 %v1375_v61, %v1371_v60  ;;  %v1391_v11 = vld [vmem:[%s9333_s7 + $0x470] sm:$0xff] }
 0x182   :  { %4448 = vmatprep.subr.bf16.mxu0 %v4447_v24  ;;  %v1344_v24 = vld [vmem:[%s9333_s7 + $0x2f8] sm:$0xff]  ;;  %v4525_v16 = vpack.c.bf16 %v1391_v11, %v1387_v9 }
 0x183   :  { %v4499_v26 = vpack.c.bf16 %v1344_v24, %v1340_v22  ;;  %v1384_v0 = vld [vmem:[%s9333_s7 + $0x438] sm:$0xff]  ;;  %v4531_v24 = vpack.c.bf16 %v1408_v21, %v1404_v20  ;;  %v1467_v21 = vld [vmem:[%s9333_s7 + $0x6d0] sm:$0xff] }
 0x184   :  { %4486 = vmatpush1.bf16.msra.mxu1 %v4485_v63  ;;  %v1388_v63 = vld [vmem:[%s9333_s7 + $0x458] sm:$0xff] }
 0x185   :  { %4450 = vmatpush1.bf16.msra.mxu0 %v4449_v39  ;;  %4488 = vmatprep.subr.bf16.mxu1 %v4487_v5  ;;  %v1356_v39 = vld [vmem:[%s9333_s7 + $0x358] sm:$0xff] }
 0x186   :  { %4452 = vmatprep.subr.bf16.mxu0 %v4451_v40  ;;  %v1360_v40 = vld [vmem:[%s9333_s7 + $0x378] sm:$0xff] }
 0x187   :  { %v4507_v42 = vpack.c.bf16 %v1360_v40, %v1356_v39  ;;  %v1392_v5 = vld [vmem:[%s9333_s7 + $0x478] sm:$0xff]  ;;  %v4539_v40 = vpack.c.bf16 %v1424_v38, %v1420_v37  ;;  %v1479_v37 = vld [vmem:[%s9333_s7 + $0x730] sm:$0xff] }
 0x188   :  { %v1432_v44 = vld [vmem:[%s9333_s7 + $0x5b8] sm:$0xff] }
 0x189   :  { %4454 = vmatpush1.bf16.msra.mxu0 %v4453_v49  ;;  %v1363_v49 = vld [vmem:[%s9333_s7 + $0x390] sm:$0xff]  ;;  %v4543_v46 = vpack.c.bf16 %v1432_v44, %v1428_v43  ;;  %v1444_v60 = vld [vmem:[%s9333_s7 + $0x618] sm:$0xff] }
 0x18a   :  { %v4513_v57 = vpack.c.bf16 %v1367_v51, %v1363_v49  ;;  %v1436_v49 = vld [vmem:[%s9333_s7 + $0x5d8] sm:$0xff] }
 0x18b   :  { %v1440_v51 = vld [vmem:[%s9333_s7 + $0x5f8] sm:$0xff] }
 0x18c   :  { %1663 = vmatmul.mubr.f32.vlgmr.msra.gmra.mrb[6].mxu0 %v6810_v23  ;;  %v1319_v23 = vld [vmem:[%s9333_s7 + $0x230] sm:$0xff]  ;;  %v4547_v54 = vpack.c.bf16 %v1440_v51, %v1436_v49  ;;  %v1448_v61 = vld [vmem:[%s9333_s7 + $0x638] sm:$0xff] }
 0x18d   :  { %1875 = vmatprep.mubr.f32.mxu0 %v5032_v62  ;;  %v4489_v12 = vpack.c.bf16 %v1319_v23, %v1315_v8  ;;  %v1380_v62 = vld [vmem:[%s9333_s7 + $0x418] sm:$0xff]  ;;  %v4521_v8 = vpack.c.bf16 %v1383_v55, %v1379_v4  ;;  %v4523_v23 = vpack.c.bf16 %v1392_v5, %v1388_v63  ;;  %v1483_v49 = vld [vmem:[%s9333_s7 + $0x750] sm:$0xff] }
 0x18e   :  { %v4519_v2 = vpack.c.bf16 %v1384_v0, %v1380_v62  ;;  %v4551_v0 = vpack.c.bf16 %v1448_v61, %v1444_v60  ;;  %v1452_v4 = vld [vmem:[%s9333_s7 + $0x658] sm:$0xff]  ;;  %v1487_v51 = vld [vmem:[%s9333_s7 + $0x770] sm:$0xff] }
 0x18f   :  { %4490 = vmatpush1.bf16.msra.mxu1 %v4489_v12  ;;  %v1396_v12 = vld [vmem:[%s9333_s7 + $0x498] sm:$0xff]  ;;  %v1491_v61 = vld [vmem:[%s9333_s7 + $0x790] sm:$0xff] }
 0x190   :  { %4492 = vmatprep.subr.bf16.mxu1 %v4491_v13  ;;  %v1400_v13 = vld [vmem:[%s9333_s7 + $0x4b8] sm:$0xff] }
 0x191   :  { %v4527_v28 = vpack.c.bf16 %v1400_v13, %v1396_v12  ;;  %v1456_v55 = vld [vmem:[%s9333_s7 + $0x678] sm:$0xff] }
 0x192   :  { %v4555_v5 = vpack.c.bf16 %v1456_v55, %v1452_v4  ;;  %v1460_v9 = vld [vmem:[%s9333_s7 + $0x698] sm:$0xff]  ;;  %v1499_v4 = vld [vmem:[%s9333_s7 + $0x7d0] sm:$0xff] }
 0x193   :  { %4494 = vmatpush1.bf16.msra.mxu1 %v4493_v18  ;;  %v1395_v18 = vld [vmem:[%s9333_s7 + $0x490] sm:$0xff]  ;;  %v1464_v11 = vld [vmem:[%s9333_s7 + $0x6b8] sm:$0xff] }
 0x194   :  { %4496 = vmatprep.subr.bf16.mxu1 %v4495_v19  ;;  %v1399_v19 = vld [vmem:[%s9333_s7 + $0x4b0] sm:$0xff]  ;;  %v4559_v13 = vpack.c.bf16 %v1464_v11, %v1460_v9 }
 0x195   :  { %v4529_v22 = vpack.c.bf16 %v1399_v19, %v1395_v18  ;;  %v943_v18 = vld [vmem:[%s9335_s6] sm:$0xf] }
 0x196   :  { %v948_v27 = vrot.slane %v943_v18, %v7074_v32 }
 0x197   :  { %4498 = vmatpush1.bf16.msra.mxu1 %v4497_v25  ;;  %v1403_v25 = vld [vmem:[%s9333_s7 + $0x4d0] sm:$0xff] }
 0x198   :  { %4500 = vmatprep.subr.bf16.mxu1 %v4499_v26  ;;  %v1407_v26 = vld [vmem:[%s9333_s7 + $0x4f0] sm:$0xff] }
 0x199   :  { %v4533_v30 = vpack.c.bf16 %v1407_v26, %v1403_v25  ;;  %v1480_v25 = vld [vmem:[%s9333_s7 + $0x738] sm:$0xff]  ;;  %v952_v26 = vrot.slane %v943_v18, %v7104_v50 }
 0x19b   :  { %4502 = vmatpush1.bf16.msra.mxu1 %v4501_v33  ;;  %v1411_v33 = vld [vmem:[%s9333_s7 + $0x510] sm:$0xff] }
 0x19c   :  { %4504 = vmatprep.subr.bf16.mxu1 %v4503_v34  ;;  %v1415_v34 = vld [vmem:[%s9333_s7 + $0x530] sm:$0xff] }
 0x19d   :  { %v4537_v39 = vpack.c.bf16 %v1415_v34, %v1411_v33  ;;  %v1475_v34 = vld [vmem:[%s9333_s7 + $0x710] sm:$0xff] }
 0x19f   :  { %4506 = vmatpush1.bf16.msra.mxu1 %v4505_v41  ;;  %v1419_v41 = vld [vmem:[%s9333_s7 + $0x550] sm:$0xff] }
 0x1a0   :  { %4508 = vmatprep.subr.bf16.mxu1 %v4507_v42  ;;  %v1423_v42 = vld [vmem:[%s9333_s7 + $0x570] sm:$0xff] }
 0x1a1   :  { %v4541_v45 = vpack.c.bf16 %v1423_v42, %v1419_v41  ;;  %v1488_v41 = vld [vmem:[%s9333_s7 + $0x778] sm:$0xff] }
 0x1a3   :  { %4510 = vmatpush1.bf16.msra.mxu1 %v4509_v47  ;;  %v1427_v47 = vld [vmem:[%s9333_s7 + $0x590] sm:$0xff] }
 0x1a4   :  { %4512 = vmatprep.subr.bf16.mxu1 %v4511_v48  ;;  %v1431_v48 = vld [vmem:[%s9333_s7 + $0x5b0] sm:$0xff] }
 0x1a5   :  { %v4545_v52 = vpack.c.bf16 %v1431_v48, %v1427_v47 }
 0x1a7   :  { %4514 = vmatpush1.bf16.msra.mxu1 %v4513_v57  ;;  %v1435_v57 = vld [vmem:[%s9333_s7 + $0x5d0] sm:$0xff] }
 0x1a8   :  { %4516 = vmatprep.subr.bf16.mxu1 %v4515_v58  ;;  %v1439_v58 = vld [vmem:[%s9333_s7 + $0x5f0] sm:$0xff] }
 0x1a9   :  { %v4549_v62 = vpack.c.bf16 %v1439_v58, %v1435_v57  ;;  %v4573_v58 = vpack.c.bf16 %v1487_v51, %v1483_v49  ;;  %v2161_v51 = vld [vmem:[%s9337_s9 + $0x80] sm:$0xff] }
 0x1ab   :  { %4518 = vmatpush1.bf16.msra.mxu1 %v4517_v1  ;;  %v1443_v1 = vld [vmem:[%s9333_s7 + $0x610] sm:$0xff] }
 0x1ac   :  { %4520 = vmatprep.subr.bf16.mxu1 %v4519_v2  ;;  %v1447_v2 = vld [vmem:[%s9333_s7 + $0x630] sm:$0xff] }
 0x1ad   :  { %v4553_v63 = vpack.c.bf16 %v1447_v2, %v1443_v1 }
 0x1ae   :  { %1734 = vmatmul.mubr.f32.vlgmr.msra.gmra.mrb[6].mxu1 %v5105_v15  ;;  %v1459_v15 = vld [vmem:[%s9333_s7 + $0x690] sm:$0xff] }
 0x1af   :  { %4522 = vmatpush1.bf16.msra.mxu1 %v4521_v8  ;;  %1804 = vmatprep.mubr.f32.mxu1 %v5106_v14  ;;  %v1451_v8 = vld [vmem:[%s9333_s7 + $0x650] sm:$0xff]  ;;  %v1468_v14 = vld [vmem:[%s9333_s7 + $0x6d8] sm:$0xff] }
 0x1b0   :  { %4524 = vmatprep.subr.bf16.mxu1 %v4523_v23  ;;  %v1455_v23 = vld [vmem:[%s9333_s7 + $0x670] sm:$0xff] }
 0x1b1   :  { %v4557_v12 = vpack.c.bf16 %v1455_v23, %v1451_v8 }
 0x1b3   :  { %4526 = vmatpush1.bf16.msra.mxu1 %v4525_v16  ;;  %v1463_v16 = vld [vmem:[%s9333_s7 + $0x6b0] sm:$0xff] }
 0x1b4   :  { %4528 = vmatprep.subr.bf16.mxu1 %v4527_v28  ;;  %v1472_v28 = vld [vmem:[%s9333_s7 + $0x6f8] sm:$0xff]  ;;  %v4561_v19 = vpack.c.bf16 %v1463_v16, %v1459_v15 }
 0x1b5   :  { %v4563_v20 = vpack.c.bf16 %v1472_v28, %v1468_v14 }
 0x1b7   :  { %4530 = vmatpush1.bf16.msra.mxu1 %v4529_v22  ;;  %v1471_v22 = vld [vmem:[%s9333_s7 + $0x6f0] sm:$0xff] }
 0x1b8   :  { %4532 = vmatprep.subr.bf16.mxu1 %v4531_v24  ;;  %v1476_v24 = vld [vmem:[%s9333_s7 + $0x718] sm:$0xff]  ;;  %v4565_v29 = vpack.c.bf16 %v1471_v22, %v1467_v21 }
 0x1b9   :  { %v4567_v33 = vpack.c.bf16 %v1480_v25, %v1476_v24 }
 0x1bb   :  { %4534 = vmatpush1.bf16.msra.mxu1 %v4533_v30 }
 0x1bc   :  { %4536 = vmatprep.subr.bf16.mxu1 %v4535_v31  ;;  %v960_v31 = vrot.slane %v943_v18, %v7081_v36 }
 0x1bf   :  { %4538 = vmatpush1.bf16.msra.mxu1 %v4537_v39 }
 0x1c0   :  { %4540 = vmatprep.subr.bf16.mxu1 %v4539_v40  ;;  %v1484_v40 = vld [vmem:[%s9333_s7 + $0x758] sm:$0xff] }
 0x1c1   :  { %v4571_v48 = vpack.c.bf16 %v1488_v41, %v1484_v40  ;;  %v2154_v41 = vld [vmem:[%s9337_s9 + $0x48] sm:$0xff] }
 0x1c3   :  { %4542 = vmatpush1.bf16.msra.mxu1 %v4541_v45  ;;  %v956_v45 = vrot.slane %v943_v18, %v7079_v35 }
 0x1c4   :  { %4544 = vmatprep.subr.bf16.mxu1 %v4543_v46  ;;  %v4569_v46 = vpack.c.bf16 %v1479_v37, %v1475_v34  ;;  %v2150_v34 = vld [vmem:[%s9337_s9 + $0x28] sm:$0xff] }
 0x1c7   :  { %4546 = vmatpush1.bf16.msra.mxu1 %v4545_v52  ;;  %v1492_v52 = vld [vmem:[%s9333_s7 + $0x798] sm:$0xff] }
 0x1c8   :  { %4548 = vmatprep.subr.bf16.mxu1 %v4547_v54  ;;  %v1496_v54 = vld [vmem:[%s9333_s7 + $0x7b8] sm:$0xff] }
 0x1c9   :  { %v4575_v60 = vpack.c.bf16 %v1496_v54, %v1492_v52  ;;  %v2165_v52 = vld [vmem:[%s9337_s9 + $0xa0] sm:$0xff] }
 0x1ca   :  { %v4593_v54 = vpack.c.bf16 %v2165_v52, %v2161_v51  ;;  %v2233_v51 = vld [vmem:[%s9337_s9 + $0x2c0] sm:$0xff] }
 0x1cb   :  { %4550 = vmatpush1.bf16.msra.mxu1 %v4549_v62  ;;  %v1495_v62 = vld [vmem:[%s9333_s7 + $0x7b0] sm:$0xff]  ;;  %v2237_v52 = vld [vmem:[%s9337_s9 + $0x2e0] sm:$0xff] }
 0x1cc   :  { %4552 = vmatprep.subr.bf16.mxu1 %v4551_v0  ;;  %v1500_v0 = vld [vmem:[%s9333_s7 + $0x7d8] sm:$0xff]  ;;  %v4577_v1 = vpack.c.bf16 %v1495_v62, %v1491_v61  ;;  %v2169_v61 = vld [vmem:[%s9337_s9 + $0xc0] sm:$0xff] }
 0x1cd   :  { %v2173_v62 = vld [vmem:[%s9337_s9 + $0xe0] sm:$0xff] }
 0x1cf   :  { %4554 = vmatpush1.bf16.msra.mxu1 %v4553_v63  ;;  %v7647_v63 = vld [vmem:[%s9336_s8] sm:$0xf] }
 0x1d0   :  { %4556 = vmatprep.subr.bf16.mxu1 %v4555_v5 }
 0x1d3   :  { %4558 = vmatpush1.bf16.msra.mxu1 %v4557_v12 }
 0x1d4   :  { %4560 = vmatprep.subr.bf16.mxu1 %v4559_v13 }
 0x1d7   :  { %4562 = vmatpush1.bf16.msra.mxu1 %v4561_v19 }
 0x1d8   :  { %4564 = vmatprep.subr.bf16.mxu1 %v4563_v20 }
 0x1db   :  { %4566 = vmatpush1.bf16.msra.mxu1 %v4565_v29 }
 0x1dc   :  { %4568 = vmatprep.subr.bf16.mxu1 %v4567_v33  ;;  %v2146_v33 = vld [vmem:[%s9337_s9 + $0x8] sm:$0xff] }
 0x1dd   :  { %v4583_v37 = vpack.c.bf16 %v2150_v34, %v2146_v33  ;;  %v2222_v33 = vld [vmem:[%s9337_s9 + $0x268] sm:$0xff] }
 0x1df   :  { %v1102_v30 = vpop.f32.mrb[4].mxu0  ;;  %4570 = vmatpush1.bf16.msra.mxu1 %v4569_v46 }
 0x1e0   :  { %v1244_v38 = vpop.f32.mrb[4].mxu1  ;;  %v1104_v39 = vpop.f32.mrb[5].mxu0  ;;  %v5039_v44 = vadd.f32 %v1102_v30, %v948_v27  ;;  %4572 = vmatprep.subr.bf16.mxu1 %v4571_v48  ;;  %v1522_v27 = vrot.slane %v7647_v63, %v7081_v36  ;;  %v2166_v48 = vld [vmem:[%s9337_s9 + $0xa8] sm:$0xff] }
 0x1e1   :  { %v5040_v42 = vadd.f32 %v1104_v39, %v952_v26  ;;  %v1246_v43 = vpop.f32.mrb[5].mxu1  ;;  %v5041_v57 = vadd.f32 %v1244_v38, %v956_v45  ;;  %v2145_v38 = vld [vmem:[%s9337_s9] sm:$0xff] }
 0x1e2   :  { %v5042_v47 = vadd.f32 %v1246_v43, %v960_v31  ;;  %v5116_v31 = vmov 0.0   ;;  %v2149_v39 = vld [vmem:[%s9337_s9 + $0x20] sm:$0xff] }
 0x1e3   :  { %1811 = vmatprep.subr.mxu0 %v5040_v42  ;;  %4574 = vmatpush1.bf16.msra.mxu1 %v4573_v58  ;;  %v4585_v40 = vpack.c.bf16 %v2149_v39, %v2145_v38  ;;  %v2158_v42 = vld [vmem:[%s9337_s9 + $0x68] sm:$0xff]  ;;  %v2157_v45 = vld [vmem:[%s9337_s9 + $0x60] sm:$0xff] }
 0x1e4   :  { %1812 = vmatpush1.xpose.msra.mxu0 %v5039_v44  ;;  %4576 = vmatprep.subr.bf16.mxu1 %v4575_v60  ;;  %v4587_v43 = vpack.c.bf16 %v2158_v42, %v2154_v41  ;;  %v2153_v44 = vld [vmem:[%s9337_s9 + $0x40] sm:$0xff]  ;;  %v2174_v58 = vld [vmem:[%s9337_s9 + $0xe8] sm:$0xff] }
 0x1e5   :  { %1886 = vmatprep.subr.mxu0 %v5042_v47  ;;  %v4589_v46 = vpack.c.bf16 %v2157_v45, %v2153_v44  ;;  %v2162_v47 = vld [vmem:[%s9337_s9 + $0x88] sm:$0xff]  ;;  %v2217_v38 = vld [vmem:[%s9337_s9 + $0x240] sm:$0xff] }
 0x1e6   :  { %v4591_v49 = vpack.c.bf16 %v2166_v48, %v2162_v47  ;;  %v2221_v39 = vld [vmem:[%s9337_s9 + $0x260] sm:$0xff]  ;;  %v2230_v41 = vld [vmem:[%s9337_s9 + $0x2a8] sm:$0xff] }
 0x1e7   :  { %1876 = vmatmul.mubr.f32.vlgmr.msra.gmra.mrb[8].mxu0 %v7112_v53  ;;  %v1504_v53 = vld [vmem:[%s9333_s7 + $0x7f8] sm:$0xff]  ;;  %4578 = vmatpush1.bf16.msra.mxu1 %v4577_v1  ;;  %v4597_v1 = vpack.c.bf16 %v2173_v62, %v2169_v61  ;;  %v4621_v42 = vpack.c.bf16 %v2221_v39, %v2217_v38  ;;  %v2225_v44 = vld [vmem:[%s9337_s9 + $0x280] sm:$0xff]  ;;  %v2238_v47 = vld [vmem:[%s9337_s9 + $0x2e8] sm:$0xff] }
 0x1e8   :  { %1880 = vmatprep.mubr.f32.mxu0 %v7140_v7  ;;  %1887 = vmatpush1.xpose.msra.mxu0 %v5041_v57  ;;  %v4579_v2 = vpack.c.bf16 %v1504_v53, %v1500_v0  ;;  %v1503_v7 = vld [vmem:[%s9333_s7 + $0x7f0] sm:$0xff]  ;;  %v2170_v57 = vld [vmem:[%s9337_s9 + $0xc8] sm:$0xff]  ;;  %v2229_v45 = vld [vmem:[%s9337_s9 + $0x2a0] sm:$0xff] }
 0x1e9   :  { %v4581_v55 = vpack.c.bf16 %v1503_v7, %v1499_v4  ;;  %4584 = vmatprep.subr.bf16.mxu0 %v4583_v37  ;;  %v4595_v60 = vpack.c.bf16 %v2174_v58, %v2170_v57  ;;  %v2178_v0 = vld [vmem:[%s9337_s9 + $0x108] sm:$0xff]  ;;  %v2177_v4 = vld [vmem:[%s9337_s9 + $0x100] sm:$0xff]  ;;  %v4625_v48 = vpack.c.bf16 %v2229_v45, %v2225_v44  ;;  %v4629_v58 = vpack.c.bf16 %v2237_v52, %v2233_v51  ;;  %v2164_v38 = vld [vmem:[%s9337_s9 + $0x98] sm:$0xff] }
 0x1ea   :  { %4580 = vmatprep.subr.bf16.mxu1 %v4579_v2  ;;  %v2182_v53 = vld [vmem:[%s9337_s9 + $0x128] sm:$0xff]  ;;  %v2181_v7 = vld [vmem:[%s9337_s9 + $0x120] sm:$0xff]  ;;  %v2168_v39 = vld [vmem:[%s9337_s9 + $0xb8] sm:$0xff] }
 0x1eb   :  { %1881 = vmatmul.mubr.f32.gmra.mrb[10].mxu0 %v7135_v3  ;;  %4582 = vmatpush1.bf16.msra.mxu1 %v4581_v55  ;;  %v5107_v3 = vld [vmem:[%s9359_s26 + $0x10] sm:$0xff]  ;;  %v4599_v2 = vpack.c.bf16 %v2182_v53, %v2178_v0  ;;  %v2186_v55 = vld [vmem:[%s9337_s9 + $0x148] sm:$0xff]  ;;  %v2241_v61 = vld [vmem:[%s9337_s9 + $0x300] sm:$0xff] }
 0x1ec   :  { %1950 = vmatprep.mubr.f32.mxu0 %v7118_v59  ;;  %v1510_v59 = vrot.slane %v7647_v63, %v7074_v32  ;;  %v2246_v57 = vld [vmem:[%s9337_s9 + $0x328] sm:$0xff]  ;;  %v2245_v62 = vld [vmem:[%s9337_s9 + $0x320] sm:$0xff]  ;;  %v2172_v44 = vld [vmem:[%s9337_s9 + $0xd8] sm:$0xff] }
 0x1ed   :  { %v2250_v0 = vld [vmem:[%s9337_s9 + $0x348] sm:$0xff]  ;;  %v2176_v45 = vld [vmem:[%s9337_s9 + $0xf8] sm:$0xff] }
 0x1ee   :  { %1805 = vmatmul.mubr.f32.vlgmr.msra.gmra.mrb[6].mxu1 %v5107_v3  ;;  %v2190_v3 = vld [vmem:[%s9337_s9 + $0x168] sm:$0xff]  ;;  %v2180_v51 = vld [vmem:[%s9337_s9 + $0x118] sm:$0xff] }
 0x1ef   :  { %1951 = vmatmul.mubr.f32.vlgmr.msra.gmra.mrb[8].mxu0 %v7116_v56  ;;  %v1514_v56 = vrot.slane %v7647_v63, %v7104_v50  ;;  %2055 = vmatprep.mubr.f32.mxu1 %v5116_v31  ;;  %v2254_v53 = vld [vmem:[%s9337_s9 + $0x368] sm:$0xff]  ;;  %v2184_v52 = vld [vmem:[%s9337_s9 + $0x138] sm:$0xff] }
 0x1f0   :  { %1955 = vmatprep.mubr.f32.mxu0 %v7142_v10  ;;  %4586 = vmatpush1.bf16.msra.mxu0 %v4585_v40  ;;  %v2226_v40 = vld [vmem:[%s9337_s9 + $0x288] sm:$0xff] }
 0x1f1   :  { %4588 = vmatprep.subr.bf16.mxu0 %v4587_v43  ;;  %v4623_v43 = vpack.c.bf16 %v2230_v41, %v2226_v40  ;;  %v4719_v41 = vpack.c.bf16 %v2168_v39, %v2164_v38  ;;  %v2235_v38 = vld [vmem:[%s9337_s9 + $0x2d0] sm:$0xff] }
 0x1f2   :  { %v2239_v39 = vld [vmem:[%s9337_s9 + $0x2f0] sm:$0xff] }
 0x1f3   :  { %1956 = vmatmul.mubr.f32.gmra.mrb[10].mxu0 %v7137_v6 }
 0x1f4   :  { %4590 = vmatpush1.bf16.msra.mxu0 %v4589_v46  ;;  %v2234_v46 = vld [vmem:[%s9337_s9 + $0x2c8] sm:$0xff] }
 0x1f5   :  { %4592 = vmatprep.subr.bf16.mxu0 %v4591_v49  ;;  %v4627_v49 = vpack.c.bf16 %v2238_v47, %v2234_v46  ;;  %v4723_v47 = vpack.c.bf16 %v2176_v45, %v2172_v44  ;;  %v2243_v44 = vld [vmem:[%s9337_s9 + $0x310] sm:$0xff] }
 0x1f6   :  { %v2247_v45 = vld [vmem:[%s9337_s9 + $0x330] sm:$0xff] }
 0x1f8   :  { %4594 = vmatpush1.bf16.msra.mxu0 %v4593_v54  ;;  %v2242_v54 = vld [vmem:[%s9337_s9 + $0x308] sm:$0xff] }
 0x1f9   :  { %4596 = vmatprep.subr.bf16.mxu0 %v4595_v60  ;;  %v4631_v60 = vpack.c.bf16 %v2246_v57, %v2242_v54  ;;  %v4727_v57 = vpack.c.bf16 %v2184_v52, %v2180_v51  ;;  %v2251_v51 = vld [vmem:[%s9337_s9 + $0x350] sm:$0xff] }
 0x1fa   :  { %v2255_v52 = vld [vmem:[%s9337_s9 + $0x370] sm:$0xff] }
 0x1fc   :  { %4598 = vmatpush1.bf16.msra.mxu0 %v4597_v1  ;;  %v4633_v1 = vpack.c.bf16 %v2245_v62, %v2241_v61  ;;  %v2188_v61 = vld [vmem:[%s9337_s9 + $0x158] sm:$0xff] }
 0x1fd   :  { %4600 = vmatprep.subr.bf16.mxu0 %v4599_v2  ;;  %v4635_v2 = vpack.c.bf16 %v2254_v53, %v2250_v0  ;;  %v2192_v62 = vld [vmem:[%s9337_s9 + $0x178] sm:$0xff] }
 0x1fe   :  { %v4731_v53 = vpack.c.bf16 %v2192_v62, %v2188_v61  ;;  %v2259_v61 = vld [vmem:[%s9337_s9 + $0x390] sm:$0xff] }
 0x1ff   :  { %v2263_v62 = vld [vmem:[%s9337_s9 + $0x3b0] sm:$0xff] }
 0x25f   :  { %v1664_v10 = vpop.f32.mrb[6].mxu0 }
 0x260   :  { %v5043_v5 = vadd.f32 %v1664_v10, %v1510_v59  ;;  %v1666_v8 = vpop.f32.mrb[7].mxu0  ;;  %v4601_v59 = vpack.c.bf16 %v2181_v7, %v2177_v4  ;;  %v2185_v10 = vld [vmem:[%s9337_s9 + $0x140] sm:$0xff] }
 0x261   :  { %v5044_v6 = vadd.f32 %v1666_v8, %v1514_v56  ;;  %v4603_v56 = vpack.c.bf16 %v2190_v3, %v2186_v55  ;;  %v2194_v8 = vld [vmem:[%s9337_s9 + $0x188] sm:$0xff]  ;;  %v2249_v4 = vld [vmem:[%s9337_s9 + $0x340] sm:$0xff] }
 0x262   :  { %4602 = vmatpush1.bf16.msra.mxu0 %v4601_v59  ;;  %v2253_v7 = vld [vmem:[%s9337_s9 + $0x360] sm:$0xff]  ;;  %v2258_v55 = vld [vmem:[%s9337_s9 + $0x388] sm:$0xff] }
 0x263   :  { %1991 = vmatprep.subr.mxu1 %v5044_v6  ;;  %v2198_v6 = vld [vmem:[%s9337_s9 + $0x1a8] sm:$0xff]  ;;  %4604 = vmatprep.subr.bf16.mxu0 %v4603_v56  ;;  %v4637_v59 = vpack.c.bf16 %v2253_v7, %v2249_v4  ;;  %v2196_v4 = vld [vmem:[%s9337_s9 + $0x198] sm:$0xff] }
 0x264   :  { %1992 = vmatpush1.msra.mxu1 %v5043_v5  ;;  %v2189_v5 = vld [vmem:[%s9337_s9 + $0x160] sm:$0xff]  ;;  %v2262_v3 = vld [vmem:[%s9337_s9 + $0x3a8] sm:$0xff]  ;;  %v2200_v7 = vld [vmem:[%s9337_s9 + $0x1b8] sm:$0xff] }
 0x265   :  { %v4639_v56 = vpack.c.bf16 %v2262_v3, %v2258_v55  ;;  %v4735_v3 = vpack.c.bf16 %v2200_v7, %v2196_v4  ;;  %v2267_v4 = vld [vmem:[%s9337_s9 + $0x3d0] sm:$0xff] }
 0x266   :  { %v2271_v7 = vld [vmem:[%s9337_s9 + $0x3f0] sm:$0xff] }
 0x2c1   :  { %v7663_v26 = vpop.f32.mrb[6].mxu1 }
 0x2c2   :  { %v1952_v23 = vpop.f32.mrb[8].mxu0  ;;  %v1808_v29 = vpop.f32.mrb[7].mxu1 }
 0x2c3   :  { %v1954_v9 = vpop.f32.mrb[9].mxu0  ;;  %v1962_v11 = vsel %vm1961_vm0, %v1952_v23, -inf  ;;  %v5046_v30 = vadd.f32 %v1808_v29, %v1522_v27  ;;  %v2209_v27 = vld [vmem:[%s9337_s9 + $0x200] sm:$0xff] }
 0x2c4   :  { %1963 = vmax.xlane.f32.xlu0 %v1962_v11  ;;  %v4607_v9 = vpack.c.bf16 %v2198_v6, %v2194_v8  ;;  %v2193_v11 = vld [vmem:[%s9337_s9 + $0x180] sm:$0xff]  ;;  %v2266_v8 = vld [vmem:[%s9337_s9 + $0x3c8] sm:$0xff] }
 0x2c5   :  { %2068 = vmatprep.subr.mxu1 %v5046_v30  ;;  %v2213_v29 = vld [vmem:[%s9337_s9 + $0x220] sm:$0xff]  ;;  %v2218_v30 = vld [vmem:[%s9337_s9 + $0x248] sm:$0xff] }
 0x2c6   :  { %v1957_v12 = vpop.f32.mrb[10].mxu0  ;;  %v4617_v34 = vpack.c.bf16 %v2213_v29, %v2209_v27  ;;  %v4619_v37 = vpack.c.bf16 %v2222_v33, %v2218_v30  ;;  %v2270_v6 = vld [vmem:[%s9337_s9 + $0x3e8] sm:$0xff]  ;;  %v2147_v29 = vld [vmem:[%s9337_s9 + $0x10] sm:$0xff]  ;;  %v2160_v30 = vld [vmem:[%s9337_s9 + $0x78] sm:$0xff] }
 0x2c7   :  { %v1959_v13 = vpop.f32.mrb[11].mxu0  ;;  %v1966_v15 = vsel %vm1965_vm1, %v1957_v12, -inf }
 0x2c8   :  { %1967 = vmax.xlane.f32.xlu0 %v1966_v15  ;;  %v2202_v13 = vld [vmem:[%s9337_s9 + $0x1c8] sm:$0xff] }
 0x2c9   :  { %v2206_v15 = vld [vmem:[%s9337_s9 + $0x1e8] sm:$0xff] }
 0x351   :  { %v1964_v16 = vpop.xlane.xlu0 %1963 }
 0x352   :  { %v1969_v14 = vsub.f32 %v1952_v23, %v1964_v16  ;;  %v4605_v23 = vpack.c.bf16 %v2189_v5, %v2185_v10  ;;  %v2257_v10 = vld [vmem:[%s9337_s9 + $0x380] sm:$0xff] }
 0x353   :  { %v2261_v5 = vld [vmem:[%s9337_s9 + $0x3a0] sm:$0xff] }
 0x354   :  { %v1971_v28 = vmul.f32 1.442695, %v1969_v14  ;;  %4606 = vmatpush1.bf16.msra.mxu0 %v4605_v23  ;;  %v4611_v14 = vpack.c.bf16 %v2206_v15, %v2202_v13  ;;  %v4641_v23 = vpack.c.bf16 %v2261_v5, %v2257_v10  ;;  %v2204_v10 = vld [vmem:[%s9337_s9 + $0x1d8] sm:$0xff] }
 0x355   :  { %v1968_v18 = vpop.xlane.xlu0 %1967  ;;  %4608 = vmatprep.subr.bf16.mxu0 %v4607_v9  ;;  %v4643_v9 = vpack.c.bf16 %v2270_v6, %v2266_v8  ;;  %v2208_v5 = vld [vmem:[%s9337_s9 + $0x1f8] sm:$0xff] }
 0x356   :  { %5084 = vpow2.f32 %v1971_v28  ;;  %v1970_v19 = vsub.f32 %v1957_v12, %v1968_v18  ;;  %v2197_v12 = vld [vmem:[%s9337_s9 + $0x1a0] sm:$0xff]  ;;  %v4739_v6 = vpack.c.bf16 %v2208_v5, %v2204_v10  ;;  %v2280_v5 = vld [vmem:[%s9337_s9 + $0x438] sm:$0xff] }
 0x357   :  { %v4609_v16 = vpack.c.bf16 %v2197_v12, %v2193_v11  ;;  %v2201_v28 = vld [vmem:[%s9337_s9 + $0x1c0] sm:$0xff] }
 0x358   :  { %v1973_v20 = vmul.f32 1.442695, %v1970_v19  ;;  %v2205_v18 = vld [vmem:[%s9337_s9 + $0x1e0] sm:$0xff]  ;;  %v2210_v19 = vld [vmem:[%s9337_s9 + $0x208] sm:$0xff] }
 0x359   :  { %4610 = vmatpush1.bf16.msra.mxu0 %v4609_v16  ;;  %v2265_v11 = vld [vmem:[%s9337_s9 + $0x3c0] sm:$0xff] }
 0x35a   :  { %5086 = vpow2.f32 %v1973_v20  ;;  %v2214_v20 = vld [vmem:[%s9337_s9 + $0x228] sm:$0xff]  ;;  %4612 = vmatprep.subr.bf16.mxu0 %v4611_v14  ;;  %v2269_v12 = vld [vmem:[%s9337_s9 + $0x3e0] sm:$0xff]  ;;  %v1518_v14 = vrot.slane %v7647_v63, %v7079_v35 }
 0x35b   :  { %v4645_v13 = vpack.c.bf16 %v2269_v12, %v2265_v11  ;;  %v2212_v11 = vld [vmem:[%s9337_s9 + $0x218] sm:$0xff] }
 0x35c   :  { %v2216_v12 = vld [vmem:[%s9337_s9 + $0x238] sm:$0xff] }
 0x360   :  { %v7655_v21 = vpop.eup %5084 }
 0x361   :  { %v1975_v22 = vsel %vm1961_vm0, %v7655_v21, 0.0 }
 0x362   :  { %1976 = vadd.xlane.f32.xlu1 %v1975_v22  ;;  %v4613_v22 = vpack.c.bf16 %v2205_v18, %v2201_v28  ;;  %v2148_v28 = vld [vmem:[%s9337_s9 + $0x18] sm:$0xff] }
 0x363   :  { %v2152_v18 = vld [vmem:[%s9337_s9 + $0x38] sm:$0xff] }
 0x364   :  { %v7659_v24 = vpop.eup %5086  ;;  %4614 = vmatpush1.bf16.msra.mxu0 %v4613_v22  ;;  %v4711_v22 = vpack.c.bf16 %v2152_v18, %v2148_v28  ;;  %v2220_v28 = vld [vmem:[%s9337_s9 + $0x258] sm:$0xff] }
 0x365   :  { %v1978_v25 = vsel %vm1965_vm1, %v7659_v24, 0.0  ;;  %v2224_v18 = vld [vmem:[%s9337_s9 + $0x278] sm:$0xff] }
 0x366   :  { %1979 = vadd.xlane.f32.xlu1 %v1978_v25  ;;  %v4615_v25 = vpack.c.bf16 %v2214_v20, %v2210_v19 }
 0x368   :  { %4616 = vmatprep.subr.bf16.mxu0 %v4615_v25  ;;  %v5045_v25 = vadd.f32 %v7663_v26, %v1518_v14  ;;  %v2156_v26 = vld [vmem:[%s9337_s9 + $0x58] sm:$0xff]  ;;  %v2215_v14 = vld [vmem:[%s9337_s9 + $0x230] sm:$0xff] }
 0x369   :  { %4618 = vmatpush1.bf16.msra.mxu0 %v4617_v34  ;;  %v4715_v33 = vpack.c.bf16 %v2160_v30, %v2156_v26  ;;  %v2155_v34 = vld [vmem:[%s9337_s9 + $0x50] sm:$0xff] }
 0x36a   :  { %4620 = vmatprep.subr.bf16.mxu0 %v4619_v37  ;;  %v2159_v37 = vld [vmem:[%s9337_s9 + $0x70] sm:$0xff] }
 0x36b   :  { %v4717_v40 = vpack.c.bf16 %v2159_v37, %v2155_v34  ;;  %v2227_v26 = vld [vmem:[%s9337_s9 + $0x290] sm:$0xff] }
 0x36c   :  { %v2231_v30 = vld [vmem:[%s9337_s9 + $0x2b0] sm:$0xff] }
 0x36d   :  { %4622 = vmatpush1.bf16.msra.mxu0 %v4621_v42  ;;  %v2163_v42 = vld [vmem:[%s9337_s9 + $0x90] sm:$0xff]  ;;  %v4753_v34 = vpack.c.bf16 %v2231_v30, %v2227_v26  ;;  %v2294_v26 = vld [vmem:[%s9337_s9 + $0x4a8] sm:$0xff]  ;;  %v2292_v30 = vld [vmem:[%s9337_s9 + $0x498] sm:$0xff] }
 0x36e   :  { %4624 = vmatprep.subr.bf16.mxu0 %v4623_v43  ;;  %v2167_v43 = vld [vmem:[%s9337_s9 + $0xb0] sm:$0xff] }
 0x36f   :  { %v4721_v46 = vpack.c.bf16 %v2167_v43, %v2163_v42  ;;  %v4757_v42 = vpack.c.bf16 %v2239_v39, %v2235_v38  ;;  %v2289_v38 = vld [vmem:[%s9337_s9 + $0x480] sm:$0xff] }
 0x370   :  { %v2293_v39 = vld [vmem:[%s9337_s9 + $0x4a0] sm:$0xff] }
 0x371   :  { %4626 = vmatpush1.bf16.msra.mxu0 %v4625_v48  ;;  %v2171_v48 = vld [vmem:[%s9337_s9 + $0xd0] sm:$0xff] }
 0x372   :  { %4628 = vmatprep.subr.bf16.mxu0 %v4627_v49  ;;  %v2175_v49 = vld [vmem:[%s9337_s9 + $0xf0] sm:$0xff] }
 0x373   :  { %v4725_v54 = vpack.c.bf16 %v2175_v49, %v2171_v48  ;;  %v4761_v48 = vpack.c.bf16 %v2247_v45, %v2243_v44  ;;  %v2295_v44 = vld [vmem:[%s9337_s9 + $0x4b0] sm:$0xff]  ;;  %v2298_v45 = vld [vmem:[%s9337_s9 + $0x4c8] sm:$0xff] }
 0x375   :  { %4630 = vmatpush1.bf16.msra.mxu0 %v4629_v58  ;;  %v2179_v58 = vld [vmem:[%s9337_s9 + $0x110] sm:$0xff] }
 0x376   :  { %4632 = vmatprep.subr.bf16.mxu0 %v4631_v60  ;;  %v2183_v60 = vld [vmem:[%s9337_s9 + $0x130] sm:$0xff] }
 0x377   :  { %v4729_v0 = vpack.c.bf16 %v2183_v60, %v2179_v58  ;;  %v4765_v58 = vpack.c.bf16 %v2255_v52, %v2251_v51  ;;  %v4657_v51 = vpack.c.bf16 %v2293_v39, %v2289_v38  ;;  %v2327_v38 = vld [vmem:[%s9337_s9 + $0x5b0] sm:$0xff]  ;;  %v2330_v39 = vld [vmem:[%s9337_s9 + $0x5c8] sm:$0xff] }
 0x379   :  { %4634 = vmatpush1.bf16.msra.mxu0 %v4633_v1  ;;  %v2187_v1 = vld [vmem:[%s9337_s9 + $0x150] sm:$0xff] }
 0x37a   :  { %4636 = vmatprep.subr.bf16.mxu0 %v4635_v2  ;;  %v2191_v2 = vld [vmem:[%s9337_s9 + $0x170] sm:$0xff] }
 0x37b   :  { %v4733_v55 = vpack.c.bf16 %v2191_v2, %v2187_v1  ;;  %v4769_v1 = vpack.c.bf16 %v2263_v62, %v2259_v61  ;;  %v2299_v62 = vld [vmem:[%s9337_s9 + $0x4d0] sm:$0xff] }
 0x37d   :  { %4638 = vmatpush1.bf16.msra.mxu0 %v4637_v59  ;;  %v2195_v59 = vld [vmem:[%s9337_s9 + $0x190] sm:$0xff] }
 0x37e   :  { %4640 = vmatprep.subr.bf16.mxu0 %v4639_v56  ;;  %v2199_v56 = vld [vmem:[%s9337_s9 + $0x1b0] sm:$0xff] }
 0x37f   :  { %v4737_v8 = vpack.c.bf16 %v2199_v56, %v2195_v59  ;;  %v2278_v59 = vld [vmem:[%s9337_s9 + $0x428] sm:$0xff]  ;;  %v2276_v56 = vld [vmem:[%s9337_s9 + $0x418] sm:$0xff] }
 0x381   :  { %4642 = vmatpush1.bf16.msra.mxu0 %v4641_v23  ;;  %v2203_v23 = vld [vmem:[%s9337_s9 + $0x1d0] sm:$0xff] }
 0x382   :  { %4644 = vmatprep.subr.bf16.mxu0 %v4643_v9  ;;  %v2207_v9 = vld [vmem:[%s9337_s9 + $0x1f0] sm:$0xff] }
 0x385   :  { %4646 = vmatpush1.bf16.msra.mxu0 %v4645_v13  ;;  %v4741_v13 = vpack.c.bf16 %v2207_v9, %v2203_v23  ;;  %v2277_v23 = vld [vmem:[%s9337_s9 + $0x420] sm:$0xff]  ;;  %v2275_v9 = vld [vmem:[%s9337_s9 + $0x410] sm:$0xff] }
 0x3ef   :  { %v1977_v15 = vpop.xlane.xlu1 %1976 }
 0x3f0   :  { %5088 = vrcp.f32 %v1977_v15  ;;  %v4743_v15 = vpack.c.bf16 %v2216_v12, %v2212_v11  ;;  %v2279_v11 = vld [vmem:[%s9337_s9 + $0x430] sm:$0xff]  ;;  %v2282_v12 = vld [vmem:[%s9337_s9 + $0x448] sm:$0xff] }
 0x3f3   :  { %v1980_v16 = vpop.xlane.xlu1 %1979 }
 0x3f4   :  { %5090 = vrcp.f32 %v1980_v16  ;;  %v2211_v16 = vld [vmem:[%s9337_s9 + $0x210] sm:$0xff] }
 0x3fa   :  { %v5089_v19 = vpop.eup %5088 }
 0x3fb   :  { %v1983_v20 = vmul.f32 %v5089_v19, %v7655_v21  ;;  %v2151_v21 = vld [vmem:[%s9337_s9 + $0x30] sm:$0xff]  ;;  %v4745_v19 = vpack.c.bf16 %v2215_v14, %v2211_v16  ;;  %v2288_v16 = vld [vmem:[%s9337_s9 + $0x478] sm:$0xff] }
 0x3fd   :  { %3657 = vmatmul.mubr.msk.f32.vlgmr.msra.gmra.mrb[8].mxu1 %vm1961_vm0, %v1983_v20 }
 0x3fe   :  { %v5091_v27 = vpop.eup %5090  ;;  %2069 = vmatpush1.msra.mxu1 %v5045_v25  ;;  %2061 = vmatprep.mubr.f32.mxu1 %v5116_v31  ;;  %v2223_v25 = vld [vmem:[%s9337_s9 + $0x270] sm:$0xff] }
 0x3ff   :  { %v1984_v63 = vmul.f32 %v5091_v27, %v7659_v24  ;;  %4712 = vmatprep.subr.bf16.mxu1 %v4711_v22  ;;  %v4713_v24 = vpack.c.bf16 %v2151_v21, %v2147_v29  ;;  %v2219_v22 = vld [vmem:[%s9337_s9 + $0x250] sm:$0xff]  ;;  %v2228_v27 = vld [vmem:[%s9337_s9 + $0x298] sm:$0xff] }
 0x400   :  { %v4749_v29 = vpack.c.bf16 %v2223_v25, %v2219_v22 }
 0x401   :  { %3658 = vmatmul.mubr.msk.f32.gmra.mrb[10].mxu1 %vm1961_vm0, %v1984_v63 }
 0x402   :  { %2132 = vmatprep.mubr.f32.mxu1 %v5116_v31 }
 0x405   :  { %3659 = vmatmul.mubr.msk.f32.vlgmr.msra.gmra.mrb[12].mxu1 %vm1961_vm0, %v1983_v20  ;;  %v4747_v20 = vpack.c.bf16 %v2224_v18, %v2220_v28  ;;  %v4777_v18 = vpack.c.bf16 %v2279_v11, %v2275_v9  ;;  %v2314_v9 = vld [vmem:[%s9337_s9 + $0x548] sm:$0xff] }
 0x406   :  { %2138 = vmatprep.mubr.f32.mxu1 %v5116_v31  ;;  %4714 = vmatpush1.bf16.msra.mxu1 %v4713_v24  ;;  %v2236_v24 = vld [vmem:[%s9337_s9 + $0x2d8] sm:$0xff]  ;;  %v2318_v11 = vld [vmem:[%s9337_s9 + $0x568] sm:$0xff] }
 0x407   :  { %4716 = vmatprep.subr.bf16.mxu1 %v4715_v33  ;;  %v2240_v33 = vld [vmem:[%s9337_s9 + $0x2f8] sm:$0xff] }
 0x408   :  { %v4755_v37 = vpack.c.bf16 %v2240_v33, %v2236_v24  ;;  %v2296_v24 = vld [vmem:[%s9337_s9 + $0x4b8] sm:$0xff] }
 0x409   :  { %3660 = vmatmul.mubr.msk.f32.gmra.mrb[14].mxu1 %vm1961_vm0, %v1984_v63  ;;  %v2232_v63 = vld [vmem:[%s9337_s9 + $0x2b8] sm:$0xff] }
 0x40a   :  { %4718 = vmatpush1.bf16.msra.mxu1 %v4717_v40  ;;  %v4751_v21 = vpack.c.bf16 %v2232_v63, %v2228_v27  ;;  %v2244_v40 = vld [vmem:[%s9337_s9 + $0x318] sm:$0xff]  ;;  %v2283_v63 = vld [vmem:[%s9337_s9 + $0x450] sm:$0xff] }
 0x40b   :  { %4720 = vmatprep.subr.bf16.mxu1 %v4719_v41  ;;  %v2248_v41 = vld [vmem:[%s9337_s9 + $0x338] sm:$0xff] }
 0x40c   :  { %v4759_v43 = vpack.c.bf16 %v2248_v41, %v2244_v40 }
 0x40e   :  { %4722 = vmatpush1.bf16.msra.mxu1 %v4721_v46  ;;  %v2252_v46 = vld [vmem:[%s9337_s9 + $0x358] sm:$0xff] }
 0x40f   :  { %4724 = vmatprep.subr.bf16.mxu1 %v4723_v47  ;;  %v2256_v47 = vld [vmem:[%s9337_s9 + $0x378] sm:$0xff] }
 0x410   :  { %v4763_v49 = vpack.c.bf16 %v2256_v47, %v2252_v46  ;;  %v2302_v46 = vld [vmem:[%s9337_s9 + $0x4e8] sm:$0xff]  ;;  %v2300_v47 = vld [vmem:[%s9337_s9 + $0x4d8] sm:$0xff] }
 0x412   :  { %4726 = vmatpush1.bf16.msra.mxu1 %v4725_v54  ;;  %v2260_v54 = vld [vmem:[%s9337_s9 + $0x398] sm:$0xff] }
 0x413   :  { %4728 = vmatprep.subr.bf16.mxu1 %v4727_v57  ;;  %v2264_v57 = vld [vmem:[%s9337_s9 + $0x3b8] sm:$0xff] }
 0x414   :  { %v4767_v60 = vpack.c.bf16 %v2264_v57, %v2260_v54  ;;  %v2297_v54 = vld [vmem:[%s9337_s9 + $0x4c0] sm:$0xff] }
 0x415   :  { %v2301_v57 = vld [vmem:[%s9337_s9 + $0x4e0] sm:$0xff] }
 0x416   :  { %4730 = vmatpush1.bf16.msra.mxu1 %v4729_v0  ;;  %v2268_v0 = vld [vmem:[%s9337_s9 + $0x3d8] sm:$0xff] }
 0x417   :  { %4732 = vmatprep.subr.bf16.mxu1 %v4731_v53  ;;  %v2272_v53 = vld [vmem:[%s9337_s9 + $0x3f8] sm:$0xff] }
 0x418   :  { %v4771_v2 = vpack.c.bf16 %v2272_v53, %v2268_v0  ;;  %v2303_v0 = vld [vmem:[%s9337_s9 + $0x4f0] sm:$0xff]  ;;  %v2306_v53 = vld [vmem:[%s9337_s9 + $0x508] sm:$0xff] }
 0x41a   :  { %4734 = vmatpush1.bf16.msra.mxu1 %v4733_v55  ;;  %v4773_v55 = vpack.c.bf16 %v2271_v7, %v2267_v4  ;;  %v2312_v4 = vld [vmem:[%s9337_s9 + $0x538] sm:$0xff] }
 0x41b   :  { %4736 = vmatprep.subr.bf16.mxu1 %v4735_v3  ;;  %v2274_v3 = vld [vmem:[%s9337_s9 + $0x408] sm:$0xff] }
 0x41c   :  { %v4647_v10 = vpack.c.bf16 %v2278_v59, %v2274_v3  ;;  %v4789_v3 = vpack.c.bf16 %v2303_v0, %v2299_v62  ;;  %v2305_v59 = vld [vmem:[%s9337_s9 + $0x500] sm:$0xff] }
 0x41d   :  { %v2337_v0 = vld [vmem:[%s9337_s9 + $0x600] sm:$0xff] }
 0x41e   :  { %4738 = vmatpush1.bf16.msra.mxu1 %v4737_v8  ;;  %v4775_v8 = vpack.c.bf16 %v2280_v5, %v2276_v56  ;;  %4648 = vmatprep.subr.bf16.mxu0 %v4647_v10  ;;  %v2309_v56 = vld [vmem:[%s9337_s9 + $0x520] sm:$0xff] }
 0x41f   :  { %4740 = vmatprep.subr.bf16.mxu1 %v4739_v6  ;;  %v2273_v6 = vld [vmem:[%s9337_s9 + $0x400] sm:$0xff] }
 0x420   :  { %v4649_v28 = vpack.c.bf16 %v2277_v23, %v2273_v6  ;;  %v2307_v6 = vld [vmem:[%s9337_s9 + $0x510] sm:$0xff] }
 0x421   :  { %v2311_v23 = vld [vmem:[%s9337_s9 + $0x530] sm:$0xff] }
 0x422   :  { %4742 = vmatpush1.bf16.msra.mxu1 %v4741_v13  ;;  %v2286_v13 = vld [vmem:[%s9337_s9 + $0x468] sm:$0xff] }
 0x423   :  { %4744 = vmatprep.subr.bf16.mxu1 %v4743_v15  ;;  %v2284_v15 = vld [vmem:[%s9337_s9 + $0x458] sm:$0xff]  ;;  %v4651_v25 = vpack.c.bf16 %v2286_v13, %v2282_v12 }
 0x424   :  { %v4779_v27 = vpack.c.bf16 %v2288_v16, %v2284_v15  ;;  %v2316_v12 = vld [vmem:[%s9337_s9 + $0x558] sm:$0xff]  ;;  %v4665_v15 = vpack.c.bf16 %v2309_v56, %v2305_v59  ;;  %v4793_v16 = vpack.c.bf16 %v2311_v23, %v2307_v6  ;;  %v2350_v59 = vld [vmem:[%s9337_s9 + $0x668] sm:$0xff]  ;;  %v2345_v23 = vld [vmem:[%s9337_s9 + $0x640] sm:$0xff] }
 0x425   :  { %v2320_v13 = vld [vmem:[%s9337_s9 + $0x578] sm:$0xff] }
 0x426   :  { %4746 = vmatpush1.bf16.msra.mxu1 %v4745_v19  ;;  %v2281_v19 = vld [vmem:[%s9337_s9 + $0x440] sm:$0xff]  ;;  %v2348_v56 = vld [vmem:[%s9337_s9 + $0x658] sm:$0xff] }
 0x427   :  { %4748 = vmatprep.subr.bf16.mxu1 %v4747_v20  ;;  %v2285_v20 = vld [vmem:[%s9337_s9 + $0x460] sm:$0xff] }
 0x42a   :  { %4750 = vmatpush1.bf16.msra.mxu1 %v4749_v29  ;;  %v2287_v29 = vld [vmem:[%s9337_s9 + $0x470] sm:$0xff] }
 0x42b   :  { %4752 = vmatprep.subr.bf16.mxu1 %v4751_v21  ;;  %v2290_v21 = vld [vmem:[%s9337_s9 + $0x488] sm:$0xff] }
 0x42c   :  { %v4655_v41 = vpack.c.bf16 %v2294_v26, %v2290_v21 }
 0x42e   :  { %4754 = vmatpush1.bf16.msra.mxu1 %v4753_v34  ;;  %v4653_v34 = vpack.c.bf16 %v2285_v20, %v2281_v19  ;;  %v4795_v19 = vpack.c.bf16 %v2320_v13, %v2316_v12  ;;  %v2315_v20 = vld [vmem:[%s9337_s9 + $0x550] sm:$0xff] }
 0x42f   :  { %4756 = vmatprep.subr.bf16.mxu1 %v4755_v37  ;;  %v4781_v37 = vpack.c.bf16 %v2287_v29, %v2283_v63  ;;  %v2324_v63 = vld [vmem:[%s9337_s9 + $0x598] sm:$0xff]  ;;  %v2347_v13 = vld [vmem:[%s9337_s9 + $0x650] sm:$0xff] }
 0x430   :  { %v2328_v29 = vld [vmem:[%s9337_s9 + $0x5b8] sm:$0xff] }
 0x432   :  { %4758 = vmatpush1.bf16.msra.mxu1 %v4757_v42  ;;  %v4783_v42 = vpack.c.bf16 %v2296_v24, %v2292_v30  ;;  %v2321_v30 = vld [vmem:[%s9337_s9 + $0x580] sm:$0xff] }
 0x433   :  { %4760 = vmatprep.subr.bf16.mxu1 %v4759_v43  ;;  %v2291_v43 = vld [vmem:[%s9337_s9 + $0x490] sm:$0xff]  ;;  %v2325_v24 = vld [vmem:[%s9337_s9 + $0x5a0] sm:$0xff] }
 0x434   :  { %v4785_v52 = vpack.c.bf16 %v2295_v44, %v2291_v43  ;;  %v4673_v43 = vpack.c.bf16 %v2325_v24, %v2321_v30  ;;  %v2366_v30 = vld [vmem:[%s9337_s9 + $0x6e8] sm:$0xff]  ;;  %v2364_v24 = vld [vmem:[%s9337_s9 + $0x6d8] sm:$0xff] }
 0x436   :  { %4762 = vmatpush1.bf16.msra.mxu1 %v4761_v48  ;;  %v2304_v48 = vld [vmem:[%s9337_s9 + $0x4f8] sm:$0xff] }
 0x437   :  { %4764 = vmatprep.subr.bf16.mxu1 %v4763_v49  ;;  %v4787_v61 = vpack.c.bf16 %v2304_v48, %v2300_v47 }
 0x43a   :  { %4766 = vmatpush1.bf16.msra.mxu1 %v4765_v58 }
 0x43b   :  { %4768 = vmatprep.subr.bf16.mxu1 %v4767_v60  ;;  %v4659_v60 = vpack.c.bf16 %v2302_v46, %v2298_v45  ;;  %v2329_v45 = vld [vmem:[%s9337_s9 + $0x5c0] sm:$0xff] }
 0x43c   :  { %v2333_v46 = vld [vmem:[%s9337_s9 + $0x5e0] sm:$0xff] }
 0x43e   :  { %4770 = vmatpush1.bf16.msra.mxu1 %v4769_v1  ;;  %v2310_v1 = vld [vmem:[%s9337_s9 + $0x528] sm:$0xff] }
 0x43f   :  { %4772 = vmatprep.subr.bf16.mxu1 %v4771_v2  ;;  %v2308_v2 = vld [vmem:[%s9337_s9 + $0x518] sm:$0xff]  ;;  %v4663_v5 = vpack.c.bf16 %v2310_v1, %v2306_v53  ;;  %v2341_v53 = vld [vmem:[%s9337_s9 + $0x620] sm:$0xff] }
 0x442   :  { %4774 = vmatpush1.bf16.msra.mxu1 %v4773_v55  ;;  %v4661_v55 = vpack.c.bf16 %v2301_v57, %v2297_v54  ;;  %v2338_v54 = vld [vmem:[%s9337_s9 + $0x608] sm:$0xff] }
 0x443   :  { %4776 = vmatprep.subr.bf16.mxu1 %v4775_v8  ;;  %v4791_v8 = vpack.c.bf16 %v2312_v4, %v2308_v2  ;;  %v2342_v57 = vld [vmem:[%s9337_s9 + $0x628] sm:$0xff]  ;;  %v2339_v4 = vld [vmem:[%s9337_s9 + $0x610] sm:$0xff] }
 0x444   :  { %v4679_v1 = vpack.c.bf16 %v2342_v57, %v2338_v54  ;;  %v2373_v54 = vld [vmem:[%s9337_s9 + $0x720] sm:$0xff] }
 0x4d0   :  { %v2057_v14 = vpop.f32.mrb[8].mxu1 }
 0x4d1   :  { %v2059_v22 = vpop.f32.mrb[9].mxu1 }
 0x4d2   :  { %2487 = vmatprep.mubr.f32.mxu0 %v2059_v22  ;;  %2641 = vmatprep.mubr.f32.mxu1 %v2059_v22  ;;  %v2319_v22 = vld [vmem:[%s9337_s9 + $0x570] sm:$0xff] }
 0x4d3   :  { %2488 = vmatmul.mubr.f32.vlgmr.msra.gmra.mrb[12].mxu0 %v2057_v14  ;;  %2642 = vmatmul.mubr.f32.vlgmr.msra.gmra.mrb[16].mxu1 %v2057_v14  ;;  %v2313_v14 = vld [vmem:[%s9337_s9 + $0x540] sm:$0xff]  ;;  %v4797_v26 = vpack.c.bf16 %v2319_v22, %v2315_v20 }
 0x4d4   :  { %4650 = vmatpush1.bf16.msra.mxu0 %v4649_v28  ;;  %4778 = vmatpush1.bf16.msra.mxu1 %v4777_v18  ;;  %v2063_v33 = vpop.f32.mrb[10].mxu1  ;;  %v2317_v28 = vld [vmem:[%s9337_s9 + $0x560] sm:$0xff]  ;;  %v4667_v18 = vpack.c.bf16 %v2318_v11, %v2314_v9 }
 0x4d5   :  { %v2065_v40 = vpop.f32.mrb[11].mxu1  ;;  %4652 = vmatprep.subr.bf16.mxu0 %v4651_v25  ;;  %4780 = vmatprep.subr.bf16.mxu1 %v4779_v27  ;;  %v2322_v25 = vld [vmem:[%s9337_s9 + $0x588] sm:$0xff]  ;;  %v4669_v21 = vpack.c.bf16 %v2317_v28, %v2313_v14  ;;  %v2349_v9 = vld [vmem:[%s9337_s9 + $0x660] sm:$0xff]  ;;  %v2356_v28 = vld [vmem:[%s9337_s9 + $0x698] sm:$0xff] }
 0x4d6   :  { %2493 = vmatprep.mubr.f32.mxu0 %v2065_v40  ;;  %2647 = vmatprep.mubr.f32.mxu1 %v2065_v40  ;;  %v2326_v27 = vld [vmem:[%s9337_s9 + $0x5a8] sm:$0xff]  ;;  %v2353_v22 = vld [vmem:[%s9337_s9 + $0x680] sm:$0xff] }
 0x4d7   :  { %2494 = vmatmul.mubr.f32.gmra.mrb[14].mxu0 %v2063_v33  ;;  %2648 = vmatmul.mubr.f32.gmra.mrb[18].mxu1 %v2063_v33  ;;  %v4671_v33 = vpack.c.bf16 %v2326_v27, %v2322_v25  ;;  %v2334_v40 = vld [vmem:[%s9337_s9 + $0x5e8] sm:$0xff]  ;;  %v2357_v25 = vld [vmem:[%s9337_s9 + $0x6a0] sm:$0xff] }
 0x4d8   :  { %4654 = vmatpush1.bf16.msra.mxu0 %v4653_v34  ;;  %4782 = vmatpush1.bf16.msra.mxu1 %v4781_v37  ;;  %v8148_v49 = vpop.f32.mrb[12].mxu1  ;;  %v4799_v34 = vpack.c.bf16 %v2328_v29, %v2324_v63  ;;  %v2323_v37 = vld [vmem:[%s9337_s9 + $0x590] sm:$0xff]  ;;  %v4675_v47 = vpack.c.bf16 %v2334_v40, %v2330_v39  ;;  %v2358_v14 = vld [vmem:[%s9337_s9 + $0x6a8] sm:$0xff]  ;;  %v2365_v39 = vld [vmem:[%s9337_s9 + $0x6e0] sm:$0xff] }
 0x4d9   :  { %v2136_v58 = vpop.f32.mrb[13].mxu1  ;;  %4656 = vmatprep.subr.bf16.mxu0 %v4655_v41  ;;  %4784 = vmatprep.subr.bf16.mxu1 %v4783_v42  ;;  %v2332_v41 = vld [vmem:[%s9337_s9 + $0x5d8] sm:$0xff]  ;;  %v4801_v44 = vpack.c.bf16 %v2327_v38, %v2323_v37  ;;  %v2355_v29 = vld [vmem:[%s9337_s9 + $0x690] sm:$0xff]  ;;  %v2361_v38 = vld [vmem:[%s9337_s9 + $0x6c0] sm:$0xff] }
 0x4da   :  { %2564 = vmatprep.mubr.f32.mxu0 %v2136_v58  ;;  %2718 = vmatprep.mubr.f32.mxu1 %v2136_v58  ;;  %v2336_v42 = vld [vmem:[%s9337_s9 + $0x5f8] sm:$0xff] }
 0x4db   :  { %v4803_v48 = vpack.c.bf16 %v2336_v42, %v2332_v41  ;;  %v2340_v58 = vld [vmem:[%s9337_s9 + $0x618] sm:$0xff]  ;;  %v2363_v42 = vld [vmem:[%s9337_s9 + $0x6d0] sm:$0xff] }
 0x4dc   :  { %4658 = vmatpush1.bf16.msra.mxu0 %v4657_v51  ;;  %4786 = vmatpush1.bf16.msra.mxu1 %v4785_v52  ;;  %v8174_v7 = vpop.f32.mrb[14].mxu1  ;;  %v2331_v51 = vld [vmem:[%s9337_s9 + $0x5d0] sm:$0xff] }
 0x4dd   :  { %v8182_v10 = vpop.f32.mrb[15].mxu1  ;;  %4660 = vmatprep.subr.bf16.mxu0 %v4659_v60  ;;  %4788 = vmatprep.subr.bf16.mxu1 %v4787_v61  ;;  %v2335_v52 = vld [vmem:[%s9337_s9 + $0x5f0] sm:$0xff]  ;;  %v2344_v60 = vld [vmem:[%s9337_s9 + $0x638] sm:$0xff]  ;;  %v4677_v61 = vpack.c.bf16 %v2333_v46, %v2329_v45  ;;  %v2374_v45 = vld [vmem:[%s9337_s9 + $0x728] sm:$0xff] }
 0x4de   :  { %v4805_v62 = vpack.c.bf16 %v2335_v52, %v2331_v51  ;;  %v4807_v2 = vpack.c.bf16 %v2344_v60, %v2340_v58  ;;  %v2372_v46 = vld [vmem:[%s9337_s9 + $0x718] sm:$0xff]  ;;  %v2369_v52 = vld [vmem:[%s9337_s9 + $0x700] sm:$0xff]  ;;  %v2371_v60 = vld [vmem:[%s9337_s9 + $0x710] sm:$0xff] }
 0x4e0   :  { %4662 = vmatpush1.bf16.msra.mxu0 %v4661_v55  ;;  %4790 = vmatpush1.bf16.msra.mxu1 %v4789_v3  ;;  %v2343_v55 = vld [vmem:[%s9337_s9 + $0x630] sm:$0xff]  ;;  %v2346_v3 = vld [vmem:[%s9337_s9 + $0x648] sm:$0xff] }
 0x4e1   :  { %4664 = vmatprep.subr.bf16.mxu0 %v4663_v5  ;;  %4792 = vmatprep.subr.bf16.mxu1 %v4791_v8  ;;  %v2352_v5 = vld [vmem:[%s9337_s9 + $0x678] sm:$0xff]  ;;  %v4681_v8 = vpack.c.bf16 %v2341_v53, %v2337_v0  ;;  %v4809_v6 = vpack.c.bf16 %v2343_v55, %v2339_v4  ;;  %v4683_v11 = vpack.c.bf16 %v2350_v59, %v2346_v3  ;;  %v2382_v0 = vld [vmem:[%s9337_s9 + $0x768] sm:$0xff]  ;;  %v2377_v55 = vld [vmem:[%s9337_s9 + $0x740] sm:$0xff] }
 0x4e2   :  { %v4811_v12 = vpack.c.bf16 %v2352_v5, %v2348_v56  ;;  %v2380_v53 = vld [vmem:[%s9337_s9 + $0x758] sm:$0xff]  ;;  %v2381_v3 = vld [vmem:[%s9337_s9 + $0x760] sm:$0xff]  ;;  %v2379_v5 = vld [vmem:[%s9337_s9 + $0x750] sm:$0xff] }
 0x4e4   :  { %4666 = vmatpush1.bf16.msra.mxu0 %v4665_v15  ;;  %4794 = vmatpush1.bf16.msra.mxu1 %v4793_v16  ;;  %v2351_v15 = vld [vmem:[%s9337_s9 + $0x670] sm:$0xff]  ;;  %v2354_v16 = vld [vmem:[%s9337_s9 + $0x688] sm:$0xff] }
 0x4e5   :  { %4668 = vmatprep.subr.bf16.mxu0 %v4667_v18  ;;  %4796 = vmatprep.subr.bf16.mxu1 %v4795_v19  ;;  %v2360_v18 = vld [vmem:[%s9337_s9 + $0x6b8] sm:$0xff]  ;;  %v4685_v19 = vpack.c.bf16 %v2349_v9, %v2345_v23  ;;  %v4813_v20 = vpack.c.bf16 %v2351_v15, %v2347_v13  ;;  %v4687_v27 = vpack.c.bf16 %v2358_v14, %v2354_v16  ;;  %v2390_v23 = vld [vmem:[%s9337_s9 + $0x7a8] sm:$0xff]  ;;  %v2385_v15 = vld [vmem:[%s9337_s9 + $0x780] sm:$0xff] }
 0x4e6   :  { %v4815_v63 = vpack.c.bf16 %v2360_v18, %v2356_v28  ;;  %v2388_v9 = vld [vmem:[%s9337_s9 + $0x798] sm:$0xff]  ;;  %v2389_v16 = vld [vmem:[%s9337_s9 + $0x7a0] sm:$0xff]  ;;  %v2387_v18 = vld [vmem:[%s9337_s9 + $0x790] sm:$0xff] }
 0x4e8   :  { %4670 = vmatpush1.bf16.msra.mxu0 %v4669_v21  ;;  %4798 = vmatpush1.bf16.msra.mxu1 %v4797_v26  ;;  %v2359_v21 = vld [vmem:[%s9337_s9 + $0x6b0] sm:$0xff]  ;;  %v2362_v26 = vld [vmem:[%s9337_s9 + $0x6c8] sm:$0xff] }
 0x4e9   :  { %4672 = vmatprep.subr.bf16.mxu0 %v4671_v33  ;;  %4800 = vmatprep.subr.bf16.mxu1 %v4799_v34  ;;  %v2368_v33 = vld [vmem:[%s9337_s9 + $0x6f8] sm:$0xff]  ;;  %v4689_v34 = vpack.c.bf16 %v2357_v25, %v2353_v22  ;;  %v4817_v37 = vpack.c.bf16 %v2359_v21, %v2355_v29  ;;  %v4691_v40 = vpack.c.bf16 %v2366_v30, %v2362_v26  ;;  %v2398_v22 = vld [vmem:[%s9337_s9 + $0x7e8] sm:$0xff]  ;;  %v2393_v21 = vld [vmem:[%s9337_s9 + $0x7c0] sm:$0xff] }
 0x4ea   :  { %v4819_v41 = vpack.c.bf16 %v2368_v33, %v2364_v24  ;;  %v2396_v25 = vld [vmem:[%s9337_s9 + $0x7d8] sm:$0xff]  ;;  %v2397_v24 = vld [vmem:[%s9337_s9 + $0x7e0] sm:$0xff]  ;;  %v2395_v33 = vld [vmem:[%s9337_s9 + $0x7d0] sm:$0xff] }
 0x4ec   :  { %4674 = vmatpush1.bf16.msra.mxu0 %v4673_v43  ;;  %4802 = vmatpush1.bf16.msra.mxu1 %v4801_v44  ;;  %v2367_v43 = vld [vmem:[%s9337_s9 + $0x6f0] sm:$0xff]  ;;  %v2370_v44 = vld [vmem:[%s9337_s9 + $0x708] sm:$0xff] }
 0x4ed   :  { %4676 = vmatprep.subr.bf16.mxu0 %v4675_v47  ;;  %4804 = vmatprep.subr.bf16.mxu1 %v4803_v48  ;;  %v2376_v47 = vld [vmem:[%s9337_s9 + $0x738] sm:$0xff]  ;;  %v4693_v48 = vpack.c.bf16 %v2365_v39, %v2361_v38  ;;  %v4821_v51 = vpack.c.bf16 %v2367_v43, %v2363_v42  ;;  %v4695_v57 = vpack.c.bf16 %v2374_v45, %v2370_v44  ;;  %v2401_v39 = vld [vmem:[%s9338_s10] sm:$0xf] }
 0x4ee   :  { %v4823_v58 = vpack.c.bf16 %v2376_v47, %v2372_v46  ;;  %v2414_v43 = vrot.slane %v2401_v39, %v7079_v35 }
 0x4f0   :  { %4678 = vmatpush1.bf16.msra.mxu0 %v4677_v61  ;;  %4806 = vmatpush1.bf16.msra.mxu1 %v4805_v62  ;;  %v2375_v61 = vld [vmem:[%s9337_s9 + $0x730] sm:$0xff]  ;;  %v2378_v62 = vld [vmem:[%s9337_s9 + $0x748] sm:$0xff] }
 0x4f1   :  { %4680 = vmatprep.subr.bf16.mxu0 %v4679_v1  ;;  %4808 = vmatprep.subr.bf16.mxu1 %v4807_v2  ;;  %v2384_v1 = vld [vmem:[%s9337_s9 + $0x778] sm:$0xff]  ;;  %v4697_v2 = vpack.c.bf16 %v2373_v54, %v2369_v52  ;;  %v4825_v4 = vpack.c.bf16 %v2375_v61, %v2371_v60  ;;  %v4699_v59 = vpack.c.bf16 %v2382_v0, %v2378_v62 }
 0x4f2   :  { %v4827_v56 = vpack.c.bf16 %v2384_v1, %v2380_v53 }
 0x4f4   :  { %4682 = vmatpush1.bf16.msra.mxu0 %v4681_v8  ;;  %4810 = vmatpush1.bf16.msra.mxu1 %v4809_v6  ;;  %v2383_v8 = vld [vmem:[%s9337_s9 + $0x770] sm:$0xff]  ;;  %v2386_v6 = vld [vmem:[%s9337_s9 + $0x788] sm:$0xff] }
 0x4f5   :  { %4684 = vmatprep.subr.bf16.mxu0 %v4683_v11  ;;  %4812 = vmatprep.subr.bf16.mxu1 %v4811_v12  ;;  %v2392_v11 = vld [vmem:[%s9337_s9 + $0x7b8] sm:$0xff]  ;;  %v4701_v12 = vpack.c.bf16 %v2381_v3, %v2377_v55  ;;  %v4829_v13 = vpack.c.bf16 %v2383_v8, %v2379_v5  ;;  %v4703_v14 = vpack.c.bf16 %v2390_v23, %v2386_v6  ;;  %v2882_v8 = vld [vmem:[%s9339_s13 + $0x80] sm:$0xff]  ;;  %v2883_v6 = vld [vmem:[%s9339_s13 + $0x88] sm:$0xff] }
 0x4f6   :  { %v4831_v28 = vpack.c.bf16 %v2392_v11, %v2388_v9  ;;  %v2914_v23 = vld [vmem:[%s9339_s13 + $0x180] sm:$0xff]  ;;  %v4839_v9 = vpack.c.bf16 %v2883_v6, %v2882_v8  ;;  %v2915_v11 = vld [vmem:[%s9339_s13 + $0x188] sm:$0xff] }
 0x4f7   :  { %v2886_v8 = vld [vmem:[%s9339_s13 + $0xa0] sm:$0xff]  ;;  %v2887_v6 = vld [vmem:[%s9339_s13 + $0xa8] sm:$0xff] }
 0x4f8   :  { %4686 = vmatpush1.bf16.msra.mxu0 %v4685_v19  ;;  %4814 = vmatpush1.bf16.msra.mxu1 %v4813_v20  ;;  %v2391_v19 = vld [vmem:[%s9337_s9 + $0x7b0] sm:$0xff]  ;;  %v2394_v20 = vld [vmem:[%s9337_s9 + $0x7c8] sm:$0xff] }
 0x4f9   :  { %4688 = vmatprep.subr.bf16.mxu0 %v4687_v27  ;;  %4816 = vmatprep.subr.bf16.mxu1 %v4815_v63  ;;  %v2400_v27 = vld [vmem:[%s9337_s9 + $0x7f8] sm:$0xff]  ;;  %v4705_v63 = vpack.c.bf16 %v2389_v16, %v2385_v15  ;;  %v4833_v29 = vpack.c.bf16 %v2391_v19, %v2387_v18  ;;  %v4707_v26 = vpack.c.bf16 %v2398_v22, %v2394_v20  ;;  %v2884_v18 = vld [vmem:[%s9339_s13 + $0x90] sm:$0xff] }
 0x4fa   :  { %v4835_v30 = vpack.c.bf16 %v2400_v27, %v2396_v25  ;;  %v4871_v15 = vpack.c.bf16 %v2915_v11, %v2914_v23  ;;  %v2885_v20 = vld [vmem:[%s9339_s13 + $0x98] sm:$0xff]  ;;  %v2916_v22 = vld [vmem:[%s9339_s13 + $0x190] sm:$0xff]  ;;  %v2918_v23 = vld [vmem:[%s9339_s13 + $0x1a0] sm:$0xff] }
 0x4fb   :  { %v2917_v25 = vld [vmem:[%s9339_s13 + $0x198] sm:$0xff]  ;;  %v4843_v27 = vpack.c.bf16 %v2885_v20, %v2884_v18  ;;  %v2919_v11 = vld [vmem:[%s9339_s13 + $0x1a8] sm:$0xff] }
 0x4fc   :  { %4690 = vmatpush1.bf16.msra.mxu0 %v4689_v34  ;;  %4818 = vmatpush1.bf16.msra.mxu1 %v4817_v37  ;;  %v2399_v34 = vld [vmem:[%s9337_s9 + $0x7f0] sm:$0xff]  ;;  %v4709_v37 = vpack.c.bf16 %v2397_v24, %v2393_v21  ;;  %v2869_v21 = vld [vmem:[%s9339_s13 + $0x18] sm:$0xff] }
 0x4fd   :  { %4692 = vmatprep.subr.bf16.mxu0 %v4691_v40  ;;  %4820 = vmatprep.subr.bf16.mxu1 %v4819_v41  ;;  %v4837_v38 = vpack.c.bf16 %v2399_v34, %v2395_v33  ;;  %v2406_v40 = vrot.slane %v2401_v39, %v7074_v32  ;;  %v2410_v41 = vrot.slane %v2401_v39, %v7104_v50  ;;  %v2901_v24 = vld [vmem:[%s9339_s13 + $0x118] sm:$0xff]  ;;  %v63_v34 = vand.u32 127, %v62_v17 }
 0x4fe   :  { %v2889_v20 = vld [vmem:[%s9339_s13 + $0xb8] sm:$0xff] }
 0x500   :  { %4694 = vmatpush1.bf16.msra.mxu0 %v4693_v48  ;;  %4822 = vmatpush1.bf16.msra.mxu1 %v4821_v51 }
 0x501   :  { %4696 = vmatprep.subr.bf16.mxu0 %v4695_v57  ;;  %4824 = vmatprep.subr.bf16.mxu1 %v4823_v58 }
 0x504   :  { %4698 = vmatpush1.bf16.msra.mxu0 %v4697_v2  ;;  %4826 = vmatpush1.bf16.msra.mxu1 %v4825_v4 }
 0x505   :  { %4700 = vmatprep.subr.bf16.mxu0 %v4699_v59  ;;  %4828 = vmatprep.subr.bf16.mxu1 %v4827_v56 }
 0x508   :  { %4702 = vmatpush1.bf16.msra.mxu0 %v4701_v12  ;;  %4830 = vmatpush1.bf16.msra.mxu1 %v4829_v13  ;;  %v2866_v12 = vld [vmem:[%s9339_s13] sm:$0xff]  ;;  %v2867_v13 = vld [vmem:[%s9339_s13 + $0x8] sm:$0xff] }
 0x509   :  { %4704 = vmatprep.subr.bf16.mxu0 %v4703_v14  ;;  %4832 = vmatprep.subr.bf16.mxu1 %v4831_v28  ;;  %v4841_v16 = vpack.c.bf16 %v2867_v13, %v2866_v12  ;;  %v2898_v14 = vld [vmem:[%s9339_s13 + $0x100] sm:$0xff]  ;;  %v2899_v28 = vld [vmem:[%s9339_s13 + $0x108] sm:$0xff] }
 0x50a   :  { %v4873_v19 = vpack.c.bf16 %v2899_v28, %v2898_v14  ;;  %v2870_v12 = vld [vmem:[%s9339_s13 + $0x20] sm:$0xff]  ;;  %v2871_v13 = vld [vmem:[%s9339_s13 + $0x28] sm:$0xff] }
 0x50b   :  { %v2902_v14 = vld [vmem:[%s9339_s13 + $0x120] sm:$0xff]  ;;  %v2903_v28 = vld [vmem:[%s9339_s13 + $0x128] sm:$0xff] }
 0x50c   :  { %4706 = vmatpush1.bf16.msra.mxu0 %v4705_v63  ;;  %4834 = vmatpush1.bf16.msra.mxu1 %v4833_v29  ;;  %v4875_v63 = vpack.c.bf16 %v2917_v25, %v2916_v22  ;;  %v2868_v29 = vld [vmem:[%s9339_s13 + $0x10] sm:$0xff]  ;;  %v4881_v18 = vpack.c.bf16 %v2903_v28, %v2902_v14  ;;  %v2897_v28 = vld [vmem:[%s9339_s13 + $0xf8] sm:$0xff] }
 0x50d   :  { %4708 = vmatprep.subr.bf16.mxu0 %v4707_v26  ;;  %4836 = vmatprep.subr.bf16.mxu1 %v4835_v30  ;;  %v2900_v26 = vld [vmem:[%s9339_s13 + $0x110] sm:$0xff]  ;;  %v4845_v30 = vpack.c.bf16 %v2869_v21, %v2868_v29  ;;  %v2873_v29 = vld [vmem:[%s9339_s13 + $0x38] sm:$0xff] }
 0x50e   :  { %v4877_v33 = vpack.c.bf16 %v2901_v24, %v2900_v26  ;;  %v2920_v22 = vld [vmem:[%s9339_s13 + $0x1b0] sm:$0xff]  ;;  %v2905_v24 = vld [vmem:[%s9339_s13 + $0x138] sm:$0xff] }
 0x50f   :  { %v2896_v14 = vld [vmem:[%s9339_s13 + $0xf0] sm:$0xff] }
 0x510   :  { %4710 = vmatpush1.bf16.msra.mxu0 %v4709_v37  ;;  %4838 = vmatpush1.bf16.msra.mxu1 %v4837_v38  ;;  %v66_v37 = vadd.s32 384, %v63_v34  ;;  %v2890_v34 = vld [vmem:[%s9339_s13 + $0xc0] sm:$0xff] }
 0x511   :  { %4840 = vmatprep.subr.bf16.mxu0 %v4839_v9  ;;  %4872 = vmatprep.subr.bf16.mxu1 %v4871_v15  ;;  %v4847_v9 = vpack.c.bf16 %v2887_v6, %v2886_v8  ;;  %v4879_v15 = vpack.c.bf16 %v2919_v11, %v2918_v23  ;;  %v2926_v8 = vld [vmem:[%s9339_s13 + $0x1e0] sm:$0xff]  ;;  %v2927_v6 = vld [vmem:[%s9339_s13 + $0x1e8] sm:$0xff] }
 0x512   :  { %vm70_vm3 = vcmp.lt.s32.totalorder %v66_v37, 400  ;;  %v2891_v37 = vld [vmem:[%s9339_s13 + $0xc8] sm:$0xff]  ;;  %v2878_v11 = vld [vmem:[%s9339_s13 + $0x60] sm:$0xff] }
 0x513   :  { %2565 = vmatmul.mubr.f32.vlgmr.msra.gmra.mrb[12].mxu0 %v8148_v49  ;;  %2719 = vmatmul.mubr.f32.vlgmr.msra.gmra.mrb[16].mxu1 %v8148_v49 }
 0x514   :  { %2570 = vmatprep.mubr.f32.mxu0 %v8182_v10  ;;  %2724 = vmatprep.mubr.f32.mxu1 %v8182_v10 }
 0x515   :  { %4842 = vmatpush3.bf16.msra.mxu0 %v4841_v16  ;;  %4874 = vmatpush3.bf16.msra.mxu1 %v4873_v19  ;;  %v4849_v16 = vpack.c.bf16 %v2871_v13, %v2870_v12  ;;  %v2888_v19 = vld [vmem:[%s9339_s13 + $0xb0] sm:$0xff]  ;;  %v2879_v12 = vld [vmem:[%s9339_s13 + $0x68] sm:$0xff]  ;;  %v2910_v13 = vld [vmem:[%s9339_s13 + $0x160] sm:$0xff] }
 0x516   :  { %4844 = vmatprep.subr.bf16.mxu0 %v4843_v27  ;;  %4876 = vmatprep.subr.bf16.mxu1 %v4875_v63  ;;  %v4851_v25 = vpack.c.bf16 %v2889_v20, %v2888_v19  ;;  %v2921_v27 = vld [vmem:[%s9339_s13 + $0x1b8] sm:$0xff]  ;;  %v2872_v63 = vld [vmem:[%s9339_s13 + $0x30] sm:$0xff]  ;;  %v4867_v19 = vpack.c.bf16 %v2897_v28, %v2896_v14 }
 0x517   :  { %2571 = vmatmul.mubr.f32.gmra.mrb[14].mxu0 %v8174_v7  ;;  %2725 = vmatmul.mubr.f32.gmra.mrb[18].mxu1 %v8174_v7  ;;  %v2418_v7 = vrot.slane %v2401_v39, %v7081_v36  ;;  %v4883_v21 = vpack.c.bf16 %v2921_v27, %v2920_v22  ;;  %v4853_v26 = vpack.c.bf16 %v2873_v29, %v2872_v63  ;;  %v2928_v20 = vld [vmem:[%s9339_s13 + $0x1f0] sm:$0xff]  ;;  %v2929_v22 = vld [vmem:[%s9339_s13 + $0x1f8] sm:$0xff] }
 0x518   :  { %v4899_v27 = vpack.c.bf16 %v2929_v22, %v2928_v20  ;;  %v2881_v63 = vld [vmem:[%s9339_s13 + $0x78] sm:$0xff]  ;;  %v2912_v29 = vld [vmem:[%s9339_s13 + $0x170] sm:$0xff] }
 0x519   :  { %4846 = vmatpush3.bf16.msra.mxu0 %v4845_v30  ;;  %4878 = vmatpush3.bf16.msra.mxu1 %v4877_v33  ;;  %v2904_v30 = vld [vmem:[%s9339_s13 + $0x130] sm:$0xff] }
 0x51a   :  { %4848 = vmatprep.subr.bf16.mxu0 %v4847_v9  ;;  %4880 = vmatprep.subr.bf16.mxu1 %v4879_v15  ;;  %v4885_v33 = vpack.c.bf16 %v2905_v24, %v2904_v30  ;;  %v4895_v9 = vpack.c.bf16 %v2927_v6, %v2926_v8  ;;  %v4865_v15 = vpack.c.bf16 %v2879_v12, %v2878_v11  ;;  %v3098_v24 = vld [vmem:[%s9340_s15 + $0x8] sm:$0xff]  ;;  %v3101_v8 = vld [vmem:[%s9340_s15 + $0x20] sm:$0xff]  ;;  %v3099_v6 = vld [vmem:[%s9340_s15 + $0x10] sm:$0xff] }
 0x51b   :  { %v3110_v11 = vld [vmem:[%s9340_s15 + $0x68] sm:$0xff]  ;;  %v3108_v12 = vld [vmem:[%s9340_s15 + $0x58] sm:$0xff] }
 0x51d   :  { %4850 = vmatpush3.bf16.msra.mxu0 %v4849_v16  ;;  %4882 = vmatpush3.bf16.msra.mxu1 %v4881_v18  ;;  %v2911_v16 = vld [vmem:[%s9339_s13 + $0x168] sm:$0xff] }
 0x51e   :  { %4852 = vmatprep.subr.bf16.mxu0 %v4851_v25  ;;  %4884 = vmatprep.subr.bf16.mxu1 %v4883_v21  ;;  %v4897_v18 = vpack.c.bf16 %v2911_v16, %v2910_v13  ;;  %v2880_v25 = vld [vmem:[%s9339_s13 + $0x70] sm:$0xff]  ;;  %v2913_v21 = vld [vmem:[%s9339_s13 + $0x178] sm:$0xff] }
 0x51f   :  { %v4901_v30 = vpack.c.bf16 %v2913_v21, %v2912_v29  ;;  %v3112_v13 = vld [vmem:[%s9340_s15 + $0x78] sm:$0xff] }
 0x520   :  { %v5109_v29 = vld [vmem:[%s9357_s21 + $0x18] sm:$0xff] }
 0x521   :  { %4854 = vmatpush3.bf16.msra.mxu0 %v4853_v26  ;;  %4886 = vmatpush3.bf16.msra.mxu1 %v4885_v33  ;;  %v4869_v26 = vpack.c.bf16 %v2881_v63, %v2880_v25  ;;  %v3102_v33 = vld [vmem:[%s9340_s15 + $0x28] sm:$0xff]  ;;  %v4939_v25 = vpack.c.bf16 %v3112_v13, %v3108_v12  ;;  %v3113_v12 = vld [vmem:[%s9340_s15 + $0x80] sm:$0xff] }
 0x5e6   :  { %v2566_v42 = vpop.f32.mrb[12].mxu0  ;;  %v2720_v49 = vpop.f32.mrb[16].mxu1 }
 0x5e7   :  { %v8466_v44 = vadd.f32 %v2566_v42, %v2406_v40  ;;  %v2568_v45 = vpop.f32.mrb[13].mxu0  ;;  %v2722_v10 = vpop.f32.mrb[17].mxu1  ;;  %v8471_v47 = vadd.f32 %v2720_v49, %v2414_v43 }
 0x5e8   :  { %v8468_v46 = vadd.f32 %v2568_v45, %v2410_v41  ;;  %v5052_v60 = vadd.f32 %v2722_v10, %v2418_v7 }
 0x5ea   :  { %v2731_v48 = vadd.f32 %v8468_v46, %v8466_v44  ;;  %v2572_v51 = vpop.f32.mrb[14].mxu0  ;;  %v2726_v52 = vpop.f32.mrb[18].mxu1 }
 0x5eb   :  { %v8475_v54 = vadd.f32 %v2572_v51, %v2406_v40  ;;  %v2574_v57 = vpop.f32.mrb[15].mxu0  ;;  %v2728_v58 = vpop.f32.mrb[19].mxu1  ;;  %v8477_v61 = vadd.f32 %v2726_v52, %v2414_v43  ;;  %v8542_v40 = vsel %vm70_vm3, 1.0, %v5116_v31 }
 0x5ec   :  { %v8479_v62 = vadd.f32 %v2574_v57, %v2410_v41  ;;  %v2732_v0 = vadd.f32 %v8471_v47, %v2731_v48  ;;  %v8486_v2 = vadd.f32 %v2728_v58, %v2418_v7 }
 0x5ed   :  { %v2737_v53 = vsel %vm2736_vm2, %v8475_v54, 0.0  ;;  %v2740_v3 = vsel %vm2736_vm2, %v8477_v61, 0.0 }
 0x5ee   :  { %v2738_v1 = vsel %vm2736_vm2, %v8479_v62, 0.0  ;;  %v2733_v4 = vadd.f32 %v5052_v60, %v2732_v0  ;;  %v2742_v56 = vsel %vm2736_vm2, %v8486_v2, 0.0 }
 0x5ef   :  { %v2739_v55 = vadd.f32 %v2738_v1, %v2737_v53 }
 0x5f0   :  { %2734 = vadd.xlane.f32.xlu0 %v2733_v4 }
 0x5f1   :  { %v2741_v59 = vadd.f32 %v2740_v3, %v2739_v55 }
 0x5f3   :  { %v2743_v5 = vadd.f32 %v2742_v56, %v2741_v59 }
 0x5f5   :  { %2744 = vadd.xlane.f32.xlu1 %v2743_v5 }
 0x67d   :  { %v2735_v38 = vpop.xlane.xlu0 %2734 }
 0x67e   :  { %v2746_v39 = vmul.f32 0.0025, %v2735_v38  ;;  %v2922_v38 = vld [vmem:[%s9339_s13 + $0x1c0] sm:$0xff] }
 0x680   :  { %v8545_v41 = vsub.f32 %v8466_v44, %v2746_v39  ;;  %v8548_v42 = vsub.f32 %v8468_v46, %v2746_v39  ;;  %v8551_v43 = vsub.f32 %v8471_v47, %v2746_v39  ;;  %v2751_v49 = vsub.f32 %v5052_v60, %v2746_v39 }
 0x681   :  { %v4855_v39 = vpack.c.bf16 %v2891_v37, %v2890_v34  ;;  %v3100_v34 = vld [vmem:[%s9340_s15 + $0x18] sm:$0xff]  ;;  %v4903_v37 = vpack.c.bf16 %v3102_v33, %v3098_v24  ;;  %v5111_v24 = vld [vmem:[%s9357_s21 + $0x10] sm:$0xff] }
 0x682   :  { %v2745_v45 = vpop.xlane.xlu1 %2744  ;;  %v8554_v17 = vmul.f32 %v8542_v40, %v2751_v49  ;;  %v2764_v10 = vmul.f32 %v8545_v41, %v8545_v41  ;;  %v2765_v7 = vmul.f32 %v8548_v42, %v8548_v42  ;;  %v2766_v44 = vmul.f32 %v8551_v43, %v8551_v43  ;;  %v2923_v49 = vld [vmem:[%s9339_s13 + $0x1c8] sm:$0xff] }
 0x683   :  { %v2747_v48 = vmul.f32 0.0025, %v2745_v45  ;;  %v2874_v45 = vld [vmem:[%s9339_s13 + $0x40] sm:$0xff]  ;;  %4856 = vmatprep.subr.bf16.mxu0 %v4855_v39 }
 0x684   :  { %v2772_v46 = vadd.f32 %v2765_v7, %v2764_v10  ;;  %v2767_v58 = vmul.f32 %v8554_v17, %v8554_v17  ;;  %v2875_v10 = vld [vmem:[%s9339_s13 + $0x48] sm:$0xff]  ;;  %v4887_v7 = vpack.c.bf16 %v2923_v49, %v2922_v38  ;;  %v3104_v38 = vld [vmem:[%s9340_s15 + $0x38] sm:$0xff] }
 0x685   :  { %v8563_v51 = vsub.f32 %v8475_v54, %v2747_v48  ;;  %v8566_v47 = vsub.f32 %v8479_v62, %v2747_v48  ;;  %v8569_v52 = vsub.f32 %v8477_v61, %v2747_v48  ;;  %v2755_v57 = vsub.f32 %v8486_v2, %v2747_v48 }
 0x686   :  { %v2773_v60 = vadd.f32 %v2772_v46, %v2766_v44  ;;  %v4857_v48 = vpack.c.bf16 %v2875_v10, %v2874_v45  ;;  %v2906_v44 = vld [vmem:[%s9339_s13 + $0x140] sm:$0xff]  ;;  %v2907_v46 = vld [vmem:[%s9339_s13 + $0x148] sm:$0xff]  ;;  %4888 = vmatprep.subr.bf16.mxu1 %v4887_v7  ;;  %v4935_v39 = vpack.c.bf16 %v3104_v38, %v3100_v34 }
 0x687   :  { %v8575_v0 = vmul.f32 %v8542_v40, %v2755_v57  ;;  %v2768_v53 = vmul.f32 %v8563_v51, %v8563_v51  ;;  %v2769_v54 = vmul.f32 %v8566_v47, %v8566_v47  ;;  %v2770_v62 = vmul.f32 %v8569_v52, %v8569_v52  ;;  %v3105_v34 = vld [vmem:[%s9340_s15 + $0x40] sm:$0xff] }
 0x688   :  { %v2774_v61 = vadd.f32 %v2773_v60, %v2767_v58  ;;  %v4889_v57 = vpack.c.bf16 %v2907_v46, %v2906_v44  ;;  %4858 = vmatpush3.bf16.msra.mxu0 %v4857_v48  ;;  %v2892_v58 = vld [vmem:[%s9339_s13 + $0xd0] sm:$0xff]  ;;  %v2893_v60 = vld [vmem:[%s9339_s13 + $0xd8] sm:$0xff]  ;;  %v79_v46 = vld [vmem:[%s9341_s11] sm:$0xf] }
 0x689   :  { %v2771_v1 = vmul.f32 %v8575_v0, %v8575_v0  ;;  %v2777_v2 = vsel %vm2736_vm2, %v2768_v53, 0.0  ;;  %v2778_v4 = vsel %vm2736_vm2, %v2769_v54, 0.0  ;;  %v2780_v3 = vsel %vm2736_vm2, %v2770_v62, 0.0  ;;  %v2924_v53 = vld [vmem:[%s9339_s13 + $0x1d0] sm:$0xff]  ;;  %v2925_v62 = vld [vmem:[%s9339_s13 + $0x1d8] sm:$0xff] }
 0x68a   :  { %2775 = vadd.xlane.f32.xlu0 %v2774_v61  ;;  %v2779_v55 = vadd.f32 %v2778_v4, %v2777_v2  ;;  %4890 = vmatpush3.bf16.msra.mxu1 %v4889_v57  ;;  %v4859_v54 = vpack.c.bf16 %v2893_v60, %v2892_v58  ;;  %v2876_v61 = vld [vmem:[%s9339_s13 + $0x50] sm:$0xff]  ;;  %v4891_v2 = vpack.c.bf16 %v2925_v62, %v2924_v53  ;;  %v80_v57 = vld [vmem:[%s9342_s12] sm:$0xf] }
 0x68b   :  { %v2782_v56 = vsel %vm2736_vm2, %v2771_v1, 0.0  ;;  %v2877_v1 = vld [vmem:[%s9339_s13 + $0x58] sm:$0xff]  ;;  %v8752_v58 = vrot.slane %v79_v46, %v7104_v50  ;;  %v8755_v60 = vrot.slane %v79_v46, %v7081_v36  ;;  %v8758_v53 = vrot.slane %v79_v46, %v7074_v32 }
 0x68c   :  { %v2781_v59 = vadd.f32 %v2780_v3, %v2779_v55  ;;  %v4861_v4 = vpack.c.bf16 %v2877_v1, %v2876_v61  ;;  %v2908_v55 = vld [vmem:[%s9339_s13 + $0x150] sm:$0xff]  ;;  %v2909_v3 = vld [vmem:[%s9339_s13 + $0x158] sm:$0xff]  ;;  %4860 = vmatprep.subr.bf16.mxu0 %v4859_v54  ;;  %4892 = vmatprep.subr.bf16.mxu1 %v4891_v2  ;;  %v8761_v54 = vrot.slane %v79_v46, %v7079_v35 }
 0x68d   :  { %v8764_v61 = vrot.slane %v80_v57, %v7104_v50  ;;  %v8767_v1 = vrot.slane %v80_v57, %v7081_v36  ;;  %v8770_v2 = vrot.slane %v80_v57, %v7074_v32 }
 0x68e   :  { %v2783_v5 = vadd.f32 %v2782_v56, %v2781_v59  ;;  %v2894_v59 = vld [vmem:[%s9339_s13 + $0xe0] sm:$0xff]  ;;  %v4893_v56 = vpack.c.bf16 %v2909_v3, %v2908_v55  ;;  %4862 = vmatpush3.bf16.msra.mxu0 %v4861_v4  ;;  %v8773_v4 = vrot.slane %v80_v57, %v7079_v35 }
 0x690   :  { %2784 = vadd.xlane.f32.xlu1 %v2783_v5  ;;  %v2895_v5 = vld [vmem:[%s9339_s13 + $0xe8] sm:$0xff]  ;;  %4894 = vmatpush3.bf16.msra.mxu1 %v4893_v56 }
 0x691   :  { %v4863_v23 = vpack.c.bf16 %v2895_v5, %v2894_v59  ;;  %4896 = vmatprep.subr.bf16.mxu1 %v4895_v9  ;;  %v3097_v5 = vld [vmem:[%s9340_s15] sm:$0xff] }
 0x693   :  { %4864 = vmatprep.subr.bf16.mxu0 %v4863_v23 }
 0x694   :  { %4866 = vmatpush3.bf16.msra.mxu0 %v4865_v15  ;;  %4898 = vmatpush3.bf16.msra.mxu1 %v4897_v18 }
 0x695   :  { %4868 = vmatprep.subr.bf16.mxu0 %v4867_v19  ;;  %4900 = vmatprep.subr.bf16.mxu1 %v4899_v27  ;;  %v4905_v19 = vpack.c.bf16 %v3101_v8, %v3097_v5  ;;  %v5108_v27 = vld [vmem:[%s9357_s21 + $0x8] sm:$0xff]  ;;  %v5114_v8 = vld [vmem:[%s9357_s21 + $0x20] sm:$0x3] }
 0x698   :  { %4870 = vmatpush3.bf16.msra.mxu0 %v4869_v26  ;;  %4902 = vmatpush3.bf16.msra.mxu1 %v4901_v30  ;;  %v5110_v26 = vld [vmem:[%s9357_s21] sm:$0xff] }
 0x699   :  { %4904 = vmatprep.subr.bf16.mxu0 %v4903_v37  ;;  %4936 = vmatprep.subr.bf16.mxu1 %v4935_v39 }
 0x717   :  { %v2776_v49 = vpop.xlane.xlu0 %2775 }
 0x718   :  { %v2786_v45 = vmul.f32 0.0025, %v2776_v49 }
 0x71a   :  { %v2788_v10 = vadd.f32 1e-05, %v2786_v45  ;;  %v3109_v45 = vld [vmem:[%s9340_s15 + $0x60] sm:$0xff] }
 0x71c   :  { %5092 = vrsqrt.f32 %v2788_v10  ;;  %v3107_v10 = vld [vmem:[%s9340_s15 + $0x50] sm:$0xff] }
 0x71d   :  { %v2785_v7 = vpop.xlane.xlu1 %2784 }
 0x71e   :  { %v2787_v48 = vmul.f32 0.0025, %v2785_v7  ;;  %v3111_v7 = vld [vmem:[%s9340_s15 + $0x70] sm:$0xff] }
 0x720   :  { %v2789_v44 = vadd.f32 1e-05, %v2787_v48  ;;  %v4909_v48 = vpack.c.bf16 %v3109_v45, %v3105_v34  ;;  %v3134_v45 = vld [vmem:[%s9340_s15 + $0x128] sm:$0xff] }
 0x722   :  { %5094 = vrsqrt.f32 %v2789_v44  ;;  %v4941_v44 = vpack.c.bf16 %v3111_v7, %v3107_v10  ;;  %v3132_v10 = vld [vmem:[%s9340_s15 + $0x118] sm:$0xff] }
 0x726   :  { %v5093_v62 = vpop.eup %5092 }
 0x727   :  { %v2793_v55 = vmul.f32 %v5093_v62, %v8548_v42  ;;  %v2795_v3 = vmul.f32 %v5093_v62, %v8554_v17  ;;  %v2792_v59 = vmul.f32 %v5093_v62, %v8545_v41  ;;  %v2794_v56 = vmul.f32 %v5093_v62, %v8551_v43  ;;  %v3103_v42 = vld [vmem:[%s9340_s15 + $0x30] sm:$0xff]  ;;  %v3106_v41 = vld [vmem:[%s9340_s15 + $0x48] sm:$0xff] }
 0x728   :  { %v4937_v20 = vpack.c.bf16 %v3103_v42, %v3099_v6  ;;  %v4907_v22 = vpack.c.bf16 %v3110_v11, %v3106_v41  ;;  %v5115_v42 = vld [vmem:[%s9357_s21 + $0x30] sm:$0x3]  ;;  %v3120_v11 = vld [vmem:[%s9340_s15 + $0xb8] sm:$0xff] }
 0x729   :  { %v2822_v43 = vmul.f32 %v8752_v58, %v2793_v55  ;;  %v2824_v17 = vmul.f32 %v8755_v60, %v2795_v3  ;;  %v2821_v23 = vmul.f32 %v8758_v53, %v2792_v59  ;;  %v2823_v9 = vmul.f32 %v8761_v54, %v2794_v56  ;;  %v5112_v3 = vld [vmem:[%s9357_s21 + $0x28] sm:$0x3]  ;;  %v5113_v56 = vld [vmem:[%s9357_s21 + $0x38] sm:$0x3] }
 0x72b   :  { %v2851_v15 = vadd.f32 %v8764_v61, %v2822_v43  ;;  %v2853_v16 = vadd.f32 %v8767_v1, %v2824_v17  ;;  %v2850_v14 = vadd.f32 %v8770_v2, %v2821_v23  ;;  %v2852_v28 = vadd.f32 %v8773_v4, %v2823_v9  ;;  %v3114_v43 = vld [vmem:[%s9340_s15 + $0x88] sm:$0xff]  ;;  %v3116_v23 = vld [vmem:[%s9340_s15 + $0x98] sm:$0xff] }
 0x72c   :  { %v5095_v18 = vpop.eup %5094  ;;  %v3118_v17 = vld [vmem:[%s9340_s15 + $0xa8] sm:$0xff]  ;;  %v4943_v13 = vpack.c.bf16 %v3120_v11, %v3116_v23  ;;  %v3143_v11 = vld [vmem:[%s9340_s15 + $0x170] sm:$0xff] }
 0x72d   :  { %v8814_v63 = vadd.f32 %v5108_v27, %v2851_v15  ;;  %v8819_v21 = vadd.f32 %v5109_v29, %v2853_v16  ;;  %v8824_v30 = vadd.f32 %v5110_v26, %v2850_v14  ;;  %v8829_v33 = vadd.f32 %v5111_v24, %v2852_v28  ;;  %v3117_v15 = vld [vmem:[%s9340_s15 + $0xa0] sm:$0xff]  ;;  %v3115_v16 = vld [vmem:[%s9340_s15 + $0x90] sm:$0xff]  ;;  %v3128_v27 = vld [vmem:[%s9340_s15 + $0xf8] sm:$0xff] }
 0x72e   :  { %v2797_v37 = vmul.f32 %v5095_v18, %v8566_v47  ;;  %v2799_v38 = vmul.f32 %v5095_v18, %v8575_v0  ;;  %v2796_v39 = vmul.f32 %v5095_v18, %v8563_v51  ;;  %v2798_v49 = vmul.f32 %v5095_v18, %v8569_v52  ;;  %v3119_v14 = vld [vmem:[%s9340_s15 + $0xb0] sm:$0xff]  ;;  %v3121_v29 = vld [vmem:[%s9340_s15 + $0xc0] sm:$0xff] }
 0x72f   :  { %3001 = vmatprep.mubr.f32.mxu0 %v8814_v63  ;;  %3076 = vmatprep.mubr.f32.mxu1 %v8819_v21  ;;  %v4911_v9 = vpack.c.bf16 %v3118_v17, %v3114_v43  ;;  %v4913_v28 = vpack.c.bf16 %v3117_v15, %v3113_v12  ;;  %v4945_v18 = vpack.c.bf16 %v3119_v14, %v3115_v16  ;;  %v3125_v26 = vld [vmem:[%s9340_s15 + $0xe0] sm:$0xff]  ;;  %v3150_v15 = vld [vmem:[%s9340_s15 + $0x1a8] sm:$0xff]  ;;  %v3148_v16 = vld [vmem:[%s9340_s15 + $0x198] sm:$0xff] }
 0x730   :  { %3002 = vmatmul.mubr.f32.vlgmr.msra.gmra.mrb[16].mxu0 %v8824_v30  ;;  %3077 = vmatmul.mubr.f32.vlgmr.msra.gmra.mrb[20].mxu1 %v8829_v33  ;;  %v2826_v51 = vmul.f32 %v8752_v58, %v2797_v37  ;;  %v2828_v47 = vmul.f32 %v8755_v60, %v2799_v38  ;;  %v2825_v52 = vmul.f32 %v8758_v53, %v2796_v39  ;;  %v3123_v37 = vld [vmem:[%s9340_s15 + $0xd0] sm:$0xff]  ;;  %v3141_v43 = vld [vmem:[%s9340_s15 + $0x160] sm:$0xff] }
 0x731   :  { %v2827_v0 = vmul.f32 %v8761_v54, %v2798_v49  ;;  %4906 = vmatpush1.bf16.msra.mxu0 %v4905_v19  ;;  %4938 = vmatpush1.bf16.msra.mxu1 %v4937_v20  ;;  %v3122_v19 = vld [vmem:[%s9340_s15 + $0xc8] sm:$0xff]  ;;  %v4917_v34 = vpack.c.bf16 %v3125_v26, %v3121_v29  ;;  %v3127_v38 = vld [vmem:[%s9340_s15 + $0xf0] sm:$0xff] }
 0x732   :  { %v2855_v46 = vadd.f32 %v8764_v61, %v2826_v51  ;;  %v2857_v57 = vadd.f32 %v8767_v1, %v2828_v47  ;;  %v2854_v62 = vadd.f32 %v8770_v2, %v2825_v52  ;;  %4908 = vmatprep.subr.bf16.mxu0 %v4907_v22  ;;  %4940 = vmatprep.subr.bf16.mxu1 %v4939_v25  ;;  %v3126_v20 = vld [vmem:[%s9340_s15 + $0xe8] sm:$0xff]  ;;  %v3124_v22 = vld [vmem:[%s9340_s15 + $0xd8] sm:$0xff]  ;;  %v3129_v47 = vld [vmem:[%s9340_s15 + $0x100] sm:$0xff] }
 0x733   :  { %v2856_v55 = vadd.f32 %v8773_v4, %v2827_v0  ;;  %v4915_v25 = vpack.c.bf16 %v3126_v20, %v3122_v19  ;;  %v4947_v24 = vpack.c.bf16 %v3128_v27, %v3124_v22  ;;  %v4949_v39 = vpack.c.bf16 %v3127_v38, %v3123_v37  ;;  %v3130_v49 = vld [vmem:[%s9340_s15 + $0x108] sm:$0xff]  ;;  %v3136_v51 = vld [vmem:[%s9340_s15 + $0x138] sm:$0xff]  ;;  %v3133_v52 = vld [vmem:[%s9340_s15 + $0x120] sm:$0xff] }
 0x734   :  { %v8862_v59 = vadd.f32 %v5112_v3, %v2855_v46  ;;  %v8867_v5 = vadd.f32 %v5113_v56, %v2857_v57  ;;  %v8872_v6 = vadd.f32 %v5114_v8, %v2854_v62  ;;  %v4919_v7 = vpack.c.bf16 %v3134_v45, %v3130_v49  ;;  %v3135_v46 = vld [vmem:[%s9340_s15 + $0x130] sm:$0xff]  ;;  %v3138_v62 = vld [vmem:[%s9340_s15 + $0x148] sm:$0xff]  ;;  %v3140_v3 = vld [vmem:[%s9340_s15 + $0x158] sm:$0xff] }
 0x735   :  { %v8877_v41 = vadd.f32 %v5115_v42, %v2856_v55  ;;  %4910 = vmatpush1.bf16.msra.mxu0 %v4909_v48  ;;  %4942 = vmatpush1.bf16.msra.mxu1 %v4941_v44  ;;  %v4951_v0 = vpack.c.bf16 %v3136_v51, %v3132_v10  ;;  %v4921_v48 = vpack.c.bf16 %v3133_v52, %v3129_v47  ;;  %v3131_v44 = vld [vmem:[%s9340_s15 + $0x110] sm:$0xff]  ;;  %v3142_v55 = vld [vmem:[%s9340_s15 + $0x168] sm:$0xff]  ;;  %v3144_v8 = vld [vmem:[%s9340_s15 + $0x178] sm:$0xff] }
 0x736   :  { %3006 = vmatprep.mubr.f32.mxu0 %v8862_v59  ;;  %3081 = vmatprep.mubr.f32.mxu1 %v8867_v5  ;;  %v4953_v57 = vpack.c.bf16 %v3135_v46, %v3131_v44  ;;  %v4923_v56 = vpack.c.bf16 %v3142_v55, %v3138_v62  ;;  %v3137_v42 = vld [vmem:[%s9340_s15 + $0x140] sm:$0xff]  ;;  %v4955_v17 = vpack.c.bf16 %v3144_v8, %v3140_v3  ;;  %v3151_v27 = vld [vmem:[%s9340_s15 + $0x1b0] sm:$0xff]  ;;  %v3154_v26 = vld [vmem:[%s9340_s15 + $0x1c8] sm:$0xff] }
 0x737   :  { %3007 = vmatmul.mubr.f32.gmra.mrb[18].mxu0 %v8872_v6  ;;  %3082 = vmatmul.mubr.f32.gmra.mrb[22].mxu1 %v8877_v41  ;;  %v4925_v23 = vpack.c.bf16 %v3141_v43, %v3137_v42  ;;  %v3149_v19 = vld [vmem:[%s9340_s15 + $0x1a0] sm:$0xff]  ;;  %v3160_v38 = vld [vmem:[%s9340_s15 + $0x1f8] sm:$0xff]  ;;  %v3159_v51 = vld [vmem:[%s9340_s15 + $0x1f0] sm:$0xff] }
 0x738   :  { %3247 = vmatprep.mubr.f32.mxu0 %v5116_v31  ;;  %3324 = vmatprep.mubr.f32.mxu1 %v5116_v31  ;;  %v3157_v49 = vld [vmem:[%s9340_s15 + $0x1e0] sm:$0xff] }
 0x739   :  { %4912 = vmatprep.subr.bf16.mxu0 %v4911_v9  ;;  %4944 = vmatprep.subr.bf16.mxu1 %v4943_v13  ;;  %v3139_v9 = vld [vmem:[%s9340_s15 + $0x150] sm:$0xff]  ;;  %v3146_v13 = vld [vmem:[%s9340_s15 + $0x188] sm:$0xff] }
 0x73a   :  { %4914 = vmatpush1.bf16.msra.mxu0 %v4913_v28  ;;  %4946 = vmatpush1.bf16.msra.mxu1 %v4945_v18  ;;  %v4957_v12 = vpack.c.bf16 %v3143_v11, %v3139_v9  ;;  %v4927_v14 = vpack.c.bf16 %v3150_v15, %v3146_v13  ;;  %v3152_v28 = vld [vmem:[%s9340_s15 + $0x1b8] sm:$0xff]  ;;  %v3145_v18 = vld [vmem:[%s9340_s15 + $0x180] sm:$0xff] }
 0x73b   :  { %4916 = vmatprep.subr.bf16.mxu0 %v4915_v25  ;;  %4948 = vmatprep.subr.bf16.mxu1 %v4947_v24  ;;  %v4959_v20 = vpack.c.bf16 %v3152_v28, %v3148_v16  ;;  %v4929_v22 = vpack.c.bf16 %v3149_v19, %v3145_v18  ;;  %v3147_v25 = vld [vmem:[%s9340_s15 + $0x190] sm:$0xff]  ;;  %v3158_v24 = vld [vmem:[%s9340_s15 + $0x1e8] sm:$0xff] }
 0x73c   :  { %v4961_v29 = vpack.c.bf16 %v3151_v27, %v3147_v25  ;;  %v4931_v37 = vpack.c.bf16 %v3158_v24, %v3154_v26  ;;  %v3161_v25 = vld [vmem:[%s9344_s16] sm:$0xf] }
 0x73d   :  { %v3166_v27 = vrot.slane %v3161_v25, %v7074_v32  ;;  %v3174_v24 = vrot.slane %v3161_v25, %v7079_v35 }
 0x73e   :  { %4918 = vmatpush1.bf16.msra.mxu0 %v4917_v34  ;;  %4950 = vmatpush1.bf16.msra.mxu1 %v4949_v39  ;;  %v3156_v34 = vld [vmem:[%s9340_s15 + $0x1d8] sm:$0xff]  ;;  %v3153_v39 = vld [vmem:[%s9340_s15 + $0x1c0] sm:$0xff] }
 0x73f   :  { %4920 = vmatprep.subr.bf16.mxu0 %v4919_v7  ;;  %4952 = vmatprep.subr.bf16.mxu1 %v4951_v0  ;;  %v4963_v45 = vpack.c.bf16 %v3160_v38, %v3156_v34  ;;  %v4933_v10 = vpack.c.bf16 %v3157_v49, %v3153_v39  ;;  %v3155_v7 = vld [vmem:[%s9340_s15 + $0x1d0] sm:$0xff]  ;;  %v3178_v49 = vrot.slane %v3161_v25, %v7081_v36 }
 0x740   :  { %v4965_v47 = vpack.c.bf16 %v3159_v51, %v3155_v7 }
 0x742   :  { %4922 = vmatpush1.bf16.msra.mxu0 %v4921_v48  ;;  %4954 = vmatpush1.bf16.msra.mxu1 %v4953_v57  ;;  %v3661_v48 = vld [vmem:[%s9343_s14] ss:$0 sm:$0xff] }
 0x743   :  { %4924 = vmatprep.subr.bf16.mxu0 %v4923_v56  ;;  %4956 = vmatprep.subr.bf16.mxu1 %v4955_v17 }
 0x746   :  { %4926 = vmatpush1.bf16.msra.mxu0 %v4925_v23  ;;  %4958 = vmatpush1.bf16.msra.mxu1 %v4957_v12 }
 0x747   :  { %4928 = vmatprep.subr.bf16.mxu0 %v4927_v14  ;;  %4960 = vmatprep.subr.bf16.mxu1 %v4959_v20 }
 0x74a   :  { %4930 = vmatpush1.bf16.msra.mxu0 %v4929_v22  ;;  %4962 = vmatpush1.bf16.msra.mxu1 %v4961_v29  ;;  %v3170_v29 = vrot.slane %v3161_v25, %v7104_v50 }
 0x74b   :  { %4932 = vmatprep.subr.bf16.mxu0 %v4931_v37  ;;  %4964 = vmatprep.subr.bf16.mxu1 %v4963_v45 }
 0x74e   :  { %4934 = vmatpush1.bf16.msra.mxu0 %v4933_v10  ;;  %4966 = vmatpush1.bf16.msra.mxu1 %v4965_v47 }
 0x803   :  { %v3695_v52 = vpop.f32.mrb[16].mxu0  ;;  %v3733_v0 = vpop.f32.mrb[20].mxu1 }
 0x804   :  { %v3696_v44 = vpop.f32.mrb[17].mxu0  ;;  %v3734_v46 = vpop.f32.mrb[21].mxu1 }
 0x805   :  { %v3697_v57 = vadd.f32 %v3696_v44, %v3695_v52  ;;  %v3735_v62 = vadd.f32 %v3734_v46, %v3733_v0 }
 0x807   :  { %v3004_v55 = vadd.f32 %v3697_v57, %v3661_v48 }
 0x809   :  { %v3079_v3 = vadd.f32 %v3735_v62, %v3004_v55 }
 0x80a   :  { %v3698_v56 = vpop.f32.mrb[18].mxu0  ;;  %v3736_v8 = vpop.f32.mrb[22].mxu1 }
 0x80b   :  { %v3089_v42 = vmul.f32 0.70710677, %v3079_v3  ;;  %v3699_v43 = vpop.f32.mrb[19].mxu0  ;;  %v3737_v17 = vpop.f32.mrb[23].mxu1  ;;  %v3087_v16 = vmul.f32 0.5, %v3079_v3 }
 0x80c   :  { %v3700_v23 = vadd.f32 %v3699_v43, %v3698_v56  ;;  %v3738_v9 = vadd.f32 %v3737_v17, %v3736_v8  ;;  %v3446_v43 = vld [vmem:[%s9345_s17 + $0x88] sm:$0xff]  ;;  %v3477_v17 = vld [vmem:[%s9345_s17 + $0x180] sm:$0xff] }
 0x80d   :  { %5096 = verf.f32 %v3089_v42  ;;  %v3445_v42 = vld [vmem:[%s9345_s17 + $0x80] sm:$0xff] }
 0x80e   :  { %v3009_v11 = vadd.f32 %v3700_v23, %v3661_v48  ;;  %v4967_v23 = vpack.c.bf16 %v3446_v43, %v3445_v42 }
 0x810   :  { %v3084_v12 = vadd.f32 %v3738_v9, %v3009_v11  ;;  %v3478_v9 = vld [vmem:[%s9345_s17 + $0x188] sm:$0xff]  ;;  %v3429_v11 = vld [vmem:[%s9345_s17] sm:$0xff]  ;;  %4968 = vmatprep.subr.bf16.mxu0 %v4967_v23 }
 0x812   :  { %v3090_v13 = vmul.f32 0.70710677, %v3084_v12  ;;  %v3088_v19 = vmul.f32 0.5, %v3084_v12  ;;  %v3430_v12 = vld [vmem:[%s9345_s17 + $0x8] sm:$0xff] }
 0x814   :  { %5098 = verf.f32 %v3090_v13  ;;  %v4999_v13 = vpack.c.bf16 %v3478_v9, %v3477_v17 }
 0x816   :  { %5000 = vmatprep.subr.bf16.mxu1 %v4999_v13 }
 0x817   :  { %v5097_v15 = vpop.eup %5096 }
 0x818   :  { %v3093_v14 = vadd.f32 1.0, %v5097_v15  ;;  %v4969_v15 = vpack.c.bf16 %v3430_v12, %v3429_v11 }
 0x81a   :  { %v3095_v28 = vmul.f32 %v3093_v14, %v3087_v16  ;;  %v3461_v16 = vld [vmem:[%s9345_s17 + $0x100] sm:$0xff]  ;;  %v3462_v14 = vld [vmem:[%s9345_s17 + $0x108] sm:$0xff] }
 0x81c   :  { %3248 = vmatmul.mubr.f32.vlgmr.msra.gmra.mrb[20].mxu0 %v3095_v28  ;;  %3325 = vmatmul.mubr.f32.vlgmr.msra.gmra.mrb[24].mxu1 %v3095_v28  ;;  %v3447_v28 = vld [vmem:[%s9345_s17 + $0x90] sm:$0xff] }
 0x81d   :  { %3253 = vmatprep.mubr.f32.mxu0 %v5116_v31  ;;  %3330 = vmatprep.mubr.f32.mxu1 %v5116_v31 }
 0x81e   :  { %v5099_v18 = vpop.eup %5098  ;;  %4970 = vmatpush3.bf16.msra.mxu0 %v4969_v15 }
 0x81f   :  { %v3094_v20 = vadd.f32 1.0, %v5099_v18  ;;  %v5001_v18 = vpack.c.bf16 %v3462_v14, %v3461_v16  ;;  %v3450_v16 = vld [vmem:[%s9345_s17 + $0xa8] sm:$0xff]  ;;  %v3481_v14 = vld [vmem:[%s9345_s17 + $0x1a0] sm:$0xff] }
 0x821   :  { %v3096_v22 = vmul.f32 %v3094_v20, %v3088_v19  ;;  %v3448_v19 = vld [vmem:[%s9345_s17 + $0x98] sm:$0xff]  ;;  %v3479_v20 = vld [vmem:[%s9345_s17 + $0x190] sm:$0xff]  ;;  %5002 = vmatpush3.bf16.msra.mxu1 %v5001_v18  ;;  %v3482_v18 = vld [vmem:[%s9345_s17 + $0x1a8] sm:$0xff] }
 0x822   :  { %v4971_v25 = vpack.c.bf16 %v3448_v19, %v3447_v28  ;;  %v3433_v19 = vld [vmem:[%s9345_s17 + $0x20] sm:$0xff] }
 0x823   :  { %3254 = vmatmul.mubr.f32.gmra.mrb[22].mxu0 %v3096_v22  ;;  %3331 = vmatmul.mubr.f32.gmra.mrb[26].mxu1 %v3096_v22  ;;  %v3480_v22 = vld [vmem:[%s9345_s17 + $0x198] sm:$0xff] }
 0x824   :  { %4972 = vmatprep.subr.bf16.mxu0 %v4971_v25 }
 0x8ef   :  { %v3249_v26 = vpop.f32.mrb[20].mxu0  ;;  %v3326_v34 = vpop.f32.mrb[24].mxu1 }
 0x8f0   :  { %v3250_v37 = vadd.f32 %v3249_v26, %v3166_v27  ;;  %v3251_v31 = vpop.f32.mrb[21].mxu0  ;;  %v3328_v38 = vpop.f32.mrb[25].mxu1  ;;  %v3327_v45 = vadd.f32 %v3326_v34, %v3174_v24  ;;  %v3432_v26 = vld [vmem:[%s9345_s17 + $0x18] sm:$0xff] }
 0x8f1   :  { %v3252_v39 = vadd.f32 %v3251_v31, %v3170_v29  ;;  %v3329_v7 = vadd.f32 %v3328_v38, %v3178_v49  ;;  %v3464_v31 = vld [vmem:[%s9345_s17 + $0x118] sm:$0xff] }
 0x8f3   :  { %v3337_v10 = vadd.f32 %v3252_v39, %v3250_v37 }
 0x8f5   :  { %v3338_v51 = vadd.f32 %v3337_v10, %v3327_v45 }
 0x8f6   :  { %v3255_v47 = vpop.f32.mrb[22].mxu0  ;;  %v3332_v52 = vpop.f32.mrb[26].mxu1 }
 0x8f7   :  { %v9041_v0 = vadd.f32 %v3255_v47, %v3166_v27  ;;  %v3257_v32 = vpop.f32.mrb[23].mxu0  ;;  %v3334_v50 = vpop.f32.mrb[27].mxu1  ;;  %v3339_v48 = vadd.f32 %v3338_v51, %v3329_v7  ;;  %v9043_v44 = vadd.f32 %v3332_v52, %v3174_v24  ;;  %v5003_v27 = vpack.c.bf16 %v3480_v22, %v3479_v20  ;;  %v3463_v24 = vld [vmem:[%s9345_s17 + $0x110] sm:$0xff]  ;;  %v3434_v20 = vld [vmem:[%s9345_s17 + $0x28] sm:$0xff] }
 0x8f8   :  { %v3258_v35 = vadd.f32 %v3257_v32, %v3170_v29  ;;  %v9048_v57 = vadd.f32 %v3334_v50, %v3178_v49  ;;  %v3431_v29 = vld [vmem:[%s9345_s17 + $0x10] sm:$0xff]  ;;  %v5005_v38 = vpack.c.bf16 %v3464_v31, %v3463_v24  ;;  %v5007_v22 = vpack.c.bf16 %v3482_v18, %v3481_v14  ;;  %v3440_v14 = vld [vmem:[%s9345_s17 + $0x58] sm:$0xff] }
 0x8f9   :  { %v3342_v46 = vsel %vm2736_vm2, %v9041_v0, 0.0  ;;  %3340 = vadd.xlane.f32.xlu0 %v3339_v48  ;;  %v3345_v55 = vsel %vm2736_vm2, %v9043_v44, 0.0  ;;  %v4973_v34 = vpack.c.bf16 %v3432_v26, %v3431_v29  ;;  %5004 = vmatprep.subr.bf16.mxu1 %v5003_v27  ;;  %v4977_v25 = vpack.c.bf16 %v3434_v20, %v3433_v19  ;;  %v3465_v27 = vld [vmem:[%s9345_s17 + $0x120] sm:$0xff]  ;;  %v3466_v29 = vld [vmem:[%s9345_s17 + $0x128] sm:$0xff]  ;;  %v3451_v24 = vld [vmem:[%s9345_s17 + $0xb0] sm:$0xff] }
 0x8fa   :  { %v3343_v36 = vsel %vm2736_vm2, %v3258_v35, 0.0  ;;  %v3347_v56 = vsel %vm2736_vm2, %v9048_v57, 0.0  ;;  %5006 = vmatpush3.bf16.msra.mxu1 %v5005_v38  ;;  %v5009_v26 = vpack.c.bf16 %v3466_v29, %v3465_v27  ;;  %v3483_v31 = vld [vmem:[%s9345_s17 + $0x1b0] sm:$0xff]  ;;  %v3472_v20 = vld [vmem:[%s9345_s17 + $0x158] sm:$0xff]  ;;  %v3458_v27 = vld [vmem:[%s9345_s17 + $0xe8] sm:$0xff] }
 0x8fb   :  { %v3344_v62 = vadd.f32 %v3343_v36, %v3342_v46  ;;  %4974 = vmatpush3.bf16.msra.mxu0 %v4973_v34  ;;  %5008 = vmatprep.subr.bf16.mxu1 %v5007_v22  ;;  %v3452_v34 = vld [vmem:[%s9345_s17 + $0xb8] sm:$0xff]  ;;  %v3471_v19 = vld [vmem:[%s9345_s17 + $0x150] sm:$0xff]  ;;  %v3457_v22 = vld [vmem:[%s9345_s17 + $0xe0] sm:$0xff] }
 0x8fc   :  { %v4979_v38 = vpack.c.bf16 %v3452_v34, %v3451_v24  ;;  %v3489_v29 = vld [vmem:[%s9345_s17 + $0x1e0] sm:$0xff]  ;;  %v4991_v24 = vpack.c.bf16 %v3458_v27, %v3457_v22 }
 0x8fd   :  { %v3346_v3 = vadd.f32 %v3345_v55, %v3344_v62 }
 0x8fe   :  { %5010 = vmatpush3.bf16.msra.mxu1 %v5009_v26  ;;  %v3490_v26 = vld [vmem:[%s9345_s17 + $0x1e8] sm:$0xff] }
 0x8ff   :  { %v3348_v8 = vadd.f32 %v3347_v56, %v3346_v3  ;;  %v5023_v34 = vpack.c.bf16 %v3490_v26, %v3489_v29 }
 0x901   :  { %3349 = vadd.xlane.f32.xlu1 %v3348_v8 }
 0x986   :  { %v3341_v49 = vpop.xlane.xlu0 %3340 }
 0x987   :  { %v3351_v10 = vmul.f32 0.0025, %v3341_v49  ;;  %v3484_v49 = vld [vmem:[%s9345_s17 + $0x1b8] sm:$0xff] }
 0x989   :  { %v9102_v51 = vsub.f32 %v3250_v37, %v3351_v10  ;;  %v9104_v47 = vsub.f32 %v3252_v39, %v3351_v10  ;;  %v9106_v52 = vsub.f32 %v3327_v45, %v3351_v10  ;;  %v3356_v32 = vsub.f32 %v3329_v7, %v3351_v10  ;;  %v3435_v10 = vld [vmem:[%s9345_s17 + $0x30] sm:$0xff] }
 0x98b   :  { %v9109_v50 = vmul.f32 %v8542_v40, %v3356_v32  ;;  %v3369_v48 = vmul.f32 %v9102_v51, %v9102_v51  ;;  %v3370_v46 = vmul.f32 %v9104_v47, %v9104_v47  ;;  %v3371_v36 = vmul.f32 %v9106_v52, %v9106_v52  ;;  %v3436_v32 = vld [vmem:[%s9345_s17 + $0x38] sm:$0xff] }
 0x98d   :  { %v3377_v62 = vadd.f32 %v3370_v46, %v3369_v48  ;;  %v3372_v39 = vmul.f32 %v9109_v50, %v9109_v50  ;;  %v5011_v48 = vpack.c.bf16 %v3484_v49, %v3483_v31  ;;  %v4981_v46 = vpack.c.bf16 %v3436_v32, %v3435_v10  ;;  %v3441_v31 = vld [vmem:[%s9345_s17 + $0x60] sm:$0xff]  ;;  %v3474_v32 = vld [vmem:[%s9345_s17 + $0x168] sm:$0xff] }
 0x98e   :  { %v3350_v37 = vpop.xlane.xlu1 %3349  ;;  %v3473_v49 = vld [vmem:[%s9345_s17 + $0x160] sm:$0xff] }
 0x98f   :  { %v3352_v55 = vmul.f32 0.0025, %v3350_v37  ;;  %v3378_v45 = vadd.f32 %v3377_v62, %v3371_v36  ;;  %v3467_v36 = vld [vmem:[%s9345_s17 + $0x130] sm:$0xff]  ;;  %v3468_v62 = vld [vmem:[%s9345_s17 + $0x138] sm:$0xff]  ;;  %5012 = vmatprep.subr.bf16.mxu1 %v5011_v48 }
 0x990   :  { %v5013_v37 = vpack.c.bf16 %v3468_v62, %v3467_v36  ;;  %v3459_v48 = vld [vmem:[%s9345_s17 + $0xf0] sm:$0xff]  ;;  %v5025_v36 = vpack.c.bf16 %v3474_v32, %v3473_v49 }
 0x991   :  { %v9120_v7 = vsub.f32 %v9041_v0, %v3352_v55  ;;  %v9122_v3 = vsub.f32 %v3258_v35, %v3352_v55  ;;  %v3379_v56 = vadd.f32 %v3378_v45, %v3372_v39  ;;  %v9125_v8 = vsub.f32 %v9043_v44, %v3352_v55  ;;  %v3454_v39 = vld [vmem:[%s9345_s17 + $0xc8] sm:$0xff]  ;;  %v3485_v45 = vld [vmem:[%s9345_s17 + $0x1c0] sm:$0xff] }
 0x992   :  { %v3360_v42 = vsub.f32 %v9048_v57, %v3352_v55  ;;  %v3453_v55 = vld [vmem:[%s9345_s17 + $0xc0] sm:$0xff]  ;;  %5014 = vmatpush3.bf16.msra.mxu1 %v5013_v37  ;;  %v3491_v37 = vld [vmem:[%s9345_s17 + $0x1f0] sm:$0xff] }
 0x993   :  { %3380 = vadd.xlane.f32.xlu0 %v3379_v56  ;;  %v3373_v43 = vmul.f32 %v9120_v7, %v9120_v7  ;;  %v3374_v17 = vmul.f32 %v9122_v3, %v9122_v3  ;;  %v3375_v23 = vmul.f32 %v9125_v8, %v9125_v8  ;;  %v4983_v56 = vpack.c.bf16 %v3454_v39, %v3453_v55  ;;  %v3492_v55 = vld [vmem:[%s9345_s17 + $0x1f8] sm:$0xff]  ;;  %v3443_v39 = vld [vmem:[%s9345_s17 + $0x70] sm:$0xff] }
 0x994   :  { %v9135_v0 = vmul.f32 %v8542_v40, %v3360_v42  ;;  %v3449_v40 = vld [vmem:[%s9345_s17 + $0xa0] sm:$0xff]  ;;  %v3486_v42 = vld [vmem:[%s9345_s17 + $0x1c8] sm:$0xff] }
 0x995   :  { %v3382_v35 = vsel %vm2736_vm2, %v3373_v43, 0.0  ;;  %v3383_v44 = vsel %vm2736_vm2, %v3374_v17, 0.0  ;;  %v3385_v11 = vsel %vm2736_vm2, %v3375_v23, 0.0  ;;  %v4975_v28 = vpack.c.bf16 %v3450_v16, %v3449_v40  ;;  %v3437_v43 = vld [vmem:[%s9345_s17 + $0x40] sm:$0xff]  ;;  %v3438_v17 = vld [vmem:[%s9345_s17 + $0x48] sm:$0xff]  ;;  %v3488_v40 = vld [vmem:[%s9345_s17 + $0x1d8] sm:$0xff] }
 0x996   :  { %v3376_v57 = vmul.f32 %v9135_v0, %v9135_v0  ;;  %v3384_v9 = vadd.f32 %v3383_v44, %v3382_v35  ;;  %v5015_v23 = vpack.c.bf16 %v3486_v42, %v3485_v45  ;;  %v4985_v35 = vpack.c.bf16 %v3438_v17, %v3437_v43  ;;  %v3469_v44 = vld [vmem:[%s9345_s17 + $0x140] sm:$0xff]  ;;  %v3439_v16 = vld [vmem:[%s9345_s17 + $0x50] sm:$0xff]  ;;  %v3476_v43 = vld [vmem:[%s9345_s17 + $0x178] sm:$0xff] }
 0x997   :  { %4976 = vmatprep.subr.bf16.mxu0 %v4975_v28  ;;  %v4989_v18 = vpack.c.bf16 %v3440_v14, %v3439_v16  ;;  %v5027_v45 = vpack.c.bf16 %v3492_v55, %v3491_v37  ;;  %v3475_v42 = vld [vmem:[%s9345_s17 + $0x170] sm:$0xff] }
 0x998   :  { %v3386_v12 = vadd.f32 %v3385_v11, %v3384_v9  ;;  %v3387_v13 = vsel %vm2736_vm2, %v3376_v57, 0.0  ;;  %4978 = vmatpush3.bf16.msra.mxu0 %v4977_v25  ;;  %v3470_v57 = vld [vmem:[%s9345_s17 + $0x148] sm:$0xff]  ;;  %5016 = vmatprep.subr.bf16.mxu1 %v5015_v23  ;;  %v3455_v11 = vld [vmem:[%s9345_s17 + $0xd0] sm:$0xff]  ;;  %v5021_v25 = vpack.c.bf16 %v3472_v20, %v3471_v19  ;;  %v5029_v23 = vpack.c.bf16 %v3476_v43, %v3475_v42 }
 0x999   :  { %4980 = vmatprep.subr.bf16.mxu0 %v4979_v38  ;;  %v5017_v9 = vpack.c.bf16 %v3470_v57, %v3469_v44  ;;  %v3442_v38 = vld [vmem:[%s9345_s17 + $0x68] sm:$0xff] }
 0x99a   :  { %v3388_v15 = vadd.f32 %v3387_v13, %v3386_v12  ;;  %v3456_v12 = vld [vmem:[%s9345_s17 + $0xd8] sm:$0xff]  ;;  %v3487_v13 = vld [vmem:[%s9345_s17 + $0x1d0] sm:$0xff]  ;;  %v4993_v10 = vpack.c.bf16 %v3442_v38, %v3441_v31 }
 0x99b   :  { %5018 = vmatpush3.bf16.msra.mxu1 %v5017_v9  ;;  %v5019_v28 = vpack.c.bf16 %v3488_v40, %v3487_v13 }
 0x99c   :  { %3389 = vadd.xlane.f32.xlu1 %v3388_v15  ;;  %4982 = vmatpush3.bf16.msra.mxu0 %v4981_v46  ;;  %v4987_v15 = vpack.c.bf16 %v3456_v12, %v3455_v11  ;;  %v3460_v46 = vld [vmem:[%s9345_s17 + $0xf8] sm:$0xff] }
 0x99d   :  { %4984 = vmatprep.subr.bf16.mxu0 %v4983_v56  ;;  %5020 = vmatprep.subr.bf16.mxu1 %v5019_v28  ;;  %v4995_v62 = vpack.c.bf16 %v3460_v46, %v3459_v48  ;;  %v3444_v56 = vld [vmem:[%s9345_s17 + $0x78] sm:$0xff] }
 0x99e   :  { %v4997_v17 = vpack.c.bf16 %v3444_v56, %v3443_v39 }
 0x99f   :  { %5022 = vmatpush3.bf16.msra.mxu1 %v5021_v25 }
 0x9a0   :  { %4986 = vmatpush3.bf16.msra.mxu0 %v4985_v35  ;;  %5024 = vmatprep.subr.bf16.mxu1 %v5023_v34 }
 0x9a1   :  { %4988 = vmatprep.subr.bf16.mxu0 %v4987_v15 }
 0x9a3   :  { %5026 = vmatpush3.bf16.msra.mxu1 %v5025_v36 }
 0x9a4   :  { %4990 = vmatpush3.bf16.msra.mxu0 %v4989_v18  ;;  %5028 = vmatprep.subr.bf16.mxu1 %v5027_v45 }
 0x9a5   :  { %4992 = vmatprep.subr.bf16.mxu0 %v4991_v24 }
 0x9a7   :  { %5030 = vmatpush3.bf16.msra.mxu1 %v5029_v23 }
 0x9a8   :  { %4994 = vmatpush3.bf16.msra.mxu0 %v4993_v10 }
 0x9a9   :  { %4996 = vmatprep.subr.bf16.mxu0 %v4995_v62 }
 0x9ac   :  { %4998 = vmatpush3.bf16.msra.mxu0 %v4997_v17 }
 0xa20   :  { %v3381_v35 = vpop.xlane.xlu0 %3380 }
 0xa21   :  { %v3391_v44 = vmul.f32 0.0025, %v3381_v35 }
 0xa23   :  { %v3393_v57 = vadd.f32 1e-05, %v3391_v44 }
 0xa25   :  { %5100 = vrsqrt.f32 %v3393_v57 }
 0xa29   :  { %v3390_v9 = vpop.xlane.xlu1 %3389 }
 0xa2a   :  { %v3392_v11 = vmul.f32 0.0025, %v3390_v9 }
 0xa2c   :  { %v3394_v12 = vadd.f32 1e-05, %v3392_v11 }
 0xa2e   :  { %5102 = vrsqrt.f32 %v3394_v12 }
 0xa2f   :  { %v5101_v13 = vpop.eup %5100 }
 0xa30   :  { %v3398_v15 = vmul.f32 %v5101_v13, %v9104_v47  ;;  %v3400_v40 = vmul.f32 %v5101_v13, %v9109_v50  ;;  %v3397_v16 = vmul.f32 %v5101_v13, %v9102_v51  ;;  %v3399_v14 = vmul.f32 %v5101_v13, %v9106_v52 }
 0xa32   :  { %v3406_v28 = vmul.f32 %v3398_v15, %v8752_v58  ;;  %v3408_v18 = vmul.f32 %v3400_v40, %v8755_v60  ;;  %v3405_v19 = vmul.f32 %v3397_v16, %v8758_v53  ;;  %v3407_v20 = vmul.f32 %v3399_v14, %v8761_v54 }
 0xa34   :  { %v3414_v22 = vadd.f32 %v3406_v28, %v8764_v61  ;;  %v3416_v25 = vadd.f32 %v3408_v18, %v8767_v1  ;;  %v3413_v47 = vadd.f32 %v3405_v19, %v8770_v2  ;;  %v3415_v50 = vadd.f32 %v3407_v20, %v8773_v4 }
 0xa36   :  { %v3422_v51 = vadd.f32 %v3414_v22, %v8814_v63  ;;  %v3424_v52 = vadd.f32 %v3416_v25, %v8819_v21  ;;  %v3421_v27 = vadd.f32 %v3413_v47, %v8824_v30  ;;  %v3423_v29 = vadd.f32 %v3415_v50, %v8829_v33 }
 0xa38   :  { %v5103_v26 = vpop.eup %5102  ;;  %3564 = vmatprep.mubr.f32.mxu0 %v3422_v51  ;;  %3639 = vmatprep.mubr.f32.mxu1 %v3424_v52 }
 0xa39   :  { %3565 = vmatmul.mubr.f32.vlgmr.msra.gmra.mrb[24].mxu0 %v3421_v27  ;;  %3640 = vmatmul.mubr.f32.vlgmr.msra.gmra.mrb[28].mxu1 %v3423_v29  ;;  %v3402_v24 = vmul.f32 %v5103_v26, %v9122_v3  ;;  %v3404_v34 = vmul.f32 %v5103_v26, %v9135_v0  ;;  %v3401_v31 = vmul.f32 %v5103_v26, %v9120_v7 }
 0xa3a   :  { %v3403_v38 = vmul.f32 %v5103_v26, %v9125_v8 }
 0xa3b   :  { %v3410_v63 = vmul.f32 %v3402_v24, %v8752_v58  ;;  %v3412_v21 = vmul.f32 %v3404_v34, %v8755_v60  ;;  %v3409_v30 = vmul.f32 %v3401_v31, %v8758_v53 }
 0xa3c   :  { %v3411_v33 = vmul.f32 %v3403_v38, %v8761_v54 }
 0xa3d   :  { %v3418_v49 = vadd.f32 %v3410_v63, %v8764_v61  ;;  %v3420_v10 = vadd.f32 %v3412_v21, %v8767_v1  ;;  %v3417_v3 = vadd.f32 %v3409_v30, %v8770_v2  ;;  %v3662_v61 = vld [vmem:[%s9346_s18] ss:$0 sm:$0xff] }
 0xa3e   :  { %v3419_v0 = vadd.f32 %v3411_v33, %v8773_v4 }
 0xa3f   :  { %v3426_v7 = vadd.f32 %v3418_v49, %v8862_v59  ;;  %v3428_v8 = vadd.f32 %v3420_v10, %v8867_v5  ;;  %v3425_v58 = vadd.f32 %v3417_v3, %v8872_v6 }
 0xa40   :  { %v3427_v60 = vadd.f32 %v3419_v0, %v8877_v41 }
 0xa41   :  { %3569 = vmatprep.mubr.f32.mxu0 %v3426_v7  ;;  %3644 = vmatprep.mubr.f32.mxu1 %v3428_v8 }
 0xa42   :  { %3570 = vmatmul.mubr.f32.gmra.mrb[26].mxu0 %v3425_v58  ;;  %3645 = vmatmul.mubr.f32.gmra.mrb[30].mxu1 %v3427_v60 }
 0xb0c   :  { %v3771_v53 = vpop.f32.mrb[24].mxu0  ;;  %v3809_v54 = vpop.f32.mrb[28].mxu1 }
 0xb0d   :  { %v3772_v1 = vpop.f32.mrb[25].mxu0  ;;  %v3810_v2 = vpop.f32.mrb[29].mxu1 }
 0xb0e   :  { %v3773_v4 = vadd.f32 %v3772_v1, %v3771_v53  ;;  %v3811_v59 = vadd.f32 %v3810_v2, %v3809_v54 }
 0xb10   :  { %v3567_v32 = vadd.f32 %v3773_v4, %v3662_v61 }
 0xb12   :  { %v3642_v5 = vadd.f32 %v3811_v59, %v3567_v32 }
 0xb14   :  { %3650 = vst [vmem:[%s9347_s19] sm:$0xff] %v3642_v5 }
 0xb15   :  { %v3774_v6 = vpop.f32.mrb[26].mxu0  ;;  %v3812_v41 = vpop.f32.mrb[30].mxu1 }
 0xb16   :  { %v3775_v48 = vpop.f32.mrb[27].mxu0  ;;  %v3813_v46 = vpop.f32.mrb[31].mxu1 }
 0xb17   :  { %v3776_v36 = vadd.f32 %v3775_v48, %v3774_v6  ;;  %v3814_v62 = vadd.f32 %v3813_v46, %v3812_v41 }
 0xb19   :  { %v3572_v37 = vadd.f32 %v3776_v36, %v3662_v61 }
 0xb1b   :  { %v3647_v55 = vadd.f32 %v3814_v62, %v3572_v37 }
 0xb1d   :  { %3651 = vst [vmem:[%s9347_s19 + $0x8] sm:$0x3] %v3647_v55 }

// kernel: model_forward.2
= control target key start
LH: loop header
LB: loop body
LE: loop exit
PB: predicated region body
PF: predicated region fallthrough
CT: control target
= control target key end

     0   :  { %s9444_s0 = inlined_call_operand.vmem [shape: f32[8,512], index: 0, kind: input, shape index: {}]   ;;  %s9445_s1 = inlined_call_operand.hbm [shape: f32[512,512], index: 1, kind: input, shape index: {}]   ;;  %s9446_s2 = inlined_call_operand.hbm [shape: f32[1,512], index: 2, kind: input, shape index: {}]   ;;  %s9447_s3 = inlined_call_operand.hbm [shape: f32[8,512], index: 3, kind: input, shape index: {}]   ;;  %s9448_s4 = inlined_call_operand.hbm [shape: f32[4,512,1536], index: 4, kind: input, shape index: {}]   ;;  %s9449_s5 = inlined_call_operand.hbm [shape: f32[4,1,1536], index: 5, kind: input, shape index: {}]   ;;  %s9450_s6 = inlined_call_operand.hbm [shape: f32[4,512,512], index: 6, kind: input, shape index: {}]   ;;  %s9451_s7 = inlined_call_operand.hbm [shape: f32[4,1,512], index: 7, kind: input, shape index: {}]   ;;  %s9452_s8 = inlined_call_operand.hbm [shape: f32[4,1,512], index: 8, kind: input, shape index: {}]   ;;  %s9453_s9 = inlined_call_operand.hbm [shape: f32[4,1,512], index: 9, kind: input, shape index: {}]   ;;  %s9454_s10 = inlined_call_operand.hbm [shape: f32[4,1,512], index: 10, kind: input, shape index: {}]   ;;  %s9455_s11 = inlined_call_operand.hbm [shape: f32[4,1,512], index: 11, kind: input, shape index: {}]   ;;  %s9456_s12 = inlined_call_operand.hbm [shape: f32[4,512,128], index: 12, kind: input, shape index: {}]   ;;  %s9457_s13 = inlined_call_operand.hbm [shape: f32[4,1,128], index: 13, kind: input, shape index: {}]   ;;  %s9458_s14 = inlined_call_operand.hbm [shape: f32[4,128,512], index: 14, kind: input, shape index: {}]   ;;  %s9459_s15 = inlined_call_operand.hbm [shape: f32[4,1,512], index: 15, kind: input, shape index: {}]   ;;  %s9460_s16 = inlined_call_operand.vmem [shape: f32[8,512], index: 16, kind: output, shape index: {0}]   ;;  %s9461_s17 = inlined_call_operand.vmem [shape: f32[8,512], index: 17, kind: output, shape index: {1}]  }
   0x1   :  { %9500 = sst [smem:[#allocation40_spill]] %s9444_s0 }
   0x2   :  { %9501 = sst [smem:[#allocation41_spill]] %s9445_s1 }
   0x3   :  { %9502 = sst [smem:[#allocation42_spill]] %s9446_s2 }
   0x4   :  { %9503 = sst [smem:[#allocation43_spill]] %s9448_s4 }
   0x5   :  { %9504 = sst [smem:[#allocation44_spill]] %s9450_s6 }
   0x6   :  { %9505 = sst [smem:[#allocation45_spill]] %s9452_s8 }
   0x7   :  { %9506 = sst [smem:[#allocation46_spill]] %s9454_s10 }
   0x8   :  { %9507 = sst [smem:[#allocation47_spill]] %s9455_s11 }
   0x9   :  { %9508 = sst [smem:[#allocation48_spill]] %s9456_s12 }
   0xa   :  { %9509 = sst [smem:[#allocation49_spill]] %s9457_s13 }
   0xb   :  { %9510 = sst [smem:[#allocation50_spill]] %s9459_s15 }
   0xc   :  { %9511 = sst [smem:[#allocation51_spill]] %s9460_s16 }
   0xd   :  { %9512 = sst [smem:[#allocation52_spill]] %s9461_s17 }
   0xe   :  { %23 = vsyncpa [#allocation3], 0 }
   0xf   :  { %24 = vsyncpa [#allocation5], 0 }
  0x10   :  { %25 = vsyncpa [#allocation8], 0 }
  0x11   :  { %27 = vsyncpa [#allocation8 + $0x1], 0 }
  0x12   :  { %28 = vsyncpa [#allocation11], 0 }
  0x13   :  { %30 = vsyncpa [#allocation11 + $0x1], 0 }
  0x14   :  { %31 = vsyncpa [#allocation14], 0 }
  0x15   :  { %33 = vsyncpa [#allocation14 + $0x1], 0 }
  0x16   :  { %34 = vsyncpa [#allocation17], 0 }
  0x17   :  { %36 = vsyncpa [#allocation17 + $0x1], 0 }
  0x18   :  { %37 = vsyncpa [#allocation20], 0 }
  0x19   :  { %39 = vsyncpa [#allocation20 + $0x1], 0 }
  0x1a   :  { %40 = vsyncpa [#allocation23], 0 }
  0x1b   :  { %42 = vsyncpa [#allocation23 + $0x1], 0  ;;  %s7429_s24 = smov 0   ;;  %s7431_s25 = smov 0  }
  0x1c   :  { %s7433_s26 = smov 0   ;;  %s7435_s27 = smov 0  }
  0x1d LB: > { %9513 = sst [smem:[#allocation33_spill]] %s7307_s25  ;;  %s7448_s28 = sadd.s32 4294967295, %s7315_s27   ;;  %s7315_s27 = sphi %s7435_s27, %s9577_s27   ;;  %s7311_s26 = sphi %s7433_s26, %s9580_s26   ;;  %s7307_s25 = sphi %s7431_s25, %s9579_s25   ;;  %s7303_s24 = sphi %s7429_s24, %s9578_s24  }
  0x1e   : > { %9514 = sst [smem:[#allocation34_spill]] %s7311_s26  ;;  %s7451_s29 = sadd.s32 1, %s7315_s27  }
  0x1f   : > { %9515 = sst [smem:[#allocation35_spill]] %s7448_s28  ;;  %s136_s0 = ssub.s32 %s7315_s27, %s7451_s29 }
  0x20   : > { %9516 = sst [smem:[#allocation36_spill]] %s7451_s29  ;;  %s139_s30 = sadd.s32 1, %s7311_s26 }
  0x21   : > { %p137_p0 = scmp.eq.s32.totalorder %s136_s0, 0  ;;  %p146_p1 = scmp.ne.s32.totalorder %s7311_s26, %s7307_s25 }
  0x22   : > { %p147_p2 = scmp.eq.s32.totalorder %s7315_s27, 0  ;;  %p152_p3 = scmp.ne.s32.totalorder %s7307_s25, %s7303_s24 }
  0x23   : > { %s7461_s18 = scalar_select %p137_p0, %s7311_s26, %s139_s30  }
  0x24   : > { %p7463_p4 = por %p147_p2, %p146_p1  ;;  %p9473_p5 = scmp.eq.s32.totalorder %s7448_s28, 0 }
  0x25   : > { %9517 = sst [smem:[#allocation37_spill]] %s7461_s18  ;;  %p5077_p6 = scmp.ge.s32.totalorder %s7315_s27, 1 }
  0x26   : > { %p491_p7 = scmp.lt.s32.totalorder %s7315_s27, 5  ;;  %p7472_p8 = por %p9473_p5, %p152_p3 }
  0x27   : > { %s7317_s21 = smov [#allocation4]   ;;  %p6749_p12 = scmp.lt.s32.totalorder %s7315_s27, 4 }
  0x28   : > { %s9519_s1 = scalar_select %p7472_p8, 1, 0 }
  0x29   : > { %p7477_p10 = pnand %p5077_p6, %p491_p7  ;;  %s520_s22 = sshll.u32 %s7317_s21, 4  ;;  %s521_s22 = int_to_ptr.vmem [resolvable:$true] %s520_s22 }
  0x2a   : > { %9520 = sst [smem:[#allocation38_spill]] %s9519_s1  ;;  %s7485_s23 = sand.u32 1, %s7315_s27  }
  0x2b   : > { %s9521_s20 = scalar_select %p7477_p10, 1, 0 }
  0x2c   : > { %p6699_p11 = pneg %p7477_p10  ;;  %p7495_p0 = pnand %p6749_p12, %p7463_p4 }
  0x2d   : > { %9522 = sst [smem:[#allocation39_spill]] %s9521_s20  ;;  %s7500_s30 = sand.u32 1, %s7311_s26  }
  0x2e   : > { %p7489_p13 = pnand %p6699_p11, %p9473_p5  ;;  %s6657_s21 = smul.u32 6144, %s7500_s30 }
  0x2f   : > { %s9524_s0 = scalar_select %p7495_p0, 1, 0 }
  0x30   : > { %s9523_s24 = scalar_select %p7489_p13, 1, 0 }
  0x31   : > { %s9525_s2 = sld [smem:[#allocation42_spill]]  ;;  %p7511_p2 = pneg %p7489_p13 }
  0x33   : > { %s9526_s19 = scalar_select %p7511_p2, 1, 0 }
  0x37   : > { %s6809_s17 = scalar_lea.hbm %s9525_s2, 64 }
  0x38   : > { %p6810_p1 = scmp.ne.s32.totalorder %s9525_s2, %s6809_s17  ;;  %p6816_p6 = scmp.lt.u32.totalorder %s6809_s17, %s9525_s2 }
  0x3a   : > { %p6812_p3 = pnand %p7511_p2, %p6810_p1 }
  0x3c   : > { %p6813_p4 = pneg %p6812_p3 }
  0x3e   : > { %p6818_p7 = pnand %p6816_p6, %p6813_p4 }
  0x40   : > { %6821 = shalt.err (!%p6818_p7)
}
  0x41   : > { %s6822_s29 = scalar_lea.vmem %s521_s22, 64  ;;  %p6830_p5 = scmp.lt.s32.totalorder %s521_s22, %s521_s22 }
  0x42   : > { %p6823_p11 = scmp.ne.s32.totalorder %s521_s22, %s6822_s29  ;;  %p6831_p8 = scmp.lt.s32.totalorder %s6822_s29, %s6822_s29 }
  0x44   : > { %p6825_p12 = pnand %p6823_p11, %p7511_p2  ;;  %p6832_p10 = por %p6831_p8, %p6830_p5 }
  0x46   : > { %p6826_p9 = pneg %p6825_p12 }
  0x48   : > { %p6833_p0 = pnand %p6832_p10, %p6826_p9 }
  0x4a   : > { %6836 = shalt.err (!%p6833_p0)
}
  0x4b   : > { %6705 = dma.hbm_to_vmem [thread:$0]  (!%p7489_p13), %s9525_s2, 64, %s521_s22, [#allocation5]  }
  0x4c   : > { %s6658_s17 = smul.u32 98304, %s7315_s27  ;;  %s546_s25 = scalar_lea.vmem [#allocation7], %s6657_s21 }
  0x4d   : > { %s553_s26 = sshll.u32 %s546_s25, 4  ;;  %s9527_s4 = sld [smem:[#allocation43_spill]]  ;;  %s7528_s26 = int_to_ptr.vmem [resolvable:$true] %s553_s26 }
  0x4e   : > { %s9488_s20 = scalar_lea.sflag [#allocation8], %s7485_s23  ;;  %p9528_p8 = scmp.ne.s32.totalorder %s9524_s0, 0 }
  0x50   : > { %p7540_p9 = pneg %p9528_p8 }
  0x52   : > { %s9529_s22 = scalar_select %p7540_p9, 1, 0 }
  0x53   : > { %s7533_s29 = scalar_lea.hbm %s9527_s4, %s6658_s17  ;;  %s6842_s18 = scalar_lea.hbm %s9527_s4, 393216 }
  0x54   : > { %s6837_s16 = scalar_lea.hbm %s7533_s29, 98304  ;;  %p6843_p1 = scmp.lt.u32.totalorder %s7533_s29, %s9527_s4 }
  0x55   : > { %p6838_p5 = scmp.ne.s32.totalorder %s7533_s29, %s6837_s16  ;;  %p6844_p3 = scmp.lt.u32.totalorder %s6842_s18, %s6837_s16 }
  0x56   : > { %p6846_p6 = scmp.lt.u32.totalorder %s6837_s16, %s7533_s29 }
  0x57   : > { %p6840_p10 = pnand %p7540_p9, %p6838_p5  ;;  %p6845_p4 = por %p6844_p3, %p6843_p1 }
  0x59   : > { %p6841_p0 = pneg %p6840_p10  ;;  %p6847_p7 = por %p6846_p6, %p6845_p4 }
  0x5b   : > { %p6848_p11 = pnand %p6847_p7, %p6841_p0 }
  0x5d   : > { %6851 = shalt.err (!%p6848_p11)
}
  0x5e   : > { %s6852_s1 = scalar_lea.vmem %s7528_s26, 98304  ;;  %s7318_s21 = smov [#allocation7]  }
  0x5f   : > { %p6853_p12 = scmp.ne.s32.totalorder %s7528_s26, %s6852_s1  ;;  %s6857_s28 = sshll.u32 %s7318_s21, 4  ;;  %s6858_s28 = int_to_ptr.vmem [resolvable:$false] %s6857_s28 }
  0x60   : > { %s6859_s17 = scalar_lea.vmem %s6858_s28, 196608  ;;  %p6860_p13 = scmp.lt.s32.totalorder %s7528_s26, %s6858_s28 }
  0x61   : > { %p6855_p5 = pnand %p6853_p12, %p7540_p9  ;;  %p6861_p2 = scmp.lt.s32.totalorder %s6859_s17, %s6852_s1 }
  0x63   : > { %p6856_p10 = pneg %p6855_p5  ;;  %p6862_p1 = por %p6861_p2, %p6860_p13 }
  0x65   : > { %p6863_p3 = pnand %p6862_p1, %p6856_p10 }
  0x67   : > { %6866 = shalt.err (!%p6863_p3)
}
  0x68   : > { %s7319_s16 = smov 1536   ;;  %s7320_s18 = smov 96  }
  0x69   : > { %6712 = dma.hbm_to_vmem [thread:$0]  (!%p9528_p8), %s7533_s29, 98304, %s7528_s26, %s9488_s20, %s7319_s16, %s7319_s16, %s7320_s18  }
  0x6a   : > { %s5084_s25 = sshll.u32 %s7500_s30, 11  ;;  %s5132_s21 = sshll.u32 %s7315_s27, 15 }
  0x6b   : > { %s9530_s6 = sld [smem:[#allocation44_spill]]  ;;  %s586_s2 = scalar_lea.vmem [#allocation10], %s5084_s25 }
  0x6c   : > { %s593_s4 = sshll.u32 %s586_s2, 4  ;;  %s7575_s15 = sshll.u32 %s7500_s30, 2  ;;  %s7572_s4 = int_to_ptr.vmem [resolvable:$true] %s593_s4 }
  0x6d   : > { %s9487_s13 = scalar_lea.sflag [#allocation11], %s7485_s23 }
  0x71   : > { %s7570_s17 = scalar_lea.hbm %s9530_s6, %s5132_s21  ;;  %s6872_s16 = scalar_lea.hbm %s9530_s6, 131072 }
  0x72   : > { %s6867_s11 = scalar_lea.hbm %s7570_s17, 32768  ;;  %p6873_p4 = scmp.lt.u32.totalorder %s7570_s17, %s9530_s6 }
  0x73   : > { %p6868_p13 = scmp.ne.s32.totalorder %s7570_s17, %s6867_s11  ;;  %p6874_p6 = scmp.lt.u32.totalorder %s6872_s16, %s6867_s11 }
  0x74   : > { %p6876_p11 = scmp.lt.u32.totalorder %s6867_s11, %s7570_s17 }
  0x75   : > { %p6870_p2 = pnand %p6868_p13, %p7540_p9  ;;  %p6875_p7 = por %p6874_p6, %p6873_p4 }
  0x77   : > { %p6871_p0 = pneg %p6870_p2  ;;  %p6877_p12 = por %p6876_p11, %p6875_p7 }
  0x79   : > { %p6878_p5 = pnand %p6877_p12, %p6871_p0 }
  0x7b   : > { %6881 = shalt.err (!%p6878_p5)
}
  0x7c   : > { %s6882_s2 = scalar_lea.vmem %s7572_s4, 32768  ;;  %s7321_s25 = smov [#allocation10]  }
  0x7d   : > { %p6883_p10 = scmp.ne.s32.totalorder %s7572_s4, %s6882_s2  ;;  %s6887_s1 = sshll.u32 %s7321_s25, 4  ;;  %s6888_s1 = int_to_ptr.vmem [resolvable:$false] %s6887_s1 }
  0x7e   : > { %s6889_s28 = scalar_lea.vmem %s6888_s1, 65536  ;;  %p6890_p13 = scmp.lt.s32.totalorder %s7572_s4, %s6888_s1 }
  0x7f   : > { %p6885_p1 = pnand %p6883_p10, %p7540_p9  ;;  %p6891_p2 = scmp.lt.s32.totalorder %s6889_s28, %s6882_s2 }
  0x81   : > { %p6886_p3 = pneg %p6885_p1  ;;  %p6892_p4 = por %p6891_p2, %p6890_p13 }
  0x83   : > { %p6893_p6 = pnand %p6892_p4, %p6886_p3 }
  0x85   : > { %6896 = shalt.err (!%p6893_p6)
}
  0x86   : > { %s9489_s11 = smov 512   ;;  %s9494_s26 = smov 32  }
  0x87   : > { %6718 = dma.hbm_to_vmem [thread:$0]  (!%p9528_p8), %s7570_s17, 32768, %s7572_s4, %s9487_s13, %s9489_s11, %s9489_s11, %s9494_s26  }
  0x88   : > { %s7605_s29 = sshll.u32 %s7315_s27, 6  ;;  %s9531_s8 = sld [smem:[#allocation45_spill]] }
  0x89   : > { %s626_s2 = scalar_lea.vmem [#allocation13], %s7575_s15  ;;  %s9492_s1 = scalar_lea.sflag [#allocation14], %s7485_s23 }
  0x8a   : > { %s634_s25 = sshll.u32 %s626_s2, 4  ;;  %s635_s25 = int_to_ptr.vmem [resolvable:$true] %s634_s25 }
  0x8e   : > { %s7611_s21 = scalar_lea.hbm %s9531_s8, %s7605_s29  ;;  %s6902_s13 = scalar_lea.hbm %s9531_s8, 256 }
  0x8f   : > { %s6897_s28 = scalar_lea.hbm %s7611_s21, 64  ;;  %p6903_p12 = scmp.lt.u32.totalorder %s7611_s21, %s9531_s8 }
  0x90   : > { %p6898_p0 = scmp.ne.s32.totalorder %s7611_s21, %s6897_s28  ;;  %p6904_p5 = scmp.lt.u32.totalorder %s6902_s13, %s6897_s28 }
  0x91   : > { %p6906_p1 = scmp.lt.u32.totalorder %s6897_s28, %s7611_s21 }
  0x92   : > { %p6900_p7 = pnand %p6898_p0, %p7540_p9  ;;  %p6905_p10 = por %p6904_p5, %p6903_p12 }
  0x94   : > { %p6901_p11 = pneg %p6900_p7  ;;  %p6907_p3 = por %p6906_p1, %p6905_p10 }
  0x96   : > { %p6908_p13 = pnand %p6907_p3, %p6901_p11 }
  0x98   : > { %6911 = shalt.err (!%p6908_p13)
}
  0x99   : > { %s6912_s2 = scalar_lea.vmem %s635_s25, 64  ;;  %s7324_s20 = smov [#allocation13]  }
  0x9a   : > { %p6913_p2 = scmp.ne.s32.totalorder %s635_s25, %s6912_s2  ;;  %s6917_s11 = sshll.u32 %s7324_s20, 4  ;;  %s6918_s11 = int_to_ptr.vmem [resolvable:$false] %s6917_s11 }
  0x9b   : > { %s6919_s4 = scalar_lea.vmem %s6918_s11, 128  ;;  %p6920_p0 = scmp.lt.s32.totalorder %s635_s25, %s6918_s11 }
  0x9c   : > { %p6915_p4 = pnand %p6913_p2, %p7540_p9  ;;  %p6921_p7 = scmp.lt.s32.totalorder %s6919_s4, %s6912_s2 }
  0x9e   : > { %p6916_p6 = pneg %p6915_p4  ;;  %p6922_p8 = por %p6921_p7, %p6920_p0 }
  0xa0   : > { %p6923_p5 = pnand %p6922_p8, %p6916_p6 }
  0xa2   : > { %6926 = shalt.err (!%p6923_p5)
}
  0xa3   : > { %p9532_p12 = scmp.ne.s32.totalorder %s9524_s0, 0  ;;  %s9533_s10 = sld [smem:[#allocation46_spill]] }
  0xa4   : > { %s664_s11 = scalar_lea.vmem [#allocation16], %s7575_s15  ;;  %s9493_s16 = scalar_lea.sflag [#allocation17], %s7485_s23 }
  0xa5   : > { %6724 = dma.hbm_to_vmem [thread:$0]  (!%p9532_p12), %s7611_s21, 64, %s635_s25, %s9492_s1  }
  0xa6   : > { %s672_s17 = sshll.u32 %s664_s11, 4  ;;  %s673_s17 = int_to_ptr.vmem [resolvable:$true] %s672_s17 }
  0xa9   : > { %s7638_s20 = scalar_lea.hbm %s9533_s10, %s7605_s29  ;;  %s6932_s25 = scalar_lea.hbm %s9533_s10, 256 }
  0xaa   : > { %s6927_s18 = scalar_lea.hbm %s7638_s20, 64  ;;  %p6933_p1 = scmp.lt.u32.totalorder %s7638_s20, %s9533_s10 }
  0xab   : > { %p6928_p8 = scmp.ne.s32.totalorder %s7638_s20, %s6927_s18  ;;  %p6934_p3 = scmp.lt.u32.totalorder %s6932_s25, %s6927_s18 }
  0xac   : > { %p6936_p2 = scmp.lt.u32.totalorder %s6927_s18, %s7638_s20 }
  0xad   : > { %p6930_p11 = pnand %p6928_p8, %p7540_p9  ;;  %p6935_p13 = por %p6934_p3, %p6933_p1 }
  0xaf   : > { %p6931_p10 = pneg %p6930_p11  ;;  %p6937_p4 = por %p6936_p2, %p6935_p13 }
  0xb1   : > { %p6938_p6 = pnand %p6937_p4, %p6931_p10 }
  0xb3   : > { %6941 = shalt.err (!%p6938_p6)
}
  0xb4   : > { %s6942_s28 = scalar_lea.vmem %s673_s17, 64  ;;  %s7325_s11 = smov [#allocation16]  }
  0xb5   : > { %p6943_p0 = scmp.ne.s32.totalorder %s673_s17, %s6942_s28  ;;  %s6947_s1 = sshll.u32 %s7325_s11, 4  ;;  %s6948_s1 = int_to_ptr.vmem [resolvable:$false] %s6947_s1 }
  0xb6   : > { %s6949_s2 = scalar_lea.vmem %s6948_s1, 128  ;;  %p6950_p8 = scmp.lt.s32.totalorder %s673_s17, %s6948_s1 }
  0xb7   : > { %p6945_p7 = pnand %p6943_p0, %p7540_p9  ;;  %p6951_p11 = scmp.lt.s32.totalorder %s6949_s2, %s6942_s28 }
  0xb9   : > { %p6946_p5 = pneg %p6945_p7  ;;  %p6952_p12 = por %p6951_p11, %p6950_p8 }
  0xbb   : > { %p6953_p1 = pnand %p6952_p12, %p6946_p5 }
  0xbd   : > { %6956 = shalt.err (!%p6953_p1)
}
  0xbe   : > { %p9534_p3 = scmp.ne.s32.totalorder %s9524_s0, 0  ;;  %s5102_s18 = sshll.u32 %s7500_s30, 9 }
  0xbf   : > { %s5138_s21 = sshll.u32 %s7315_s27, 13  ;;  %s9535_s12 = sld [smem:[#allocation48_spill]] }
  0xc0   : > { %6730 = dma.hbm_to_vmem [thread:$0]  (!%p9534_p3), %s7638_s20, 64, %s673_s17, %s9493_s16  }
  0xc1   : > { %s702_s13 = scalar_lea.vmem [#allocation19], %s5102_s18  ;;  %s9496_s11 = scalar_lea.sflag [#allocation20], %s7485_s23 }
  0xc2   : > { %s709_s28 = sshll.u32 %s702_s13, 4  ;;  %s7672_s28 = int_to_ptr.vmem [resolvable:$true] %s709_s28 }
  0xc5   : > { %s7668_s4 = scalar_lea.hbm %s9535_s12, %s5138_s21  ;;  %s6962_s1 = scalar_lea.hbm %s9535_s12, 32768 }
  0xc6   : > { %s6957_s2 = scalar_lea.hbm %s7668_s4, 8192  ;;  %p6963_p2 = scmp.lt.u32.totalorder %s7668_s4, %s9535_s12 }
  0xc7   : > { %p6958_p12 = scmp.ne.s32.totalorder %s7668_s4, %s6957_s2  ;;  %p6964_p4 = scmp.lt.u32.totalorder %s6962_s1, %s6957_s2 }
  0xc8   : > { %p6966_p0 = scmp.lt.u32.totalorder %s6957_s2, %s7668_s4 }
  0xc9   : > { %p6960_p10 = pnand %p6958_p12, %p7540_p9  ;;  %p6965_p6 = por %p6964_p4, %p6963_p2 }
  0xcb   : > { %p6961_p13 = pneg %p6960_p10  ;;  %p6967_p7 = por %p6966_p0, %p6965_p6 }
  0xcd   : > { %p6968_p5 = pnand %p6967_p7, %p6961_p13 }
  0xcf   : > { %6971 = shalt.err (!%p6968_p5)
}
  0xd0   : > { %s6972_s13 = scalar_lea.vmem %s7672_s28, 8192  ;;  %s7326_s20 = smov [#allocation19]  }
  0xd1   : > { %p6973_p8 = scmp.ne.s32.totalorder %s7672_s28, %s6972_s13  ;;  %s6977_s17 = sshll.u32 %s7326_s20, 4  ;;  %s6978_s17 = int_to_ptr.vmem [resolvable:$false] %s6977_s17 }
  0xd2   : > { %s6979_s16 = scalar_lea.vmem %s6978_s17, 16384  ;;  %p6980_p12 = scmp.lt.s32.totalorder %s7672_s28, %s6978_s17 }
  0xd3   : > { %p6975_p11 = pnand %p6973_p8, %p7540_p9  ;;  %p6981_p10 = scmp.lt.s32.totalorder %s6979_s16, %s6972_s13 }
  0xd5   : > { %p6976_p1 = pneg %p6975_p11  ;;  %p6982_p2 = por %p6981_p10, %p6980_p12 }
  0xd7   : > { %p6983_p4 = pnand %p6982_p2, %p6976_p1 }
  0xd9   : > { %6986 = shalt.err (!%p6983_p4)
}
  0xda   : > { %s7327_s2 = smov 128   ;;  %s7328_s1 = smov 8  }
  0xdb   : > { %6736 = dma.hbm_to_vmem [thread:$0]  (!%p9534_p3), %s7668_s4, 8192, %s7672_s28, %s9496_s11, %s7327_s2, %s7327_s2, %s7328_s1  }
  0xdc   : > { %s7703_s13 = scalar_lea.hbm %s9458_s14, %s5138_s21  ;;  %s740_s17 = scalar_lea.vmem [#allocation22], %s5102_s18 }
  0xdd   : > { %s747_s16 = sshll.u32 %s740_s17, 4  ;;  %s737_s26 = scalar_lea.sflag [#allocation23], %s7485_s23  ;;  %s7707_s16 = int_to_ptr.vmem [resolvable:$true] %s747_s16 }
  0xde   : > { %s6987_s6 = scalar_lea.hbm %s7703_s13, 8192  ;;  %s6992_s21 = scalar_lea.hbm %s9458_s14, 32768 }
  0xdf   : > { %p6988_p13 = scmp.ne.s32.totalorder %s7703_s13, %s6987_s6  ;;  %p6993_p7 = scmp.lt.u32.totalorder %s7703_s13, %s9458_s14 }
  0xe0   : > { %p6994_p5 = scmp.lt.u32.totalorder %s6992_s21, %s6987_s6  ;;  %p6996_p11 = scmp.lt.u32.totalorder %s6987_s6, %s7703_s13 }
  0xe1   : > { %p6990_p6 = pnand %p6988_p13, %p7540_p9 }
  0xe2   : > { %p6995_p8 = por %p6994_p5, %p6993_p7 }
  0xe3   : > { %p6991_p0 = pneg %p6990_p6 }
  0xe4   : > { %p6997_p1 = por %p6996_p11, %p6995_p8 }
  0xe6   : > { %p6998_p12 = pnand %p6997_p1, %p6991_p0 }
  0xe8   : > { %7001 = shalt.err (!%p6998_p12)
}
  0xe9   : > { %s7002_s18 = scalar_lea.vmem %s7707_s16, 8192  ;;  %s7329_s25 = smov [#allocation22]  }
  0xea   : > { %p7003_p10 = scmp.ne.s32.totalorder %s7707_s16, %s7002_s18  ;;  %s7007_s20 = sshll.u32 %s7329_s25, 4  ;;  %s7008_s20 = int_to_ptr.vmem [resolvable:$false] %s7007_s20 }
  0xeb   : > { %s7009_s17 = scalar_lea.vmem %s7008_s20, 16384  ;;  %p7010_p13 = scmp.lt.s32.totalorder %s7707_s16, %s7008_s20 }
  0xec   : > { %p7005_p2 = pnand %p7003_p10, %p7540_p9  ;;  %p7011_p6 = scmp.lt.s32.totalorder %s7009_s17, %s7002_s18 }
  0xee   : > { %p7006_p4 = pneg %p7005_p2  ;;  %p7012_p7 = por %p7011_p6, %p7010_p13 }
  0xf0   : > { %p7013_p5 = pnand %p7012_p7, %p7006_p4 }
  0xf2   : > { %7016 = shalt.err (!%p7013_p5)
}
  0xf3   : > { %s9536_s6 = smov 32   ;;  %s9537_s4 = smov 512  }
  0xf4   : > { %6742 = dma.hbm_to_vmem [thread:$0]  (!%p9534_p3), %s7703_s13, 8192, %s7707_s16, %s737_s26, %s9537_s4, %s9537_s4, %s9536_s6  }
  0xf5   : > { %s7330_s28 = smov [#allocation2]   ;;  %s7331_s2 = smov [#allocation6]  }
  0xf6   : > { %s506_s21 = sshll.u32 %s7330_s28, 4  ;;  %s531_s1 = sshll.u32 %s7331_s2, 4  ;;  %s507_s21 = int_to_ptr.vmem [resolvable:$true] %s506_s21  ;;  %s532_s1 = int_to_ptr.vmem [resolvable:$true] %s531_s1 }
  0xf7   : > { %s9538_s20 = sld [smem:[#allocation41_spill]]  ;;  %p9539_p8 = scmp.ne.s32.totalorder %s9526_s19, 0 }
  0xfd   : > { %s7017_s17 = scalar_lea.hbm %s9538_s20, 32768 }
  0xfe   : > { %p7018_p0 = scmp.ne.s32.totalorder %s9538_s20, %s7017_s17  ;;  %p7024_p12 = scmp.lt.u32.totalorder %s7017_s17, %s9538_s20 }
 0x100   : > { %p7020_p11 = pnand %p7018_p0, %p9539_p8 }
 0x102   : > { %p7021_p1 = pneg %p7020_p11 }
 0x104   : > { %p7026_p10 = pnand %p7024_p12, %p7021_p1 }
 0x106   : > { %7029 = shalt.err (!%p7026_p10)
}
 0x107   : > { %s7030_s13 = scalar_lea.vmem %s507_s21, 32768  ;;  %p7038_p6 = scmp.lt.s32.totalorder %s507_s21, %s507_s21 }
 0x108   : > { %p7031_p2 = scmp.ne.s32.totalorder %s507_s21, %s7030_s13  ;;  %p7039_p7 = scmp.lt.s32.totalorder %s7030_s13, %s7030_s13 }
 0x10a   : > { %p7033_p4 = pnand %p7031_p2, %p9539_p8  ;;  %p7040_p5 = por %p7039_p7, %p7038_p6 }
 0x10c   : > { %p7034_p13 = pneg %p7033_p4 }
 0x10e   : > { %p7041_p3 = pnand %p7040_p5, %p7034_p13 }
 0x110   : > { %7044 = shalt.err (!%p7041_p3)
}
 0x111   : > { %p9540_p0 = scmp.ne.s32.totalorder %s9523_s24, 0  ;;  %s6659_s12 = smul.u32 12, %s7500_s30 }
 0x112   : > { %s7045_s28 = scalar_lea.hbm %s9447_s3, 512 }
 0x113   : > { %6702 = dma.hbm_to_vmem [thread:$0]  (!%p9540_p0), %s9538_s20, 32768, %s507_s21, [#allocation3], %s9537_s4, %s9537_s4, %s9536_s6  }
 0x114   : > { %p7046_p3 = scmp.ne.s32.totalorder %s9447_s3, %s7045_s28  ;;  %p7052_p12 = scmp.lt.u32.totalorder %s7045_s28, %s9447_s3 }
 0x116   : > { %p7048_p11 = pnand %p7046_p3, %p9539_p8 }
 0x118   : > { %p7049_p1 = pneg %p7048_p11 }
 0x11a   : > { %p7054_p10 = pnand %p7052_p12, %p7049_p1 }
 0x11c   : > { %7057 = shalt.err (!%p7054_p10)
}
 0x11d   : > { %s7058_s6 = scalar_lea.vmem %s532_s1, 512  ;;  %p7066_p6 = scmp.lt.s32.totalorder %s532_s1, %s532_s1 }
 0x11e   : > { %p7059_p2 = scmp.ne.s32.totalorder %s532_s1, %s7058_s6  ;;  %p7067_p7 = scmp.lt.s32.totalorder %s7058_s6, %s7058_s6 }
 0x120   : > { %p7061_p4 = pnand %p7059_p2, %p9539_p8  ;;  %p7068_p5 = por %p7067_p7, %p7066_p6 }
 0x122   : > { %p7062_p13 = pneg %p7061_p4 }
 0x124   : > { %p7069_p9 = pnand %p7068_p5, %p7062_p13 }
 0x126   : > { %7072 = shalt.err (!%p7069_p9)
}
 0x127   : > { %6708 = dma.hbm_to_vmem [thread:$0]  (!%p9540_p0), %s9447_s3, 512, %s532_s1, [#allocation5]  }
 0x128   : > { %s6660_s13 = smul.u32 192, %s7315_s27  ;;  %s567_s8 = scalar_lea.vmem [#allocation9], %s6659_s12 }
 0x129   : > { %s575_s10 = sshll.u32 %s567_s8, 4  ;;  %p9541_p3 = scmp.ne.s32.totalorder %s9529_s22, 0  ;;  %s576_s10 = int_to_ptr.vmem [resolvable:$true] %s575_s10 }
 0x12a   : > { %s573_s16 = scalar_lea.hbm %s9449_s5, %s6660_s13  ;;  %s7078_s18 = scalar_lea.hbm %s9449_s5, 768 }
 0x12b   : > { %s7073_s28 = scalar_lea.hbm %s573_s16, 192  ;;  %p7079_p0 = scmp.lt.u32.totalorder %s573_s16, %s9449_s5 }
 0x12c   : > { %p7074_p8 = scmp.ne.s32.totalorder %s573_s16, %s7073_s28  ;;  %p7080_p1 = scmp.lt.u32.totalorder %s7078_s18, %s7073_s28 }
 0x12d   : > { %p7082_p10 = scmp.lt.u32.totalorder %s7073_s28, %s573_s16 }
 0x12e   : > { %p7076_p9 = pnand %p7074_p8, %p9541_p3  ;;  %p7081_p12 = por %p7080_p1, %p7079_p0 }
 0x130   : > { %p7077_p11 = pneg %p7076_p9  ;;  %p7083_p2 = por %p7082_p10, %p7081_p12 }
 0x132   : > { %p7084_p4 = pnand %p7083_p2, %p7077_p11 }
 0x134   : > { %7087 = shalt.err (!%p7084_p4)
}
 0x135   : > { %s7088_s1 = scalar_lea.vmem %s576_s10, 192  ;;  %s7332_s12 = smov [#allocation9]  }
 0x136   : > { %p7089_p13 = scmp.ne.s32.totalorder %s576_s10, %s7088_s1  ;;  %s7093_s6 = sshll.u32 %s7332_s12, 4  ;;  %s7094_s6 = int_to_ptr.vmem [resolvable:$false] %s7093_s6 }
 0x137   : > { %s7095_s4 = scalar_lea.vmem %s7094_s6, 384  ;;  %p7096_p5 = scmp.lt.s32.totalorder %s576_s10, %s7094_s6 }
 0x138   : > { %p7091_p6 = pnand %p7089_p13, %p9541_p3  ;;  %p7097_p8 = scmp.lt.s32.totalorder %s7095_s4, %s7088_s1 }
 0x13a   : > { %p7092_p7 = pneg %p7091_p6  ;;  %p7098_p9 = por %p7097_p8, %p7096_p5 }
 0x13c   : > { %p7099_p0 = pnand %p7098_p9, %p7092_p7 }
 0x13e   : > { %7102 = shalt.err (!%p7099_p0)
}
 0x13f   : > { %p9542_p1 = scmp.ne.s32.totalorder %s9524_s0, 0  ;;  %s9543_s21 = scalar_lea.sflag [#allocation8], %s7485_s23 }
 0x140   : > { %s7798_s11 = scalar_lea.hbm %s9451_s7, %s7605_s29  ;;  %s607_s19 = scalar_lea.vmem [#allocation12], %s7575_s15 }
 0x141   : > { %6715 = dma.hbm_to_vmem [thread:$0]  (!%p9542_p1), %s573_s16, 192, %s576_s10, %s9543_s21  }
 0x142   : > { %s615_s28 = sshll.u32 %s607_s19, 4  ;;  %s7103_s24 = scalar_lea.hbm %s7798_s11, 64  ;;  %s616_s28 = int_to_ptr.vmem [resolvable:$true] %s615_s28 }
 0x143   : > { %p7104_p11 = scmp.ne.s32.totalorder %s7798_s11, %s7103_s24  ;;  %s7108_s10 = scalar_lea.hbm %s9451_s7, 256 }
 0x144   : > { %p7109_p2 = scmp.lt.u32.totalorder %s7798_s11, %s9451_s7  ;;  %p7110_p4 = scmp.lt.u32.totalorder %s7108_s10, %s7103_s24 }
 0x145   : > { %p7106_p12 = pnand %p7104_p11, %p9541_p3  ;;  %p7112_p6 = scmp.lt.u32.totalorder %s7103_s24, %s7798_s11 }
 0x146   : > { %p7111_p13 = por %p7110_p4, %p7109_p2 }
 0x147   : > { %p7107_p10 = pneg %p7106_p12 }
 0x148   : > { %p7113_p7 = por %p7112_p6, %p7111_p13 }
 0x14a   : > { %p7114_p5 = pnand %p7113_p7, %p7107_p10 }
 0x14c   : > { %7117 = shalt.err (!%p7114_p5)
}
 0x14d   : > { %s7118_s17 = scalar_lea.vmem %s616_s28, 64  ;;  %s7333_s1 = smov [#allocation12]  }
 0x14e   : > { %p7119_p8 = scmp.ne.s32.totalorder %s616_s28, %s7118_s17  ;;  %s7123_s12 = sshll.u32 %s7333_s1, 4  ;;  %s7124_s12 = int_to_ptr.vmem [resolvable:$false] %s7123_s12 }
 0x14f   : > { %s7125_s6 = scalar_lea.vmem %s7124_s12, 128  ;;  %p7126_p11 = scmp.lt.s32.totalorder %s616_s28, %s7124_s12 }
 0x150   : > { %p7121_p9 = pnand %p7119_p8, %p9541_p3  ;;  %p7127_p12 = scmp.lt.s32.totalorder %s7125_s6, %s7118_s17 }
 0x152   : > { %p7122_p0 = pneg %p7121_p9  ;;  %p7128_p1 = por %p7127_p12, %p7126_p11 }
 0x154   : > { %p7129_p2 = pnand %p7128_p1, %p7122_p0 }
 0x156   : > { %7132 = shalt.err (!%p7129_p2)
}
 0x157   : > { %p9544_p4 = scmp.ne.s32.totalorder %s9524_s0, 0  ;;  %s9545_s4 = scalar_lea.sflag [#allocation11], %s7485_s23 }
 0x158   : > { %s7824_s8 = scalar_lea.hbm %s9453_s9, %s7605_s29  ;;  %s645_s19 = scalar_lea.vmem [#allocation15], %s7575_s15 }
 0x159   : > { %6721 = dma.hbm_to_vmem [thread:$0]  (!%p9544_p4), %s7798_s11, 64, %s616_s28, %s9545_s4  }
 0x15a   : > { %s653_s24 = sshll.u32 %s645_s19, 4  ;;  %s7133_s2 = scalar_lea.hbm %s7824_s8, 64  ;;  %s654_s24 = int_to_ptr.vmem [resolvable:$true] %s653_s24 }
 0x15b   : > { %p7134_p1 = scmp.ne.s32.totalorder %s7824_s8, %s7133_s2  ;;  %s7138_s11 = scalar_lea.hbm %s9453_s9, 256 }
 0x15c   : > { %p7139_p6 = scmp.lt.u32.totalorder %s7824_s8, %s9453_s9  ;;  %p7140_p7 = scmp.lt.u32.totalorder %s7138_s11, %s7133_s2 }
 0x15d   : > { %p7136_p10 = pnand %p7134_p1, %p9541_p3  ;;  %p7142_p8 = scmp.lt.u32.totalorder %s7133_s2, %s7824_s8 }
 0x15e   : > { %p7141_p5 = por %p7140_p7, %p7139_p6 }
 0x15f   : > { %p7137_p13 = pneg %p7136_p10 }
 0x160   : > { %p7143_p9 = por %p7142_p8, %p7141_p5 }
 0x162   : > { %p7144_p0 = pnand %p7143_p9, %p7137_p13 }
 0x164   : > { %7147 = shalt.err (!%p7144_p0)
}
 0x165   : > { %s7148_s25 = scalar_lea.vmem %s654_s24, 64  ;;  %s7334_s17 = smov [#allocation15]  }
 0x166   : > { %p7149_p11 = scmp.ne.s32.totalorder %s654_s24, %s7148_s25  ;;  %s7153_s1 = sshll.u32 %s7334_s17, 4  ;;  %s7154_s1 = int_to_ptr.vmem [resolvable:$false] %s7153_s1 }
 0x167   : > { %s7155_s12 = scalar_lea.vmem %s7154_s1, 128  ;;  %p7156_p1 = scmp.lt.s32.totalorder %s654_s24, %s7154_s1 }
 0x168   : > { %p7151_p12 = pnand %p7149_p11, %p9541_p3  ;;  %p7157_p10 = scmp.lt.s32.totalorder %s7155_s12, %s7148_s25 }
 0x16a   : > { %p7152_p2 = pneg %p7151_p12  ;;  %p7158_p4 = por %p7157_p10, %p7156_p1 }
 0x16c   : > { %p7159_p6 = pnand %p7158_p4, %p7152_p2 }
 0x16e   : > { %7162 = shalt.err (!%p7159_p6)
}
 0x16f   : > { %p9546_p7 = scmp.ne.s32.totalorder %s9524_s0, 0  ;;  %s9547_s6 = scalar_lea.sflag [#allocation14], %s7485_s23 }
 0x170   : > { %s9548_s13 = sld [smem:[#allocation47_spill]]  ;;  %s683_s2 = scalar_lea.vmem [#allocation18], %s7575_s15 }
 0x171   : > { %6727 = dma.hbm_to_vmem [thread:$0]  (!%p9546_p7), %s7824_s8, 64, %s654_s24, %s9547_s6  }
 0x172   : > { %s691_s18 = sshll.u32 %s683_s2, 4  ;;  %s692_s18 = int_to_ptr.vmem [resolvable:$true] %s691_s18 }
 0x176   : > { %s7850_s19 = scalar_lea.hbm %s9548_s13, %s7605_s29  ;;  %s7168_s8 = scalar_lea.hbm %s9548_s13, 256 }
 0x177   : > { %s7163_s10 = scalar_lea.hbm %s7850_s19, 64  ;;  %p7169_p8 = scmp.lt.u32.totalorder %s7850_s19, %s9548_s13 }
 0x178   : > { %p7164_p4 = scmp.ne.s32.totalorder %s7850_s19, %s7163_s10  ;;  %p7170_p9 = scmp.lt.u32.totalorder %s7168_s8, %s7163_s10 }
 0x179   : > { %p7172_p11 = scmp.lt.u32.totalorder %s7163_s10, %s7850_s19 }
 0x17a   : > { %p7166_p13 = pnand %p7164_p4, %p9541_p3  ;;  %p7171_p0 = por %p7170_p9, %p7169_p8 }
 0x17c   : > { %p7167_p5 = pneg %p7166_p13  ;;  %p7173_p12 = por %p7172_p11, %p7171_p0 }
 0x17e   : > { %p7174_p2 = pnand %p7173_p12, %p7167_p5 }
 0x180   : > { %7177 = shalt.err (!%p7174_p2)
}
 0x181   : > { %s7178_s25 = scalar_lea.vmem %s692_s18, 64  ;;  %s7335_s17 = smov [#allocation18]  }
 0x182   : > { %p7179_p1 = scmp.ne.s32.totalorder %s692_s18, %s7178_s25  ;;  %s7183_s1 = sshll.u32 %s7335_s17, 4  ;;  %s7184_s1 = int_to_ptr.vmem [resolvable:$false] %s7183_s1 }
 0x183   : > { %s7185_s12 = scalar_lea.vmem %s7184_s1, 128  ;;  %p7186_p4 = scmp.lt.s32.totalorder %s692_s18, %s7184_s1 }
 0x184   : > { %p7181_p10 = pnand %p7179_p1, %p9541_p3  ;;  %p7187_p13 = scmp.lt.s32.totalorder %s7185_s12, %s7178_s25 }
 0x186   : > { %p7182_p6 = pneg %p7181_p10  ;;  %p7188_p7 = por %p7187_p13, %p7186_p4 }
 0x188   : > { %p7189_p8 = pnand %p7188_p7, %p7182_p6 }
 0x18a   : > { %7192 = shalt.err (!%p7189_p8)
}
 0x18b   : > { %p9549_p9 = scmp.ne.s32.totalorder %s9524_s0, 0  ;;  %s9550_s6 = scalar_lea.sflag [#allocation17], %s7485_s23 }
 0x18c   : > { %s5105_s4 = sshll.u32 %s7315_s27, 4  ;;  %s722_s21 = scalar_lea.vmem [#allocation21], %s7500_s30 }
 0x18d   : > { %6733 = dma.hbm_to_vmem [thread:$0]  (!%p9549_p9), %s7850_s19, 64, %s692_s18, %s9550_s6  }
 0x18e   : > { %s729_s2 = sshll.u32 %s722_s21, 4  ;;  %s9551_s28 = sld [smem:[#allocation49_spill]]  ;;  %s730_s2 = int_to_ptr.vmem [resolvable:$true] %s729_s2 }
 0x194   : > { %s727_s8 = scalar_lea.hbm %s9551_s28, %s5105_s4  ;;  %s7198_s17 = scalar_lea.hbm %s9551_s28, 64 }
 0x195   : > { %s7193_s24 = scalar_lea.hbm %s727_s8, 16  ;;  %p7199_p11 = scmp.lt.u32.totalorder %s727_s8, %s9551_s28 }
 0x196   : > { %p7194_p7 = scmp.ne.s32.totalorder %s727_s8, %s7193_s24  ;;  %p7200_p12 = scmp.lt.u32.totalorder %s7198_s17, %s7193_s24 }
 0x197   : > { %p7202_p1 = scmp.lt.u32.totalorder %s7193_s24, %s727_s8 }
 0x198   : > { %p7196_p5 = pnand %p7194_p7, %p9541_p3  ;;  %p7201_p2 = por %p7200_p12, %p7199_p11 }
 0x19a   : > { %p7197_p0 = pneg %p7196_p5  ;;  %p7203_p10 = por %p7202_p1, %p7201_p2 }
 0x19c   : > { %p7204_p6 = pnand %p7203_p10, %p7197_p0 }
 0x19e   : > { %7207 = shalt.err (!%p7204_p6)
}
 0x19f   : > { %s7208_s27 = scalar_lea.vmem %s730_s2, 16  ;;  %s7336_s30 = smov [#allocation21]  }
 0x1a0   : > { %p7209_p4 = scmp.ne.s32.totalorder %s730_s2, %s7208_s27  ;;  %s7213_s19 = sshll.u32 %s7336_s30, 4  ;;  %s7214_s19 = int_to_ptr.vmem [resolvable:$false] %s7213_s19 }
 0x1a1   : > { %s7215_s18 = scalar_lea.vmem %s7214_s19, 32  ;;  %p7216_p7 = scmp.lt.s32.totalorder %s730_s2, %s7214_s19 }
 0x1a2   : > { %p7211_p13 = pnand %p7209_p4, %p9541_p3  ;;  %p7217_p5 = scmp.lt.s32.totalorder %s7215_s18, %s7208_s27 }
 0x1a4   : > { %p7212_p8 = pneg %p7211_p13  ;;  %p7218_p9 = por %p7217_p5, %p7216_p7 }
 0x1a6   : > { %p7219_p11 = pnand %p7218_p9, %p7212_p8 }
 0x1a8   : > { %7222 = shalt.err (!%p7219_p11)
}
 0x1a9   : > { %p9552_p12 = scmp.ne.s32.totalorder %s9524_s0, 0  ;;  %s9553_s6 = scalar_lea.sflag [#allocation20], %s7485_s23 }
 0x1aa   : > { %s9554_s10 = sld [smem:[#allocation50_spill]]  ;;  %s761_s24 = scalar_lea.vmem [#allocation24], %s7575_s15 }
 0x1ab   : > { %6739 = dma.hbm_to_vmem [thread:$0]  (!%p9552_p12), %s727_s8, 16, %s730_s2, %s9553_s6  }
 0x1ac   : > { %s769_s16 = sshll.u32 %s761_s24, 4  ;;  %s770_s16 = int_to_ptr.vmem [resolvable:$true] %s769_s16 }
 0x1b0   : > { %s7895_s11 = scalar_lea.hbm %s9554_s10, %s7605_s29  ;;  %s7228_s2 = scalar_lea.hbm %s9554_s10, 256 }
 0x1b1   : > { %s7223_s25 = scalar_lea.hbm %s7895_s11, 64  ;;  %p7229_p1 = scmp.lt.u32.totalorder %s7895_s11, %s9554_s10 }
 0x1b2   : > { %p7224_p9 = scmp.ne.s32.totalorder %s7895_s11, %s7223_s25  ;;  %p7230_p10 = scmp.lt.u32.totalorder %s7228_s2, %s7223_s25 }
 0x1b3   : > { %p7232_p4 = scmp.lt.u32.totalorder %s7223_s25, %s7895_s11 }
 0x1b4   : > { %p7226_p0 = pnand %p7224_p9, %p9541_p3  ;;  %p7231_p6 = por %p7230_p10, %p7229_p1 }
 0x1b6   : > { %p7227_p2 = pneg %p7226_p0  ;;  %p7233_p13 = por %p7232_p4, %p7231_p6 }
 0x1b8   : > { %p7234_p8 = pnand %p7233_p13, %p7227_p2 }
 0x1ba   : > { %7237 = shalt.err (!%p7234_p8)
}
 0x1bb   : > { %s7238_s15 = scalar_lea.vmem %s770_s16, 64  ;;  %s7337_s29 = smov [#allocation24]  }
 0x1bc   : > { %p7239_p7 = scmp.ne.s32.totalorder %s770_s16, %s7238_s15  ;;  %s7243_s27 = sshll.u32 %s7337_s29, 4  ;;  %s7244_s27 = int_to_ptr.vmem [resolvable:$false] %s7243_s27 }
 0x1bd   : > { %s7245_s30 = scalar_lea.vmem %s7244_s27, 128  ;;  %p7246_p9 = scmp.lt.s32.totalorder %s770_s16, %s7244_s27 }
 0x1be   : > { %p7241_p5 = pnand %p7239_p7, %p9541_p3  ;;  %p7247_p0 = scmp.lt.s32.totalorder %s7245_s30, %s7238_s15 }
 0x1c0   : > { %p7242_p11 = pneg %p7241_p5  ;;  %p7248_p12 = por %p7247_p0, %p7246_p9 }
 0x1c2   : > { %p7249_p1 = pnand %p7248_p12, %p7242_p11 }
 0x1c4   : > { %7252 = shalt.err (!%p7249_p1)
}
 0x1c5   : > { %p9555_p10 = scmp.ne.s32.totalorder %s9524_s0, 0  ;;  %s9556_s19 = sld [smem:[#allocation39_spill]] }
 0x1c7   : > { %6745 = dma.hbm_to_vmem [thread:$0]  (!%p9555_p10), %s7895_s11, 64, %s770_s16, %s737_s26  }
 0x1cb   : > { %p9557_p2 = scmp.ne.s32.totalorder %s9556_s19, 0 }
 0x1cc   : > { %s9558_s22 = sld [smem:[#allocation35_spill]] (!%p9557_p2) }
 0x1cd   : > { %778 = sbr.rel (%p9557_p2) target bundleno = 3398 (0xd46), region = 84 }
 0x1d2   : > { %p9559_p3 = scmp.eq.s32.totalorder (!%p9557_p2), %s9558_s22, 0 }
 0x1d4   : > { %7270 = dma.done.wait (%p9559_p3), [#allocation3], 32768   ;;  %p9560_p6 = pmov %p9559_p3 }
 0x1d5   : > { %p9561_p4 = pmov %p9559_p3 }
 0x1d6   : > { %7272 = vsyncadd (%p9560_p6), [#allocation3], 4294934528 }
 0x1d7   : > { %7274 = dma.done.wait (%p9561_p4), [#allocation5], 576   ;;  %p9562_p12 = pmov %p9559_p3 }
 0x1d8   : > { %s9563_s0 = sld [smem:[#allocation33_spill]]  ;;  %s9564_s23 = sld [smem:[#allocation38_spill]] }
 0x1d9   : > { %7276 = vsyncadd (%p9562_p12), [#allocation5], 4294966720  ;;  %s7928_s18 = sand.u32 1, %s9558_s22  }
 0x1da   : > { %s793_s4 = scalar_lea.sflag [#allocation8], %s7928_s18 }
 0x1de   : > { %s7931_s26 = sand.u32 1, %s9563_s0   ;;  %p9565_p13 = scmp.ne.s32.totalorder %s9564_s23, 0 }
 0x1df   : > { %s6661_s6 = smul.u32 6144, %s7931_s26 }
 0x1e1   : > { %s7935_s21 = scalar_lea.vmem [#allocation7], %s6661_s6 }
 0x1e2   : > { %7278 = dma.done.wait (%p9565_p13), %s793_s4, 98496  }
 0x1e3   : > { %7280 = vsyncadd (%p9565_p13), %s793_s4, 4294868800  ;;  %s6662_s11 = smul.u32 12, %s7931_s26  ;;  %s5116_s24 = sshll.u32 %s7931_s26, 11 }
 0x1e4   : > { %s811_s25 = scalar_lea.sflag [#allocation11], %s7928_s18  ;;  %s7946_s17 = scalar_lea.vmem [#allocation10], %s5116_s24 }
 0x1e5   : > { %s7943_s16 = scalar_lea.vmem [#allocation9], %s6662_s11 }
 0x1e6   : > { %7282 = dma.done.wait (%p9565_p13), %s811_s25, 32832  }
 0x1e7   : > { %7284 = vsyncadd (%p9565_p13), %s811_s25, 4294934464  ;;  %s7953_s1 = sshll.u32 %s7931_s26, 2  ;;  %s829_s8 = scalar_lea.sflag [#allocation14], %s7928_s18 }
 0x1e8   : > { %s832_s12 = scalar_lea.vmem [#allocation13], %s7953_s1 }
 0x1e9   : > { %7286 = dma.done.wait (%p9565_p13), %s829_s8, 128  }
 0x1ea   : > { %7288 = vsyncadd (%p9565_p13), %s829_s8, 4294967168  ;;  %s847_s29 = scalar_lea.sflag [#allocation17], %s7928_s18 }
 0x1eb   : > { %7290 = dma.done.wait (%p9565_p13), %s847_s29, 128  }
 0x1ec   : > { %7292 = vsyncadd (%p9565_p13), %s847_s29, 4294967168  ;;  %s5122_s30 = sshll.u32 %s7931_s26, 9  ;;  %s865_s0 = scalar_lea.sflag [#allocation20], %s7928_s18 }
 0x1ed   : > { %s7972_s6 = scalar_lea.vmem [#allocation19], %s5122_s30 }
 0x1ee   : > { %7294 = dma.done.wait (%p9565_p13), %s865_s0, 8208  }
 0x1ef   : > { %7296 = vsyncadd (%p9565_p13), %s865_s0, 4294959088  ;;  %s882_s11 = scalar_lea.sflag [#allocation23], %s7928_s18  ;;  %s7980_s24 = scalar_lea.vmem [#allocation22], %s5122_s30 }
 0x1f0   : > { %7298 = dma.done.wait (%p9565_p13), %s882_s11, 8256  }
 0x1f1   : > { %7300 = vsyncadd (%p9565_p13), %s882_s11, 4294959040  ;;  %p9566_p8 = scmp.ne.s32.totalorder %s9558_s22, 0 }
 0x1f2   : > { %v1003_v0 = vld [vmem:[#allocation2 + $0x8] sm:$0xff] (!%p9566_p8)  ;;  %v1005_v2 = vld [vmem:[#allocation2 + $0x18] sm:$0xff] (!%p9566_p8)  ;;  %v1002_v5 = vld [vmem:[#allocation2] sm:$0xff] (!%p9566_p8)  ;;  %s9567_s18 = sld [smem:[#allocation40_spill]] (!%p9566_p8)  ;;  %s9568_s29 = sld [smem:[#allocation51_spill]] (!%p9566_p8) }
 0x1f3   : > { %997 = sbr.rel (%p9566_p8) target bundleno = 849 (0x351), region = 148  ;;  %v1007_v1 = vld [vmem:[#allocation2 + $0x28] sm:$0xff] (!%p9566_p8)  ;;  %v1009_v4 = vld [vmem:[#allocation2 + $0x38] sm:$0xff] (!%p9566_p8)  ;;  %v1006_v6 = vld [vmem:[#allocation2 + $0x20] sm:$0xff] (!%p9566_p8)  ;;  %s9569_s19 = sld [smem:[#allocation52_spill]] (!%p9566_p8) }
 0x1f4   : > { %v5211_v3 = vpack.c.bf16 (!%p9566_p8), %v1007_v1, %v1003_v0  ;;  %v5339_v7 = vpack.c.bf16 (!%p9566_p8), %v1009_v4, %v1005_v2  ;;  %v5213_v8 = vpack.c.bf16 (!%p9566_p8), %v1006_v6, %v1002_v5  ;;  %v1004_v9 = vld [vmem:[#allocation2 + $0x10] sm:$0xff] (!%p9566_p8)  ;;  %v1011_v11 = vld [vmem:[#allocation2 + $0x48] sm:$0xff] (!%p9566_p8)  ;;  %v1013_v14 = vld [vmem:[#allocation2 + $0x58] sm:$0xff] (!%p9566_p8) }
 0x1f5   : > { %v1008_v10 = vld [vmem:[#allocation2 + $0x30] sm:$0xff] (!%p9566_p8)  ;;  %v1015_v13 = vld [vmem:[#allocation2 + $0x68] sm:$0xff] (!%p9566_p8)  ;;  %v1017_v15 = vld [vmem:[#allocation2 + $0x78] sm:$0xff] (!%p9566_p8) }
 0x1f6   : > { %5212 = vmatprep.subr.bf16.mxu0 (!%p9566_p8), %v5211_v3  ;;  %v5341_v12 = vpack.c.bf16 (!%p9566_p8), %v1008_v10, %v1004_v9  ;;  %5340 = vmatprep.subr.bf16.mxu1 (!%p9566_p8), %v5339_v7  ;;  %v5215_v16 = vpack.c.bf16 (!%p9566_p8), %v1015_v13, %v1011_v11  ;;  %v5343_v17 = vpack.c.bf16 (!%p9566_p8), %v1017_v15, %v1013_v14  ;;  %v1010_v18 = vld [vmem:[#allocation2 + $0x40] sm:$0xff] (!%p9566_p8)  ;;  %v1012_v20 = vld [vmem:[#allocation2 + $0x50] sm:$0xff] (!%p9566_p8)  ;;  %v1019_v23 = vld [vmem:[#allocation2 + $0x88] sm:$0xff] (!%p9566_p8) }
 0x1f7   : > { %5214 = vmatpush1.bf16.msra.mxu0 (!%p9566_p8), %v5213_v8  ;;  %v1014_v19 = vld [vmem:[#allocation2 + $0x60] sm:$0xff] (!%p9566_p8)  ;;  %v1016_v22 = vld [vmem:[#allocation2 + $0x70] sm:$0xff] (!%p9566_p8)  ;;  %v1023_v24 = vld [vmem:[#allocation2 + $0xa8] sm:$0xff] (!%p9566_p8) }
 0x1f8   : > { %5342 = vmatpush1.bf16.msra.mxu1 (!%p9566_p8), %v5341_v12  ;;  %v5217_v21 = vpack.c.bf16 (!%p9566_p8), %v1014_v19, %v1010_v18  ;;  %5216 = vmatprep.subr.bf16.mxu0 (!%p9566_p8), %v5215_v16  ;;  %v5345_v25 = vpack.c.bf16 (!%p9566_p8), %v1016_v22, %v1012_v20  ;;  %v5219_v26 = vpack.c.bf16 (!%p9566_p8), %v1023_v24, %v1019_v23  ;;  %v1021_v27 = vld [vmem:[#allocation2 + $0x98] sm:$0xff] (!%p9566_p8)  ;;  %v1018_v29 = vld [vmem:[#allocation2 + $0x80] sm:$0xff] (!%p9566_p8)  ;;  %v1020_v32 = vld [vmem:[#allocation2 + $0x90] sm:$0xff] (!%p9566_p8) }
 0x1f9   : > { %5344 = vmatprep.subr.bf16.mxu1 (!%p9566_p8), %v5343_v17  ;;  %v1025_v28 = vld [vmem:[#allocation2 + $0xb8] sm:$0xff] (!%p9566_p8)  ;;  %v1022_v31 = vld [vmem:[#allocation2 + $0xa0] sm:$0xff] (!%p9566_p8)  ;;  %v1024_v33 = vld [vmem:[#allocation2 + $0xb0] sm:$0xff] (!%p9566_p8) }
 0x1fa   : > { %v5347_v30 = vpack.c.bf16 %v1025_v28, %v1021_v27  ;;  %v5221_v34 = vpack.c.bf16 %v1022_v31, %v1018_v29  ;;  %v1027_v35 = vld [vmem:[#allocation2 + $0xc8] sm:$0xff]  ;;  %v1029_v37 = vld [vmem:[#allocation2 + $0xd8] sm:$0xff]  ;;  %v5349_v38 = vpack.c.bf16 %v1024_v33, %v1020_v32  ;;  %v1026_v41 = vld [vmem:[#allocation2 + $0xc0] sm:$0xff] }
 0x1fb   : > { %5218 = vmatpush1.bf16.msra.mxu0 %v5217_v21  ;;  %v1031_v36 = vld [vmem:[#allocation2 + $0xe8] sm:$0xff]  ;;  %v1033_v40 = vld [vmem:[#allocation2 + $0xf8] sm:$0xff]  ;;  %v1030_v42 = vld [vmem:[#allocation2 + $0xe0] sm:$0xff] }
 0x1fc   : > { %5346 = vmatpush1.bf16.msra.mxu1 %v5345_v25  ;;  %5220 = vmatprep.subr.bf16.mxu0 %v5219_v26  ;;  %v5223_v39 = vpack.c.bf16 %v1031_v36, %v1027_v35  ;;  %v5351_v43 = vpack.c.bf16 %v1033_v40, %v1029_v37  ;;  %v1028_v44 = vld [vmem:[#allocation2 + $0xd0] sm:$0xff]  ;;  %v1035_v46 = vld [vmem:[#allocation2 + $0x108] sm:$0xff]  ;;  %v1037_v48 = vld [vmem:[#allocation2 + $0x118] sm:$0xff]  ;;  %v5225_v50 = vpack.c.bf16 %v1030_v42, %v1026_v41 }
 0x1fd   : > { %5348 = vmatprep.subr.bf16.mxu1 %v5347_v30  ;;  %v1032_v45 = vld [vmem:[#allocation2 + $0xf0] sm:$0xff]  ;;  %v1039_v47 = vld [vmem:[#allocation2 + $0x128] sm:$0xff]  ;;  %v1041_v49 = vld [vmem:[#allocation2 + $0x138] sm:$0xff] }
 0x1fe   : > { %v5353_v51 = vpack.c.bf16 %v1032_v45, %v1028_v44  ;;  %v5227_v52 = vpack.c.bf16 %v1039_v47, %v1035_v46  ;;  %v1034_v53 = vld [vmem:[#allocation2 + $0x100] sm:$0xff]  ;;  %v1036_v55 = vld [vmem:[#allocation2 + $0x110] sm:$0xff]  ;;  %v5355_v56 = vpack.c.bf16 %v1041_v49, %v1037_v48  ;;  %v1043_v58 = vld [vmem:[#allocation2 + $0x148] sm:$0xff] }
 0x1ff   : > { %5222 = vmatpush1.bf16.msra.mxu0 %v5221_v34  ;;  %v1038_v54 = vld [vmem:[#allocation2 + $0x120] sm:$0xff]  ;;  %v1040_v57 = vld [vmem:[#allocation2 + $0x130] sm:$0xff]  ;;  %v1047_v59 = vld [vmem:[#allocation2 + $0x168] sm:$0xff] }
 0x200   : > { %5350 = vmatpush1.bf16.msra.mxu1 %v5349_v38  ;;  %5224 = vmatprep.subr.bf16.mxu0 %v5223_v39  ;;  %v1045_v60 = vld [vmem:[#allocation2 + $0x158] sm:$0xff]  ;;  %v5229_v62 = vpack.c.bf16 %v1038_v54, %v1034_v53  ;;  %v5357_v63 = vpack.c.bf16 %v1040_v57, %v1036_v55  ;;  %v5231_v0 = vpack.c.bf16 %v1047_v59, %v1043_v58  ;;  %v1042_v1 = vld [vmem:[#allocation2 + $0x140] sm:$0xff]  ;;  %v1044_v3 = vld [vmem:[#allocation2 + $0x150] sm:$0xff] }
 0x201   : > { %5352 = vmatprep.subr.bf16.mxu1 %v5351_v43  ;;  %v1049_v61 = vld [vmem:[#allocation2 + $0x178] sm:$0xff]  ;;  %v1046_v2 = vld [vmem:[#allocation2 + $0x160] sm:$0xff]  ;;  %v1048_v5 = vld [vmem:[#allocation2 + $0x170] sm:$0xff] }
 0x202   : > { %v5359_v4 = vpack.c.bf16 %v1049_v61, %v1045_v60  ;;  %v1051_v6 = vld [vmem:[#allocation2 + $0x188] sm:$0xff]  ;;  %v1053_v8 = vld [vmem:[#allocation2 + $0x198] sm:$0xff]  ;;  %v5233_v10 = vpack.c.bf16 %v1046_v2, %v1042_v1  ;;  %v5361_v11 = vpack.c.bf16 %v1048_v5, %v1044_v3  ;;  %v1050_v13 = vld [vmem:[#allocation2 + $0x180] sm:$0xff] }
 0x203   : > { %5226 = vmatpush1.bf16.msra.mxu0 %v5225_v50  ;;  %v1055_v7 = vld [vmem:[#allocation2 + $0x1a8] sm:$0xff]  ;;  %v1057_v9 = vld [vmem:[#allocation2 + $0x1b8] sm:$0xff]  ;;  %v1054_v14 = vld [vmem:[#allocation2 + $0x1a0] sm:$0xff] }
 0x204   : > { %5354 = vmatpush1.bf16.msra.mxu1 %v5353_v51  ;;  %5228 = vmatprep.subr.bf16.mxu0 %v5227_v52  ;;  %v5235_v12 = vpack.c.bf16 %v1055_v7, %v1051_v6  ;;  %v1052_v15 = vld [vmem:[#allocation2 + $0x190] sm:$0xff]  ;;  %v5363_v16 = vpack.c.bf16 %v1057_v9, %v1053_v8  ;;  %v1059_v18 = vld [vmem:[#allocation2 + $0x1c8] sm:$0xff]  ;;  %v1061_v20 = vld [vmem:[#allocation2 + $0x1d8] sm:$0xff]  ;;  %v5237_v22 = vpack.c.bf16 %v1054_v14, %v1050_v13 }
 0x205   : > { %5356 = vmatprep.subr.bf16.mxu1 %v5355_v56  ;;  %v1056_v17 = vld [vmem:[#allocation2 + $0x1b0] sm:$0xff]  ;;  %v1063_v19 = vld [vmem:[#allocation2 + $0x1e8] sm:$0xff]  ;;  %v1065_v21 = vld [vmem:[#allocation2 + $0x1f8] sm:$0xff] }
 0x206   : > { %v5365_v23 = vpack.c.bf16 %v1056_v17, %v1052_v15  ;;  %v5239_v24 = vpack.c.bf16 %v1063_v19, %v1059_v18  ;;  %v1058_v25 = vld [vmem:[#allocation2 + $0x1c0] sm:$0xff]  ;;  %v1060_v27 = vld [vmem:[#allocation2 + $0x1d0] sm:$0xff]  ;;  %v5367_v28 = vpack.c.bf16 %v1065_v21, %v1061_v20  ;;  %v1067_v30 = vld [vmem:[#allocation2 + $0x208] sm:$0xff] }
 0x207   : > { %5230 = vmatpush1.bf16.msra.mxu0 %v5229_v62  ;;  %v1062_v26 = vld [vmem:[#allocation2 + $0x1e0] sm:$0xff]  ;;  %v1064_v29 = vld [vmem:[#allocation2 + $0x1f0] sm:$0xff]  ;;  %v1071_v31 = vld [vmem:[#allocation2 + $0x228] sm:$0xff] }
 0x208   : > { %5358 = vmatpush1.bf16.msra.mxu1 %v5357_v63  ;;  %5232 = vmatprep.subr.bf16.mxu0 %v5231_v0  ;;  %v1069_v32 = vld [vmem:[#allocation2 + $0x218] sm:$0xff]  ;;  %v5241_v34 = vpack.c.bf16 %v1062_v26, %v1058_v25  ;;  %v5369_v35 = vpack.c.bf16 %v1064_v29, %v1060_v27  ;;  %v5243_v36 = vpack.c.bf16 %v1071_v31, %v1067_v30  ;;  %v1066_v37 = vld [vmem:[#allocation2 + $0x200] sm:$0xff]  ;;  %v1068_v39 = vld [vmem:[#allocation2 + $0x210] sm:$0xff] }
 0x209   : > { %5360 = vmatprep.subr.bf16.mxu1 %v5359_v4  ;;  %v1073_v33 = vld [vmem:[#allocation2 + $0x238] sm:$0xff]  ;;  %v1070_v38 = vld [vmem:[#allocation2 + $0x220] sm:$0xff]  ;;  %v1072_v41 = vld [vmem:[#allocation2 + $0x230] sm:$0xff] }
 0x20a   : > { %v5371_v40 = vpack.c.bf16 %v1073_v33, %v1069_v32  ;;  %v1075_v42 = vld [vmem:[#allocation2 + $0x248] sm:$0xff]  ;;  %v1077_v44 = vld [vmem:[#allocation2 + $0x258] sm:$0xff]  ;;  %v5245_v46 = vpack.c.bf16 %v1070_v38, %v1066_v37  ;;  %v5373_v47 = vpack.c.bf16 %v1072_v41, %v1068_v39  ;;  %v1074_v49 = vld [vmem:[#allocation2 + $0x240] sm:$0xff] }
 0x20b   : > { %5234 = vmatpush1.bf16.msra.mxu0 %v5233_v10  ;;  %v1079_v43 = vld [vmem:[#allocation2 + $0x268] sm:$0xff]  ;;  %v1081_v45 = vld [vmem:[#allocation2 + $0x278] sm:$0xff]  ;;  %v1078_v50 = vld [vmem:[#allocation2 + $0x260] sm:$0xff] }
 0x20c   : > { %5362 = vmatpush1.bf16.msra.mxu1 %v5361_v11  ;;  %5236 = vmatprep.subr.bf16.mxu0 %v5235_v12  ;;  %v5247_v48 = vpack.c.bf16 %v1079_v43, %v1075_v42  ;;  %v1076_v51 = vld [vmem:[#allocation2 + $0x250] sm:$0xff]  ;;  %v5375_v52 = vpack.c.bf16 %v1081_v45, %v1077_v44  ;;  %v1083_v54 = vld [vmem:[#allocation2 + $0x288] sm:$0xff]  ;;  %v1085_v56 = vld [vmem:[#allocation2 + $0x298] sm:$0xff]  ;;  %v5249_v58 = vpack.c.bf16 %v1078_v50, %v1074_v49 }
 0x20d   : > { %5364 = vmatprep.subr.bf16.mxu1 %v5363_v16  ;;  %v1080_v53 = vld [vmem:[#allocation2 + $0x270] sm:$0xff]  ;;  %v1087_v55 = vld [vmem:[#allocation2 + $0x2a8] sm:$0xff]  ;;  %v1089_v57 = vld [vmem:[#allocation2 + $0x2b8] sm:$0xff] }
 0x20e   : > { %v5377_v59 = vpack.c.bf16 %v1080_v53, %v1076_v51  ;;  %v5251_v60 = vpack.c.bf16 %v1087_v55, %v1083_v54  ;;  %v1082_v61 = vld [vmem:[#allocation2 + $0x280] sm:$0xff]  ;;  %v1084_v63 = vld [vmem:[#allocation2 + $0x290] sm:$0xff]  ;;  %v5379_v0 = vpack.c.bf16 %v1089_v57, %v1085_v56  ;;  %v1091_v2 = vld [vmem:[#allocation2 + $0x2c8] sm:$0xff] }
 0x20f   : > { %5238 = vmatpush1.bf16.msra.mxu0 %v5237_v22  ;;  %v1086_v62 = vld [vmem:[#allocation2 + $0x2a0] sm:$0xff]  ;;  %v1088_v1 = vld [vmem:[#allocation2 + $0x2b0] sm:$0xff]  ;;  %v1095_v3 = vld [vmem:[#allocation2 + $0x2e8] sm:$0xff] }
 0x210   : > { %5366 = vmatpush1.bf16.msra.mxu1 %v5365_v23  ;;  %5240 = vmatprep.subr.bf16.mxu0 %v5239_v24  ;;  %v1093_v4 = vld [vmem:[#allocation2 + $0x2d8] sm:$0xff]  ;;  %v5253_v6 = vpack.c.bf16 %v1086_v62, %v1082_v61  ;;  %v1090_v7 = vld [vmem:[#allocation2 + $0x2c0] sm:$0xff]  ;;  %v5381_v8 = vpack.c.bf16 %v1088_v1, %v1084_v63  ;;  %v5255_v9 = vpack.c.bf16 %v1095_v3, %v1091_v2  ;;  %v1092_v11 = vld [vmem:[#allocation2 + $0x2d0] sm:$0xff] }
 0x211   : > { %5368 = vmatprep.subr.bf16.mxu1 %v5367_v28  ;;  %v1097_v5 = vld [vmem:[#allocation2 + $0x2f8] sm:$0xff]  ;;  %v1094_v10 = vld [vmem:[#allocation2 + $0x2e0] sm:$0xff]  ;;  %v1096_v12 = vld [vmem:[#allocation2 + $0x2f0] sm:$0xff] }
 0x212   : > { %v5383_v13 = vpack.c.bf16 %v1097_v5, %v1093_v4  ;;  %v1099_v14 = vld [vmem:[#allocation2 + $0x308] sm:$0xff]  ;;  %v1101_v17 = vld [vmem:[#allocation2 + $0x318] sm:$0xff]  ;;  %v5257_v19 = vpack.c.bf16 %v1094_v10, %v1090_v7  ;;  %v5385_v20 = vpack.c.bf16 %v1096_v12, %v1092_v11  ;;  %v1098_v22 = vld [vmem:[#allocation2 + $0x300] sm:$0xff] }
 0x213   : > { %5242 = vmatpush1.bf16.msra.mxu0 %v5241_v34  ;;  %v1103_v15 = vld [vmem:[#allocation2 + $0x328] sm:$0xff]  ;;  %v1105_v18 = vld [vmem:[#allocation2 + $0x338] sm:$0xff]  ;;  %v1102_v23 = vld [vmem:[#allocation2 + $0x320] sm:$0xff] }
 0x214   : > { %5370 = vmatpush1.bf16.msra.mxu1 %v5369_v35  ;;  %5244 = vmatprep.subr.bf16.mxu0 %v5243_v36  ;;  %v999_v16 = vld [vmem:[%s9567_s18 + $0x8] sm:$0xff]  ;;  %v5259_v21 = vpack.c.bf16 %v1103_v15, %v1099_v14  ;;  %v1100_v24 = vld [vmem:[#allocation2 + $0x310] sm:$0xff]  ;;  %v5387_v25 = vpack.c.bf16 %v1105_v18, %v1101_v17  ;;  %v1109_v29 = vld [vmem:[#allocation2 + $0x358] sm:$0xff]  ;;  %v5261_v31 = vpack.c.bf16 %v1102_v23, %v1098_v22 }
 0x215   : > { %5372 = vmatprep.subr.bf16.mxu1 %v5371_v40  ;;  %1344 = vmatprep.mubr.f32.mxu0 %v999_v16  ;;  %v1104_v26 = vld [vmem:[#allocation2 + $0x330] sm:$0xff]  ;;  %v1107_v27 = vld [vmem:[#allocation2 + $0x348] sm:$0xff]  ;;  %v1113_v30 = vld [vmem:[#allocation2 + $0x378] sm:$0xff] }
 0x216   : > { %1486 = vmatprep.mubr.f32.mxu1 %v999_v16  ;;  %v1111_v28 = vld [vmem:[#allocation2 + $0x368] sm:$0xff]  ;;  %v5389_v32 = vpack.c.bf16 %v1104_v26, %v1100_v24  ;;  %v1106_v34 = vld [vmem:[#allocation2 + $0x340] sm:$0xff]  ;;  %v1108_v36 = vld [vmem:[#allocation2 + $0x350] sm:$0xff]  ;;  %v5391_v37 = vpack.c.bf16 %v1113_v30, %v1109_v29 }
 0x217   : > { %5246 = vmatpush1.bf16.msra.mxu0 %v5245_v46  ;;  %v5263_v33 = vpack.c.bf16 %v1111_v28, %v1107_v27  ;;  %v1110_v35 = vld [vmem:[#allocation2 + $0x360] sm:$0xff]  ;;  %v1112_v38 = vld [vmem:[#allocation2 + $0x370] sm:$0xff]  ;;  %v1115_v39 = vld [vmem:[#allocation2 + $0x388] sm:$0xff] }
 0x218   : > { %5374 = vmatpush1.bf16.msra.mxu1 %v5373_v47  ;;  %5248 = vmatprep.subr.bf16.mxu0 %v5247_v48  ;;  %v1119_v40 = vld [vmem:[#allocation2 + $0x3a8] sm:$0xff]  ;;  %v1117_v41 = vld [vmem:[#allocation2 + $0x398] sm:$0xff]  ;;  %v5265_v43 = vpack.c.bf16 %v1110_v35, %v1106_v34  ;;  %v5393_v44 = vpack.c.bf16 %v1112_v38, %v1108_v36  ;;  %v1114_v46 = vld [vmem:[#allocation2 + $0x380] sm:$0xff] }
 0x219   : > { %5376 = vmatprep.subr.bf16.mxu1 %v5375_v52  ;;  %v1121_v42 = vld [vmem:[#allocation2 + $0x3b8] sm:$0xff]  ;;  %v5267_v45 = vpack.c.bf16 %v1119_v40, %v1115_v39  ;;  %v1118_v47 = vld [vmem:[#allocation2 + $0x3a0] sm:$0xff]  ;;  %v1116_v48 = vld [vmem:[#allocation2 + $0x390] sm:$0xff] }
 0x21a   : > { %v5395_v49 = vpack.c.bf16 %v1121_v42, %v1117_v41  ;;  %v1120_v50 = vld [vmem:[#allocation2 + $0x3b0] sm:$0xff]  ;;  %v1123_v51 = vld [vmem:[#allocation2 + $0x3c8] sm:$0xff]  ;;  %v1125_v53 = vld [vmem:[#allocation2 + $0x3d8] sm:$0xff]  ;;  %v5269_v55 = vpack.c.bf16 %v1118_v47, %v1114_v46 }
 0x21b   : > { %5250 = vmatpush1.bf16.msra.mxu0 %v5249_v58  ;;  %v1127_v52 = vld [vmem:[#allocation2 + $0x3e8] sm:$0xff]  ;;  %v1129_v54 = vld [vmem:[#allocation2 + $0x3f8] sm:$0xff]  ;;  %v5397_v56 = vpack.c.bf16 %v1120_v50, %v1116_v48  ;;  %v1122_v58 = vld [vmem:[#allocation2 + $0x3c0] sm:$0xff] }
 0x21c   : > { %5378 = vmatpush1.bf16.msra.mxu1 %v5377_v59  ;;  %5252 = vmatprep.subr.bf16.mxu0 %v5251_v60  ;;  %v5271_v57 = vpack.c.bf16 %v1127_v52, %v1123_v51  ;;  %v1126_v59 = vld [vmem:[#allocation2 + $0x3e0] sm:$0xff]  ;;  %v1124_v60 = vld [vmem:[#allocation2 + $0x3d0] sm:$0xff]  ;;  %v5399_v61 = vpack.c.bf16 %v1129_v54, %v1125_v53  ;;  %v1131_v63 = vld [vmem:[#allocation2 + $0x408] sm:$0xff] }
 0x21d   : > { %5380 = vmatprep.subr.bf16.mxu1 %v5379_v0  ;;  %v1128_v62 = vld [vmem:[#allocation2 + $0x3f0] sm:$0xff]  ;;  %v1135_v0 = vld [vmem:[#allocation2 + $0x428] sm:$0xff]  ;;  %v1133_v1 = vld [vmem:[#allocation2 + $0x418] sm:$0xff]  ;;  %v5273_v3 = vpack.c.bf16 %v1126_v59, %v1122_v58 }
 0x21e   : > { %v1137_v2 = vld [vmem:[#allocation2 + $0x438] sm:$0xff]  ;;  %v5401_v4 = vpack.c.bf16 %v1128_v62, %v1124_v60  ;;  %v5275_v5 = vpack.c.bf16 %v1135_v0, %v1131_v63  ;;  %v1134_v7 = vld [vmem:[#allocation2 + $0x420] sm:$0xff]  ;;  %v1136_v10 = vld [vmem:[#allocation2 + $0x430] sm:$0xff] }
 0x21f   : > { %5254 = vmatpush1.bf16.msra.mxu0 %v5253_v6  ;;  %v1130_v6 = vld [vmem:[#allocation2 + $0x400] sm:$0xff]  ;;  %v1139_v11 = vld [vmem:[#allocation2 + $0x448] sm:$0xff]  ;;  %v1145_v14 = vld [vmem:[#allocation2 + $0x478] sm:$0xff] }
 0x220   : > { %5382 = vmatpush1.bf16.msra.mxu1 %v5381_v8  ;;  %5256 = vmatprep.subr.bf16.mxu0 %v5255_v9  ;;  %v1132_v8 = vld [vmem:[#allocation2 + $0x410] sm:$0xff]  ;;  %v5403_v9 = vpack.c.bf16 %v1137_v2, %v1133_v1  ;;  %v1143_v12 = vld [vmem:[#allocation2 + $0x468] sm:$0xff]  ;;  %v998_v15 = vld [vmem:[%s9567_s18] sm:$0xff]  ;;  %v5277_v16 = vpack.c.bf16 %v1134_v7, %v1130_v6 }
 0x221   : > { %5384 = vmatprep.subr.bf16.mxu1 %v5383_v13  ;;  %v1141_v13 = vld [vmem:[#allocation2 + $0x458] sm:$0xff]  ;;  %v5405_v17 = vpack.c.bf16 %v1136_v10, %v1132_v8  ;;  %v5279_v18 = vpack.c.bf16 %v1143_v12, %v1139_v11  ;;  %v1144_v23 = vld [vmem:[#allocation2 + $0x470] sm:$0xff]  ;;  %v1147_v24 = vld [vmem:[#allocation2 + $0x488] sm:$0xff] }
 0x222   : > { %v5407_v22 = vpack.c.bf16 %v1145_v14, %v1141_v13  ;;  %v1149_v26 = vld [vmem:[#allocation2 + $0x498] sm:$0xff]  ;;  %v1152_v35 = vld [vmem:[#allocation2 + $0x4b0] sm:$0xff]  ;;  %v1155_v36 = vld [vmem:[#allocation2 + $0x4c8] sm:$0xff] }
 0x223   : > { %5258 = vmatpush1.bf16.msra.mxu0 %v5257_v19  ;;  %v1138_v19 = vld [vmem:[#allocation2 + $0x440] sm:$0xff]  ;;  %v1153_v27 = vld [vmem:[#allocation2 + $0x4b8] sm:$0xff]  ;;  %v1160_v47 = vld [vmem:[#allocation2 + $0x4f0] sm:$0xff] }
 0x224   : > { %5386 = vmatpush1.bf16.msra.mxu1 %v5385_v20  ;;  %5260 = vmatprep.subr.bf16.mxu0 %v5259_v21  ;;  %v1142_v20 = vld [vmem:[#allocation2 + $0x460] sm:$0xff]  ;;  %v1140_v21 = vld [vmem:[#allocation2 + $0x450] sm:$0xff]  ;;  %v5411_v34 = vpack.c.bf16 %v1153_v27, %v1149_v26  ;;  %v1157_v38 = vld [vmem:[#allocation2 + $0x4d8] sm:$0xff] }
 0x225   : > { %5388 = vmatprep.subr.bf16.mxu1 %v5387_v25  ;;  %v1151_v25 = vld [vmem:[#allocation2 + $0x4a8] sm:$0xff]  ;;  %v5281_v28 = vpack.c.bf16 %v1142_v20, %v1138_v19  ;;  %v5409_v29 = vpack.c.bf16 %v1144_v23, %v1140_v21  ;;  %v1161_v39 = vld [vmem:[#allocation2 + $0x4f8] sm:$0xff]  ;;  %v1168_v59 = vld [vmem:[#allocation2 + $0x530] sm:$0xff] }
 0x226   : > { %v5283_v30 = vpack.c.bf16 %v1151_v25, %v1147_v24  ;;  %v5415_v46 = vpack.c.bf16 %v1161_v39, %v1157_v38  ;;  %v1163_v48 = vld [vmem:[#allocation2 + $0x508] sm:$0xff]  ;;  %v1165_v50 = vld [vmem:[#allocation2 + $0x518] sm:$0xff]  ;;  %v1176_v7 = vld [vmem:[#allocation2 + $0x570] sm:$0xff] }
 0x227   : > { %5262 = vmatpush1.bf16.msra.mxu0 %v5261_v31  ;;  %v1146_v31 = vld [vmem:[#allocation2 + $0x480] sm:$0xff]  ;;  %v1169_v51 = vld [vmem:[#allocation2 + $0x538] sm:$0xff]  ;;  %v1171_v60 = vld [vmem:[#allocation2 + $0x548] sm:$0xff] }
 0x228   : > { %5390 = vmatpush1.bf16.msra.mxu1 %v5389_v32  ;;  %5264 = vmatprep.subr.bf16.mxu0 %v5263_v33  ;;  %v1150_v32 = vld [vmem:[#allocation2 + $0x4a0] sm:$0xff]  ;;  %v1148_v33 = vld [vmem:[#allocation2 + $0x490] sm:$0xff]  ;;  %v5419_v58 = vpack.c.bf16 %v1169_v51, %v1165_v50  ;;  %v1173_v62 = vld [vmem:[#allocation2 + $0x558] sm:$0xff] }
 0x229   : > { %5392 = vmatprep.subr.bf16.mxu1 %v5391_v37  ;;  %v1159_v37 = vld [vmem:[#allocation2 + $0x4e8] sm:$0xff]  ;;  %v5285_v40 = vpack.c.bf16 %v1150_v32, %v1146_v31  ;;  %v5413_v41 = vpack.c.bf16 %v1152_v35, %v1148_v33  ;;  %v1177_v63 = vld [vmem:[#allocation2 + $0x578] sm:$0xff]  ;;  %v1178_v13 = vld [vmem:[#allocation2 + $0x580] sm:$0xff] }
 0x22a   : > { %v5287_v42 = vpack.c.bf16 %v1159_v37, %v1155_v36  ;;  %v5423_v6 = vpack.c.bf16 %v1177_v63, %v1173_v62  ;;  %v1179_v8 = vld [vmem:[#allocation2 + $0x588] sm:$0xff]  ;;  %v1181_v10 = vld [vmem:[#allocation2 + $0x598] sm:$0xff]  ;;  %v1192_v32 = vld [vmem:[#allocation2 + $0x5f0] sm:$0xff] }
 0x22b   : > { %5266 = vmatpush1.bf16.msra.mxu0 %v5265_v43  ;;  %v1154_v43 = vld [vmem:[#allocation2 + $0x4c0] sm:$0xff]  ;;  %v1185_v11 = vld [vmem:[#allocation2 + $0x5b8] sm:$0xff]  ;;  %v1187_v20 = vld [vmem:[#allocation2 + $0x5c8] sm:$0xff] }
 0x22c   : > { %5394 = vmatpush1.bf16.msra.mxu1 %v5393_v44  ;;  %5268 = vmatprep.subr.bf16.mxu0 %v5267_v45  ;;  %v1158_v44 = vld [vmem:[#allocation2 + $0x4e0] sm:$0xff]  ;;  %v1156_v45 = vld [vmem:[#allocation2 + $0x4d0] sm:$0xff]  ;;  %v5427_v19 = vpack.c.bf16 %v1185_v11, %v1181_v10  ;;  %v1191_v21 = vld [vmem:[#allocation2 + $0x5e8] sm:$0xff] }
 0x22d   : > { %5396 = vmatprep.subr.bf16.mxu1 %v5395_v49  ;;  %v1167_v49 = vld [vmem:[#allocation2 + $0x528] sm:$0xff]  ;;  %v5289_v52 = vpack.c.bf16 %v1158_v44, %v1154_v43  ;;  %v5417_v53 = vpack.c.bf16 %v1160_v47, %v1156_v45  ;;  %v1189_v23 = vld [vmem:[#allocation2 + $0x5d8] sm:$0xff]  ;;  %v5303_v27 = vpack.c.bf16 %v1191_v21, %v1187_v20  ;;  %v1200_v44 = vld [vmem:[#allocation2 + $0x630] sm:$0xff] }
 0x22e   : > { %v5291_v54 = vpack.c.bf16 %v1167_v49, %v1163_v48  ;;  %v1193_v24 = vld [vmem:[#allocation2 + $0x5f8] sm:$0xff]  ;;  %v1195_v33 = vld [vmem:[#allocation2 + $0x608] sm:$0xff] }
 0x22f   : > { %5270 = vmatpush1.bf16.msra.mxu0 %v5269_v55  ;;  %v1162_v55 = vld [vmem:[#allocation2 + $0x500] sm:$0xff]  ;;  %v5431_v31 = vpack.c.bf16 %v1193_v24, %v1189_v23  ;;  %v1197_v35 = vld [vmem:[#allocation2 + $0x618] sm:$0xff]  ;;  %v1203_v45 = vld [vmem:[#allocation2 + $0x648] sm:$0xff] }
 0x230   : > { %5398 = vmatpush1.bf16.msra.mxu1 %v5397_v56  ;;  %5272 = vmatprep.subr.bf16.mxu0 %v5271_v57  ;;  %v1166_v56 = vld [vmem:[#allocation2 + $0x520] sm:$0xff]  ;;  %v1164_v57 = vld [vmem:[#allocation2 + $0x510] sm:$0xff]  ;;  %v1201_v36 = vld [vmem:[#allocation2 + $0x638] sm:$0xff] }
 0x231   : > { %5400 = vmatprep.subr.bf16.mxu1 %v5399_v61  ;;  %v1175_v61 = vld [vmem:[#allocation2 + $0x568] sm:$0xff]  ;;  %v5293_v0 = vpack.c.bf16 %v1166_v56, %v1162_v55  ;;  %v5421_v1 = vpack.c.bf16 %v1168_v59, %v1164_v57  ;;  %v5435_v43 = vpack.c.bf16 %v1201_v36, %v1197_v35  ;;  %v1205_v47 = vld [vmem:[#allocation2 + $0x658] sm:$0xff]  ;;  %v1208_v56 = vld [vmem:[#allocation2 + $0x670] sm:$0xff] }
 0x232   : > { %v5295_v2 = vpack.c.bf16 %v1175_v61, %v1171_v60  ;;  %v1209_v48 = vld [vmem:[#allocation2 + $0x678] sm:$0xff]  ;;  %v1211_v57 = vld [vmem:[#allocation2 + $0x688] sm:$0xff]  ;;  %v1226_v24 = vld [vmem:[#allocation2 + $0x700] sm:$0xff] }
 0x233   : > { %5274 = vmatpush1.bf16.msra.mxu0 %v5273_v3  ;;  %v1170_v3 = vld [vmem:[#allocation2 + $0x540] sm:$0xff]  ;;  %v5439_v55 = vpack.c.bf16 %v1209_v48, %v1205_v47  ;;  %v1213_v59 = vld [vmem:[#allocation2 + $0x698] sm:$0xff] }
 0x234   : > { %5402 = vmatpush1.bf16.msra.mxu1 %v5401_v4  ;;  %5276 = vmatprep.subr.bf16.mxu0 %v5275_v5  ;;  %v1174_v4 = vld [vmem:[#allocation2 + $0x560] sm:$0xff]  ;;  %v1172_v5 = vld [vmem:[#allocation2 + $0x550] sm:$0xff]  ;;  %v1217_v60 = vld [vmem:[#allocation2 + $0x6b8] sm:$0xff] }
 0x235   : > { %5404 = vmatprep.subr.bf16.mxu1 %v5403_v9  ;;  %v1183_v9 = vld [vmem:[#allocation2 + $0x5a8] sm:$0xff]  ;;  %v5297_v12 = vpack.c.bf16 %v1174_v4, %v1170_v3  ;;  %v5425_v14 = vpack.c.bf16 %v1176_v7, %v1172_v5  ;;  %v5443_v3 = vpack.c.bf16 %v1217_v60, %v1213_v59  ;;  %v1216_v4 = vld [vmem:[#allocation2 + $0x6b0] sm:$0xff]  ;;  %v1221_v7 = vld [vmem:[#allocation2 + $0x6d8] sm:$0xff] }
 0x236   : > { %1345 = vmatmul.mubr.f32.vlgmr.msra.gmra.mrb[0].mxu0 %v998_v15  ;;  %v1219_v5 = vld [vmem:[#allocation2 + $0x6c8] sm:$0xff]  ;;  %v1233_v20 = vld [vmem:[#allocation2 + $0x738] sm:$0xff]  ;;  %v1234_v36 = vld [vmem:[#allocation2 + $0x740] sm:$0xff] }
 0x237   : > { %5278 = vmatpush1.bf16.msra.mxu0 %v5277_v16  ;;  %1487 = vmatmul.mubr.f32.vlgmr.msra.gmra.mrb[0].mxu1 %v998_v15  ;;  %v5299_v15 = vpack.c.bf16 %v1183_v9, %v1179_v8  ;;  %v1182_v16 = vld [vmem:[#allocation2 + $0x5a0] sm:$0xff]  ;;  %v1225_v8 = vld [vmem:[#allocation2 + $0x6f8] sm:$0xff] }
 0x238   : > { %5406 = vmatpush1.bf16.msra.mxu1 %v5405_v17  ;;  %5280 = vmatprep.subr.bf16.mxu0 %v5279_v18  ;;  %v1180_v17 = vld [vmem:[#allocation2 + $0x590] sm:$0xff]  ;;  %v5301_v25 = vpack.c.bf16 %v1182_v16, %v1178_v13  ;;  %v1222_v13 = vld [vmem:[#allocation2 + $0x6e0] sm:$0xff] }
 0x239   : > { %5408 = vmatprep.subr.bf16.mxu1 %v5407_v22  ;;  %v1184_v18 = vld [vmem:[#allocation2 + $0x5b0] sm:$0xff]  ;;  %v1001_v22 = vld [vmem:[%s9567_s18 + $0x18] sm:$0xff]  ;;  %v1242_v48 = vld [vmem:[#allocation2 + $0x780] sm:$0xff] }
 0x23a   : > { %1415 = vmatprep.mubr.f32.mxu0 %v1001_v22  ;;  %1557 = vmatprep.mubr.f32.mxu1 %v1001_v22  ;;  %v5429_v26 = vpack.c.bf16 %v1184_v18, %v1180_v17  ;;  %v1224_v16 = vld [vmem:[#allocation2 + $0x6f0] sm:$0xff]  ;;  %v1227_v17 = vld [vmem:[#allocation2 + $0x708] sm:$0xff]  ;;  %v1250_v60 = vld [vmem:[#allocation2 + $0x7c0] sm:$0xff] }
 0x23b   : > { %5282 = vmatpush1.bf16.msra.mxu0 %v5281_v28  ;;  %v1186_v28 = vld [vmem:[#allocation2 + $0x5c0] sm:$0xff]  ;;  %v1231_v18 = vld [vmem:[#allocation2 + $0x728] sm:$0xff] }
 0x23c   : > { %5410 = vmatpush1.bf16.msra.mxu1 %v5409_v29  ;;  %5284 = vmatprep.subr.bf16.mxu0 %v5283_v30  ;;  %v1190_v29 = vld [vmem:[#allocation2 + $0x5e0] sm:$0xff]  ;;  %v1188_v30 = vld [vmem:[#allocation2 + $0x5d0] sm:$0xff]  ;;  %v5323_v23 = vpack.c.bf16 %v1231_v18, %v1227_v17 }
 0x23d   : > { %5412 = vmatprep.subr.bf16.mxu1 %v5411_v34  ;;  %v1199_v34 = vld [vmem:[#allocation2 + $0x628] sm:$0xff]  ;;  %v5305_v37 = vpack.c.bf16 %v1190_v29, %v1186_v28  ;;  %v5433_v38 = vpack.c.bf16 %v1192_v32, %v1188_v30  ;;  %v1232_v28 = vld [vmem:[#allocation2 + $0x730] sm:$0xff]  ;;  %v1241_v32 = vld [vmem:[#allocation2 + $0x778] sm:$0xff] }
 0x23e   : > { %v5307_v39 = vpack.c.bf16 %v1199_v34, %v1195_v33  ;;  %v1235_v29 = vld [vmem:[#allocation2 + $0x748] sm:$0xff] }
 0x23f   : > { %5286 = vmatpush1.bf16.msra.mxu0 %v5285_v40  ;;  %v1194_v40 = vld [vmem:[#allocation2 + $0x600] sm:$0xff]  ;;  %v1239_v30 = vld [vmem:[#allocation2 + $0x768] sm:$0xff] }
 0x240   : > { %5414 = vmatpush1.bf16.msra.mxu1 %v5413_v41  ;;  %5288 = vmatprep.subr.bf16.mxu0 %v5287_v42  ;;  %v1198_v41 = vld [vmem:[#allocation2 + $0x620] sm:$0xff]  ;;  %v1196_v42 = vld [vmem:[#allocation2 + $0x610] sm:$0xff]  ;;  %v5327_v35 = vpack.c.bf16 %v1239_v30, %v1235_v29 }
 0x241   : > { %5416 = vmatprep.subr.bf16.mxu1 %v5415_v46  ;;  %v1207_v46 = vld [vmem:[#allocation2 + $0x668] sm:$0xff]  ;;  %v5309_v49 = vpack.c.bf16 %v1198_v41, %v1194_v40  ;;  %v5437_v50 = vpack.c.bf16 %v1200_v44, %v1196_v42  ;;  %v1240_v40 = vld [vmem:[#allocation2 + $0x770] sm:$0xff]  ;;  %v1249_v44 = vld [vmem:[#allocation2 + $0x7b8] sm:$0xff] }
 0x242   : > { %v5311_v51 = vpack.c.bf16 %v1207_v46, %v1203_v45  ;;  %v1243_v41 = vld [vmem:[#allocation2 + $0x788] sm:$0xff] }
 0x243   : > { %5290 = vmatpush1.bf16.msra.mxu0 %v5289_v52  ;;  %v1202_v52 = vld [vmem:[#allocation2 + $0x640] sm:$0xff]  ;;  %v1247_v42 = vld [vmem:[#allocation2 + $0x7a8] sm:$0xff] }
 0x244   : > { %5418 = vmatpush1.bf16.msra.mxu1 %v5417_v53  ;;  %5292 = vmatprep.subr.bf16.mxu0 %v5291_v54  ;;  %v1206_v53 = vld [vmem:[#allocation2 + $0x660] sm:$0xff]  ;;  %v1204_v54 = vld [vmem:[#allocation2 + $0x650] sm:$0xff]  ;;  %v5331_v47 = vpack.c.bf16 %v1247_v42, %v1243_v41 }
 0x245   : > { %5420 = vmatprep.subr.bf16.mxu1 %v5419_v58  ;;  %v1215_v58 = vld [vmem:[#allocation2 + $0x6a8] sm:$0xff]  ;;  %v5313_v61 = vpack.c.bf16 %v1206_v53, %v1202_v52  ;;  %v5441_v62 = vpack.c.bf16 %v1208_v56, %v1204_v54  ;;  %v1248_v52 = vld [vmem:[#allocation2 + $0x7b0] sm:$0xff]  ;;  %v1257_v56 = vld [vmem:[#allocation2 + $0x7f8] sm:$0xff] }
 0x246   : > { %v5315_v63 = vpack.c.bf16 %v1215_v58, %v1211_v57  ;;  %v1251_v53 = vld [vmem:[#allocation2 + $0x7c8] sm:$0xff] }
 0x247   : > { %5294 = vmatpush1.bf16.msra.mxu0 %v5293_v0  ;;  %v1210_v0 = vld [vmem:[#allocation2 + $0x680] sm:$0xff]  ;;  %v1255_v54 = vld [vmem:[#allocation2 + $0x7e8] sm:$0xff] }
 0x248   : > { %5422 = vmatpush1.bf16.msra.mxu1 %v5421_v1  ;;  %5296 = vmatprep.subr.bf16.mxu0 %v5295_v2  ;;  %v1214_v1 = vld [vmem:[#allocation2 + $0x6a0] sm:$0xff]  ;;  %v1212_v2 = vld [vmem:[#allocation2 + $0x690] sm:$0xff]  ;;  %v5335_v59 = vpack.c.bf16 %v1255_v54, %v1251_v53 }
 0x249   : > { %5424 = vmatprep.subr.bf16.mxu1 %v5423_v6  ;;  %v1223_v6 = vld [vmem:[#allocation2 + $0x6e8] sm:$0xff]  ;;  %v5317_v9 = vpack.c.bf16 %v1214_v1, %v1210_v0  ;;  %v5445_v10 = vpack.c.bf16 %v1216_v4, %v1212_v2  ;;  %v1256_v0 = vld [vmem:[#allocation2 + $0x7f0] sm:$0xff]  ;;  %v1260_v4 = vlaneseq }
 0x24a   : > { %v5319_v11 = vpack.c.bf16 %v1223_v6, %v1219_v5 }
 0x24b   : > { %5298 = vmatpush1.bf16.msra.mxu0 %v5297_v12  ;;  %v1218_v12 = vld [vmem:[#allocation2 + $0x6c0] sm:$0xff]  ;;  %v1261_v5 = vshrl.u32 %v1260_v4, 7 }
 0x24c   : > { %5426 = vmatpush1.bf16.msra.mxu1 %v5425_v14  ;;  %5300 = vmatprep.subr.bf16.mxu0 %v5299_v15  ;;  %v1220_v14 = vld [vmem:[#allocation2 + $0x6d0] sm:$0xff]  ;;  %v5447_v15 = vpack.c.bf16 %v1225_v8, %v1221_v7  ;;  %v5321_v21 = vpack.c.bf16 %v1222_v13, %v1218_v12  ;;  %v1258_v7 = vld [vmem:[#allocation4] sm:$0xf] }
 0x24d   : > { %5428 = vmatprep.subr.bf16.mxu1 %v5427_v19  ;;  %v1229_v19 = vld [vmem:[#allocation2 + $0x718] sm:$0xff]  ;;  %v5449_v22 = vpack.c.bf16 %v1224_v16, %v1220_v14  ;;  %v1262_v6 = vsub.s32 0, %v1261_v5  ;;  %v1270_v8 = vsub.s32 2, %v1261_v5  ;;  %v1568_v16 = vld [vmem:[#allocation6] sm:$0xff] }
 0x24f   : > { %5302 = vmatpush1.bf16.msra.mxu0 %v5301_v25  ;;  %v1230_v25 = vld [vmem:[#allocation2 + $0x720] sm:$0xff]  ;;  %v1271_v12 = vrot.slane %v1258_v7, %v1270_v8 }
 0x250   : > { %5430 = vmatpush1.bf16.msra.mxu1 %v5429_v26  ;;  %5304 = vmatprep.subr.bf16.mxu0 %v5303_v27  ;;  %v1228_v26 = vld [vmem:[#allocation2 + $0x710] sm:$0xff]  ;;  %v5451_v27 = vpack.c.bf16 %v1233_v20, %v1229_v19  ;;  %v5325_v33 = vpack.c.bf16 %v1230_v25, %v1226_v24  ;;  %v1571_v25 = vld [vmem:[#allocation6 + $0x18] sm:$0xff] }
 0x251   : > { %5432 = vmatprep.subr.bf16.mxu1 %v5431_v31  ;;  %v1237_v31 = vld [vmem:[#allocation2 + $0x758] sm:$0xff]  ;;  %v5453_v34 = vpack.c.bf16 %v1232_v28, %v1228_v26 }
 0x252   : > { %v1570_v19 = vld [vmem:[#allocation6 + $0x10] sm:$0xff] }
 0x253   : > { %5306 = vmatpush1.bf16.msra.mxu0 %v5305_v37  ;;  %v1238_v37 = vld [vmem:[#allocation2 + $0x760] sm:$0xff] }
 0x254   : > { %5434 = vmatpush1.bf16.msra.mxu1 %v5433_v38  ;;  %5308 = vmatprep.subr.bf16.mxu0 %v5307_v39  ;;  %v1236_v38 = vld [vmem:[#allocation2 + $0x750] sm:$0xff]  ;;  %v5455_v39 = vpack.c.bf16 %v1241_v32, %v1237_v31  ;;  %v5329_v45 = vpack.c.bf16 %v1238_v37, %v1234_v36 }
 0x255   : > { %5436 = vmatprep.subr.bf16.mxu1 %v5435_v43  ;;  %v1245_v43 = vld [vmem:[#allocation2 + $0x798] sm:$0xff]  ;;  %v5457_v46 = vpack.c.bf16 %v1240_v40, %v1236_v38 }
 0x257   : > { %5310 = vmatpush1.bf16.msra.mxu0 %v5309_v49  ;;  %v1246_v49 = vld [vmem:[#allocation2 + $0x7a0] sm:$0xff] }
 0x258   : > { %5438 = vmatpush1.bf16.msra.mxu1 %v5437_v50  ;;  %5312 = vmatprep.subr.bf16.mxu0 %v5311_v51  ;;  %v1244_v50 = vld [vmem:[#allocation2 + $0x790] sm:$0xff]  ;;  %v5459_v51 = vpack.c.bf16 %v1249_v44, %v1245_v43  ;;  %v5333_v57 = vpack.c.bf16 %v1246_v49, %v1242_v48 }
 0x259   : > { %5440 = vmatprep.subr.bf16.mxu1 %v5439_v55  ;;  %v1253_v55 = vld [vmem:[#allocation2 + $0x7d8] sm:$0xff]  ;;  %v5461_v58 = vpack.c.bf16 %v1248_v52, %v1244_v50 }
 0x25b   : > { %5314 = vmatpush1.bf16.msra.mxu0 %v5313_v61  ;;  %v1254_v61 = vld [vmem:[#allocation2 + $0x7e0] sm:$0xff] }
 0x25c   : > { %5442 = vmatpush1.bf16.msra.mxu1 %v5441_v62  ;;  %5316 = vmatprep.subr.bf16.mxu0 %v5315_v63  ;;  %v5463_v62 = vpack.c.bf16 %v1257_v56, %v1253_v55  ;;  %v1252_v63 = vld [vmem:[#allocation2 + $0x7d0] sm:$0xff]  ;;  %v5337_v1 = vpack.c.bf16 %v1254_v61, %v1250_v60 }
 0x25d   : > { %5444 = vmatprep.subr.bf16.mxu1 %v5443_v3  ;;  %v5465_v2 = vpack.c.bf16 %v1256_v0, %v1252_v63  ;;  %v1000_v3 = vld [vmem:[%s9567_s18 + $0x10] sm:$0xff] }
 0x25f   : > { %5318 = vmatpush1.bf16.msra.mxu0 %v5317_v9  ;;  %v1266_v9 = vsub.s32 1, %v1261_v5 }
 0x260   : > { %5446 = vmatpush1.bf16.msra.mxu1 %v5445_v10  ;;  %5320 = vmatprep.subr.bf16.mxu0 %v5319_v11  ;;  %v1274_v10 = vsub.s32 3, %v1261_v5  ;;  %v1263_v11 = vrot.slane %v1258_v7, %v1262_v6 }
 0x261   : > { %5448 = vmatprep.subr.bf16.mxu1 %v5447_v15  ;;  %v1267_v13 = vrot.slane %v1258_v7, %v1266_v9 }
 0x262   : > { %v1275_v14 = vrot.slane %v1258_v7, %v1274_v10 }
 0x263   : > { %5322 = vmatpush1.bf16.msra.mxu0 %v5321_v21  ;;  %v1569_v21 = vld [vmem:[#allocation6 + $0x8] sm:$0xff] }
 0x264   : > { %5450 = vmatpush1.bf16.msra.mxu1 %v5449_v22  ;;  %5324 = vmatprep.subr.bf16.mxu0 %v5323_v23 }
 0x265   : > { %5452 = vmatprep.subr.bf16.mxu1 %v5451_v27 }
 0x267   : > { %5326 = vmatpush1.bf16.msra.mxu0 %v5325_v33 }
 0x268   : > { %5454 = vmatpush1.bf16.msra.mxu1 %v5453_v34  ;;  %5328 = vmatprep.subr.bf16.mxu0 %v5327_v35 }
 0x269   : > { %5456 = vmatprep.subr.bf16.mxu1 %v5455_v39 }
 0x26b   : > { %5330 = vmatpush1.bf16.msra.mxu0 %v5329_v45 }
 0x26c   : > { %5458 = vmatpush1.bf16.msra.mxu1 %v5457_v46  ;;  %5332 = vmatprep.subr.bf16.mxu0 %v5331_v47 }
 0x26d   : > { %5460 = vmatprep.subr.bf16.mxu1 %v5459_v51 }
 0x26f   : > { %5334 = vmatpush1.bf16.msra.mxu0 %v5333_v57 }
 0x270   : > { %5462 = vmatpush1.bf16.msra.mxu1 %v5461_v58  ;;  %5336 = vmatprep.subr.bf16.mxu0 %v5335_v59 }
 0x271   : > { %5464 = vmatprep.subr.bf16.mxu1 %v5463_v62 }
 0x273   : > { %5338 = vmatpush1.bf16.msra.mxu0 %v5337_v1 }
 0x274   : > { %5466 = vmatpush1.bf16.msra.mxu1 %v5465_v2 }
 0x276   : > { %1416 = vmatmul.mubr.f32.vlgmr.msra.gmra.mrb[0].mxu0 %v1000_v3 }
 0x277   : > { %1558 = vmatmul.mubr.f32.vlgmr.msra.gmra.mrb[0].mxu1 %v1000_v3 }
 0x349   : > { %v1417_v15 = vpop.f32.mrb[0].mxu0 }
 0x34a   : > { %v6619_v17 = vadd.f32 %v1417_v15, %v1263_v11  ;;  %v1559_v18 = vpop.f32.mrb[0].mxu1  ;;  %v1419_v20 = vpop.f32.mrb[1].mxu0 }
 0x34b   : > { %v6621_v22 = vadd.f32 %v1559_v18, %v1271_v12  ;;  %v6620_v23 = vadd.f32 %v1419_v20, %v1267_v13  ;;  %v1561_v24 = vpop.f32.mrb[1].mxu1 }
 0x34c   : > { %1564 = vst [vmem:[%s9568_s29] sm:$0xff] %v6619_v17  ;;  %v1572_v26 = vadd.f32 %v6619_v17, %v1568_v16  ;;  %v6622_v27 = vadd.f32 %v1561_v24, %v1275_v14 }
 0x34d   : > { %1566 = vst [vmem:[%s9568_s29 + $0x10] sm:$0xff] %v6621_v22  ;;  %v1574_v28 = vadd.f32 %v6621_v22, %v1570_v19  ;;  %1565 = vst [vmem:[%s9568_s29 + $0x8] sm:$0xff] %v6620_v23  ;;  %v1573_v29 = vadd.f32 %v6620_v23, %v1569_v21 }
 0x34e   : > { %1576 = vst [vmem:[%s9569_s19] sm:$0xff] %v1572_v26  ;;  %1567 = vst [vmem:[%s9568_s29 + $0x18] sm:$0xff] %v6622_v27  ;;  %v1575_v30 = vadd.f32 %v6622_v27, %v1571_v25 }
 0x34f   : > { %1578 = vst [vmem:[%s9569_s19 + $0x10] sm:$0xff] %v1574_v28  ;;  %1577 = vst [vmem:[%s9569_s19 + $0x8] sm:$0xff] %v1573_v29 }
 0x350   : > { %1579 = vst [vmem:[%s9569_s19 + $0x18] sm:$0xff] %v1575_v30 }
 0x351 PF: > { %s9570_s15 = sld [smem:[#allocation52_spill]]  ;;  %v1684_v38 = vld [vmem:[%s7935_s21 + $0x8] sm:$0xff]  ;;  %v1686_v41 = vld [vmem:[%s7935_s21 + $0x18] sm:$0xff]  ;;  %v1683_v43 = vld [vmem:[%s7935_s21] sm:$0xff]  ;;  %s9571_s0 = scalar_lea.vmem [#allocation15], %s7953_s1  ;;  %vm3507_vm1 = vcmask 64512  }
 0x352   : > { %v1696_v39 = vld [vmem:[%s7935_s21 + $0x68] sm:$0xff]  ;;  %v1698_v42 = vld [vmem:[%s7935_s21 + $0x78] sm:$0xff]  ;;  %v1695_v45 = vld [vmem:[%s7935_s21 + $0x60] sm:$0xff]  ;;  %s9574_s27 = scalar_lea.vmem [#allocation18], %s7953_s1  ;;  %s9575_s23 = scalar_lea.vmem [#allocation21], %s7931_s26 }
 0x353   : > { %v5467_v40 = vpack.c.bf16 %v1696_v39, %v1684_v38  ;;  %v5595_v44 = vpack.c.bf16 %v1698_v42, %v1686_v41  ;;  %v1685_v46 = vld [vmem:[%s7935_s21 + $0x10] sm:$0xff]  ;;  %v5469_v48 = vpack.c.bf16 %v1695_v45, %v1683_v43  ;;  %v1708_v50 = vld [vmem:[%s7935_s21 + $0xc8] sm:$0xff]  ;;  %v1710_v52 = vld [vmem:[%s7935_s21 + $0xd8] sm:$0xff] }
 0x354   : > { %v1697_v47 = vld [vmem:[%s7935_s21 + $0x70] sm:$0xff]  ;;  %v1720_v51 = vld [vmem:[%s7935_s21 + $0x128] sm:$0xff]  ;;  %v1722_v54 = vld [vmem:[%s7935_s21 + $0x138] sm:$0xff] }
 0x355   : > { %5468 = vmatprep.subr.bf16.mxu0 %v5467_v40  ;;  %v5597_v49 = vpack.c.bf16 %v1697_v47, %v1685_v46  ;;  %5596 = vmatprep.subr.bf16.mxu1 %v5595_v44  ;;  %v5471_v53 = vpack.c.bf16 %v1720_v51, %v1708_v50  ;;  %v1707_v55 = vld [vmem:[%s7935_s21 + $0xc0] sm:$0xff]  ;;  %v5599_v57 = vpack.c.bf16 %v1722_v54, %v1710_v52  ;;  %v1709_v59 = vld [vmem:[%s7935_s21 + $0xd0] sm:$0xff]  ;;  %v1732_v61 = vld [vmem:[%s7935_s21 + $0x188] sm:$0xff] }
 0x356   : > { %v1719_v56 = vld [vmem:[%s7935_s21 + $0x120] sm:$0xff]  ;;  %5470 = vmatpush1.bf16.msra.mxu0 %v5469_v48  ;;  %v1721_v60 = vld [vmem:[%s7935_s21 + $0x130] sm:$0xff]  ;;  %v1744_v63 = vld [vmem:[%s7935_s21 + $0x1e8] sm:$0xff] }
 0x357   : > { %v8028_v31 = vld [vmem:[%s9570_s15] sm:$0xff]  ;;  %v8033_v32 = vld [vmem:[%s9570_s15 + $0x8] sm:$0xff]  ;;  %v8038_v33 = vld [vmem:[%s9570_s15 + $0x10] sm:$0xff]  ;;  %5598 = vmatpush1.bf16.msra.mxu1 %v5597_v49  ;;  %v5473_v58 = vpack.c.bf16 %v1719_v56, %v1707_v55  ;;  %5472 = vmatprep.subr.bf16.mxu0 %v5471_v53  ;;  %v5601_v62 = vpack.c.bf16 %v1721_v60, %v1709_v59  ;;  %v5475_v2 = vpack.c.bf16 %v1744_v63, %v1732_v61 }
 0x358   : > { %v1603_v34 = vadd.f32 %v8033_v32, %v8028_v31  ;;  %v8045_v35 = vld [vmem:[%s9570_s15 + $0x18] sm:$0xff]  ;;  %5600 = vmatprep.subr.bf16.mxu1 %v5599_v57  ;;  %v1731_v4 = vld [vmem:[%s7935_s21 + $0x180] sm:$0xff]  ;;  %v1756_v8 = vld [vmem:[%s7935_s21 + $0x248] sm:$0xff] }
 0x359   : > { %v1734_v0 = vld [vmem:[%s7935_s21 + $0x198] sm:$0xff]  ;;  %v1743_v5 = vld [vmem:[%s7935_s21 + $0x1e0] sm:$0xff]  ;;  %v1733_v6 = vld [vmem:[%s7935_s21 + $0x190] sm:$0xff] }
 0x35a   : > { %v1604_v36 = vadd.f32 %v1603_v34, %v8038_v33  ;;  %v1746_v1 = vld [vmem:[%s7935_s21 + $0x1f8] sm:$0xff]  ;;  %v1745_v7 = vld [vmem:[%s7935_s21 + $0x1f0] sm:$0xff]  ;;  %v1768_v9 = vld [vmem:[%s7935_s21 + $0x2a8] sm:$0xff]  ;;  %5474 = vmatpush1.bf16.msra.mxu0 %v5473_v58  ;;  %v5477_v10 = vpack.c.bf16 %v1743_v5, %v1731_v4 }
 0x35b   : > { %v5603_v3 = vpack.c.bf16 %v1746_v1, %v1734_v0  ;;  %5602 = vmatpush1.bf16.msra.mxu1 %v5601_v62  ;;  %v5605_v11 = vpack.c.bf16 %v1745_v7, %v1733_v6  ;;  %v1758_v12 = vld [vmem:[%s7935_s21 + $0x258] sm:$0xff]  ;;  %v1755_v14 = vld [vmem:[%s7935_s21 + $0x240] sm:$0xff]  ;;  %5476 = vmatprep.subr.bf16.mxu0 %v5475_v2  ;;  %v5479_v15 = vpack.c.bf16 %v1768_v9, %v1756_v8  ;;  %v1757_v18 = vld [vmem:[%s7935_s21 + $0x250] sm:$0xff] }
 0x35c   : > { %v1605_v37 = vadd.f32 %v1604_v36, %v8045_v35  ;;  %v1770_v13 = vld [vmem:[%s7935_s21 + $0x2b8] sm:$0xff]  ;;  %v1767_v17 = vld [vmem:[%s7935_s21 + $0x2a0] sm:$0xff]  ;;  %v1769_v19 = vld [vmem:[%s7935_s21 + $0x2b0] sm:$0xff] }
 0x35d   : > { %5604 = vmatprep.subr.bf16.mxu1 %v5603_v3  ;;  %v5607_v16 = vpack.c.bf16 %v1770_v13, %v1758_v12  ;;  %v1780_v20 = vld [vmem:[%s7935_s21 + $0x308] sm:$0xff]  ;;  %v1782_v22 = vld [vmem:[%s7935_s21 + $0x318] sm:$0xff]  ;;  %v5481_v24 = vpack.c.bf16 %v1767_v17, %v1755_v14  ;;  %v5609_v25 = vpack.c.bf16 %v1769_v19, %v1757_v18  ;;  %v1779_v26 = vld [vmem:[%s7935_s21 + $0x300] sm:$0xff] }
 0x35e   : > { %1606 = vadd.xlane.f32.xlu0 %v1605_v37  ;;  %v1792_v21 = vld [vmem:[%s7935_s21 + $0x368] sm:$0xff]  ;;  %v1794_v23 = vld [vmem:[%s7935_s21 + $0x378] sm:$0xff]  ;;  %5478 = vmatpush1.bf16.msra.mxu0 %v5477_v10  ;;  %v1791_v27 = vld [vmem:[%s7935_s21 + $0x360] sm:$0xff] }
 0x35f   : > { %5606 = vmatpush1.bf16.msra.mxu1 %v5605_v11  ;;  %5480 = vmatprep.subr.bf16.mxu0 %v5479_v15  ;;  %v5483_v28 = vpack.c.bf16 %v1792_v21, %v1780_v20  ;;  %v5611_v29 = vpack.c.bf16 %v1794_v23, %v1782_v22  ;;  %v1781_v30 = vld [vmem:[%s7935_s21 + $0x310] sm:$0xff]  ;;  %v1804_v36 = vld [vmem:[%s7935_s21 + $0x3c8] sm:$0xff]  ;;  %v1806_v38 = vld [vmem:[%s7935_s21 + $0x3d8] sm:$0xff]  ;;  %v5485_v40 = vpack.c.bf16 %v1791_v27, %v1779_v26 }
 0x360   : > { %5608 = vmatprep.subr.bf16.mxu1 %v5607_v16  ;;  %v1793_v34 = vld [vmem:[%s7935_s21 + $0x370] sm:$0xff]  ;;  %v1816_v37 = vld [vmem:[%s7935_s21 + $0x428] sm:$0xff]  ;;  %v1818_v39 = vld [vmem:[%s7935_s21 + $0x438] sm:$0xff] }
 0x361   : > { %v5613_v41 = vpack.c.bf16 %v1793_v34, %v1781_v30  ;;  %v1803_v42 = vld [vmem:[%s7935_s21 + $0x3c0] sm:$0xff]  ;;  %v5487_v44 = vpack.c.bf16 %v1816_v37, %v1804_v36  ;;  %v5615_v45 = vpack.c.bf16 %v1818_v39, %v1806_v38  ;;  %v1805_v46 = vld [vmem:[%s7935_s21 + $0x3d0] sm:$0xff]  ;;  %v1828_v48 = vld [vmem:[%s7935_s21 + $0x488] sm:$0xff] }
 0x362   : > { %5482 = vmatpush1.bf16.msra.mxu0 %v5481_v24  ;;  %v1815_v43 = vld [vmem:[%s7935_s21 + $0x420] sm:$0xff]  ;;  %v1817_v47 = vld [vmem:[%s7935_s21 + $0x430] sm:$0xff]  ;;  %v1840_v49 = vld [vmem:[%s7935_s21 + $0x4e8] sm:$0xff] }
 0x363   : > { %5610 = vmatpush1.bf16.msra.mxu1 %v5609_v25  ;;  %5484 = vmatprep.subr.bf16.mxu0 %v5483_v28  ;;  %v1830_v50 = vld [vmem:[%s7935_s21 + $0x498] sm:$0xff]  ;;  %v5489_v52 = vpack.c.bf16 %v1815_v43, %v1803_v42  ;;  %v5617_v53 = vpack.c.bf16 %v1817_v47, %v1805_v46  ;;  %v1827_v54 = vld [vmem:[%s7935_s21 + $0x480] sm:$0xff]  ;;  %v5491_v56 = vpack.c.bf16 %v1840_v49, %v1828_v48  ;;  %v1829_v58 = vld [vmem:[%s7935_s21 + $0x490] sm:$0xff] }
 0x364   : > { %5612 = vmatprep.subr.bf16.mxu1 %v5611_v29  ;;  %v1842_v51 = vld [vmem:[%s7935_s21 + $0x4f8] sm:$0xff]  ;;  %v1839_v55 = vld [vmem:[%s7935_s21 + $0x4e0] sm:$0xff]  ;;  %v1841_v59 = vld [vmem:[%s7935_s21 + $0x4f0] sm:$0xff] }
 0x365   : > { %v5619_v57 = vpack.c.bf16 %v1842_v51, %v1830_v50  ;;  %v1852_v60 = vld [vmem:[%s7935_s21 + $0x548] sm:$0xff]  ;;  %v1854_v62 = vld [vmem:[%s7935_s21 + $0x558] sm:$0xff]  ;;  %v5493_v0 = vpack.c.bf16 %v1839_v55, %v1827_v54  ;;  %v5621_v1 = vpack.c.bf16 %v1841_v59, %v1829_v58  ;;  %v1851_v2 = vld [vmem:[%s7935_s21 + $0x540] sm:$0xff]  ;;  %v1580_v50 = vlaneseq }
 0x366   : > { %5486 = vmatpush1.bf16.msra.mxu0 %v5485_v40  ;;  %v1864_v61 = vld [vmem:[%s7935_s21 + $0x5a8] sm:$0xff]  ;;  %v1866_v63 = vld [vmem:[%s7935_s21 + $0x5b8] sm:$0xff]  ;;  %v1863_v3 = vld [vmem:[%s7935_s21 + $0x5a0] sm:$0xff]  ;;  %v7338_v55 = vmov 0.0  }
 0x367   : > { %5614 = vmatpush1.bf16.msra.mxu1 %v5613_v41  ;;  %5488 = vmatprep.subr.bf16.mxu0 %v5487_v44  ;;  %v5495_v4 = vpack.c.bf16 %v1864_v61, %v1852_v60  ;;  %v5623_v5 = vpack.c.bf16 %v1866_v63, %v1854_v62  ;;  %v1853_v6 = vld [vmem:[%s7935_s21 + $0x550] sm:$0xff]  ;;  %v1876_v8 = vld [vmem:[%s7935_s21 + $0x608] sm:$0xff]  ;;  %v1878_v10 = vld [vmem:[%s7935_s21 + $0x618] sm:$0xff]  ;;  %v5497_v12 = vpack.c.bf16 %v1863_v3, %v1851_v2  ;;  %v1581_v51 = vand.u32 127, %v1580_v50 }
 0x368   : > { %5616 = vmatprep.subr.bf16.mxu1 %v5615_v45  ;;  %v1865_v7 = vld [vmem:[%s7935_s21 + $0x5b0] sm:$0xff]  ;;  %v1888_v9 = vld [vmem:[%s7935_s21 + $0x668] sm:$0xff]  ;;  %v1890_v11 = vld [vmem:[%s7935_s21 + $0x678] sm:$0xff] }
 0x369   : > { %v5625_v13 = vpack.c.bf16 %v1865_v7, %v1853_v6  ;;  %v1875_v14 = vld [vmem:[%s7935_s21 + $0x600] sm:$0xff]  ;;  %v5499_v16 = vpack.c.bf16 %v1888_v9, %v1876_v8  ;;  %v5627_v17 = vpack.c.bf16 %v1890_v11, %v1878_v10  ;;  %v1877_v18 = vld [vmem:[%s7935_s21 + $0x610] sm:$0xff]  ;;  %v1900_v20 = vld [vmem:[%s7935_s21 + $0x6c8] sm:$0xff] }
 0x36a   : > { %5490 = vmatpush1.bf16.msra.mxu0 %v5489_v52  ;;  %v1887_v15 = vld [vmem:[%s7935_s21 + $0x660] sm:$0xff]  ;;  %v1889_v19 = vld [vmem:[%s7935_s21 + $0x670] sm:$0xff]  ;;  %v1912_v21 = vld [vmem:[%s7935_s21 + $0x728] sm:$0xff]  ;;  %v1584_v52 = vadd.s32 384, %v1581_v51 }
 0x36b   : > { %5618 = vmatpush1.bf16.msra.mxu1 %v5617_v53  ;;  %5492 = vmatprep.subr.bf16.mxu0 %v5491_v56  ;;  %v1902_v22 = vld [vmem:[%s7935_s21 + $0x6d8] sm:$0xff]  ;;  %v5501_v24 = vpack.c.bf16 %v1887_v15, %v1875_v14  ;;  %v5629_v25 = vpack.c.bf16 %v1889_v19, %v1877_v18  ;;  %v1899_v26 = vld [vmem:[%s7935_s21 + $0x6c0] sm:$0xff]  ;;  %v5503_v28 = vpack.c.bf16 %v1912_v21, %v1900_v20  ;;  %v1901_v30 = vld [vmem:[%s7935_s21 + $0x6d0] sm:$0xff] }
 0x36c   : > { %5620 = vmatprep.subr.bf16.mxu1 %v5619_v57  ;;  %v1914_v23 = vld [vmem:[%s7935_s21 + $0x738] sm:$0xff]  ;;  %v1911_v27 = vld [vmem:[%s7935_s21 + $0x720] sm:$0xff]  ;;  %v1913_v34 = vld [vmem:[%s7935_s21 + $0x730] sm:$0xff]  ;;  %vm1588_vm0 = vcmp.lt.s32.totalorder %v1584_v52, 400 }
 0x36d   : > { %v5631_v29 = vpack.c.bf16 %v1914_v23, %v1902_v22  ;;  %v1924_v36 = vld [vmem:[%s7935_s21 + $0x788] sm:$0xff]  ;;  %v1926_v38 = vld [vmem:[%s7935_s21 + $0x798] sm:$0xff]  ;;  %v5505_v40 = vpack.c.bf16 %v1911_v27, %v1899_v26  ;;  %v5633_v41 = vpack.c.bf16 %v1913_v34, %v1901_v30  ;;  %v1923_v42 = vld [vmem:[%s7935_s21 + $0x780] sm:$0xff]  ;;  %v8139_v56 = vsel %vm1588_vm0, 1.0, %v7338_v55 }
 0x36e   : > { %5494 = vmatpush1.bf16.msra.mxu0 %v5493_v0  ;;  %v1936_v37 = vld [vmem:[%s7935_s21 + $0x7e8] sm:$0xff]  ;;  %v1938_v39 = vld [vmem:[%s7935_s21 + $0x7f8] sm:$0xff]  ;;  %v1935_v45 = vld [vmem:[%s7935_s21 + $0x7e0] sm:$0xff] }
 0x36f   : > { %5622 = vmatpush1.bf16.msra.mxu1 %v5621_v1  ;;  %5496 = vmatprep.subr.bf16.mxu0 %v5495_v4  ;;  %v5507_v43 = vpack.c.bf16 %v1936_v37, %v1924_v36  ;;  %v5635_v44 = vpack.c.bf16 %v1938_v39, %v1926_v38  ;;  %v1925_v46 = vld [vmem:[%s7935_s21 + $0x790] sm:$0xff]  ;;  %v5509_v48 = vpack.c.bf16 %v1935_v45, %v1923_v42  ;;  %v1948_v1 = vld [vmem:[%s7935_s21 + $0x848] sm:$0xff]  ;;  %v1950_v3 = vld [vmem:[%s7935_s21 + $0x858] sm:$0xff] }
 0x370   : > { %5624 = vmatprep.subr.bf16.mxu1 %v5623_v5  ;;  %v1937_v47 = vld [vmem:[%s7935_s21 + $0x7f0] sm:$0xff]  ;;  %v1960_v2 = vld [vmem:[%s7935_s21 + $0x8a8] sm:$0xff]  ;;  %v1962_v5 = vld [vmem:[%s7935_s21 + $0x8b8] sm:$0xff] }
 0x371   : > { %v5637_v49 = vpack.c.bf16 %v1937_v47, %v1925_v46  ;;  %v5511_v4 = vpack.c.bf16 %v1960_v2, %v1948_v1  ;;  %v1947_v6 = vld [vmem:[%s7935_s21 + $0x840] sm:$0xff]  ;;  %v5639_v8 = vpack.c.bf16 %v1962_v5, %v1950_v3  ;;  %v1949_v10 = vld [vmem:[%s7935_s21 + $0x850] sm:$0xff]  ;;  %v1984_v14 = vld [vmem:[%s7935_s21 + $0x968] sm:$0xff] }
 0x372   : > { %5498 = vmatpush1.bf16.msra.mxu0 %v5497_v12  ;;  %v1959_v7 = vld [vmem:[%s7935_s21 + $0x8a0] sm:$0xff]  ;;  %v1961_v11 = vld [vmem:[%s7935_s21 + $0x8b0] sm:$0xff]  ;;  %v1974_v15 = vld [vmem:[%s7935_s21 + $0x918] sm:$0xff] }
 0x373   : > { %5626 = vmatpush1.bf16.msra.mxu1 %v5625_v13  ;;  %5500 = vmatprep.subr.bf16.mxu0 %v5499_v16  ;;  %v5513_v9 = vpack.c.bf16 %v1959_v7, %v1947_v6  ;;  %v5641_v12 = vpack.c.bf16 %v1961_v11, %v1949_v10  ;;  %v1972_v13 = vld [vmem:[%s7935_s21 + $0x908] sm:$0xff]  ;;  %v1971_v18 = vld [vmem:[%s7935_s21 + $0x900] sm:$0xff]  ;;  %v1973_v22 = vld [vmem:[%s7935_s21 + $0x910] sm:$0xff] }
 0x374   : > { %5628 = vmatprep.subr.bf16.mxu1 %v5627_v17  ;;  %v5515_v16 = vpack.c.bf16 %v1984_v14, %v1972_v13  ;;  %v1986_v17 = vld [vmem:[%s7935_s21 + $0x978] sm:$0xff]  ;;  %v1983_v19 = vld [vmem:[%s7935_s21 + $0x960] sm:$0xff]  ;;  %v1985_v23 = vld [vmem:[%s7935_s21 + $0x970] sm:$0xff]  ;;  %v8207_v13 = vshrl.u32 %v1580_v50, 7 }
 0x375   : > { %v5643_v20 = vpack.c.bf16 %v1986_v17, %v1974_v15  ;;  %v5517_v21 = vpack.c.bf16 %v1983_v19, %v1971_v18  ;;  %v2008_v26 = vld [vmem:[%s7935_s21 + $0xa28] sm:$0xff]  ;;  %v1998_v27 = vld [vmem:[%s7935_s21 + $0x9d8] sm:$0xff]  ;;  %v1995_v34 = vld [vmem:[%s7935_s21 + $0x9c0] sm:$0xff] }
 0x376   : > { %5502 = vmatpush1.bf16.msra.mxu0 %v5501_v24  ;;  %v1996_v24 = vld [vmem:[%s7935_s21 + $0x9c8] sm:$0xff]  ;;  %v2007_v36 = vld [vmem:[%s7935_s21 + $0xa20] sm:$0xff]  ;;  %v1997_v37 = vld [vmem:[%s7935_s21 + $0x9d0] sm:$0xff]  ;;  %v8210_v14 = vsub.s32 0, %v8207_v13  ;;  %v8213_v15 = vsub.s32 1, %v8207_v13  ;;  %v8219_v17 = vsub.s32 3, %v8207_v13 }
 0x377   : > { %5630 = vmatpush1.bf16.msra.mxu1 %v5629_v25  ;;  %5504 = vmatprep.subr.bf16.mxu0 %v5503_v28  ;;  %v5645_v25 = vpack.c.bf16 %v1985_v23, %v1973_v22  ;;  %v2010_v28 = vld [vmem:[%s7935_s21 + $0xa38] sm:$0xff]  ;;  %v5521_v38 = vpack.c.bf16 %v2007_v36, %v1995_v34  ;;  %v2009_v39 = vld [vmem:[%s7935_s21 + $0xa30] sm:$0xff]  ;;  %v2019_v46 = vld [vmem:[%s7935_s21 + $0xa80] sm:$0xff] }
 0x378   : > { %5632 = vmatprep.subr.bf16.mxu1 %v5631_v29  ;;  %v5519_v29 = vpack.c.bf16 %v2008_v26, %v1996_v24  ;;  %v5647_v30 = vpack.c.bf16 %v2010_v28, %v1998_v27  ;;  %v5649_v42 = vpack.c.bf16 %v2009_v39, %v1997_v37  ;;  %v2034_v45 = vld [vmem:[%s7935_s21 + $0xaf8] sm:$0xff]  ;;  %v2033_v51 = vld [vmem:[%s7935_s21 + $0xaf0] sm:$0xff]  ;;  %v2080_v5 = vld [vmem:[%s7935_s21 + $0xc68] sm:$0xff] }
 0x379   : > { %v2057_v1 = vld [vmem:[%s7935_s21 + $0xbb0] sm:$0xff]  ;;  %v2070_v6 = vld [vmem:[%s7935_s21 + $0xc18] sm:$0xff]  ;;  %v1601_v18 = vld [vmem:[%s832_s12] sm:$0xf] }
 0x37a   : > { %5506 = vmatpush1.bf16.msra.mxu0 %v5505_v40  ;;  %v2020_v40 = vld [vmem:[%s7935_s21 + $0xa88] sm:$0xff]  ;;  %v1641_v19 = vrot.slane %v1601_v18, %v8213_v15  ;;  %v2069_v37 = vld [vmem:[%s7935_s21 + $0xc10] sm:$0xff] }
 0x37b   : > { %5634 = vmatpush1.bf16.msra.mxu1 %v5633_v41  ;;  %5508 = vmatprep.subr.bf16.mxu0 %v5507_v43  ;;  %v2032_v41 = vld [vmem:[%s7935_s21 + $0xae8] sm:$0xff] }
 0x37c   : > { %5636 = vmatprep.subr.bf16.mxu1 %v5635_v44  ;;  %v5523_v43 = vpack.c.bf16 %v2032_v41, %v2020_v40  ;;  %v2022_v44 = vld [vmem:[%s7935_s21 + $0xa98] sm:$0xff]  ;;  %v1602_v50 = vld [vmem:[%s9571_s0] sm:$0xf] }
 0x37d   : > { %v5651_v47 = vpack.c.bf16 %v2034_v45, %v2022_v44  ;;  %v1666_v23 = vrot.slane %v1602_v50, %v8213_v15  ;;  %v1662_v24 = vrot.slane %v1602_v50, %v8210_v14  ;;  %v2092_v41 = vld [vmem:[%s7935_s21 + $0xcc8] sm:$0xff] }
 0x37e   : > { %5510 = vmatpush1.bf16.msra.mxu0 %v5509_v48  ;;  %v2031_v48 = vld [vmem:[%s7935_s21 + $0xae0] sm:$0xff]  ;;  %v2104_v44 = vld [vmem:[%s7935_s21 + $0xd28] sm:$0xff] }
 0x37f   : > { %5638 = vmatpush1.bf16.msra.mxu1 %v5637_v49  ;;  %5512 = vmatprep.subr.bf16.mxu0 %v5511_v4  ;;  %v2021_v49 = vld [vmem:[%s7935_s21 + $0xa90] sm:$0xff]  ;;  %v5525_v52 = vpack.c.bf16 %v2031_v48, %v2019_v46  ;;  %v2068_v4 = vld [vmem:[%s7935_s21 + $0xc08] sm:$0xff]  ;;  %v2091_v48 = vld [vmem:[%s7935_s21 + $0xcc0] sm:$0xff] }
 0x380   : > { %5640 = vmatprep.subr.bf16.mxu1 %v5639_v8  ;;  %v5531_v7 = vpack.c.bf16 %v2080_v5, %v2068_v4  ;;  %v2082_v8 = vld [vmem:[%s7935_s21 + $0xc78] sm:$0xff]  ;;  %v2117_v5 = vld [vmem:[%s7935_s21 + $0xd90] sm:$0xff] }
 0x382   : > { %5514 = vmatpush1.bf16.msra.mxu0 %v5513_v9  ;;  %v5659_v9 = vpack.c.bf16 %v2082_v8, %v2070_v6  ;;  %v2129_v6 = vld [vmem:[%s7935_s21 + $0xdf0] sm:$0xff]  ;;  %v2152_v8 = vld [vmem:[%s7935_s21 + $0xea8] sm:$0xff] }
 0x383   : > { %5642 = vmatpush1.bf16.msra.mxu1 %v5641_v12  ;;  %5516 = vmatprep.subr.bf16.mxu0 %v5515_v16  ;;  %v8216_v16 = vsub.s32 2, %v8207_v13 }
 0x384   : > { %5644 = vmatprep.subr.bf16.mxu1 %v5643_v20  ;;  %v1637_v20 = vrot.slane %v1601_v18, %v8210_v14 }
 0x385   : > { %v1670_v26 = vrot.slane %v1602_v50, %v8216_v16 }
 0x386   : > { %5518 = vmatpush1.bf16.msra.mxu0 %v5517_v21  ;;  %v1645_v21 = vrot.slane %v1601_v18, %v8216_v16 }
 0x387   : > { %5646 = vmatpush1.bf16.msra.mxu1 %v5645_v25  ;;  %5520 = vmatprep.subr.bf16.mxu0 %v5519_v29  ;;  %v1649_v25 = vrot.slane %v1601_v18, %v8219_v17  ;;  %v2067_v29 = vld [vmem:[%s7935_s21 + $0xc00] sm:$0xff] }
 0x388   : > { %5648 = vmatprep.subr.bf16.mxu1 %v5647_v30  ;;  %v2079_v30 = vld [vmem:[%s7935_s21 + $0xc60] sm:$0xff] }
 0x389   : > { %v2139_v18 = vld [vmem:[%s7935_s21 + $0xe40] sm:$0xff] }
 0x38a   : > { %5522 = vmatpush1.bf16.msra.mxu0 %v5521_v38  ;;  %v2081_v38 = vld [vmem:[%s7935_s21 + $0xc70] sm:$0xff] }
 0x38b   : > { %5650 = vmatpush1.bf16.msra.mxu1 %v5649_v42  ;;  %5524 = vmatprep.subr.bf16.mxu0 %v5523_v43  ;;  %v5533_v42 = vpack.c.bf16 %v2079_v30, %v2067_v29  ;;  %v1674_v43 = vrot.slane %v1602_v50, %v8219_v17  ;;  %v2151_v50 = vld [vmem:[%s7935_s21 + $0xea0] sm:$0xff] }
 0x38c   : > { %5652 = vmatprep.subr.bf16.mxu1 %v5651_v47  ;;  %v5661_v47 = vpack.c.bf16 %v2081_v38, %v2069_v37  ;;  %v2163_v29 = vld [vmem:[%s7935_s21 + $0xf00] sm:$0xff]  ;;  %v2165_v37 = vld [vmem:[%s7935_s21 + $0xf10] sm:$0xff] }
 0x38d   : > { %v2175_v30 = vld [vmem:[%s7935_s21 + $0xf60] sm:$0xff]  ;;  %v2177_v38 = vld [vmem:[%s7935_s21 + $0xf70] sm:$0xff] }
 0x38e   : > { %5526 = vmatpush1.bf16.msra.mxu0 %v5525_v52  ;;  %v2093_v52 = vld [vmem:[%s7935_s21 + $0xcd0] sm:$0xff] }
 0x3eb   : > { %v1607_v53 = vpop.xlane.xlu0 %1606 }
 0x3ec   : > { %v1608_v54 = vmul.f32 0.0025, %v1607_v53  ;;  %v2044_v53 = vld [vmem:[%s7935_s21 + $0xb48] sm:$0xff] }
 0x3ee   : > { %v8142_v57 = vsub.f32 %v8028_v31, %v1608_v54  ;;  %v8145_v58 = vsub.f32 %v8033_v32, %v1608_v54  ;;  %v8148_v59 = vsub.f32 %v8038_v33, %v1608_v54  ;;  %v1612_v60 = vsub.f32 %v8045_v35, %v1608_v54  ;;  %v2056_v54 = vld [vmem:[%s7935_s21 + $0xba8] sm:$0xff] }
 0x3f0   : > { %v8152_v61 = vmul.f32 %v8139_v56, %v1612_v60  ;;  %v1617_v62 = vmul.f32 %v8142_v57, %v8142_v57  ;;  %v1618_v31 = vmul.f32 %v8145_v58, %v8145_v58  ;;  %v1619_v32 = vmul.f32 %v8148_v59, %v8148_v59  ;;  %v2046_v60 = vld [vmem:[%s7935_s21 + $0xb58] sm:$0xff] }
 0x3f2   : > { %v1621_v33 = vadd.f32 %v1618_v31, %v1617_v62  ;;  %v1620_v63 = vmul.f32 %v8152_v61, %v8152_v61  ;;  %v5653_v62 = vpack.c.bf16 %v2033_v51, %v2021_v49  ;;  %v5527_v31 = vpack.c.bf16 %v2056_v54, %v2044_v53  ;;  %v2103_v49 = vld [vmem:[%s7935_s21 + $0xd20] sm:$0xff]  ;;  %v2105_v53 = vld [vmem:[%s7935_s21 + $0xd30] sm:$0xff]  ;;  %v2116_v54 = vld [vmem:[%s7935_s21 + $0xd88] sm:$0xff] }
 0x3f4   : > { %v1622_v35 = vadd.f32 %v1621_v33, %v1619_v32  ;;  %v2058_v32 = vld [vmem:[%s7935_s21 + $0xbb8] sm:$0xff]  ;;  %v2043_v33 = vld [vmem:[%s7935_s21 + $0xb40] sm:$0xff]  ;;  %5654 = vmatpush1.bf16.msra.mxu1 %v5653_v62  ;;  %5528 = vmatprep.subr.bf16.mxu0 %v5527_v31  ;;  %v2128_v31 = vld [vmem:[%s7935_s21 + $0xde8] sm:$0xff] }
 0x3f6   : > { %v1623_v0 = vadd.f32 %v1622_v35, %v1620_v63  ;;  %v2055_v63 = vld [vmem:[%s7935_s21 + $0xba0] sm:$0xff]  ;;  %v5655_v35 = vpack.c.bf16 %v2058_v32, %v2046_v60  ;;  %v5535_v60 = vpack.c.bf16 %v2104_v44, %v2092_v41  ;;  %v2118_v32 = vld [vmem:[%s7935_s21 + $0xd98] sm:$0xff] }
 0x3f7   : > { %v5529_v2 = vpack.c.bf16 %v2055_v63, %v2043_v33  ;;  %v2130_v33 = vld [vmem:[%s7935_s21 + $0xdf8] sm:$0xff]  ;;  %v2199_v44 = vld [vmem:[%s7935_s21 + $0x1020] sm:$0xff] }
 0x3f8   : > { %1624 = vadd.xlane.f32.xlu0 %v1623_v0  ;;  %v2045_v0 = vld [vmem:[%s7935_s21 + $0xb50] sm:$0xff]  ;;  %5656 = vmatprep.subr.bf16.mxu1 %v5655_v35  ;;  %v5537_v35 = vpack.c.bf16 %v2103_v49, %v2091_v48  ;;  %v5667_v4 = vpack.c.bf16 %v2130_v33, %v2118_v32  ;;  %v2190_v41 = vld [vmem:[%s7935_s21 + $0xfd8] sm:$0xff]  ;;  %v2212_v49 = vld [vmem:[%s7935_s21 + $0x1088] sm:$0xff] }
 0x3f9   : > { %v5657_v3 = vpack.c.bf16 %v2057_v1, %v2045_v0  ;;  %5530 = vmatpush1.bf16.msra.mxu0 %v5529_v2  ;;  %v5665_v0 = vpack.c.bf16 %v2105_v53, %v2093_v52  ;;  %v2115_v1 = vld [vmem:[%s7935_s21 + $0xd80] sm:$0xff]  ;;  %v2201_v48 = vld [vmem:[%s7935_s21 + $0x1030] sm:$0xff]  ;;  %v2224_v52 = vld [vmem:[%s7935_s21 + $0x10e8] sm:$0xff] }
 0x3fa   : > { %5532 = vmatprep.subr.bf16.mxu0 %v5531_v7  ;;  %v2127_v2 = vld [vmem:[%s7935_s21 + $0xde0] sm:$0xff]  ;;  %v2140_v7 = vld [vmem:[%s7935_s21 + $0xe48] sm:$0xff]  ;;  %v2214_v53 = vld [vmem:[%s7935_s21 + $0x1098] sm:$0xff]  ;;  %v5555_v33 = vpack.c.bf16 %v2224_v52, %v2212_v49 }
 0x3fb   : > { %5658 = vmatpush1.bf16.msra.mxu1 %v5657_v3  ;;  %v5539_v3 = vpack.c.bf16 %v2128_v31, %v2116_v54  ;;  %v2226_v54 = vld [vmem:[%s7935_s21 + $0x10f8] sm:$0xff]  ;;  %v2211_v31 = vld [vmem:[%s7935_s21 + $0x1080] sm:$0xff] }
 0x3fc   : > { %5660 = vmatprep.subr.bf16.mxu1 %v5659_v9  ;;  %v2142_v9 = vld [vmem:[%s7935_s21 + $0xe58] sm:$0xff]  ;;  %v2223_v32 = vld [vmem:[%s7935_s21 + $0x10e0] sm:$0xff] }
 0x3fd   : > { %v2307_v52 = vld [vmem:[%s7935_s21 + $0x1380] sm:$0xff] }
 0x485   : > { %v1625_v10 = vpop.xlane.xlu0 %1624 }
 0x486   : > { %v1626_v11 = vmul.f32 0.0025, %v1625_v10  ;;  %v2154_v10 = vld [vmem:[%s7935_s21 + $0xeb8] sm:$0xff] }
 0x488   : > { %v1627_v12 = vadd.f32 1e-05, %v1626_v11  ;;  %v5541_v11 = vpack.c.bf16 %v2127_v2, %v2115_v1  ;;  %v2225_v1 = vld [vmem:[%s7935_s21 + $0x10f0] sm:$0xff]  ;;  %v2236_v2 = vld [vmem:[%s7935_s21 + $0x1148] sm:$0xff] }
 0x48a   : > { %6795 = vrsqrt.f32 %v1627_v12  ;;  %v5669_v12 = vpack.c.bf16 %v2129_v6, %v2117_v5  ;;  %v2250_v5 = vld [vmem:[%s7935_s21 + $0x11b8] sm:$0xff]  ;;  %v5557_v6 = vpack.c.bf16 %v2223_v32, %v2211_v31  ;;  %v2321_v31 = vld [vmem:[%s7935_s21 + $0x13f0] sm:$0xff]  ;;  %v2332_v32 = vld [vmem:[%s7935_s21 + $0x1448] sm:$0xff] }
 0x494   : > { %v6796_v22 = vpop.eup %6795 }
 0x495   : > { %v1630_v27 = vmul.f32 %v6796_v22, %v8145_v58  ;;  %v1629_v28 = vmul.f32 %v6796_v22, %v8142_v57  ;;  %v1632_v34 = vmul.f32 %v6796_v22, %v8152_v61  ;;  %v1631_v36 = vmul.f32 %v6796_v22, %v8148_v59  ;;  %v2094_v61 = vld [vmem:[%s7935_s21 + $0xcd8] sm:$0xff]  ;;  %v2153_v22 = vld [vmem:[%s7935_s21 + $0xeb0] sm:$0xff] }
 0x496   : > { %v2106_v59 = vld [vmem:[%s7935_s21 + $0xd38] sm:$0xff] }
 0x497   : > { %v1655_v39 = vmul.f32 %v1641_v19, %v1630_v27  ;;  %v1654_v40 = vmul.f32 %v1637_v20, %v1629_v28  ;;  %v1656_v58 = vmul.f32 %v1645_v21, %v1631_v36  ;;  %v1657_v57 = vmul.f32 %v1649_v25, %v1632_v34  ;;  %v2141_v21 = vld [vmem:[%s7935_s21 + $0xe50] sm:$0xff]  ;;  %v2166_v25 = vld [vmem:[%s7935_s21 + $0xf18] sm:$0xff] }
 0x498   : > { %v5663_v62 = vpack.c.bf16 %v2106_v59, %v2094_v61  ;;  %v5543_v19 = vpack.c.bf16 %v2152_v8, %v2140_v7  ;;  %v5671_v20 = vpack.c.bf16 %v2154_v10, %v2142_v9  ;;  %v5545_v27 = vpack.c.bf16 %v2151_v50, %v2139_v18  ;;  %v2235_v8 = vld [vmem:[%s7935_s21 + $0x1140] sm:$0xff]  ;;  %v2249_v18 = vld [vmem:[%s7935_s21 + $0x11b0] sm:$0xff]  ;;  %v2260_v50 = vld [vmem:[%s7935_s21 + $0x1208] sm:$0xff] }
 0x499   : > { %v8245_v45 = vadd.f32 %v1666_v23, %v1655_v39  ;;  %v8247_v46 = vadd.f32 %v1662_v24, %v1654_v40  ;;  %v8251_v51 = vadd.f32 %v1670_v26, %v1656_v58  ;;  %v8263_v63 = vadd.f32 %v1674_v43, %v1657_v57  ;;  %v2164_v23 = vld [vmem:[%s7935_s21 + $0xf08] sm:$0xff]  ;;  %v2178_v26 = vld [vmem:[%s7935_s21 + $0xf78] sm:$0xff]  ;;  %v2187_v43 = vld [vmem:[%s7935_s21 + $0xfc0] sm:$0xff] }
 0x49a   : > { %v2176_v24 = vld [vmem:[%s7935_s21 + $0xf68] sm:$0xff]  ;;  %v5673_v28 = vpack.c.bf16 %v2153_v22, %v2141_v21  ;;  %v5675_v36 = vpack.c.bf16 %v2178_v26, %v2166_v25  ;;  %v2202_v58 = vld [vmem:[%s7935_s21 + $0x1038] sm:$0xff]  ;;  %v5677_v57 = vpack.c.bf16 %v2177_v38, %v2165_v37  ;;  %v2247_v9 = vld [vmem:[%s7935_s21 + $0x11a0] sm:$0xff] }
 0x49b   : > { %2579 = vmatprep.mubr.f32.mxu0 %v8245_v45  ;;  %2721 = vmatprep.mubr.f32.mxu1 %v8245_v45  ;;  %v5547_v34 = vpack.c.bf16 %v2176_v24, %v2164_v23  ;;  %v2188_v39 = vld [vmem:[%s7935_s21 + $0xfc8] sm:$0xff]  ;;  %v5679_v59 = vpack.c.bf16 %v2202_v58, %v2190_v41  ;;  %v2274_v21 = vld [vmem:[%s7935_s21 + $0x1278] sm:$0xff]  ;;  %v5561_v22 = vpack.c.bf16 %v2247_v9, %v2235_v8  ;;  %v2259_v24 = vld [vmem:[%s7935_s21 + $0x1200] sm:$0xff] }
 0x49c   : > { %2580 = vmatmul.mubr.f32.vlgmr.msra.gmra.mrb[0].mxu0 %v8247_v46  ;;  %2722 = vmatmul.mubr.f32.vlgmr.msra.gmra.mrb[0].mxu1 %v8247_v46  ;;  %v2200_v40 = vld [vmem:[%s7935_s21 + $0x1028] sm:$0xff]  ;;  %v2271_v25 = vld [vmem:[%s7935_s21 + $0x1260] sm:$0xff]  ;;  %v2298_v37 = vld [vmem:[%s7935_s21 + $0x1338] sm:$0xff] }
 0x49d   : > { %5534 = vmatpush1.bf16.msra.mxu0 %v5533_v42  ;;  %5662 = vmatpush1.bf16.msra.mxu1 %v5661_v47  ;;  %v5549_v42 = vpack.c.bf16 %v2175_v30, %v2163_v29  ;;  %v5551_v61 = vpack.c.bf16 %v2200_v40, %v2188_v39  ;;  %v2189_v47 = vld [vmem:[%s7935_s21 + $0xfd0] sm:$0xff]  ;;  %v2284_v30 = vld [vmem:[%s7935_s21 + $0x12c8] sm:$0xff]  ;;  %v5565_v38 = vpack.c.bf16 %v2271_v25, %v2259_v24  ;;  %v2283_v40 = vld [vmem:[%s7935_s21 + $0x12c0] sm:$0xff] }
 0x49e   : > { %2650 = vmatprep.mubr.f32.mxu0 %v8263_v63  ;;  %2792 = vmatprep.mubr.f32.mxu1 %v8263_v63  ;;  %v2273_v29 = vld [vmem:[%s7935_s21 + $0x1270] sm:$0xff]  ;;  %v2295_v41 = vld [vmem:[%s7935_s21 + $0x1320] sm:$0xff]  ;;  %v2356_v9 = vld [vmem:[%s7935_s21 + $0x1508] sm:$0xff] }
 0x49f   : > { %5536 = vmatprep.subr.bf16.mxu0 %v5535_v60  ;;  %5664 = vmatprep.subr.bf16.mxu1 %v5663_v62  ;;  %v5553_v60 = vpack.c.bf16 %v2199_v44, %v2187_v43  ;;  %v5681_v62 = vpack.c.bf16 %v2201_v48, %v2189_v47  ;;  %v2297_v43 = vld [vmem:[%s7935_s21 + $0x1330] sm:$0xff]  ;;  %v2308_v44 = vld [vmem:[%s7935_s21 + $0x1388] sm:$0xff]  ;;  %v2322_v47 = vld [vmem:[%s7935_s21 + $0x13f8] sm:$0xff]  ;;  %v5569_v48 = vpack.c.bf16 %v2295_v41, %v2283_v40 }
 0x4a0   : > { %v2345_v8 = vld [vmem:[%s7935_s21 + $0x14b0] sm:$0xff]  ;;  %v2380_v25 = vld [vmem:[%s7935_s21 + $0x15c8] sm:$0xff] }
 0x4a1   : > { %5538 = vmatpush1.bf16.msra.mxu0 %v5537_v35  ;;  %5666 = vmatpush1.bf16.msra.mxu1 %v5665_v0  ;;  %v5683_v35 = vpack.c.bf16 %v2226_v54, %v2214_v53  ;;  %v2213_v0 = vld [vmem:[%s7935_s21 + $0x1090] sm:$0xff]  ;;  %v2319_v53 = vld [vmem:[%s7935_s21 + $0x13e0] sm:$0xff]  ;;  %v2404_v41 = vld [vmem:[%s7935_s21 + $0x1688] sm:$0xff] }
 0x4a2   : > { %5540 = vmatprep.subr.bf16.mxu0 %v5539_v3  ;;  %5668 = vmatprep.subr.bf16.mxu1 %v5667_v4  ;;  %v2248_v3 = vld [vmem:[%s7935_s21 + $0x11a8] sm:$0xff]  ;;  %v2238_v4 = vld [vmem:[%s7935_s21 + $0x1158] sm:$0xff]  ;;  %v5685_v7 = vpack.c.bf16 %v2225_v1, %v2213_v0  ;;  %v5573_v1 = vpack.c.bf16 %v2319_v53, %v2307_v52  ;;  %v2369_v24 = vld [vmem:[%s7935_s21 + $0x1570] sm:$0xff] }
 0x4a3   : > { %v5559_v10 = vpack.c.bf16 %v2248_v3, %v2236_v2  ;;  %v2346_v0 = vld [vmem:[%s7935_s21 + $0x14b8] sm:$0xff]  ;;  %v2331_v3 = vld [vmem:[%s7935_s21 + $0x1440] sm:$0xff]  ;;  %v2393_v40 = vld [vmem:[%s7935_s21 + $0x1630] sm:$0xff] }
 0x4a4   : > { %v2417_v52 = vld [vmem:[%s7935_s21 + $0x16f0] sm:$0xff]  ;;  %v2428_v53 = vld [vmem:[%s7935_s21 + $0x1748] sm:$0xff] }
 0x4a5   : > { %5542 = vmatpush1.bf16.msra.mxu0 %v5541_v11  ;;  %5670 = vmatpush1.bf16.msra.mxu1 %v5669_v12  ;;  %v5687_v11 = vpack.c.bf16 %v2250_v5, %v2238_v4  ;;  %v2237_v12 = vld [vmem:[%s7935_s21 + $0x1150] sm:$0xff]  ;;  %v2343_v4 = vld [vmem:[%s7935_s21 + $0x14a0] sm:$0xff] }
 0x4a6   : > { %5544 = vmatprep.subr.bf16.mxu0 %v5543_v19  ;;  %5672 = vmatprep.subr.bf16.mxu1 %v5671_v20  ;;  %v2272_v19 = vld [vmem:[%s7935_s21 + $0x1268] sm:$0xff]  ;;  %v2262_v20 = vld [vmem:[%s7935_s21 + $0x1218] sm:$0xff]  ;;  %v5689_v23 = vpack.c.bf16 %v2249_v18, %v2237_v12  ;;  %v5577_v18 = vpack.c.bf16 %v2343_v4, %v2331_v3  ;;  %v2441_v3 = vld [vmem:[%s7935_s21 + $0x17b0] sm:$0xff] }
 0x4a7   : > { %v5563_v26 = vpack.c.bf16 %v2272_v19, %v2260_v50  ;;  %v2370_v12 = vld [vmem:[%s7935_s21 + $0x1578] sm:$0xff]  ;;  %v2355_v19 = vld [vmem:[%s7935_s21 + $0x1500] sm:$0xff]  ;;  %v1688_v4 = vld [vmem:[%s7935_s21 + $0x28] sm:$0xff] }
 0x4a9   : > { %5546 = vmatpush1.bf16.msra.mxu0 %v5545_v27  ;;  %5674 = vmatpush1.bf16.msra.mxu1 %v5673_v28  ;;  %v5691_v27 = vpack.c.bf16 %v2274_v21, %v2262_v20  ;;  %v2261_v28 = vld [vmem:[%s7935_s21 + $0x1210] sm:$0xff]  ;;  %v2367_v20 = vld [vmem:[%s7935_s21 + $0x1560] sm:$0xff] }
 0x4aa   : > { %5548 = vmatprep.subr.bf16.mxu0 %v5547_v34  ;;  %5676 = vmatprep.subr.bf16.mxu1 %v5675_v36  ;;  %v2296_v34 = vld [vmem:[%s7935_s21 + $0x1328] sm:$0xff]  ;;  %v2286_v36 = vld [vmem:[%s7935_s21 + $0x12d8] sm:$0xff]  ;;  %v5693_v39 = vpack.c.bf16 %v2273_v29, %v2261_v28  ;;  %v5581_v29 = vpack.c.bf16 %v2367_v20, %v2355_v19  ;;  %v1701_v19 = vld [vmem:[%s7935_s21 + $0x90] sm:$0xff] }
 0x4ab   : > { %v5567_v58 = vpack.c.bf16 %v2296_v34, %v2284_v30  ;;  %v2394_v28 = vld [vmem:[%s7935_s21 + $0x1638] sm:$0xff]  ;;  %v2379_v34 = vld [vmem:[%s7935_s21 + $0x15c0] sm:$0xff]  ;;  %v1712_v20 = vld [vmem:[%s7935_s21 + $0xe8] sm:$0xff] }
 0x4ad   : > { %5550 = vmatpush1.bf16.msra.mxu0 %v5549_v42  ;;  %5678 = vmatpush1.bf16.msra.mxu1 %v5677_v57  ;;  %v5695_v42 = vpack.c.bf16 %v2298_v37, %v2286_v36  ;;  %v2285_v57 = vld [vmem:[%s7935_s21 + $0x12d0] sm:$0xff]  ;;  %v2391_v36 = vld [vmem:[%s7935_s21 + $0x1620] sm:$0xff] }
 0x4ae   : > { %5552 = vmatprep.subr.bf16.mxu0 %v5551_v61  ;;  %5680 = vmatprep.subr.bf16.mxu1 %v5679_v59  ;;  %v2320_v61 = vld [vmem:[%s7935_s21 + $0x13e8] sm:$0xff]  ;;  %v2310_v59 = vld [vmem:[%s7935_s21 + $0x1398] sm:$0xff]  ;;  %v5697_v49 = vpack.c.bf16 %v2297_v43, %v2285_v57  ;;  %v5585_v43 = vpack.c.bf16 %v2391_v36, %v2379_v34  ;;  %v1725_v34 = vld [vmem:[%s7935_s21 + $0x150] sm:$0xff] }
 0x4af   : > { %v5571_v54 = vpack.c.bf16 %v2320_v61, %v2308_v44  ;;  %v2418_v57 = vld [vmem:[%s7935_s21 + $0x16f8] sm:$0xff]  ;;  %v2403_v61 = vld [vmem:[%s7935_s21 + $0x1680] sm:$0xff]  ;;  %v1736_v36 = vld [vmem:[%s7935_s21 + $0x1a8] sm:$0xff] }
 0x4b1   : > { %5554 = vmatpush1.bf16.msra.mxu0 %v5553_v60  ;;  %5682 = vmatpush1.bf16.msra.mxu1 %v5681_v62  ;;  %v5699_v60 = vpack.c.bf16 %v2322_v47, %v2310_v59  ;;  %v2309_v62 = vld [vmem:[%s7935_s21 + $0x1390] sm:$0xff]  ;;  %v2415_v59 = vld [vmem:[%s7935_s21 + $0x16e0] sm:$0xff] }
 0x4b2   : > { %5556 = vmatprep.subr.bf16.mxu0 %v5555_v33  ;;  %5684 = vmatprep.subr.bf16.mxu1 %v5683_v35  ;;  %v2344_v33 = vld [vmem:[%s7935_s21 + $0x14a8] sm:$0xff]  ;;  %v2334_v35 = vld [vmem:[%s7935_s21 + $0x1458] sm:$0xff]  ;;  %v5701_v2 = vpack.c.bf16 %v2321_v31, %v2309_v62  ;;  %v5589_v31 = vpack.c.bf16 %v2415_v59, %v2403_v61  ;;  %v1749_v61 = vld [vmem:[%s7935_s21 + $0x210] sm:$0xff] }
 0x4b3   : > { %v5575_v5 = vpack.c.bf16 %v2344_v33, %v2332_v32  ;;  %v2442_v62 = vld [vmem:[%s7935_s21 + $0x17b8] sm:$0xff]  ;;  %v2427_v33 = vld [vmem:[%s7935_s21 + $0x1740] sm:$0xff]  ;;  %v1760_v59 = vld [vmem:[%s7935_s21 + $0x268] sm:$0xff] }
 0x4b5   : > { %5558 = vmatpush1.bf16.msra.mxu0 %v5557_v6  ;;  %5686 = vmatpush1.bf16.msra.mxu1 %v5685_v7  ;;  %v5703_v6 = vpack.c.bf16 %v2346_v0, %v2334_v35  ;;  %v2333_v7 = vld [vmem:[%s7935_s21 + $0x1450] sm:$0xff]  ;;  %v2439_v35 = vld [vmem:[%s7935_s21 + $0x17a0] sm:$0xff] }
 0x4b6   : > { %5560 = vmatprep.subr.bf16.mxu0 %v5559_v10  ;;  %5688 = vmatprep.subr.bf16.mxu1 %v5687_v11  ;;  %v2368_v10 = vld [vmem:[%s7935_s21 + $0x1568] sm:$0xff]  ;;  %v2358_v11 = vld [vmem:[%s7935_s21 + $0x1518] sm:$0xff]  ;;  %v5705_v50 = vpack.c.bf16 %v2345_v8, %v2333_v7  ;;  %v5593_v8 = vpack.c.bf16 %v2439_v35, %v2427_v33  ;;  %v1773_v33 = vld [vmem:[%s7935_s21 + $0x2d0] sm:$0xff] }
 0x4b7   : > { %v5579_v21 = vpack.c.bf16 %v2368_v10, %v2356_v9  ;;  %v1702_v7 = vld [vmem:[%s7935_s21 + $0x98] sm:$0xff]  ;;  %v1784_v35 = vld [vmem:[%s7935_s21 + $0x328] sm:$0xff] }
 0x4b9   : > { %5562 = vmatpush1.bf16.msra.mxu0 %v5561_v22  ;;  %5690 = vmatpush1.bf16.msra.mxu1 %v5689_v23  ;;  %v5707_v22 = vpack.c.bf16 %v2370_v12, %v2358_v11  ;;  %v2357_v23 = vld [vmem:[%s7935_s21 + $0x1510] sm:$0xff]  ;;  %v1687_v12 = vld [vmem:[%s7935_s21 + $0x20] sm:$0xff] }
 0x4ba   : > { %5564 = vmatprep.subr.bf16.mxu0 %v5563_v26  ;;  %5692 = vmatprep.subr.bf16.mxu1 %v5691_v27  ;;  %v2392_v26 = vld [vmem:[%s7935_s21 + $0x1628] sm:$0xff]  ;;  %v2382_v27 = vld [vmem:[%s7935_s21 + $0x15d8] sm:$0xff]  ;;  %v5709_v30 = vpack.c.bf16 %v2369_v24, %v2357_v23 }
 0x4bb   : > { %v5583_v37 = vpack.c.bf16 %v2392_v26, %v2380_v25  ;;  %v1726_v23 = vld [vmem:[%s7935_s21 + $0x158] sm:$0xff]  ;;  %v1711_v26 = vld [vmem:[%s7935_s21 + $0xe0] sm:$0xff] }
 0x4bd   : > { %5566 = vmatpush1.bf16.msra.mxu0 %v5565_v38  ;;  %5694 = vmatpush1.bf16.msra.mxu1 %v5693_v39  ;;  %v5711_v38 = vpack.c.bf16 %v2394_v28, %v2382_v27  ;;  %v2381_v39 = vld [vmem:[%s7935_s21 + $0x15d0] sm:$0xff]  ;;  %v1723_v27 = vld [vmem:[%s7935_s21 + $0x140] sm:$0xff] }
 0x4be   : > { %5568 = vmatprep.subr.bf16.mxu0 %v5567_v58  ;;  %5696 = vmatprep.subr.bf16.mxu1 %v5695_v42  ;;  %v2416_v58 = vld [vmem:[%s7935_s21 + $0x16e8] sm:$0xff]  ;;  %v2406_v42 = vld [vmem:[%s7935_s21 + $0x1698] sm:$0xff]  ;;  %v5713_v44 = vpack.c.bf16 %v2393_v40, %v2381_v39  ;;  %v1713_v28 = vld [vmem:[%s7935_s21 + $0xf0] sm:$0xff]  ;;  %v5729_v40 = vpack.c.bf16 %v1723_v27, %v1711_v26 }
 0x4bf   : > { %v5587_v47 = vpack.c.bf16 %v2416_v58, %v2404_v41  ;;  %v1750_v39 = vld [vmem:[%s7935_s21 + $0x218] sm:$0xff]  ;;  %v5857_v41 = vpack.c.bf16 %v1725_v34, %v1713_v28  ;;  %v1821_v26 = vld [vmem:[%s7935_s21 + $0x450] sm:$0xff]  ;;  %v1832_v27 = vld [vmem:[%s7935_s21 + $0x4a8] sm:$0xff] }
 0x4c0   : > { %v1844_v28 = vld [vmem:[%s7935_s21 + $0x508] sm:$0xff] }
 0x4c1   : > { %5570 = vmatpush1.bf16.msra.mxu0 %v5569_v48  ;;  %5698 = vmatpush1.bf16.msra.mxu1 %v5697_v49  ;;  %v5715_v48 = vpack.c.bf16 %v2418_v57, %v2406_v42  ;;  %v2405_v49 = vld [vmem:[%s7935_s21 + $0x1690] sm:$0xff]  ;;  %v1735_v42 = vld [vmem:[%s7935_s21 + $0x1a0] sm:$0xff] }
 0x4c2   : > { %5572 = vmatprep.subr.bf16.mxu0 %v5571_v54  ;;  %5700 = vmatprep.subr.bf16.mxu1 %v5699_v60  ;;  %v2440_v54 = vld [vmem:[%s7935_s21 + $0x17a8] sm:$0xff]  ;;  %v2430_v60 = vld [vmem:[%s7935_s21 + $0x1758] sm:$0xff]  ;;  %v5717_v32 = vpack.c.bf16 %v2417_v52, %v2405_v49  ;;  %v1747_v57 = vld [vmem:[%s7935_s21 + $0x200] sm:$0xff] }
 0x4c3   : > { %v5591_v0 = vpack.c.bf16 %v2440_v54, %v2428_v53  ;;  %v1774_v49 = vld [vmem:[%s7935_s21 + $0x2d8] sm:$0xff]  ;;  %v5733_v52 = vpack.c.bf16 %v1747_v57, %v1735_v42  ;;  %v1856_v42 = vld [vmem:[%s7935_s21 + $0x568] sm:$0xff] }
 0x4c4   : > { %v1868_v57 = vld [vmem:[%s7935_s21 + $0x5c8] sm:$0xff] }
 0x4c5   : > { %5574 = vmatpush1.bf16.msra.mxu0 %v5573_v1  ;;  %5702 = vmatpush1.bf16.msra.mxu1 %v5701_v2  ;;  %v5719_v1 = vpack.c.bf16 %v2442_v62, %v2430_v60  ;;  %v2429_v2 = vld [vmem:[%s7935_s21 + $0x1750] sm:$0xff]  ;;  %v1759_v60 = vld [vmem:[%s7935_s21 + $0x260] sm:$0xff] }
 0x4c6   : > { %5576 = vmatprep.subr.bf16.mxu0 %v5575_v5  ;;  %5704 = vmatprep.subr.bf16.mxu1 %v5703_v6  ;;  %v1700_v5 = vld [vmem:[%s7935_s21 + $0x88] sm:$0xff]  ;;  %v1690_v6 = vld [vmem:[%s7935_s21 + $0x38] sm:$0xff]  ;;  %v5721_v9 = vpack.c.bf16 %v2441_v3, %v2429_v2  ;;  %v1771_v62 = vld [vmem:[%s7935_s21 + $0x2c0] sm:$0xff] }
 0x4c7   : > { %v5723_v10 = vpack.c.bf16 %v1700_v5, %v1688_v4  ;;  %v5851_v11 = vpack.c.bf16 %v1702_v7, %v1690_v6  ;;  %v1798_v2 = vld [vmem:[%s7935_s21 + $0x398] sm:$0xff]  ;;  %v5737_v3 = vpack.c.bf16 %v1771_v62, %v1759_v60  ;;  %v1783_v6 = vld [vmem:[%s7935_s21 + $0x320] sm:$0xff]  ;;  %v1880_v60 = vld [vmem:[%s7935_s21 + $0x628] sm:$0xff] }
 0x4c8   : > { %v1795_v7 = vld [vmem:[%s7935_s21 + $0x380] sm:$0xff]  ;;  %v1892_v62 = vld [vmem:[%s7935_s21 + $0x688] sm:$0xff] }
 0x4c9   : > { %5578 = vmatpush1.bf16.msra.mxu0 %v5577_v18  ;;  %5706 = vmatpush1.bf16.msra.mxu1 %v5705_v50  ;;  %v1699_v18 = vld [vmem:[%s7935_s21 + $0x80] sm:$0xff]  ;;  %v1689_v50 = vld [vmem:[%s7935_s21 + $0x30] sm:$0xff] }
 0x4ca   : > { %5580 = vmatprep.subr.bf16.mxu0 %v5579_v21  ;;  %5708 = vmatprep.subr.bf16.mxu1 %v5707_v22  ;;  %v1724_v21 = vld [vmem:[%s7935_s21 + $0x148] sm:$0xff]  ;;  %v1714_v22 = vld [vmem:[%s7935_s21 + $0xf8] sm:$0xff]  ;;  %v5725_v24 = vpack.c.bf16 %v1699_v18, %v1687_v12  ;;  %v5853_v25 = vpack.c.bf16 %v1701_v19, %v1689_v50  ;;  %v5741_v19 = vpack.c.bf16 %v1795_v7, %v1783_v6 }
 0x4cb   : > { %v1820_v12 = vld [vmem:[%s7935_s21 + $0x448] sm:$0xff]  ;;  %v1810_v18 = vld [vmem:[%s7935_s21 + $0x3f8] sm:$0xff] }
 0x4cc   : > { %v1822_v50 = vld [vmem:[%s7935_s21 + $0x458] sm:$0xff]  ;;  %v1904_v6 = vld [vmem:[%s7935_s21 + $0x6e8] sm:$0xff] }
 0x4cd   : > { %5582 = vmatpush1.bf16.msra.mxu0 %v5581_v29  ;;  %5710 = vmatpush1.bf16.msra.mxu1 %v5709_v30  ;;  %v5727_v29 = vpack.c.bf16 %v1724_v21, %v1712_v20  ;;  %v5855_v30 = vpack.c.bf16 %v1726_v23, %v1714_v22  ;;  %v1807_v22 = vld [vmem:[%s7935_s21 + $0x3e0] sm:$0xff]  ;;  %v1916_v7 = vld [vmem:[%s7935_s21 + $0x748] sm:$0xff] }
 0x4ce   : > { %5584 = vmatprep.subr.bf16.mxu0 %v5583_v37  ;;  %5712 = vmatprep.subr.bf16.mxu1 %v5711_v38  ;;  %v1748_v37 = vld [vmem:[%s7935_s21 + $0x208] sm:$0xff]  ;;  %v1738_v38 = vld [vmem:[%s7935_s21 + $0x1b8] sm:$0xff]  ;;  %v1819_v23 = vld [vmem:[%s7935_s21 + $0x440] sm:$0xff] }
 0x4cf   : > { %v5731_v58 = vpack.c.bf16 %v1748_v37, %v1736_v36  ;;  %v5745_v34 = vpack.c.bf16 %v1819_v23, %v1807_v22  ;;  %v5747_v37 = vpack.c.bf16 %v1844_v28, %v1832_v27  ;;  %v1928_v22 = vld [vmem:[%s7935_s21 + $0x7a8] sm:$0xff] }
 0x4d0   : > { %v1940_v23 = vld [vmem:[%s7935_s21 + $0x808] sm:$0xff] }
 0x4d1   : > { %5586 = vmatpush1.bf16.msra.mxu0 %v5585_v43  ;;  %5714 = vmatpush1.bf16.msra.mxu1 %v5713_v44  ;;  %v1737_v43 = vld [vmem:[%s7935_s21 + $0x1b0] sm:$0xff]  ;;  %v5859_v44 = vpack.c.bf16 %v1750_v39, %v1738_v38  ;;  %v1831_v38 = vld [vmem:[%s7935_s21 + $0x4a0] sm:$0xff]  ;;  %v5763_v28 = vpack.c.bf16 %v1940_v23, %v1928_v22 }
 0x4d2   : > { %5588 = vmatprep.subr.bf16.mxu0 %v5587_v47  ;;  %5716 = vmatprep.subr.bf16.mxu1 %v5715_v48  ;;  %v1772_v47 = vld [vmem:[%s7935_s21 + $0x2c8] sm:$0xff]  ;;  %v1762_v48 = vld [vmem:[%s7935_s21 + $0x278] sm:$0xff]  ;;  %v5861_v53 = vpack.c.bf16 %v1749_v61, %v1737_v43  ;;  %v1843_v39 = vld [vmem:[%s7935_s21 + $0x500] sm:$0xff] }
 0x4d3   : > { %v5735_v54 = vpack.c.bf16 %v1772_v47, %v1760_v59  ;;  %v1858_v43 = vld [vmem:[%s7935_s21 + $0x578] sm:$0xff]  ;;  %v5749_v61 = vpack.c.bf16 %v1843_v39, %v1831_v38  ;;  %v5751_v47 = vpack.c.bf16 %v1868_v57, %v1856_v42  ;;  %v1952_v38 = vld [vmem:[%s7935_s21 + $0x868] sm:$0xff] }
 0x4d4   : > { %v1964_v39 = vld [vmem:[%s7935_s21 + $0x8c8] sm:$0xff] }
 0x4d5   : > { %5590 = vmatpush1.bf16.msra.mxu0 %v5589_v31  ;;  %5718 = vmatpush1.bf16.msra.mxu1 %v5717_v32  ;;  %v1761_v31 = vld [vmem:[%s7935_s21 + $0x270] sm:$0xff]  ;;  %v5863_v32 = vpack.c.bf16 %v1774_v49, %v1762_v48  ;;  %v1855_v48 = vld [vmem:[%s7935_s21 + $0x560] sm:$0xff]  ;;  %v5767_v57 = vpack.c.bf16 %v1964_v39, %v1952_v38 }
 0x4d6   : > { %5592 = vmatprep.subr.bf16.mxu0 %v5591_v0  ;;  %5720 = vmatprep.subr.bf16.mxu1 %v5719_v1  ;;  %v1796_v0 = vld [vmem:[%s7935_s21 + $0x388] sm:$0xff]  ;;  %v1786_v1 = vld [vmem:[%s7935_s21 + $0x338] sm:$0xff]  ;;  %v5865_v4 = vpack.c.bf16 %v1773_v33, %v1761_v31  ;;  %v1867_v49 = vld [vmem:[%s7935_s21 + $0x5c0] sm:$0xff] }
 0x4d7   : > { %v5739_v5 = vpack.c.bf16 %v1796_v0, %v1784_v35  ;;  %v1882_v31 = vld [vmem:[%s7935_s21 + $0x638] sm:$0xff]  ;;  %v5753_v33 = vpack.c.bf16 %v1867_v49, %v1855_v48  ;;  %v5755_v0 = vpack.c.bf16 %v1892_v62, %v1880_v60  ;;  %v1976_v48 = vld [vmem:[%s7935_s21 + $0x928] sm:$0xff] }
 0x4d8   : > { %v1988_v49 = vld [vmem:[%s7935_s21 + $0x988] sm:$0xff] }
 0x4d9   : > { %5594 = vmatpush1.bf16.msra.mxu0 %v5593_v8  ;;  %5722 = vmatpush1.bf16.msra.mxu1 %v5721_v9  ;;  %v1785_v8 = vld [vmem:[%s7935_s21 + $0x330] sm:$0xff]  ;;  %v5867_v9 = vpack.c.bf16 %v1798_v2, %v1786_v1  ;;  %v1879_v1 = vld [vmem:[%s7935_s21 + $0x620] sm:$0xff]  ;;  %v5771_v62 = vpack.c.bf16 %v1988_v49, %v1976_v48 }
 0x4da   : > { %5724 = vmatprep.subr.bf16.mxu0 %v5723_v10  ;;  %5852 = vmatprep.subr.bf16.mxu1 %v5851_v11  ;;  %v1797_v10 = vld [vmem:[%s7935_s21 + $0x390] sm:$0xff]  ;;  %v1808_v11 = vld [vmem:[%s7935_s21 + $0x3e8] sm:$0xff]  ;;  %v1891_v2 = vld [vmem:[%s7935_s21 + $0x680] sm:$0xff] }
 0x4db   : > { %v5869_v20 = vpack.c.bf16 %v1797_v10, %v1785_v8  ;;  %v5743_v21 = vpack.c.bf16 %v1820_v12, %v1808_v11  ;;  %v1906_v8 = vld [vmem:[%s7935_s21 + $0x6f8] sm:$0xff]  ;;  %v5757_v10 = vpack.c.bf16 %v1891_v2, %v1879_v1  ;;  %v5759_v12 = vpack.c.bf16 %v1916_v7, %v1904_v6  ;;  %v2000_v1 = vld [vmem:[%s7935_s21 + $0x9e8] sm:$0xff] }
 0x4dc   : > { %2651 = vmatmul.mubr.f32.vlgmr.msra.gmra.mrb[0].mxu0 %v8251_v51  ;;  %2793 = vmatmul.mubr.f32.vlgmr.msra.gmra.mrb[0].mxu1 %v8251_v51  ;;  %v2012_v2 = vld [vmem:[%s7935_s21 + $0xa48] sm:$0xff] }
 0x4dd   : > { %5726 = vmatpush1.bf16.msra.mxu0 %v5725_v24  ;;  %2863 = vmatprep.mubr.f32.mxu0 %v8245_v45  ;;  %v1809_v24 = vld [vmem:[%s7935_s21 + $0x3f0] sm:$0xff]  ;;  %v5775_v7 = vpack.c.bf16 %v2012_v2, %v2000_v1  ;;  %v2095_v2 = vld [vmem:[%s7935_s21 + $0xce0] sm:$0xff] }
 0x4de   : > { %5854 = vmatpush1.bf16.msra.mxu1 %v5853_v25  ;;  %3005 = vmatprep.mubr.f32.mxu1 %v8245_v45  ;;  %v5871_v25 = vpack.c.bf16 %v1822_v50, %v1810_v18  ;;  %v5873_v36 = vpack.c.bf16 %v1821_v26, %v1809_v24  ;;  %v1903_v18 = vld [vmem:[%s7935_s21 + $0x6e0] sm:$0xff]  ;;  %v1930_v24 = vld [vmem:[%s7935_s21 + $0x7b8] sm:$0xff] }
 0x4df   : > { %5728 = vmatprep.subr.bf16.mxu0 %v5727_v29  ;;  %5856 = vmatprep.subr.bf16.mxu1 %v5855_v30  ;;  %v1834_v29 = vld [vmem:[%s7935_s21 + $0x4b8] sm:$0xff]  ;;  %v1915_v50 = vld [vmem:[%s7935_s21 + $0x740] sm:$0xff] }
 0x4e0   : > { %v1846_v30 = vld [vmem:[%s7935_s21 + $0x518] sm:$0xff]  ;;  %v5761_v26 = vpack.c.bf16 %v1915_v50, %v1903_v18  ;;  %v2024_v18 = vld [vmem:[%s7935_s21 + $0xaa8] sm:$0xff] }
 0x4e1   : > { %5730 = vmatpush1.bf16.msra.mxu0 %v5729_v40  ;;  %v1833_v40 = vld [vmem:[%s7935_s21 + $0x4b0] sm:$0xff]  ;;  %v2036_v50 = vld [vmem:[%s7935_s21 + $0xb08] sm:$0xff] }
 0x4e2   : > { %5858 = vmatpush1.bf16.msra.mxu1 %v5857_v41  ;;  %5732 = vmatprep.subr.bf16.mxu0 %v5731_v58  ;;  %v5875_v41 = vpack.c.bf16 %v1846_v30, %v1834_v29  ;;  %v1845_v58 = vld [vmem:[%s7935_s21 + $0x510] sm:$0xff]  ;;  %v1927_v29 = vld [vmem:[%s7935_s21 + $0x7a0] sm:$0xff]  ;;  %v5779_v23 = vpack.c.bf16 %v2036_v50, %v2024_v18 }
 0x4e3   : > { %5860 = vmatprep.subr.bf16.mxu1 %v5859_v44  ;;  %v1870_v44 = vld [vmem:[%s7935_s21 + $0x5d8] sm:$0xff]  ;;  %v5877_v59 = vpack.c.bf16 %v1845_v58, %v1833_v40  ;;  %v1939_v30 = vld [vmem:[%s7935_s21 + $0x800] sm:$0xff] }
 0x4e4   : > { %v1954_v40 = vld [vmem:[%s7935_s21 + $0x878] sm:$0xff]  ;;  %v5765_v58 = vpack.c.bf16 %v1939_v30, %v1927_v29  ;;  %v2048_v29 = vld [vmem:[%s7935_s21 + $0xb68] sm:$0xff] }
 0x4e5   : > { %5734 = vmatpush1.bf16.msra.mxu0 %v5733_v52  ;;  %v1857_v52 = vld [vmem:[%s7935_s21 + $0x570] sm:$0xff]  ;;  %v2060_v30 = vld [vmem:[%s7935_s21 + $0xbc8] sm:$0xff] }
 0x4e6   : > { %5862 = vmatpush1.bf16.msra.mxu1 %v5861_v53  ;;  %5736 = vmatprep.subr.bf16.mxu0 %v5735_v54  ;;  %v5879_v53 = vpack.c.bf16 %v1870_v44, %v1858_v43  ;;  %v1869_v54 = vld [vmem:[%s7935_s21 + $0x5d0] sm:$0xff]  ;;  %v1951_v43 = vld [vmem:[%s7935_s21 + $0x860] sm:$0xff]  ;;  %v5783_v39 = vpack.c.bf16 %v2060_v30, %v2048_v29 }
 0x4e7   : > { %5864 = vmatprep.subr.bf16.mxu1 %v5863_v32  ;;  %v1894_v32 = vld [vmem:[%s7935_s21 + $0x698] sm:$0xff]  ;;  %v5881_v35 = vpack.c.bf16 %v1869_v54, %v1857_v52  ;;  %v1963_v44 = vld [vmem:[%s7935_s21 + $0x8c0] sm:$0xff] }
 0x4e8   : > { %v1978_v52 = vld [vmem:[%s7935_s21 + $0x938] sm:$0xff]  ;;  %v5769_v54 = vpack.c.bf16 %v1963_v44, %v1951_v43  ;;  %v2072_v43 = vld [vmem:[%s7935_s21 + $0xc28] sm:$0xff] }
 0x4e9   : > { %5738 = vmatpush1.bf16.msra.mxu0 %v5737_v3  ;;  %v1881_v3 = vld [vmem:[%s7935_s21 + $0x630] sm:$0xff]  ;;  %v2084_v44 = vld [vmem:[%s7935_s21 + $0xc88] sm:$0xff] }
 0x4ea   : > { %5866 = vmatpush1.bf16.msra.mxu1 %v5865_v4  ;;  %5740 = vmatprep.subr.bf16.mxu0 %v5739_v5  ;;  %v5883_v4 = vpack.c.bf16 %v1894_v32, %v1882_v31  ;;  %v1893_v5 = vld [vmem:[%s7935_s21 + $0x690] sm:$0xff]  ;;  %v1975_v31 = vld [vmem:[%s7935_s21 + $0x920] sm:$0xff]  ;;  %v5787_v49 = vpack.c.bf16 %v2084_v44, %v2072_v43 }
 0x4eb   : > { %5868 = vmatprep.subr.bf16.mxu1 %v5867_v9  ;;  %v1918_v9 = vld [vmem:[%s7935_s21 + $0x758] sm:$0xff]  ;;  %v5885_v11 = vpack.c.bf16 %v1893_v5, %v1881_v3  ;;  %v1987_v32 = vld [vmem:[%s7935_s21 + $0x980] sm:$0xff] }
 0x4ec   : > { %v2002_v3 = vld [vmem:[%s7935_s21 + $0x9f8] sm:$0xff]  ;;  %v5773_v5 = vpack.c.bf16 %v1987_v32, %v1975_v31  ;;  %v2096_v31 = vld [vmem:[%s7935_s21 + $0xce8] sm:$0xff] }
 0x4ed   : > { %5742 = vmatpush1.bf16.msra.mxu0 %v5741_v19  ;;  %v1905_v19 = vld [vmem:[%s7935_s21 + $0x6f0] sm:$0xff]  ;;  %v2108_v32 = vld [vmem:[%s7935_s21 + $0xd48] sm:$0xff] }
 0x4ee   : > { %5870 = vmatpush1.bf16.msra.mxu1 %v5869_v20  ;;  %5744 = vmatprep.subr.bf16.mxu0 %v5743_v21  ;;  %v5887_v20 = vpack.c.bf16 %v1918_v9, %v1906_v8  ;;  %v1917_v21 = vld [vmem:[%s7935_s21 + $0x750] sm:$0xff]  ;;  %v1999_v8 = vld [vmem:[%s7935_s21 + $0x9e0] sm:$0xff] }
 0x4ef   : > { %5872 = vmatprep.subr.bf16.mxu1 %v5871_v25  ;;  %v1942_v25 = vld [vmem:[%s7935_s21 + $0x818] sm:$0xff]  ;;  %v5889_v27 = vpack.c.bf16 %v1917_v21, %v1905_v19  ;;  %v2011_v9 = vld [vmem:[%s7935_s21 + $0xa40] sm:$0xff] }
 0x4f0   : > { %v2026_v19 = vld [vmem:[%s7935_s21 + $0xab8] sm:$0xff]  ;;  %v5777_v21 = vpack.c.bf16 %v2011_v9, %v1999_v8  ;;  %v2132_v8 = vld [vmem:[%s7935_s21 + $0xe08] sm:$0xff] }
 0x4f1   : > { %5746 = vmatpush1.bf16.msra.mxu0 %v5745_v34  ;;  %v1929_v34 = vld [vmem:[%s7935_s21 + $0x7b0] sm:$0xff] }
 0x4f2   : > { %5874 = vmatpush1.bf16.msra.mxu1 %v5873_v36  ;;  %5748 = vmatprep.subr.bf16.mxu0 %v5747_v37  ;;  %v5891_v36 = vpack.c.bf16 %v1942_v25, %v1930_v24  ;;  %v1941_v37 = vld [vmem:[%s7935_s21 + $0x810] sm:$0xff]  ;;  %v2023_v24 = vld [vmem:[%s7935_s21 + $0xaa0] sm:$0xff] }
 0x4f3   : > { %5876 = vmatprep.subr.bf16.mxu1 %v5875_v41  ;;  %v1966_v41 = vld [vmem:[%s7935_s21 + $0x8d8] sm:$0xff]  ;;  %v5893_v42 = vpack.c.bf16 %v1941_v37, %v1929_v34  ;;  %v2035_v25 = vld [vmem:[%s7935_s21 + $0xb00] sm:$0xff] }
 0x4f4   : > { %v2050_v34 = vld [vmem:[%s7935_s21 + $0xb78] sm:$0xff]  ;;  %v5781_v37 = vpack.c.bf16 %v2035_v25, %v2023_v24  ;;  %v2144_v24 = vld [vmem:[%s7935_s21 + $0xe68] sm:$0xff] }
 0x4f5   : > { %5750 = vmatpush1.bf16.msra.mxu0 %v5749_v61  ;;  %v1953_v61 = vld [vmem:[%s7935_s21 + $0x870] sm:$0xff]  ;;  %v2156_v25 = vld [vmem:[%s7935_s21 + $0xec8] sm:$0xff] }
 0x4f6   : > { %5878 = vmatpush1.bf16.msra.mxu1 %v5877_v59  ;;  %5752 = vmatprep.subr.bf16.mxu0 %v5751_v47  ;;  %v5895_v59 = vpack.c.bf16 %v1966_v41, %v1954_v40  ;;  %v1965_v47 = vld [vmem:[%s7935_s21 + $0x8d0] sm:$0xff]  ;;  %v2047_v40 = vld [vmem:[%s7935_s21 + $0xb60] sm:$0xff]  ;;  %v5799_v30 = vpack.c.bf16 %v2156_v25, %v2144_v24 }
 0x4f7   : > { %5880 = vmatprep.subr.bf16.mxu1 %v5879_v53  ;;  %v1990_v53 = vld [vmem:[%s7935_s21 + $0x998] sm:$0xff]  ;;  %v5897_v60 = vpack.c.bf16 %v1965_v47, %v1953_v61  ;;  %v2059_v41 = vld [vmem:[%s7935_s21 + $0xbc0] sm:$0xff] }
 0x4f8   : > { %v2074_v61 = vld [vmem:[%s7935_s21 + $0xc38] sm:$0xff]  ;;  %v5785_v47 = vpack.c.bf16 %v2059_v41, %v2047_v40  ;;  %v2168_v40 = vld [vmem:[%s7935_s21 + $0xf28] sm:$0xff] }
 0x4f9   : > { %5754 = vmatpush1.bf16.msra.mxu0 %v5753_v33  ;;  %v1977_v33 = vld [vmem:[%s7935_s21 + $0x930] sm:$0xff]  ;;  %v2180_v41 = vld [vmem:[%s7935_s21 + $0xf88] sm:$0xff] }
 0x4fa   : > { %5882 = vmatpush1.bf16.msra.mxu1 %v5881_v35  ;;  %5756 = vmatprep.subr.bf16.mxu0 %v5755_v0  ;;  %v5899_v35 = vpack.c.bf16 %v1990_v53, %v1978_v52  ;;  %v1989_v0 = vld [vmem:[%s7935_s21 + $0x990] sm:$0xff]  ;;  %v2071_v52 = vld [vmem:[%s7935_s21 + $0xc20] sm:$0xff]  ;;  %v5803_v44 = vpack.c.bf16 %v2180_v41, %v2168_v40 }
 0x4fb   : > { %5884 = vmatprep.subr.bf16.mxu1 %v5883_v4  ;;  %v2014_v4 = vld [vmem:[%s7935_s21 + $0xa58] sm:$0xff]  ;;  %v5901_v6 = vpack.c.bf16 %v1989_v0, %v1977_v33  ;;  %v2083_v53 = vld [vmem:[%s7935_s21 + $0xc80] sm:$0xff] }
 0x4fc   : > { %v5789_v33 = vpack.c.bf16 %v2083_v53, %v2071_v52  ;;  %v2110_v0 = vld [vmem:[%s7935_s21 + $0xd58] sm:$0xff]  ;;  %v2192_v52 = vld [vmem:[%s7935_s21 + $0xfe8] sm:$0xff] }
 0x4fd   : > { %5758 = vmatpush1.bf16.msra.mxu0 %v5757_v10  ;;  %v2001_v10 = vld [vmem:[%s7935_s21 + $0x9f0] sm:$0xff]  ;;  %v2204_v53 = vld [vmem:[%s7935_s21 + $0x1048] sm:$0xff] }
 0x4fe   : > { %5886 = vmatpush1.bf16.msra.mxu1 %v5885_v11  ;;  %5760 = vmatprep.subr.bf16.mxu0 %v5759_v12  ;;  %v5903_v11 = vpack.c.bf16 %v2014_v4, %v2002_v3  ;;  %v2013_v12 = vld [vmem:[%s7935_s21 + $0xa50] sm:$0xff]  ;;  %v2107_v3 = vld [vmem:[%s7935_s21 + $0xd40] sm:$0xff] }
 0x4ff   : > { %5888 = vmatprep.subr.bf16.mxu1 %v5887_v20  ;;  %v2038_v20 = vld [vmem:[%s7935_s21 + $0xb18] sm:$0xff]  ;;  %v5905_v22 = vpack.c.bf16 %v2013_v12, %v2001_v10  ;;  %v2097_v4 = vld [vmem:[%s7935_s21 + $0xcf0] sm:$0xff]  ;;  %v5793_v12 = vpack.c.bf16 %v2107_v3, %v2095_v2  ;;  %v2216_v3 = vld [vmem:[%s7935_s21 + $0x10a8] sm:$0xff] }
 0x500   : > { %v2122_v10 = vld [vmem:[%s7935_s21 + $0xdb8] sm:$0xff]  ;;  %v2205_v2 = vld [vmem:[%s7935_s21 + $0x1050] sm:$0xff] }
 0x501   : > { %5762 = vmatpush1.bf16.msra.mxu0 %v5761_v26  ;;  %v2025_v26 = vld [vmem:[%s7935_s21 + $0xab0] sm:$0xff] }
 0x502   : > { %5890 = vmatpush1.bf16.msra.mxu1 %v5889_v27  ;;  %5764 = vmatprep.subr.bf16.mxu0 %v5763_v28  ;;  %v5907_v27 = vpack.c.bf16 %v2038_v20, %v2026_v19  ;;  %v2037_v28 = vld [vmem:[%s7935_s21 + $0xb10] sm:$0xff]  ;;  %v2119_v19 = vld [vmem:[%s7935_s21 + $0xda0] sm:$0xff] }
 0x503   : > { %5892 = vmatprep.subr.bf16.mxu1 %v5891_v36  ;;  %v2062_v36 = vld [vmem:[%s7935_s21 + $0xbd8] sm:$0xff]  ;;  %v5909_v38 = vpack.c.bf16 %v2037_v28, %v2025_v26  ;;  %v2131_v20 = vld [vmem:[%s7935_s21 + $0xe00] sm:$0xff] }
 0x504   : > { %v2146_v26 = vld [vmem:[%s7935_s21 + $0xe78] sm:$0xff]  ;;  %v5797_v28 = vpack.c.bf16 %v2131_v20, %v2119_v19  ;;  %v2240_v19 = vld [vmem:[%s7935_s21 + $0x1168] sm:$0xff] }
 0x505   : > { %5766 = vmatpush1.bf16.msra.mxu0 %v5765_v58  ;;  %v2049_v58 = vld [vmem:[%s7935_s21 + $0xb70] sm:$0xff]  ;;  %v2252_v20 = vld [vmem:[%s7935_s21 + $0x11c8] sm:$0xff] }
 0x506   : > { %5894 = vmatpush1.bf16.msra.mxu1 %v5893_v42  ;;  %5768 = vmatprep.subr.bf16.mxu0 %v5767_v57  ;;  %v5911_v42 = vpack.c.bf16 %v2062_v36, %v2050_v34  ;;  %v2061_v57 = vld [vmem:[%s7935_s21 + $0xbd0] sm:$0xff]  ;;  %v2143_v34 = vld [vmem:[%s7935_s21 + $0xe60] sm:$0xff]  ;;  %v5815_v25 = vpack.c.bf16 %v2252_v20, %v2240_v19 }
 0x507   : > { %5896 = vmatprep.subr.bf16.mxu1 %v5895_v59  ;;  %v2086_v59 = vld [vmem:[%s7935_s21 + $0xc98] sm:$0xff]  ;;  %v5913_v48 = vpack.c.bf16 %v2061_v57, %v2049_v58  ;;  %v2155_v36 = vld [vmem:[%s7935_s21 + $0xec0] sm:$0xff] }
 0x508   : > { %v2170_v58 = vld [vmem:[%s7935_s21 + $0xf38] sm:$0xff]  ;;  %v5801_v57 = vpack.c.bf16 %v2155_v36, %v2143_v34  ;;  %v2264_v34 = vld [vmem:[%s7935_s21 + $0x1228] sm:$0xff] }
 0x509   : > { %5770 = vmatpush1.bf16.msra.mxu0 %v5769_v54  ;;  %v5915_v54 = vpack.c.bf16 %v2086_v59, %v2074_v61  ;;  %v2167_v61 = vld [vmem:[%s7935_s21 + $0xf20] sm:$0xff]  ;;  %v2276_v36 = vld [vmem:[%s7935_s21 + $0x1288] sm:$0xff] }
 0x50a   : > { %5898 = vmatpush1.bf16.msra.mxu1 %v5897_v60  ;;  %5772 = vmatprep.subr.bf16.mxu0 %v5771_v62  ;;  %v2073_v60 = vld [vmem:[%s7935_s21 + $0xc30] sm:$0xff]  ;;  %v2179_v59 = vld [vmem:[%s7935_s21 + $0xf80] sm:$0xff]  ;;  %v5819_v41 = vpack.c.bf16 %v2276_v36, %v2264_v34 }
 0x50b   : > { %5900 = vmatprep.subr.bf16.mxu1 %v5899_v35  ;;  %v2085_v62 = vld [vmem:[%s7935_s21 + $0xc90] sm:$0xff]  ;;  %v2098_v35 = vld [vmem:[%s7935_s21 + $0xcf8] sm:$0xff] }
 0x50c   : > { %v5917_v1 = vpack.c.bf16 %v2085_v62, %v2073_v60  ;;  %v5919_v9 = vpack.c.bf16 %v2110_v0, %v2098_v35  ;;  %v2206_v60 = vld [vmem:[%s7935_s21 + $0x1058] sm:$0xff]  ;;  %v5805_v62 = vpack.c.bf16 %v2179_v59, %v2167_v61  ;;  %v2203_v35 = vld [vmem:[%s7935_s21 + $0x1040] sm:$0xff]  ;;  %v2193_v0 = vld [vmem:[%s7935_s21 + $0xff0] sm:$0xff] }
 0x50d   : > { %5774 = vmatpush1.bf16.msra.mxu0 %v5773_v5  ;;  %v5791_v5 = vpack.c.bf16 %v2108_v32, %v2096_v31  ;;  %v5807_v32 = vpack.c.bf16 %v2204_v53, %v2192_v52  ;;  %v2288_v61 = vld [vmem:[%s7935_s21 + $0x12e8] sm:$0xff] }
 0x50e   : > { %5902 = vmatpush1.bf16.msra.mxu1 %v5901_v6  ;;  %5776 = vmatprep.subr.bf16.mxu0 %v5775_v7  ;;  %v2109_v6 = vld [vmem:[%s7935_s21 + $0xd50] sm:$0xff]  ;;  %v2120_v7 = vld [vmem:[%s7935_s21 + $0xda8] sm:$0xff] }
 0x50f   : > { %5904 = vmatprep.subr.bf16.mxu1 %v5903_v11  ;;  %v2134_v11 = vld [vmem:[%s7935_s21 + $0xe18] sm:$0xff]  ;;  %v5921_v18 = vpack.c.bf16 %v2109_v6, %v2097_v4  ;;  %v5795_v50 = vpack.c.bf16 %v2132_v8, %v2120_v7  ;;  %v2228_v4 = vld [vmem:[%s7935_s21 + $0x1108] sm:$0xff]  ;;  %v5937_v8 = vpack.c.bf16 %v2205_v2, %v2193_v0 }
 0x510   : > { %v2230_v6 = vld [vmem:[%s7935_s21 + $0x1118] sm:$0xff]  ;;  %v2300_v59 = vld [vmem:[%s7935_s21 + $0x1348] sm:$0xff] }
 0x511   : > { %5778 = vmatpush1.bf16.msra.mxu0 %v5777_v21  ;;  %v2121_v21 = vld [vmem:[%s7935_s21 + $0xdb0] sm:$0xff]  ;;  %v5823_v53 = vpack.c.bf16 %v2300_v59, %v2288_v61  ;;  %v2314_v0 = vld [vmem:[%s7935_s21 + $0x13b8] sm:$0xff] }
 0x512   : > { %5906 = vmatpush1.bf16.msra.mxu1 %v5905_v22  ;;  %5780 = vmatprep.subr.bf16.mxu0 %v5779_v23  ;;  %v5923_v22 = vpack.c.bf16 %v2134_v11, %v2122_v10  ;;  %v2133_v23 = vld [vmem:[%s7935_s21 + $0xe10] sm:$0xff]  ;;  %v2215_v10 = vld [vmem:[%s7935_s21 + $0x10a0] sm:$0xff] }
 0x513   : > { %5908 = vmatprep.subr.bf16.mxu1 %v5907_v27  ;;  %v2158_v27 = vld [vmem:[%s7935_s21 + $0xed8] sm:$0xff]  ;;  %v5925_v29 = vpack.c.bf16 %v2133_v23, %v2121_v21  ;;  %v2227_v11 = vld [vmem:[%s7935_s21 + $0x1100] sm:$0xff] }
 0x514   : > { %v2242_v21 = vld [vmem:[%s7935_s21 + $0x1178] sm:$0xff]  ;;  %v5813_v23 = vpack.c.bf16 %v2227_v11, %v2215_v10  ;;  %v2336_v10 = vld [vmem:[%s7935_s21 + $0x1468] sm:$0xff] }
 0x515   : > { %5782 = vmatpush1.bf16.msra.mxu0 %v5781_v37  ;;  %v2145_v37 = vld [vmem:[%s7935_s21 + $0xe70] sm:$0xff]  ;;  %v2348_v11 = vld [vmem:[%s7935_s21 + $0x14c8] sm:$0xff] }
 0x516   : > { %5910 = vmatpush1.bf16.msra.mxu1 %v5909_v38  ;;  %5784 = vmatprep.subr.bf16.mxu0 %v5783_v39  ;;  %v5927_v38 = vpack.c.bf16 %v2158_v27, %v2146_v26  ;;  %v2157_v39 = vld [vmem:[%s7935_s21 + $0xed0] sm:$0xff]  ;;  %v2239_v26 = vld [vmem:[%s7935_s21 + $0x1160] sm:$0xff]  ;;  %v5831_v20 = vpack.c.bf16 %v2348_v11, %v2336_v10 }
 0x517   : > { %5912 = vmatprep.subr.bf16.mxu1 %v5911_v42  ;;  %v2182_v42 = vld [vmem:[%s7935_s21 + $0xf98] sm:$0xff]  ;;  %v5929_v43 = vpack.c.bf16 %v2157_v39, %v2145_v37  ;;  %v2251_v27 = vld [vmem:[%s7935_s21 + $0x11c0] sm:$0xff] }
 0x518   : > { %v2266_v37 = vld [vmem:[%s7935_s21 + $0x1238] sm:$0xff]  ;;  %v5817_v39 = vpack.c.bf16 %v2251_v27, %v2239_v26  ;;  %v2360_v26 = vld [vmem:[%s7935_s21 + $0x1528] sm:$0xff] }
 0x519   : > { %5786 = vmatpush1.bf16.msra.mxu0 %v5785_v47  ;;  %v2169_v47 = vld [vmem:[%s7935_s21 + $0xf30] sm:$0xff]  ;;  %v2372_v27 = vld [vmem:[%s7935_s21 + $0x1588] sm:$0xff] }
 0x51a   : > { %5914 = vmatpush1.bf16.msra.mxu1 %v5913_v48  ;;  %5788 = vmatprep.subr.bf16.mxu0 %v5787_v49  ;;  %v5931_v48 = vpack.c.bf16 %v2182_v42, %v2170_v58  ;;  %v2181_v49 = vld [vmem:[%s7935_s21 + $0xf90] sm:$0xff]  ;;  %v2263_v58 = vld [vmem:[%s7935_s21 + $0x1220] sm:$0xff]  ;;  %v5835_v36 = vpack.c.bf16 %v2372_v27, %v2360_v26 }
 0x51b   : > { %5916 = vmatprep.subr.bf16.mxu1 %v5915_v54  ;;  %v2194_v54 = vld [vmem:[%s7935_s21 + $0xff8] sm:$0xff]  ;;  %v5933_v31 = vpack.c.bf16 %v2181_v49, %v2169_v47  ;;  %v2275_v42 = vld [vmem:[%s7935_s21 + $0x1280] sm:$0xff] }
 0x51c   : > { %2864 = vmatmul.mubr.f32.vlgmr.msra.gmra.mrb[2].mxu0 %v8247_v46  ;;  %v2290_v47 = vld [vmem:[%s7935_s21 + $0x12f8] sm:$0xff]  ;;  %v5821_v49 = vpack.c.bf16 %v2275_v42, %v2263_v58  ;;  %v2384_v58 = vld [vmem:[%s7935_s21 + $0x15e8] sm:$0xff] }
 0x51d   : > { %3006 = vmatmul.mubr.f32.vlgmr.msra.gmra.mrb[2].mxu1 %v8247_v46  ;;  %5790 = vmatpush1.bf16.msra.mxu0 %v5789_v33  ;;  %v2191_v33 = vld [vmem:[%s7935_s21 + $0xfe0] sm:$0xff]  ;;  %v2396_v42 = vld [vmem:[%s7935_s21 + $0x1648] sm:$0xff] }
 0x51e   : > { %2934 = vmatprep.mubr.f32.mxu0 %v8263_v63  ;;  %5918 = vmatpush1.bf16.msra.mxu1 %v5917_v1  ;;  %v5935_v1 = vpack.c.bf16 %v2206_v60, %v2194_v54  ;;  %v5809_v7 = vpack.c.bf16 %v2203_v35, %v2191_v33  ;;  %v2287_v54 = vld [vmem:[%s7935_s21 + $0x12e0] sm:$0xff]  ;;  %v2312_v33 = vld [vmem:[%s7935_s21 + $0x13a8] sm:$0xff]  ;;  %v5839_v59 = vpack.c.bf16 %v2396_v42, %v2384_v58 }
 0x51f   : > { %3076 = vmatprep.mubr.f32.mxu1 %v8263_v63  ;;  %5792 = vmatprep.subr.bf16.mxu0 %v5791_v5  ;;  %v2218_v5 = vld [vmem:[%s7935_s21 + $0x10b8] sm:$0xff]  ;;  %v2299_v60 = vld [vmem:[%s7935_s21 + $0x1340] sm:$0xff]  ;;  %v2324_v35 = vld [vmem:[%s7935_s21 + $0x1408] sm:$0xff] }
 0x520   : > { %5920 = vmatprep.subr.bf16.mxu1 %v5919_v9  ;;  %v5811_v9 = vpack.c.bf16 %v2228_v4, %v2216_v3  ;;  %v5825_v2 = vpack.c.bf16 %v2299_v60, %v2287_v54  ;;  %v5827_v4 = vpack.c.bf16 %v2324_v35, %v2312_v33  ;;  %v2408_v54 = vld [vmem:[%s7935_s21 + $0x16a8] sm:$0xff]  ;;  %v1715_v42 = vld [vmem:[%s7935_s21 + $0x100] sm:$0xff] }
 0x521   : > { %5794 = vmatpush1.bf16.msra.mxu0 %v5793_v12  ;;  %v2217_v12 = vld [vmem:[%s7935_s21 + $0x10b0] sm:$0xff]  ;;  %v2420_v60 = vld [vmem:[%s7935_s21 + $0x1708] sm:$0xff] }
 0x522   : > { %5922 = vmatpush1.bf16.msra.mxu1 %v5921_v18  ;;  %5796 = vmatprep.subr.bf16.mxu0 %v5795_v50  ;;  %v5939_v18 = vpack.c.bf16 %v2230_v6, %v2218_v5  ;;  %v2229_v50 = vld [vmem:[%s7935_s21 + $0x1110] sm:$0xff]  ;;  %v2311_v5 = vld [vmem:[%s7935_s21 + $0x13a0] sm:$0xff]  ;;  %v5843_v35 = vpack.c.bf16 %v2420_v60, %v2408_v54 }
 0x523   : > { %5924 = vmatprep.subr.bf16.mxu1 %v5923_v22  ;;  %v2254_v22 = vld [vmem:[%s7935_s21 + $0x11d8] sm:$0xff]  ;;  %v5941_v24 = vpack.c.bf16 %v2229_v50, %v2217_v12  ;;  %v2323_v6 = vld [vmem:[%s7935_s21 + $0x1400] sm:$0xff] }
 0x524   : > { %v2338_v12 = vld [vmem:[%s7935_s21 + $0x1478] sm:$0xff]  ;;  %v5829_v50 = vpack.c.bf16 %v2323_v6, %v2311_v5  ;;  %v2432_v5 = vld [vmem:[%s7935_s21 + $0x1768] sm:$0xff] }
 0x525   : > { %5798 = vmatpush1.bf16.msra.mxu0 %v5797_v28  ;;  %v2241_v28 = vld [vmem:[%s7935_s21 + $0x1170] sm:$0xff]  ;;  %v2444_v6 = vld [vmem:[%s7935_s21 + $0x17c8] sm:$0xff] }
 0x526   : > { %5926 = vmatpush1.bf16.msra.mxu1 %v5925_v29  ;;  %5800 = vmatprep.subr.bf16.mxu0 %v5799_v30  ;;  %v5943_v29 = vpack.c.bf16 %v2254_v22, %v2242_v21  ;;  %v2253_v30 = vld [vmem:[%s7935_s21 + $0x11d0] sm:$0xff]  ;;  %v2335_v21 = vld [vmem:[%s7935_s21 + $0x1460] sm:$0xff]  ;;  %v5847_v11 = vpack.c.bf16 %v2444_v6, %v2432_v5 }
 0x527   : > { %5928 = vmatprep.subr.bf16.mxu1 %v5927_v38  ;;  %v2278_v38 = vld [vmem:[%s7935_s21 + $0x1298] sm:$0xff]  ;;  %v5945_v40 = vpack.c.bf16 %v2253_v30, %v2241_v28  ;;  %v2347_v22 = vld [vmem:[%s7935_s21 + $0x14c0] sm:$0xff] }
 0x528   : > { %v2362_v28 = vld [vmem:[%s7935_s21 + $0x1538] sm:$0xff]  ;;  %v5833_v30 = vpack.c.bf16 %v2347_v22, %v2335_v21  ;;  %v1692_v21 = vld [vmem:[%s7935_s21 + $0x48] sm:$0xff]  ;;  %v1763_v6 = vld [vmem:[%s7935_s21 + $0x280] sm:$0xff] }
 0x529   : > { %5802 = vmatpush1.bf16.msra.mxu0 %v5801_v57  ;;  %v2265_v57 = vld [vmem:[%s7935_s21 + $0x1230] sm:$0xff]  ;;  %v1704_v22 = vld [vmem:[%s7935_s21 + $0xa8] sm:$0xff] }
 0x52a   : > { %5930 = vmatpush1.bf16.msra.mxu1 %v5929_v43  ;;  %5804 = vmatprep.subr.bf16.mxu0 %v5803_v44  ;;  %v5947_v43 = vpack.c.bf16 %v2278_v38, %v2266_v37  ;;  %v2277_v44 = vld [vmem:[%s7935_s21 + $0x1290] sm:$0xff]  ;;  %v2359_v37 = vld [vmem:[%s7935_s21 + $0x1520] sm:$0xff]  ;;  %v5979_v27 = vpack.c.bf16 %v1704_v22, %v1692_v21 }
 0x52b   : > { %5932 = vmatprep.subr.bf16.mxu1 %v5931_v48  ;;  %v2302_v48 = vld [vmem:[%s7935_s21 + $0x1358] sm:$0xff]  ;;  %v5949_v52 = vpack.c.bf16 %v2277_v44, %v2265_v57  ;;  %v2371_v38 = vld [vmem:[%s7935_s21 + $0x1580] sm:$0xff] }
 0x52c   : > { %v2386_v57 = vld [vmem:[%s7935_s21 + $0x15f8] sm:$0xff]  ;;  %v5837_v44 = vpack.c.bf16 %v2371_v38, %v2359_v37  ;;  %v1716_v37 = vld [vmem:[%s7935_s21 + $0x108] sm:$0xff]  ;;  %v1787_v22 = vld [vmem:[%s7935_s21 + $0x340] sm:$0xff] }
 0x52d   : > { %5806 = vmatpush1.bf16.msra.mxu0 %v5805_v62  ;;  %v2289_v62 = vld [vmem:[%s7935_s21 + $0x12f0] sm:$0xff]  ;;  %v1728_v38 = vld [vmem:[%s7935_s21 + $0x168] sm:$0xff] }
 0x52e   : > { %5934 = vmatpush1.bf16.msra.mxu1 %v5933_v31  ;;  %5808 = vmatprep.subr.bf16.mxu0 %v5807_v32  ;;  %v5951_v31 = vpack.c.bf16 %v2302_v48, %v2290_v47  ;;  %v2301_v32 = vld [vmem:[%s7935_s21 + $0x1350] sm:$0xff]  ;;  %v2383_v47 = vld [vmem:[%s7935_s21 + $0x15e0] sm:$0xff] }
 0x52f   : > { %5936 = vmatprep.subr.bf16.mxu1 %v5935_v1  ;;  %v2326_v1 = vld [vmem:[%s7935_s21 + $0x1418] sm:$0xff]  ;;  %v5953_v3 = vpack.c.bf16 %v2301_v32, %v2289_v62  ;;  %v2395_v48 = vld [vmem:[%s7935_s21 + $0x1640] sm:$0xff] }
 0x530   : > { %v2410_v62 = vld [vmem:[%s7935_s21 + $0x16b8] sm:$0xff]  ;;  %v5841_v32 = vpack.c.bf16 %v2395_v48, %v2383_v47  ;;  %v1752_v47 = vld [vmem:[%s7935_s21 + $0x228] sm:$0xff] }
 0x531   : > { %5810 = vmatpush1.bf16.msra.mxu0 %v5809_v7  ;;  %v2313_v7 = vld [vmem:[%s7935_s21 + $0x13b0] sm:$0xff] }
 0x532   : > { %5938 = vmatpush1.bf16.msra.mxu1 %v5937_v8  ;;  %5812 = vmatprep.subr.bf16.mxu0 %v5811_v9  ;;  %v5955_v8 = vpack.c.bf16 %v2326_v1, %v2314_v0  ;;  %v2325_v9 = vld [vmem:[%s7935_s21 + $0x1410] sm:$0xff]  ;;  %v2407_v0 = vld [vmem:[%s7935_s21 + $0x16a0] sm:$0xff] }
 0x533   : > { %5940 = vmatprep.subr.bf16.mxu1 %v5939_v18  ;;  %v2350_v18 = vld [vmem:[%s7935_s21 + $0x14d8] sm:$0xff]  ;;  %v5957_v19 = vpack.c.bf16 %v2325_v9, %v2313_v7  ;;  %v2419_v1 = vld [vmem:[%s7935_s21 + $0x1700] sm:$0xff] }
 0x534   : > { %v2434_v7 = vld [vmem:[%s7935_s21 + $0x1778] sm:$0xff]  ;;  %v5845_v9 = vpack.c.bf16 %v2419_v1, %v2407_v0  ;;  %v1764_v0 = vld [vmem:[%s7935_s21 + $0x288] sm:$0xff] }
 0x535   : > { %5814 = vmatpush1.bf16.msra.mxu0 %v5813_v23  ;;  %v2337_v23 = vld [vmem:[%s7935_s21 + $0x1470] sm:$0xff]  ;;  %v1776_v1 = vld [vmem:[%s7935_s21 + $0x2e8] sm:$0xff] }
 0x536   : > { %5942 = vmatpush1.bf16.msra.mxu1 %v5941_v24  ;;  %5816 = vmatprep.subr.bf16.mxu0 %v5815_v25  ;;  %v5959_v24 = vpack.c.bf16 %v2350_v18, %v2338_v12  ;;  %v2349_v25 = vld [vmem:[%s7935_s21 + $0x14d0] sm:$0xff]  ;;  %v2431_v12 = vld [vmem:[%s7935_s21 + $0x1760] sm:$0xff]  ;;  %v5991_v5 = vpack.c.bf16 %v1776_v1, %v1764_v0 }
 0x537   : > { %5944 = vmatprep.subr.bf16.mxu1 %v5943_v29  ;;  %v2374_v29 = vld [vmem:[%s7935_s21 + $0x1598] sm:$0xff]  ;;  %v5961_v34 = vpack.c.bf16 %v2349_v25, %v2337_v23  ;;  %v2443_v18 = vld [vmem:[%s7935_s21 + $0x17c0] sm:$0xff] }
 0x538   : > { %v1694_v23 = vld [vmem:[%s7935_s21 + $0x58] sm:$0xff]  ;;  %v5849_v25 = vpack.c.bf16 %v2443_v18, %v2431_v12  ;;  %v1800_v12 = vld [vmem:[%s7935_s21 + $0x3a8] sm:$0xff]  ;;  %v1859_v1 = vld [vmem:[%s7935_s21 + $0x580] sm:$0xff] }
 0x539   : > { %5818 = vmatpush1.bf16.msra.mxu0 %v5817_v39  ;;  %v2361_v39 = vld [vmem:[%s7935_s21 + $0x1530] sm:$0xff]  ;;  %v1790_v18 = vld [vmem:[%s7935_s21 + $0x358] sm:$0xff] }
 0x53a   : > { %5946 = vmatpush1.bf16.msra.mxu1 %v5945_v40  ;;  %5820 = vmatprep.subr.bf16.mxu0 %v5819_v41  ;;  %v5963_v40 = vpack.c.bf16 %v2374_v29, %v2362_v28  ;;  %v2373_v41 = vld [vmem:[%s7935_s21 + $0x1590] sm:$0xff]  ;;  %v1691_v28 = vld [vmem:[%s7935_s21 + $0x40] sm:$0xff] }
 0x53b   : > { %5948 = vmatprep.subr.bf16.mxu1 %v5947_v43  ;;  %v2398_v43 = vld [vmem:[%s7935_s21 + $0x1658] sm:$0xff]  ;;  %v5965_v61 = vpack.c.bf16 %v2373_v41, %v2361_v39  ;;  %v1703_v29 = vld [vmem:[%s7935_s21 + $0xa0] sm:$0xff] }
 0x53c   : > { %v5981_v39 = vpack.c.bf16 %v1703_v29, %v1691_v28  ;;  %v1730_v41 = vld [vmem:[%s7935_s21 + $0x178] sm:$0xff]  ;;  %v1824_v28 = vld [vmem:[%s7935_s21 + $0x468] sm:$0xff] }
 0x53d   : > { %5822 = vmatpush1.bf16.msra.mxu0 %v5821_v49  ;;  %v2385_v49 = vld [vmem:[%s7935_s21 + $0x15f0] sm:$0xff]  ;;  %v1814_v29 = vld [vmem:[%s7935_s21 + $0x418] sm:$0xff] }
 0x53e   : > { %5950 = vmatpush1.bf16.msra.mxu1 %v5949_v52  ;;  %5824 = vmatprep.subr.bf16.mxu0 %v5823_v53  ;;  %v5967_v52 = vpack.c.bf16 %v2398_v43, %v2386_v57  ;;  %v2397_v53 = vld [vmem:[%s7935_s21 + $0x1650] sm:$0xff]  ;;  %v1727_v57 = vld [vmem:[%s7935_s21 + $0x160] sm:$0xff] }
 0x53f   : > { %5952 = vmatprep.subr.bf16.mxu1 %v5951_v31  ;;  %v2422_v31 = vld [vmem:[%s7935_s21 + $0x1718] sm:$0xff]  ;;  %v5969_v33 = vpack.c.bf16 %v2397_v53, %v2385_v49  ;;  %v1717_v43 = vld [vmem:[%s7935_s21 + $0x110] sm:$0xff]  ;;  %v5985_v53 = vpack.c.bf16 %v1727_v57, %v1715_v42  ;;  %v1836_v42 = vld [vmem:[%s7935_s21 + $0x4c8] sm:$0xff] }
 0x540   : > { %v1742_v49 = vld [vmem:[%s7935_s21 + $0x1d8] sm:$0xff]  ;;  %v1848_v57 = vld [vmem:[%s7935_s21 + $0x528] sm:$0xff] }
 0x541   : > { %5826 = vmatpush1.bf16.msra.mxu0 %v5825_v2  ;;  %v2409_v2 = vld [vmem:[%s7935_s21 + $0x16b0] sm:$0xff] }
 0x542   : > { %5954 = vmatpush1.bf16.msra.mxu1 %v5953_v3  ;;  %5828 = vmatprep.subr.bf16.mxu0 %v5827_v4  ;;  %v5971_v3 = vpack.c.bf16 %v2422_v31, %v2410_v62  ;;  %v2421_v4 = vld [vmem:[%s7935_s21 + $0x1710] sm:$0xff]  ;;  %v1739_v62 = vld [vmem:[%s7935_s21 + $0x1c0] sm:$0xff] }
 0x543   : > { %5956 = vmatprep.subr.bf16.mxu1 %v5955_v8  ;;  %v2446_v8 = vld [vmem:[%s7935_s21 + $0x17d8] sm:$0xff]  ;;  %v5973_v10 = vpack.c.bf16 %v2421_v4, %v2409_v2  ;;  %v1751_v31 = vld [vmem:[%s7935_s21 + $0x220] sm:$0xff] }
 0x544   : > { %v1766_v2 = vld [vmem:[%s7935_s21 + $0x298] sm:$0xff]  ;;  %v5989_v4 = vpack.c.bf16 %v1751_v31, %v1739_v62  ;;  %v1872_v62 = vld [vmem:[%s7935_s21 + $0x5e8] sm:$0xff] }
 0x545   : > { %5830 = vmatpush1.bf16.msra.mxu0 %v5829_v50  ;;  %v2433_v50 = vld [vmem:[%s7935_s21 + $0x1770] sm:$0xff]  ;;  %v1862_v31 = vld [vmem:[%s7935_s21 + $0x598] sm:$0xff] }
 0x546   : > { %5958 = vmatpush1.bf16.msra.mxu1 %v5957_v19  ;;  %5832 = vmatprep.subr.bf16.mxu0 %v5831_v20  ;;  %v5975_v19 = vpack.c.bf16 %v2446_v8, %v2434_v7  ;;  %v2445_v20 = vld [vmem:[%s7935_s21 + $0x17d0] sm:$0xff]  ;;  %v1775_v7 = vld [vmem:[%s7935_s21 + $0x2e0] sm:$0xff] }
 0x547   : > { %5960 = vmatprep.subr.bf16.mxu1 %v5959_v24  ;;  %v1706_v24 = vld [vmem:[%s7935_s21 + $0xb8] sm:$0xff]  ;;  %v5977_v26 = vpack.c.bf16 %v2445_v20, %v2433_v50  ;;  %v1765_v8 = vld [vmem:[%s7935_s21 + $0x290] sm:$0xff] }
 0x548   : > { %v1802_v50 = vld [vmem:[%s7935_s21 + $0x3b8] sm:$0xff] }
 0x549   : > { %5834 = vmatpush1.bf16.msra.mxu0 %v5833_v30  ;;  %v6107_v30 = vpack.c.bf16 %v1706_v24, %v1694_v23  ;;  %v1799_v23 = vld [vmem:[%s7935_s21 + $0x3a0] sm:$0xff]  ;;  %v1789_v24 = vld [vmem:[%s7935_s21 + $0x350] sm:$0xff] }
 0x54a   : > { %5962 = vmatpush1.bf16.msra.mxu1 %v5961_v34  ;;  %5836 = vmatprep.subr.bf16.mxu0 %v5835_v36  ;;  %v1693_v34 = vld [vmem:[%s7935_s21 + $0x50] sm:$0xff] }
 0x54b   : > { %5964 = vmatprep.subr.bf16.mxu1 %v5963_v40  ;;  %v1705_v36 = vld [vmem:[%s7935_s21 + $0xb0] sm:$0xff]  ;;  %v1718_v40 = vld [vmem:[%s7935_s21 + $0x118] sm:$0xff] }
 0x54c   : > { %v6109_v58 = vpack.c.bf16 %v1705_v36, %v1693_v34  ;;  %v6111_v48 = vpack.c.bf16 %v1730_v41, %v1718_v40  ;;  %v5997_v34 = vpack.c.bf16 %v1799_v23, %v1787_v22  ;;  %v1813_v40 = vld [vmem:[%s7935_s21 + $0x410] sm:$0xff]  ;;  %v1920_v22 = vld [vmem:[%s7935_s21 + $0x768] sm:$0xff]  ;;  %v1910_v23 = vld [vmem:[%s7935_s21 + $0x718] sm:$0xff] }
 0x54d   : > { %5838 = vmatpush1.bf16.msra.mxu0 %v5837_v44  ;;  %v5983_v44 = vpack.c.bf16 %v1728_v38, %v1716_v37  ;;  %v1811_v38 = vld [vmem:[%s7935_s21 + $0x400] sm:$0xff] }
 0x54e   : > { %5966 = vmatpush1.bf16.msra.mxu1 %v5965_v61  ;;  %5840 = vmatprep.subr.bf16.mxu0 %v5839_v59  ;;  %v1729_v61 = vld [vmem:[%s7935_s21 + $0x170] sm:$0xff]  ;;  %v1740_v59 = vld [vmem:[%s7935_s21 + $0x1c8] sm:$0xff] }
 0x54f   : > { %5968 = vmatprep.subr.bf16.mxu1 %v5967_v52  ;;  %v1754_v52 = vld [vmem:[%s7935_s21 + $0x238] sm:$0xff]  ;;  %v6113_v54 = vpack.c.bf16 %v1729_v61, %v1717_v43  ;;  %v5987_v60 = vpack.c.bf16 %v1752_v47, %v1740_v59  ;;  %v6003_v47 = vpack.c.bf16 %v1848_v57, %v1836_v42  ;;  %v1931_v57 = vld [vmem:[%s7935_s21 + $0x7c0] sm:$0xff] }
 0x550   : > { %v1838_v43 = vld [vmem:[%s7935_s21 + $0x4d8] sm:$0xff] }
 0x551   : > { %5842 = vmatpush1.bf16.msra.mxu0 %v5841_v32  ;;  %v1741_v32 = vld [vmem:[%s7935_s21 + $0x1d0] sm:$0xff] }
 0x552   : > { %5970 = vmatpush1.bf16.msra.mxu1 %v5969_v33  ;;  %5844 = vmatprep.subr.bf16.mxu0 %v5843_v35  ;;  %v6115_v33 = vpack.c.bf16 %v1754_v52, %v1742_v49  ;;  %v1753_v35 = vld [vmem:[%s7935_s21 + $0x230] sm:$0xff]  ;;  %v1847_v49 = vld [vmem:[%s7935_s21 + $0x520] sm:$0xff] }
 0x553   : > { %5972 = vmatprep.subr.bf16.mxu1 %v5971_v3  ;;  %v1778_v3 = vld [vmem:[%s7935_s21 + $0x2f8] sm:$0xff]  ;;  %v1837_v52 = vld [vmem:[%s7935_s21 + $0x4d0] sm:$0xff] }
 0x555   : > { %5846 = vmatpush1.bf16.msra.mxu0 %v5845_v9  ;;  %v6119_v9 = vpack.c.bf16 %v1778_v3, %v1766_v2  ;;  %v1871_v2 = vld [vmem:[%s7935_s21 + $0x5e0] sm:$0xff]  ;;  %v1861_v3 = vld [vmem:[%s7935_s21 + $0x590] sm:$0xff] }
 0x556   : > { %5974 = vmatpush1.bf16.msra.mxu1 %v5973_v10  ;;  %5848 = vmatprep.subr.bf16.mxu0 %v5847_v11  ;;  %v1777_v10 = vld [vmem:[%s7935_s21 + $0x2f0] sm:$0xff]  ;;  %v1788_v11 = vld [vmem:[%s7935_s21 + $0x348] sm:$0xff] }
 0x557   : > { %5976 = vmatprep.subr.bf16.mxu1 %v5975_v19  ;;  %v5993_v19 = vpack.c.bf16 %v1775_v7, %v1763_v6  ;;  %v6121_v20 = vpack.c.bf16 %v1777_v10, %v1765_v8  ;;  %v5995_v21 = vpack.c.bf16 %v1800_v12, %v1788_v11  ;;  %v1896_v6 = vld [vmem:[%s7935_s21 + $0x6a8] sm:$0xff]  ;;  %v1886_v7 = vld [vmem:[%s7935_s21 + $0x658] sm:$0xff]  ;;  %v1883_v12 = vld [vmem:[%s7935_s21 + $0x640] sm:$0xff] }
 0x558   : > { %v1898_v8 = vld [vmem:[%s7935_s21 + $0x6b8] sm:$0xff] }
 0x559   : > { %5850 = vmatpush1.bf16.msra.mxu0 %v5849_v25  ;;  %v6123_v25 = vpack.c.bf16 %v1802_v50, %v1790_v18  ;;  %v1895_v18 = vld [vmem:[%s7935_s21 + $0x6a0] sm:$0xff]  ;;  %v1885_v50 = vld [vmem:[%s7935_s21 + $0x650] sm:$0xff] }
 0x55a   : > { %5978 = vmatpush1.bf16.msra.mxu1 %v5977_v26  ;;  %5980 = vmatprep.subr.bf16.mxu0 %v5979_v27  ;;  %v1801_v26 = vld [vmem:[%s7935_s21 + $0x3b0] sm:$0xff]  ;;  %v1812_v27 = vld [vmem:[%s7935_s21 + $0x408] sm:$0xff] }
 0x55b   : > { %6108 = vmatprep.subr.bf16.mxu1 %v6107_v30  ;;  %v1826_v30 = vld [vmem:[%s7935_s21 + $0x478] sm:$0xff]  ;;  %v6125_v36 = vpack.c.bf16 %v1801_v26, %v1789_v24  ;;  %v5999_v37 = vpack.c.bf16 %v1824_v28, %v1812_v27  ;;  %v1907_v28 = vld [vmem:[%s7935_s21 + $0x700] sm:$0xff] }
 0x55c   : > { %2935 = vmatmul.mubr.f32.vlgmr.msra.gmra.mrb[2].mxu0 %v8251_v51  ;;  %v6127_v41 = vpack.c.bf16 %v1826_v30, %v1814_v29  ;;  %v1922_v24 = vld [vmem:[%s7935_s21 + $0x778] sm:$0xff]  ;;  %v1919_v29 = vld [vmem:[%s7935_s21 + $0x760] sm:$0xff]  ;;  %v1909_v30 = vld [vmem:[%s7935_s21 + $0x710] sm:$0xff] }
 0x55d   : > { %3077 = vmatmul.mubr.f32.vlgmr.msra.gmra.mrb[2].mxu1 %v8251_v51  ;;  %5982 = vmatpush1.bf16.msra.mxu0 %v5981_v39  ;;  %v1823_v39 = vld [vmem:[%s7935_s21 + $0x460] sm:$0xff] }
 0x55e   : > { %3147 = vmatprep.mubr.f32.mxu0 %v8245_v45  ;;  %6110 = vmatpush1.bf16.msra.mxu1 %v6109_v58  ;;  %v1825_v58 = vld [vmem:[%s7935_s21 + $0x470] sm:$0xff]  ;;  %v6001_v61 = vpack.c.bf16 %v1823_v39, %v1811_v38  ;;  %v1944_v38 = vld [vmem:[%s7935_s21 + $0x828] sm:$0xff]  ;;  %v1934_v39 = vld [vmem:[%s7935_s21 + $0x7d8] sm:$0xff] }
 0x55f   : > { %3289 = vmatprep.mubr.f32.mxu1 %v8245_v45  ;;  %5984 = vmatprep.subr.bf16.mxu0 %v5983_v44  ;;  %v6117_v45 = vpack.c.bf16 %v1753_v35, %v1741_v32  ;;  %v1850_v44 = vld [vmem:[%s7935_s21 + $0x538] sm:$0xff]  ;;  %v6129_v59 = vpack.c.bf16 %v1825_v58, %v1813_v40 }
 0x560   : > { %6112 = vmatprep.subr.bf16.mxu1 %v6111_v48  ;;  %v1835_v48 = vld [vmem:[%s7935_s21 + $0x4c0] sm:$0xff]  ;;  %v1874_v32 = vld [vmem:[%s7935_s21 + $0x5f8] sm:$0xff] }
 0x561   : > { %5986 = vmatpush1.bf16.msra.mxu0 %v5985_v53  ;;  %v6131_v53 = vpack.c.bf16 %v1850_v44, %v1838_v43  ;;  %v1946_v40 = vld [vmem:[%s7935_s21 + $0x838] sm:$0xff]  ;;  %v1943_v43 = vld [vmem:[%s7935_s21 + $0x820] sm:$0xff]  ;;  %v1933_v44 = vld [vmem:[%s7935_s21 + $0x7d0] sm:$0xff] }
 0x562   : > { %6114 = vmatpush1.bf16.msra.mxu1 %v6113_v54  ;;  %5988 = vmatprep.subr.bf16.mxu0 %v5987_v60  ;;  %v1849_v54 = vld [vmem:[%s7935_s21 + $0x530] sm:$0xff]  ;;  %v1860_v60 = vld [vmem:[%s7935_s21 + $0x588] sm:$0xff] }
 0x563   : > { %6116 = vmatprep.subr.bf16.mxu1 %v6115_v33  ;;  %v6005_v33 = vpack.c.bf16 %v1847_v49, %v1835_v48  ;;  %v6133_v35 = vpack.c.bf16 %v1849_v54, %v1837_v52  ;;  %v6007_v0 = vpack.c.bf16 %v1872_v62, %v1860_v60  ;;  %v1968_v48 = vld [vmem:[%s7935_s21 + $0x8e8] sm:$0xff]  ;;  %v1958_v49 = vld [vmem:[%s7935_s21 + $0x898] sm:$0xff]  ;;  %v1955_v62 = vld [vmem:[%s7935_s21 + $0x880] sm:$0xff] }
 0x564   : > { %v1970_v52 = vld [vmem:[%s7935_s21 + $0x8f8] sm:$0xff] }
 0x565   : > { %5990 = vmatpush1.bf16.msra.mxu0 %v5989_v4  ;;  %v6135_v4 = vpack.c.bf16 %v1874_v32, %v1862_v31  ;;  %v1967_v31 = vld [vmem:[%s7935_s21 + $0x8e0] sm:$0xff]  ;;  %v1957_v32 = vld [vmem:[%s7935_s21 + $0x890] sm:$0xff] }
 0x566   : > { %6118 = vmatpush1.bf16.msra.mxu1 %v6117_v45  ;;  %5992 = vmatprep.subr.bf16.mxu0 %v5991_v5  ;;  %v1873_v45 = vld [vmem:[%s7935_s21 + $0x5f0] sm:$0xff]  ;;  %v1884_v5 = vld [vmem:[%s7935_s21 + $0x648] sm:$0xff] }
 0x567   : > { %6120 = vmatprep.subr.bf16.mxu1 %v6119_v9  ;;  %v6009_v9 = vpack.c.bf16 %v1871_v2, %v1859_v1  ;;  %v6137_v10 = vpack.c.bf16 %v1873_v45, %v1861_v3  ;;  %v6011_v11 = vpack.c.bf16 %v1896_v6, %v1884_v5  ;;  %v1992_v1 = vld [vmem:[%s7935_s21 + $0x9a8] sm:$0xff]  ;;  %v1982_v2 = vld [vmem:[%s7935_s21 + $0x958] sm:$0xff]  ;;  %v1979_v6 = vld [vmem:[%s7935_s21 + $0x940] sm:$0xff] }
 0x568   : > { %v1994_v3 = vld [vmem:[%s7935_s21 + $0x9b8] sm:$0xff] }
 0x569   : > { %5994 = vmatpush1.bf16.msra.mxu0 %v5993_v19  ;;  %v6139_v19 = vpack.c.bf16 %v1898_v8, %v1886_v7  ;;  %v1991_v7 = vld [vmem:[%s7935_s21 + $0x9a0] sm:$0xff]  ;;  %v1981_v8 = vld [vmem:[%s7935_s21 + $0x950] sm:$0xff] }
 0x56a   : > { %6122 = vmatpush1.bf16.msra.mxu1 %v6121_v20  ;;  %5996 = vmatprep.subr.bf16.mxu0 %v5995_v21  ;;  %v1897_v20 = vld [vmem:[%s7935_s21 + $0x6b0] sm:$0xff]  ;;  %v1908_v21 = vld [vmem:[%s7935_s21 + $0x708] sm:$0xff] }
 0x56b   : > { %6124 = vmatprep.subr.bf16.mxu1 %v6123_v25  ;;  %v6013_v25 = vpack.c.bf16 %v1895_v18, %v1883_v12  ;;  %v6141_v26 = vpack.c.bf16 %v1897_v20, %v1885_v50  ;;  %v6015_v27 = vpack.c.bf16 %v1920_v22, %v1908_v21  ;;  %v2016_v12 = vld [vmem:[%s7935_s21 + $0xa68] sm:$0xff]  ;;  %v2006_v18 = vld [vmem:[%s7935_s21 + $0xa18] sm:$0xff]  ;;  %v2003_v22 = vld [vmem:[%s7935_s21 + $0xa00] sm:$0xff] }
 0x56c   : > { %v2018_v50 = vld [vmem:[%s7935_s21 + $0xa78] sm:$0xff] }
 0x56d   : > { %5998 = vmatpush1.bf16.msra.mxu0 %v5997_v34  ;;  %v6143_v34 = vpack.c.bf16 %v1922_v24, %v1910_v23  ;;  %v2015_v23 = vld [vmem:[%s7935_s21 + $0xa60] sm:$0xff]  ;;  %v2005_v24 = vld [vmem:[%s7935_s21 + $0xa10] sm:$0xff] }
 0x56e   : > { %6126 = vmatpush1.bf16.msra.mxu1 %v6125_v36  ;;  %6000 = vmatprep.subr.bf16.mxu0 %v5999_v37  ;;  %v1921_v36 = vld [vmem:[%s7935_s21 + $0x770] sm:$0xff]  ;;  %v1932_v37 = vld [vmem:[%s7935_s21 + $0x7c8] sm:$0xff] }
 0x56f   : > { %6128 = vmatprep.subr.bf16.mxu1 %v6127_v41  ;;  %v6017_v41 = vpack.c.bf16 %v1919_v29, %v1907_v28  ;;  %v6145_v58 = vpack.c.bf16 %v1921_v36, %v1909_v30  ;;  %v6019_v42 = vpack.c.bf16 %v1944_v38, %v1932_v37  ;;  %v2040_v28 = vld [vmem:[%s7935_s21 + $0xb28] sm:$0xff]  ;;  %v2030_v29 = vld [vmem:[%s7935_s21 + $0xad8] sm:$0xff]  ;;  %v2027_v38 = vld [vmem:[%s7935_s21 + $0xac0] sm:$0xff] }
 0x570   : > { %v2042_v30 = vld [vmem:[%s7935_s21 + $0xb38] sm:$0xff] }
 0x571   : > { %6002 = vmatpush1.bf16.msra.mxu0 %v6001_v61  ;;  %v6147_v61 = vpack.c.bf16 %v1946_v40, %v1934_v39  ;;  %v2039_v39 = vld [vmem:[%s7935_s21 + $0xb20] sm:$0xff]  ;;  %v2029_v40 = vld [vmem:[%s7935_s21 + $0xad0] sm:$0xff] }
 0x572   : > { %6130 = vmatpush1.bf16.msra.mxu1 %v6129_v59  ;;  %6004 = vmatprep.subr.bf16.mxu0 %v6003_v47  ;;  %v1945_v59 = vld [vmem:[%s7935_s21 + $0x830] sm:$0xff]  ;;  %v1956_v47 = vld [vmem:[%s7935_s21 + $0x888] sm:$0xff] }
 0x573   : > { %6132 = vmatprep.subr.bf16.mxu1 %v6131_v53  ;;  %v6021_v53 = vpack.c.bf16 %v1943_v43, %v1931_v57  ;;  %v6149_v54 = vpack.c.bf16 %v1945_v59, %v1933_v44  ;;  %v6023_v60 = vpack.c.bf16 %v1968_v48, %v1956_v47  ;;  %v2064_v57 = vld [vmem:[%s7935_s21 + $0xbe8] sm:$0xff]  ;;  %v2054_v43 = vld [vmem:[%s7935_s21 + $0xb98] sm:$0xff]  ;;  %v2051_v48 = vld [vmem:[%s7935_s21 + $0xb80] sm:$0xff] }
 0x574   : > { %v2066_v44 = vld [vmem:[%s7935_s21 + $0xbf8] sm:$0xff] }
 0x575   : > { %6006 = vmatpush1.bf16.msra.mxu0 %v6005_v33  ;;  %v6151_v33 = vpack.c.bf16 %v1970_v52, %v1958_v49  ;;  %v2063_v49 = vld [vmem:[%s7935_s21 + $0xbe0] sm:$0xff]  ;;  %v2053_v52 = vld [vmem:[%s7935_s21 + $0xb90] sm:$0xff] }
 0x576   : > { %6134 = vmatpush1.bf16.msra.mxu1 %v6133_v35  ;;  %6008 = vmatprep.subr.bf16.mxu0 %v6007_v0  ;;  %v1969_v35 = vld [vmem:[%s7935_s21 + $0x8f0] sm:$0xff]  ;;  %v1980_v0 = vld [vmem:[%s7935_s21 + $0x948] sm:$0xff] }
 0x577   : > { %6136 = vmatprep.subr.bf16.mxu1 %v6135_v4  ;;  %v6025_v4 = vpack.c.bf16 %v1967_v31, %v1955_v62  ;;  %v6153_v45 = vpack.c.bf16 %v1969_v35, %v1957_v32  ;;  %v6027_v5 = vpack.c.bf16 %v1992_v1, %v1980_v0  ;;  %v2088_v62 = vld [vmem:[%s7935_s21 + $0xca8] sm:$0xff]  ;;  %v2078_v31 = vld [vmem:[%s7935_s21 + $0xc58] sm:$0xff]  ;;  %v2075_v1 = vld [vmem:[%s7935_s21 + $0xc40] sm:$0xff] }
 0x578   : > { %v2090_v32 = vld [vmem:[%s7935_s21 + $0xcb8] sm:$0xff] }
 0x579   : > { %6010 = vmatpush1.bf16.msra.mxu0 %v6009_v9  ;;  %v6155_v9 = vpack.c.bf16 %v1994_v3, %v1982_v2  ;;  %v2087_v2 = vld [vmem:[%s7935_s21 + $0xca0] sm:$0xff]  ;;  %v6171_v3 = vpack.c.bf16 %v2090_v32, %v2078_v31  ;;  %v2185_v32 = vld [vmem:[%s7935_s21 + $0xfb0] sm:$0xff] }
 0x57a   : > { %6138 = vmatpush1.bf16.msra.mxu1 %v6137_v10  ;;  %6012 = vmatprep.subr.bf16.mxu0 %v6011_v11  ;;  %v1993_v10 = vld [vmem:[%s7935_s21 + $0x9b0] sm:$0xff]  ;;  %v2004_v11 = vld [vmem:[%s7935_s21 + $0xa08] sm:$0xff] }
 0x57b   : > { %6140 = vmatprep.subr.bf16.mxu1 %v6139_v19  ;;  %v6029_v19 = vpack.c.bf16 %v1991_v7, %v1979_v6  ;;  %v6157_v20 = vpack.c.bf16 %v1993_v10, %v1981_v8  ;;  %v6031_v21 = vpack.c.bf16 %v2016_v12, %v2004_v11  ;;  %v2112_v6 = vld [vmem:[%s7935_s21 + $0xd68] sm:$0xff]  ;;  %v6045_v7 = vpack.c.bf16 %v2087_v2, %v2075_v1  ;;  %v2102_v8 = vld [vmem:[%s7935_s21 + $0xd18] sm:$0xff]  ;;  %v2099_v11 = vld [vmem:[%s7935_s21 + $0xd00] sm:$0xff] }
 0x57c   : > { %v2111_v12 = vld [vmem:[%s7935_s21 + $0xd60] sm:$0xff]  ;;  %v2210_v1 = vld [vmem:[%s7935_s21 + $0x1078] sm:$0xff] }
 0x57d   : > { %6014 = vmatpush1.bf16.msra.mxu0 %v6013_v25  ;;  %v6159_v25 = vpack.c.bf16 %v2018_v50, %v2006_v18  ;;  %v2101_v18 = vld [vmem:[%s7935_s21 + $0xd10] sm:$0xff] }
 0x57e   : > { %6142 = vmatpush1.bf16.msra.mxu1 %v6141_v26  ;;  %6016 = vmatprep.subr.bf16.mxu0 %v6015_v27  ;;  %v2017_v26 = vld [vmem:[%s7935_s21 + $0xa70] sm:$0xff]  ;;  %v2028_v27 = vld [vmem:[%s7935_s21 + $0xac8] sm:$0xff] }
 0x57f   : > { %6144 = vmatprep.subr.bf16.mxu1 %v6143_v34  ;;  %v6033_v34 = vpack.c.bf16 %v2015_v23, %v2003_v22  ;;  %v6161_v36 = vpack.c.bf16 %v2017_v26, %v2005_v24  ;;  %v6035_v37 = vpack.c.bf16 %v2040_v28, %v2028_v27  ;;  %v2126_v23 = vld [vmem:[%s7935_s21 + $0xdd8] sm:$0xff]  ;;  %v2123_v28 = vld [vmem:[%s7935_s21 + $0xdc0] sm:$0xff] }
 0x580   : > { %v2138_v24 = vld [vmem:[%s7935_s21 + $0xe38] sm:$0xff] }
 0x581   : > { %6018 = vmatpush1.bf16.msra.mxu0 %v6017_v41  ;;  %v6163_v41 = vpack.c.bf16 %v2042_v30, %v2030_v29  ;;  %v2135_v29 = vld [vmem:[%s7935_s21 + $0xe20] sm:$0xff]  ;;  %v2125_v30 = vld [vmem:[%s7935_s21 + $0xdd0] sm:$0xff] }
 0x582   : > { %6146 = vmatpush1.bf16.msra.mxu1 %v6145_v58  ;;  %6020 = vmatprep.subr.bf16.mxu0 %v6019_v42  ;;  %v2041_v58 = vld [vmem:[%s7935_s21 + $0xb30] sm:$0xff]  ;;  %v2052_v42 = vld [vmem:[%s7935_s21 + $0xb88] sm:$0xff] }
 0x583   : > { %6148 = vmatprep.subr.bf16.mxu1 %v6147_v61  ;;  %v6037_v61 = vpack.c.bf16 %v2039_v39, %v2027_v38  ;;  %v6165_v59 = vpack.c.bf16 %v2041_v58, %v2029_v40  ;;  %v6039_v47 = vpack.c.bf16 %v2064_v57, %v2052_v42  ;;  %v2150_v38 = vld [vmem:[%s7935_s21 + $0xe98] sm:$0xff]  ;;  %v6053_v40 = vpack.c.bf16 %v2135_v29, %v2123_v28  ;;  %v2147_v58 = vld [vmem:[%s7935_s21 + $0xe80] sm:$0xff]  ;;  %v2149_v57 = vld [vmem:[%s7935_s21 + $0xe90] sm:$0xff] }
 0x584   : > { %v2162_v39 = vld [vmem:[%s7935_s21 + $0xef8] sm:$0xff]  ;;  %v2159_v42 = vld [vmem:[%s7935_s21 + $0xee0] sm:$0xff]  ;;  %v2256_v28 = vld [vmem:[%s7935_s21 + $0x11e8] sm:$0xff] }
 0x585   : > { %6022 = vmatpush1.bf16.msra.mxu0 %v6021_v53  ;;  %v6167_v53 = vpack.c.bf16 %v2066_v44, %v2054_v43  ;;  %v6183_v43 = vpack.c.bf16 %v2162_v39, %v2150_v38  ;;  %v2161_v44 = vld [vmem:[%s7935_s21 + $0xef0] sm:$0xff]  ;;  %v2243_v39 = vld [vmem:[%s7935_s21 + $0x1180] sm:$0xff] }
 0x586   : > { %6150 = vmatpush1.bf16.msra.mxu1 %v6149_v54  ;;  %6024 = vmatprep.subr.bf16.mxu0 %v6023_v60  ;;  %v2065_v54 = vld [vmem:[%s7935_s21 + $0xbf0] sm:$0xff]  ;;  %v2076_v60 = vld [vmem:[%s7935_s21 + $0xc48] sm:$0xff] }
 0x587   : > { %6152 = vmatprep.subr.bf16.mxu1 %v6151_v33  ;;  %v6041_v33 = vpack.c.bf16 %v2063_v49, %v2051_v48  ;;  %v6169_v35 = vpack.c.bf16 %v2065_v54, %v2053_v52  ;;  %v6043_v0 = vpack.c.bf16 %v2088_v62, %v2076_v60  ;;  %v2186_v48 = vld [vmem:[%s7935_s21 + $0xfb8] sm:$0xff]  ;;  %v6057_v49 = vpack.c.bf16 %v2159_v42, %v2147_v58  ;;  %v2171_v54 = vld [vmem:[%s7935_s21 + $0xf40] sm:$0xff]  ;;  %v2173_v62 = vld [vmem:[%s7935_s21 + $0xf50] sm:$0xff] }
 0x588   : > { %v6185_v52 = vpack.c.bf16 %v2161_v44, %v2149_v57  ;;  %v2183_v60 = vld [vmem:[%s7935_s21 + $0xfa0] sm:$0xff]  ;;  %v2257_v58 = vld [vmem:[%s7935_s21 + $0x11f0] sm:$0xff]  ;;  %v2268_v42 = vld [vmem:[%s7935_s21 + $0x1248] sm:$0xff] }
 0x589   : > { %6026 = vmatpush1.bf16.msra.mxu0 %v6025_v4  ;;  %v2077_v4 = vld [vmem:[%s7935_s21 + $0xc50] sm:$0xff]  ;;  %v6061_v2 = vpack.c.bf16 %v2183_v60, %v2171_v54  ;;  %v2280_v57 = vld [vmem:[%s7935_s21 + $0x12a8] sm:$0xff]  ;;  %v2282_v44 = vld [vmem:[%s7935_s21 + $0x12b8] sm:$0xff] }
 0x58a   : > { %6154 = vmatpush1.bf16.msra.mxu1 %v6153_v45  ;;  %6028 = vmatprep.subr.bf16.mxu0 %v6027_v5  ;;  %v2089_v45 = vld [vmem:[%s7935_s21 + $0xcb0] sm:$0xff]  ;;  %v2100_v5 = vld [vmem:[%s7935_s21 + $0xd08] sm:$0xff] }
 0x58b   : > { %6156 = vmatprep.subr.bf16.mxu1 %v6155_v9  ;;  %v2114_v9 = vld [vmem:[%s7935_s21 + $0xd78] sm:$0xff]  ;;  %v6173_v10 = vpack.c.bf16 %v2089_v45, %v2077_v4  ;;  %v6047_v50 = vpack.c.bf16 %v2112_v6, %v2100_v5  ;;  %v2195_v45 = vld [vmem:[%s7935_s21 + $0x1000] sm:$0xff]  ;;  %v2197_v6 = vld [vmem:[%s7935_s21 + $0x1010] sm:$0xff] }
 0x58c   : > { %v6175_v22 = vpack.c.bf16 %v2114_v9, %v2102_v8  ;;  %v2207_v5 = vld [vmem:[%s7935_s21 + $0x1060] sm:$0xff]  ;;  %v2209_v8 = vld [vmem:[%s7935_s21 + $0x1070] sm:$0xff]  ;;  %v2220_v9 = vld [vmem:[%s7935_s21 + $0x10c8] sm:$0xff] }
 0x58d   : > { %6030 = vmatpush1.bf16.msra.mxu0 %v6029_v19  ;;  %v2113_v19 = vld [vmem:[%s7935_s21 + $0xd70] sm:$0xff]  ;;  %v2292_v60 = vld [vmem:[%s7935_s21 + $0x1308] sm:$0xff] }
 0x58e   : > { %6158 = vmatpush1.bf16.msra.mxu1 %v6157_v20  ;;  %6032 = vmatprep.subr.bf16.mxu0 %v6031_v21  ;;  %v2124_v20 = vld [vmem:[%s7935_s21 + $0xdc8] sm:$0xff]  ;;  %v6177_v26 = vpack.c.bf16 %v2113_v19, %v2101_v18  ;;  %v6065_v18 = vpack.c.bf16 %v2207_v5, %v2195_v45  ;;  %v2281_v54 = vld [vmem:[%s7935_s21 + $0x12b0] sm:$0xff] }
 0x58f   : > { %6160 = vmatprep.subr.bf16.mxu1 %v6159_v25  ;;  %v2136_v21 = vld [vmem:[%s7935_s21 + $0xe28] sm:$0xff]  ;;  %v6049_v25 = vpack.c.bf16 %v2111_v12, %v2099_v11  ;;  %v2222_v11 = vld [vmem:[%s7935_s21 + $0x10d8] sm:$0xff]  ;;  %v2305_v45 = vld [vmem:[%s7935_s21 + $0x1370] sm:$0xff] }
 0x590   : > { %v6051_v27 = vpack.c.bf16 %v2136_v21, %v2124_v20  ;;  %v2234_v12 = vld [vmem:[%s7935_s21 + $0x1138] sm:$0xff]  ;;  %v2219_v20 = vld [vmem:[%s7935_s21 + $0x10c0] sm:$0xff]  ;;  %v2316_v5 = vld [vmem:[%s7935_s21 + $0x13c8] sm:$0xff] }
 0x591   : > { %6034 = vmatpush1.bf16.msra.mxu0 %v6033_v34  ;;  %v6179_v34 = vpack.c.bf16 %v2138_v24, %v2126_v23  ;;  %v2231_v21 = vld [vmem:[%s7935_s21 + $0x1120] sm:$0xff] }
 0x592   : > { %6162 = vmatpush1.bf16.msra.mxu1 %v6161_v36  ;;  %6036 = vmatprep.subr.bf16.mxu0 %v6035_v37  ;;  %v2148_v36 = vld [vmem:[%s7935_s21 + $0xe88] sm:$0xff] }
 0x593   : > { %6164 = vmatprep.subr.bf16.mxu1 %v6163_v41  ;;  %v2160_v37 = vld [vmem:[%s7935_s21 + $0xee8] sm:$0xff] }
 0x594   : > { %v6055_v41 = vpack.c.bf16 %v2160_v37, %v2148_v36  ;;  %v6069_v36 = vpack.c.bf16 %v2231_v21, %v2219_v20  ;;  %v2329_v20 = vld [vmem:[%s7935_s21 + $0x1430] sm:$0xff]  ;;  %v2340_v21 = vld [vmem:[%s7935_s21 + $0x1488] sm:$0xff] }
 0x595   : > { %6038 = vmatpush1.bf16.msra.mxu0 %v6037_v61  ;;  %v2172_v61 = vld [vmem:[%s7935_s21 + $0xf48] sm:$0xff] }
 0x596   : > { %6166 = vmatpush1.bf16.msra.mxu1 %v6165_v59  ;;  %6040 = vmatprep.subr.bf16.mxu0 %v6039_v47  ;;  %v2184_v59 = vld [vmem:[%s7935_s21 + $0xfa8] sm:$0xff]  ;;  %v2174_v47 = vld [vmem:[%s7935_s21 + $0xf58] sm:$0xff] }
 0x597   : > { %6168 = vmatprep.subr.bf16.mxu1 %v6167_v53  ;;  %v6059_v53 = vpack.c.bf16 %v2184_v59, %v2172_v61  ;;  %v6187_v31 = vpack.c.bf16 %v2186_v48, %v2174_v47  ;;  %v6075_v47 = vpack.c.bf16 %v2280_v57, %v2268_v42  ;;  %v2267_v48 = vld [vmem:[%s7935_s21 + $0x1240] sm:$0xff] }
 0x599   : > { %6042 = vmatpush1.bf16.msra.mxu0 %v6041_v33  ;;  %v2196_v33 = vld [vmem:[%s7935_s21 + $0x1008] sm:$0xff] }
 0x59a   : > { %6170 = vmatpush1.bf16.msra.mxu1 %v6169_v35  ;;  %6044 = vmatprep.subr.bf16.mxu0 %v6043_v0  ;;  %v2208_v35 = vld [vmem:[%s7935_s21 + $0x1068] sm:$0xff]  ;;  %v2198_v0 = vld [vmem:[%s7935_s21 + $0x1018] sm:$0xff] }
 0x59b   : > { %6172 = vmatprep.subr.bf16.mxu1 %v6171_v3  ;;  %v6189_v3 = vpack.c.bf16 %v2185_v32, %v2173_v62  ;;  %v6063_v4 = vpack.c.bf16 %v2208_v35, %v2196_v33  ;;  %v2304_v62 = vld [vmem:[%s7935_s21 + $0x1368] sm:$0xff]  ;;  %v2306_v32 = vld [vmem:[%s7935_s21 + $0x1378] sm:$0xff] }
 0x59c   : > { %3148 = vmatmul.mubr.f32.vlgmr.msra.gmra.mrb[4].mxu0 %v8247_v46 }
 0x59d   : > { %3290 = vmatmul.mubr.f32.vlgmr.msra.gmra.mrb[4].mxu1 %v8247_v46  ;;  %6046 = vmatpush1.bf16.msra.mxu0 %v6045_v7  ;;  %v2137_v46 = vld [vmem:[%s7935_s21 + $0xe30] sm:$0xff]  ;;  %v6191_v7 = vpack.c.bf16 %v2210_v1, %v2198_v0  ;;  %v6079_v0 = vpack.c.bf16 %v2304_v62, %v2292_v60  ;;  %v2291_v1 = vld [vmem:[%s7935_s21 + $0x1300] sm:$0xff] }
 0x59e   : > { %3218 = vmatprep.mubr.f32.mxu0 %v8263_v63  ;;  %6174 = vmatpush1.bf16.msra.mxu1 %v6173_v10  ;;  %v2232_v10 = vld [vmem:[%s7935_s21 + $0x1128] sm:$0xff] }
 0x59f   : > { %3360 = vmatprep.mubr.f32.mxu1 %v8263_v63  ;;  %6048 = vmatprep.subr.bf16.mxu0 %v6047_v50  ;;  %v6181_v63 = vpack.c.bf16 %v2137_v46, %v2125_v30  ;;  %v6193_v50 = vpack.c.bf16 %v2209_v8, %v2197_v6  ;;  %v6067_v19 = vpack.c.bf16 %v2232_v10, %v2220_v9  ;;  %v2258_v46 = vld [vmem:[%s7935_s21 + $0x11f8] sm:$0xff]  ;;  %v2328_v6 = vld [vmem:[%s7935_s21 + $0x1428] sm:$0xff] }
 0x5a0   : > { %6176 = vmatprep.subr.bf16.mxu1 %v6175_v22  ;;  %v2221_v22 = vld [vmem:[%s7935_s21 + $0x10d0] sm:$0xff]  ;;  %v2330_v8 = vld [vmem:[%s7935_s21 + $0x1438] sm:$0xff] }
 0x5a1   : > { %6050 = vmatpush1.bf16.msra.mxu0 %v6049_v25  ;;  %v6195_v25 = vpack.c.bf16 %v2234_v12, %v2222_v11  ;;  %v6083_v11 = vpack.c.bf16 %v2328_v6, %v2316_v5  ;;  %v2315_v12 = vld [vmem:[%s7935_s21 + $0x13c0] sm:$0xff] }
 0x5a2   : > { %6178 = vmatpush1.bf16.msra.mxu1 %v6177_v26  ;;  %6052 = vmatprep.subr.bf16.mxu0 %v6051_v27  ;;  %v2233_v26 = vld [vmem:[%s7935_s21 + $0x1130] sm:$0xff]  ;;  %v2244_v27 = vld [vmem:[%s7935_s21 + $0x1188] sm:$0xff] }
 0x5a3   : > { %6180 = vmatprep.subr.bf16.mxu1 %v6179_v34  ;;  %v2246_v34 = vld [vmem:[%s7935_s21 + $0x1198] sm:$0xff]  ;;  %v6197_v37 = vpack.c.bf16 %v2233_v26, %v2221_v22  ;;  %v6071_v38 = vpack.c.bf16 %v2256_v28, %v2244_v27  ;;  %v2352_v22 = vld [vmem:[%s7935_s21 + $0x14e8] sm:$0xff] }
 0x5a4   : > { %v2354_v26 = vld [vmem:[%s7935_s21 + $0x14f8] sm:$0xff] }
 0x5a5   : > { %6054 = vmatpush1.bf16.msra.mxu0 %v6053_v40  ;;  %v2255_v40 = vld [vmem:[%s7935_s21 + $0x11e0] sm:$0xff] }
 0x5a6   : > { %6182 = vmatpush1.bf16.msra.mxu1 %v6181_v63  ;;  %6056 = vmatprep.subr.bf16.mxu0 %v6055_v41  ;;  %v2245_v63 = vld [vmem:[%s7935_s21 + $0x1190] sm:$0xff]  ;;  %v6199_v41 = vpack.c.bf16 %v2258_v46, %v2246_v34  ;;  %v6073_v61 = vpack.c.bf16 %v2255_v40, %v2243_v39  ;;  %v6087_v34 = vpack.c.bf16 %v2352_v22, %v2340_v21  ;;  %v2339_v46 = vld [vmem:[%s7935_s21 + $0x1480] sm:$0xff]  ;;  %v2364_v40 = vld [vmem:[%s7935_s21 + $0x1548] sm:$0xff] }
 0x5a7   : > { %6184 = vmatprep.subr.bf16.mxu1 %v6183_v43  ;;  %v2270_v43 = vld [vmem:[%s7935_s21 + $0x1258] sm:$0xff]  ;;  %v6201_v59 = vpack.c.bf16 %v2257_v58, %v2245_v63  ;;  %v2353_v39 = vld [vmem:[%s7935_s21 + $0x14f0] sm:$0xff]  ;;  %v2376_v63 = vld [vmem:[%s7935_s21 + $0x15a8] sm:$0xff] }
 0x5a8   : > { %v2378_v58 = vld [vmem:[%s7935_s21 + $0x15b8] sm:$0xff] }
 0x5a9   : > { %6058 = vmatpush1.bf16.msra.mxu0 %v6057_v49  ;;  %v2279_v49 = vld [vmem:[%s7935_s21 + $0x12a0] sm:$0xff] }
 0x5aa   : > { %6186 = vmatpush1.bf16.msra.mxu1 %v6185_v52  ;;  %6060 = vmatprep.subr.bf16.mxu0 %v6059_v53  ;;  %v2269_v52 = vld [vmem:[%s7935_s21 + $0x1250] sm:$0xff]  ;;  %v6203_v53 = vpack.c.bf16 %v2282_v44, %v2270_v43  ;;  %v6077_v33 = vpack.c.bf16 %v2279_v49, %v2267_v48  ;;  %v6091_v43 = vpack.c.bf16 %v2376_v63, %v2364_v40  ;;  %v2363_v44 = vld [vmem:[%s7935_s21 + $0x1540] sm:$0xff]  ;;  %v2388_v49 = vld [vmem:[%s7935_s21 + $0x1608] sm:$0xff]  ;;  %v2477_v63 = vsub.s32 5, %v8207_v13 }
 0x5ab   : > { %6188 = vmatprep.subr.bf16.mxu1 %v6187_v31  ;;  %v2294_v31 = vld [vmem:[%s7935_s21 + $0x1318] sm:$0xff]  ;;  %v6205_v35 = vpack.c.bf16 %v2281_v54, %v2269_v52  ;;  %v2377_v48 = vld [vmem:[%s7935_s21 + $0x15b0] sm:$0xff]  ;;  %v2400_v52 = vld [vmem:[%s7935_s21 + $0x1668] sm:$0xff] }
 0x5ac   : > { %v2402_v54 = vld [vmem:[%s7935_s21 + $0x1678] sm:$0xff] }
 0x5ad   : > { %6062 = vmatpush1.bf16.msra.mxu0 %v6061_v2  ;;  %v2303_v2 = vld [vmem:[%s7935_s21 + $0x1360] sm:$0xff] }
 0x5ae   : > { %6190 = vmatpush1.bf16.msra.mxu1 %v6189_v3  ;;  %6064 = vmatprep.subr.bf16.mxu0 %v6063_v4  ;;  %v2293_v3 = vld [vmem:[%s7935_s21 + $0x1310] sm:$0xff]  ;;  %v6207_v4 = vpack.c.bf16 %v2306_v32, %v2294_v31  ;;  %v6081_v9 = vpack.c.bf16 %v2303_v2, %v2291_v1  ;;  %v6095_v31 = vpack.c.bf16 %v2400_v52, %v2388_v49  ;;  %v2387_v32 = vld [vmem:[%s7935_s21 + $0x1600] sm:$0xff]  ;;  %v2412_v2 = vld [vmem:[%s7935_s21 + $0x16c8] sm:$0xff] }
 0x5af   : > { %v8830_v23 = vpop.f32.mrb[0].mxu0  ;;  %v8832_v24 = vpop.f32.mrb[0].mxu1  ;;  %6192 = vmatprep.subr.bf16.mxu1 %v6191_v7  ;;  %v2318_v7 = vld [vmem:[%s7935_s21 + $0x13d8] sm:$0xff]  ;;  %v6209_v10 = vpack.c.bf16 %v2305_v45, %v2293_v3  ;;  %v2401_v1 = vld [vmem:[%s7935_s21 + $0x1670] sm:$0xff]  ;;  %v2424_v3 = vld [vmem:[%s7935_s21 + $0x1728] sm:$0xff] }
 0x5b0   : > { %v8837_v29 = vpop.f32.mrb[1].mxu0  ;;  %v8839_v30 = vpop.f32.mrb[1].mxu1  ;;  %v2426_v45 = vld [vmem:[%s7935_s21 + $0x1738] sm:$0xff] }
 0x5b1   : > { %6066 = vmatpush1.bf16.msra.mxu0 %v6065_v18  ;;  %v2327_v18 = vld [vmem:[%s7935_s21 + $0x1420] sm:$0xff] }
 0x5b2   : > { %6194 = vmatpush1.bf16.msra.mxu1 %v6193_v50  ;;  %6068 = vmatprep.subr.bf16.mxu0 %v6067_v19  ;;  %v2317_v50 = vld [vmem:[%s7935_s21 + $0x13d0] sm:$0xff]  ;;  %v6211_v19 = vpack.c.bf16 %v2330_v8, %v2318_v7  ;;  %v6085_v27 = vpack.c.bf16 %v2327_v18, %v2315_v12  ;;  %v6099_v7 = vpack.c.bf16 %v2424_v3, %v2412_v2  ;;  %v2411_v8 = vld [vmem:[%s7935_s21 + $0x16c0] sm:$0xff]  ;;  %v2436_v18 = vld [vmem:[%s7935_s21 + $0x1788] sm:$0xff] }
 0x5b3   : > { %6196 = vmatprep.subr.bf16.mxu1 %v6195_v25  ;;  %v2342_v25 = vld [vmem:[%s7935_s21 + $0x1498] sm:$0xff]  ;;  %v6213_v28 = vpack.c.bf16 %v2329_v20, %v2317_v50  ;;  %v2425_v12 = vld [vmem:[%s7935_s21 + $0x1730] sm:$0xff]  ;;  %v2448_v50 = vld [vmem:[%s7935_s21 + $0x17e8] sm:$0xff] }
 0x5b4   : > { %v2450_v20 = vld [vmem:[%s7935_s21 + $0x17f8] sm:$0xff] }
 0x5b5   : > { %6070 = vmatpush1.bf16.msra.mxu0 %v6069_v36  ;;  %v2351_v36 = vld [vmem:[%s7935_s21 + $0x14e0] sm:$0xff] }
 0x5b6   : > { %6198 = vmatpush1.bf16.msra.mxu1 %v6197_v37  ;;  %6072 = vmatprep.subr.bf16.mxu0 %v6071_v38  ;;  %v2341_v37 = vld [vmem:[%s7935_s21 + $0x1490] sm:$0xff]  ;;  %v6215_v38 = vpack.c.bf16 %v2354_v26, %v2342_v25  ;;  %v6089_v42 = vpack.c.bf16 %v2351_v36, %v2339_v46  ;;  %v6103_v25 = vpack.c.bf16 %v2448_v50, %v2436_v18  ;;  %v2435_v26 = vld [vmem:[%s7935_s21 + $0x1780] sm:$0xff] }
 0x5b7   : > { %6200 = vmatprep.subr.bf16.mxu1 %v6199_v41  ;;  %v2366_v41 = vld [vmem:[%s7935_s21 + $0x1558] sm:$0xff]  ;;  %v6217_v57 = vpack.c.bf16 %v2353_v39, %v2341_v37  ;;  %v2449_v46 = vld [vmem:[%s7935_s21 + $0x17f0] sm:$0xff]  ;;  %v3665_v18 = vld [vmem:[%s7946_s17 + $0x8] sm:$0xff] }
 0x5b8   : > { %v2451_v36 = vld [vmem:[%s7943_s16] sm:$0xff] }
 0x5b9   : > { %6074 = vmatpush1.bf16.msra.mxu0 %v6073_v61  ;;  %v2375_v61 = vld [vmem:[%s7935_s21 + $0x15a0] sm:$0xff]  ;;  %v2462_v39 = vrot.slane %v2451_v36, %v8213_v15  ;;  %v2470_v49 = vrot.slane %v2451_v36, %v8219_v17 }
 0x5ba   : > { %6202 = vmatpush1.bf16.msra.mxu1 %v6201_v59  ;;  %6076 = vmatprep.subr.bf16.mxu0 %v6075_v47  ;;  %v2365_v59 = vld [vmem:[%s7935_s21 + $0x1550] sm:$0xff]  ;;  %v6219_v47 = vpack.c.bf16 %v2378_v58, %v2366_v41  ;;  %v6093_v60 = vpack.c.bf16 %v2375_v61, %v2363_v44  ;;  %v2473_v41 = vsub.s32 4, %v8207_v13  ;;  %v2485_v58 = vsub.s32 7, %v8207_v13  ;;  %v3669_v50 = vld [vmem:[%s7946_s17 + $0x28] sm:$0xff] }
 0x5bb   : > { %6204 = vmatprep.subr.bf16.mxu1 %v6203_v53  ;;  %v2390_v53 = vld [vmem:[%s7935_s21 + $0x1618] sm:$0xff]  ;;  %v6221_v62 = vpack.c.bf16 %v2377_v48, %v2365_v59  ;;  %v6628_v40 = vadd.f32 %v8837_v29, %v2462_v39 }
 0x5bc   : > { %v2486_v61 = vrot.slane %v2451_v36, %v2485_v58  ;;  %v3680_v39 = vld [vmem:[%s7946_s17 + $0x80] sm:$0xff]  ;;  %v3693_v58 = vld [vmem:[%s7946_s17 + $0xe8] sm:$0xff] }
 0x5bd   : > { %6078 = vmatpush1.bf16.msra.mxu0 %v6077_v33  ;;  %v2399_v33 = vld [vmem:[%s7935_s21 + $0x1660] sm:$0xff] }
 0x5be   : > { %6206 = vmatpush1.bf16.msra.mxu1 %v6205_v35  ;;  %6080 = vmatprep.subr.bf16.mxu0 %v6079_v0  ;;  %v2389_v35 = vld [vmem:[%s7935_s21 + $0x1610] sm:$0xff]  ;;  %v6223_v0 = vpack.c.bf16 %v2402_v54, %v2390_v53  ;;  %v6097_v5 = vpack.c.bf16 %v2399_v33, %v2387_v32 }
 0x5bf   : > { %6208 = vmatprep.subr.bf16.mxu1 %v6207_v4  ;;  %v2414_v4 = vld [vmem:[%s7935_s21 + $0x16d8] sm:$0xff]  ;;  %v6225_v6 = vpack.c.bf16 %v2401_v1, %v2389_v35  ;;  %v8928_v33 = vld [vmem:[%s7943_s16 + $0x8] sm:$0xf] }
 0x5c0   : > { %v2494_v35 = vrot.slane %v8928_v33, %v8213_v15 }
 0x5c1   : > { %6082 = vmatpush1.bf16.msra.mxu0 %v6081_v9  ;;  %v2423_v9 = vld [vmem:[%s7935_s21 + $0x1720] sm:$0xff] }
 0x5c2   : > { %6210 = vmatpush1.bf16.msra.mxu1 %v6209_v10  ;;  %6084 = vmatprep.subr.bf16.mxu0 %v6083_v11  ;;  %v2413_v10 = vld [vmem:[%s7935_s21 + $0x16d0] sm:$0xff]  ;;  %v6227_v11 = vpack.c.bf16 %v2426_v45, %v2414_v4  ;;  %v6101_v21 = vpack.c.bf16 %v2423_v9, %v2411_v8 }
 0x5c3   : > { %6212 = vmatprep.subr.bf16.mxu1 %v6211_v19  ;;  %v2438_v19 = vld [vmem:[%s7935_s21 + $0x1798] sm:$0xff]  ;;  %v6229_v22 = vpack.c.bf16 %v2425_v12, %v2413_v10 }
 0x5c5   : > { %6086 = vmatpush1.bf16.msra.mxu0 %v6085_v27  ;;  %v2447_v27 = vld [vmem:[%s7935_s21 + $0x17e0] sm:$0xff] }
 0x5c6   : > { %6214 = vmatpush1.bf16.msra.mxu1 %v6213_v28  ;;  %6088 = vmatprep.subr.bf16.mxu0 %v6087_v34  ;;  %v6231_v28 = vpack.c.bf16 %v2450_v20, %v2438_v19  ;;  %v2437_v34 = vld [vmem:[%s7935_s21 + $0x1790] sm:$0xff]  ;;  %v6105_v37 = vpack.c.bf16 %v2447_v27, %v2435_v26  ;;  %v6235_v19 = vpack.c.bf16 %v3669_v50, %v3665_v18  ;;  %v3664_v20 = vld [vmem:[%s7946_s17] sm:$0xff]  ;;  %v3677_v26 = vld [vmem:[%s7946_s17 + $0x68] sm:$0xff]  ;;  %s9572_s21 = scalar_lea.vmem [#allocation12], %s7953_s1 }
 0x5c7   : > { %6216 = vmatprep.subr.bf16.mxu1 %v6215_v38  ;;  %v6233_v38 = vpack.c.bf16 %v2449_v46, %v2437_v34  ;;  %v3676_v34 = vld [vmem:[%s7946_s17 + $0x60] sm:$0xff]  ;;  %v3741_v18 = vld [vmem:[%s7946_s17 + $0x268] sm:$0xff] }
 0x5c9   : > { %6090 = vmatpush1.bf16.msra.mxu0 %v6089_v42  ;;  %v2478_v42 = vrot.slane %v2451_v36, %v2477_v63 }
 0x5ca   : > { %6218 = vmatpush1.bf16.msra.mxu1 %v6217_v57  ;;  %6092 = vmatprep.subr.bf16.mxu0 %v6091_v43  ;;  %v2474_v57 = vrot.slane %v2451_v36, %v2473_v41  ;;  %v2481_v43 = vsub.s32 6, %v8207_v13  ;;  %v6630_v13 = vadd.f32 %v8839_v30, %v2470_v49  ;;  %v2502_v30 = vrot.slane %v8928_v33, %v8219_v17  ;;  %v3689_v41 = vld [vmem:[%s7946_s17 + $0xc8] sm:$0xff] }
 0x5cb   : > { %6220 = vmatprep.subr.bf16.mxu1 %v6219_v47  ;;  %v2458_v47 = vrot.slane %v2451_v36, %v8210_v14  ;;  %v3705_v49 = vld [vmem:[%s7946_s17 + $0x148] sm:$0xff] }
 0x5cc   : > { %v2482_v53 = vrot.slane %v2451_v36, %v2481_v43  ;;  %v3692_v43 = vld [vmem:[%s7946_s17 + $0xe0] sm:$0xff] }
 0x5cd   : > { %6094 = vmatpush1.bf16.msra.mxu0 %v6093_v60  ;;  %v6627_v60 = vadd.f32 %v8830_v23, %v2458_v47  ;;  %v2490_v23 = vrot.slane %v8928_v33, %v8210_v14  ;;  %v3696_v47 = vld [vmem:[%s7946_s17 + $0x100] sm:$0xff] }
 0x5ce   : > { %6222 = vmatpush1.bf16.msra.mxu1 %v6221_v62  ;;  %6096 = vmatprep.subr.bf16.mxu0 %v6095_v31  ;;  %v2466_v31 = vrot.slane %v2451_v36, %v8216_v16  ;;  %v3681_v36 = vld [vmem:[%s7946_s17 + $0x88] sm:$0xff] }
 0x5cf   : > { %6224 = vmatprep.subr.bf16.mxu1 %v6223_v0 }
 0x5d0   : > { %v6629_v32 = vadd.f32 %v8832_v24, %v2466_v31  ;;  %v3717_v31 = vld [vmem:[%s7946_s17 + $0x1a8] sm:$0xff] }
 0x5d1   : > { %6098 = vmatpush1.bf16.msra.mxu0 %v6097_v5 }
 0x5d2   : > { %6226 = vmatpush1.bf16.msra.mxu1 %v6225_v6  ;;  %6100 = vmatprep.subr.bf16.mxu0 %v6099_v7 }
 0x5d3   : > { %6228 = vmatprep.subr.bf16.mxu1 %v6227_v11 }
 0x5d5   : > { %6102 = vmatpush1.bf16.msra.mxu0 %v6101_v21  ;;  %v3668_v21 = vld [vmem:[%s7946_s17 + $0x20] sm:$0xff] }
 0x5d6   : > { %6230 = vmatpush1.bf16.msra.mxu1 %v6229_v22  ;;  %6104 = vmatprep.subr.bf16.mxu0 %v6103_v25  ;;  %v6237_v22 = vpack.c.bf16 %v3668_v21, %v3664_v20  ;;  %v3673_v25 = vld [vmem:[%s7946_s17 + $0x48] sm:$0xff]  ;;  %v3740_v20 = vld [vmem:[%s7946_s17 + $0x260] sm:$0xff] }
 0x5d7   : > { %6232 = vmatprep.subr.bf16.mxu1 %v6231_v28  ;;  %v6239_v27 = vpack.c.bf16 %v3677_v26, %v3673_v25  ;;  %v3672_v28 = vld [vmem:[%s7946_s17 + $0x40] sm:$0xff]  ;;  %v3749_v25 = vld [vmem:[%s7946_s17 + $0x2a8] sm:$0xff] }
 0x5d8   : > { %v6241_v46 = vpack.c.bf16 %v3676_v34, %v3672_v28  ;;  %v3748_v28 = vld [vmem:[%s7946_s17 + $0x2a0] sm:$0xff] }
 0x5d9   : > { %6106 = vmatpush1.bf16.msra.mxu0 %v6105_v37  ;;  %v3685_v37 = vld [vmem:[%s7946_s17 + $0xa8] sm:$0xff] }
 0x5da   : > { %6234 = vmatpush1.bf16.msra.mxu1 %v6233_v38  ;;  %v6243_v38 = vpack.c.bf16 %v3685_v37, %v3681_v36  ;;  %v3757_v36 = vld [vmem:[%s7946_s17 + $0x2e8] sm:$0xff] }
 0x5dc   : > { %3219 = vmatmul.mubr.f32.vlgmr.msra.gmra.mrb[4].mxu0 %v8251_v51 }
 0x5dd   : > { %3361 = vmatmul.mubr.f32.vlgmr.msra.gmra.mrb[4].mxu1 %v8251_v51  ;;  %3431 = vmatprep.mubr.f32.mxu0 %v6628_v40  ;;  %v3684_v40 = vld [vmem:[%s7946_s17 + $0xa0] sm:$0xff] }
 0x5de   : > { %3586 = vmatprep.mubr.f32.mxu1 %v7338_v55  ;;  %v6245_v63 = vpack.c.bf16 %v3684_v40, %v3680_v39  ;;  %v3756_v39 = vld [vmem:[%s7946_s17 + $0x2e0] sm:$0xff] }
 0x62f   : > { %v2936_v44 = vpop.f32.mrb[2].mxu0 }
 0x630   : > { %v3078_v29 = vpop.f32.mrb[2].mxu1  ;;  %v2938_v59 = vpop.f32.mrb[3].mxu0  ;;  %v6631_v52 = vadd.f32 %v2936_v44, %v2474_v57  ;;  %v3688_v57 = vld [vmem:[%s7946_s17 + $0xc0] sm:$0xff] }
 0x631   : > { %v6632_v51 = vadd.f32 %v2938_v59, %v2478_v42  ;;  %v3080_v48 = vpop.f32.mrb[3].mxu1  ;;  %v6633_v62 = vadd.f32 %v3078_v29, %v2482_v53  ;;  %v6247_v42 = vpack.c.bf16 %v3693_v58, %v3689_v41  ;;  %v6249_v44 = vpack.c.bf16 %v3692_v43, %v3688_v57  ;;  %v3701_v29 = vld [vmem:[%s7946_s17 + $0x128] sm:$0xff]  ;;  %v3764_v57 = vld [vmem:[%s7946_s17 + $0x320] sm:$0xff] }
 0x632   : > { %v6634_v54 = vadd.f32 %v3080_v48, %v2486_v61  ;;  %v3697_v61 = vld [vmem:[%s7946_s17 + $0x108] sm:$0xff] }
 0x633   : > { %3367 = vmatprep.subr.mxu0 %v6632_v51  ;;  %v6251_v59 = vpack.c.bf16 %v3701_v29, %v3697_v61  ;;  %v3700_v51 = vld [vmem:[%s7946_s17 + $0x120] sm:$0xff]  ;;  %v3765_v41 = vld [vmem:[%s7946_s17 + $0x328] sm:$0xff] }
 0x634   : > { %3368 = vmatpush1.xpose.msra.mxu0 %v6631_v52  ;;  %v6253_v48 = vpack.c.bf16 %v3700_v51, %v3696_v47  ;;  %v3709_v52 = vld [vmem:[%s7946_s17 + $0x168] sm:$0xff]  ;;  %v3772_v47 = vld [vmem:[%s7946_s17 + $0x360] sm:$0xff] }
 0x635   : > { %3437 = vmatprep.subr.mxu0 %v6634_v54  ;;  %v6255_v53 = vpack.c.bf16 %v3709_v52, %v3705_v49  ;;  %v3704_v54 = vld [vmem:[%s7946_s17 + $0x140] sm:$0xff]  ;;  %v3773_v61 = vld [vmem:[%s7946_s17 + $0x368] sm:$0xff] }
 0x636   : > { %v3781_v49 = vld [vmem:[%s7946_s17 + $0x3a8] sm:$0xff] }
 0x637   : > { %3432 = vmatmul.mubr.f32.vlgmr.msra.gmra.mrb[6].mxu0 %v6627_v60  ;;  %v3708_v60 = vld [vmem:[%s7946_s17 + $0x160] sm:$0xff] }
 0x638   : > { %3438 = vmatpush1.xpose.msra.mxu0 %v6633_v62  ;;  %3501 = vmatprep.mubr.f32.mxu0 %v6630_v13  ;;  %v6257_v13 = vpack.c.bf16 %v3708_v60, %v3704_v54  ;;  %v3713_v62 = vld [vmem:[%s7946_s17 + $0x188] sm:$0xff]  ;;  %v3780_v54 = vld [vmem:[%s7946_s17 + $0x3a0] sm:$0xff] }
 0x639   : > { %6236 = vmatprep.subr.bf16.mxu0 %v6235_v19  ;;  %v3736_v19 = vld [vmem:[%s7946_s17 + $0x240] sm:$0xff] }
 0x63a   : > { %v6273_v21 = vpack.c.bf16 %v3740_v20, %v3736_v19  ;;  %v3682_v20 = vld [vmem:[%s7946_s17 + $0x90] sm:$0xff] }
 0x63f   : > { %3502 = vmatmul.mubr.f32.vlgmr.msra.gmra.mrb[6].mxu0 %v6629_v32  ;;  %v6259_v32 = vpack.c.bf16 %v3717_v31, %v3713_v62  ;;  %v3789_v62 = vld [vmem:[%s7946_s17 + $0x3e8] sm:$0xff] }
 0x640   : > { %6238 = vmatpush1.bf16.msra.mxu0 %v6237_v22  ;;  %v3745_v22 = vld [vmem:[%s7946_s17 + $0x288] sm:$0xff] }
 0x641   : > { %6240 = vmatprep.subr.bf16.mxu0 %v6239_v27  ;;  %v6275_v26 = vpack.c.bf16 %v3749_v25, %v3745_v22  ;;  %v3744_v27 = vld [vmem:[%s7946_s17 + $0x280] sm:$0xff]  ;;  %v3691_v22 = vld [vmem:[%s7946_s17 + $0xd8] sm:$0xff] }
 0x642   : > { %v6277_v34 = vpack.c.bf16 %v3748_v28, %v3744_v27  ;;  %v3695_v25 = vld [vmem:[%s7946_s17 + $0xf8] sm:$0xff]  ;;  %v3690_v28 = vld [vmem:[%s7946_s17 + $0xd0] sm:$0xff] }
 0x643   : > { %v6375_v27 = vpack.c.bf16 %v3695_v25, %v3691_v22  ;;  %v3762_v22 = vld [vmem:[%s7946_s17 + $0x310] sm:$0xff] }
 0x644   : > { %6242 = vmatpush1.bf16.msra.mxu0 %v6241_v46  ;;  %v3753_v46 = vld [vmem:[%s7946_s17 + $0x2c8] sm:$0xff]  ;;  %v3766_v25 = vld [vmem:[%s7946_s17 + $0x330] sm:$0xff] }
 0x645   : > { %6244 = vmatprep.subr.bf16.mxu0 %v6243_v38  ;;  %v6279_v37 = vpack.c.bf16 %v3757_v36, %v3753_v46  ;;  %v3752_v38 = vld [vmem:[%s7946_s17 + $0x2c0] sm:$0xff]  ;;  %v3699_v46 = vld [vmem:[%s7946_s17 + $0x118] sm:$0xff] }
 0x646   : > { %v6281_v40 = vpack.c.bf16 %v3756_v39, %v3752_v38  ;;  %v3703_v36 = vld [vmem:[%s7946_s17 + $0x138] sm:$0xff]  ;;  %v3698_v39 = vld [vmem:[%s7946_s17 + $0x110] sm:$0xff] }
 0x647   : > { %v6379_v38 = vpack.c.bf16 %v3703_v36, %v3699_v46  ;;  %v3770_v46 = vld [vmem:[%s7946_s17 + $0x350] sm:$0xff] }
 0x648   : > { %6246 = vmatpush1.bf16.msra.mxu0 %v6245_v63  ;;  %v3761_v63 = vld [vmem:[%s7946_s17 + $0x308] sm:$0xff]  ;;  %v3774_v36 = vld [vmem:[%s7946_s17 + $0x370] sm:$0xff] }
 0x649   : > { %6248 = vmatprep.subr.bf16.mxu0 %v6247_v42  ;;  %v6283_v58 = vpack.c.bf16 %v3765_v41, %v3761_v63  ;;  %v3760_v42 = vld [vmem:[%s7946_s17 + $0x300] sm:$0xff]  ;;  %v3707_v63 = vld [vmem:[%s7946_s17 + $0x158] sm:$0xff] }
 0x64a   : > { %v6285_v43 = vpack.c.bf16 %v3764_v57, %v3760_v42  ;;  %v3711_v41 = vld [vmem:[%s7946_s17 + $0x178] sm:$0xff]  ;;  %v3706_v57 = vld [vmem:[%s7946_s17 + $0x150] sm:$0xff] }
 0x64b   : > { %v6383_v42 = vpack.c.bf16 %v3711_v41, %v3707_v63  ;;  %v3778_v63 = vld [vmem:[%s7946_s17 + $0x390] sm:$0xff] }
 0x64c   : > { %6250 = vmatpush1.bf16.msra.mxu0 %v6249_v44  ;;  %v3769_v44 = vld [vmem:[%s7946_s17 + $0x348] sm:$0xff]  ;;  %v3782_v41 = vld [vmem:[%s7946_s17 + $0x3b0] sm:$0xff] }
 0x64d   : > { %6252 = vmatprep.subr.bf16.mxu0 %v6251_v59  ;;  %v6287_v29 = vpack.c.bf16 %v3773_v61, %v3769_v44  ;;  %v3768_v59 = vld [vmem:[%s7946_s17 + $0x340] sm:$0xff]  ;;  %v3715_v44 = vld [vmem:[%s7946_s17 + $0x198] sm:$0xff] }
 0x64e   : > { %v6289_v51 = vpack.c.bf16 %v3772_v47, %v3768_v59  ;;  %v3719_v61 = vld [vmem:[%s7946_s17 + $0x1b8] sm:$0xff]  ;;  %v3714_v47 = vld [vmem:[%s7946_s17 + $0x190] sm:$0xff] }
 0x64f   : > { %v6387_v59 = vpack.c.bf16 %v3719_v61, %v3715_v44  ;;  %v3786_v44 = vld [vmem:[%s7946_s17 + $0x3d0] sm:$0xff] }
 0x650   : > { %6254 = vmatpush1.bf16.msra.mxu0 %v6253_v48  ;;  %v3777_v48 = vld [vmem:[%s7946_s17 + $0x388] sm:$0xff]  ;;  %v3790_v61 = vld [vmem:[%s7946_s17 + $0x3f0] sm:$0xff] }
 0x651   : > { %6256 = vmatprep.subr.bf16.mxu0 %v6255_v53  ;;  %v6291_v52 = vpack.c.bf16 %v3781_v49, %v3777_v48  ;;  %v3776_v53 = vld [vmem:[%s7946_s17 + $0x380] sm:$0xff]  ;;  %v3723_v48 = vld [vmem:[%s7946_s17 + $0x1d8] sm:$0xff] }
 0x652   : > { %v6293_v60 = vpack.c.bf16 %v3780_v54, %v3776_v53  ;;  %v3727_v49 = vld [vmem:[%s7946_s17 + $0x1f8] sm:$0xff]  ;;  %v3722_v54 = vld [vmem:[%s7946_s17 + $0x1d0] sm:$0xff] }
 0x653   : > { %v6391_v53 = vpack.c.bf16 %v3727_v49, %v3723_v48  ;;  %v3799_v49 = vld [vmem:[%s7946_s17 + $0x438] sm:$0xff] }
 0x654   : > { %6258 = vmatpush1.bf16.msra.mxu0 %v6257_v13  ;;  %v3785_v13 = vld [vmem:[%s7946_s17 + $0x3c8] sm:$0xff] }
 0x655   : > { %6260 = vmatprep.subr.bf16.mxu0 %v6259_v32  ;;  %v6295_v31 = vpack.c.bf16 %v3789_v62, %v3785_v13  ;;  %v3784_v32 = vld [vmem:[%s7946_s17 + $0x3c0] sm:$0xff]  ;;  %v3731_v13 = vld [vmem:[%s7946_s17 + $0x218] sm:$0xff] }
 0x656   : > { %v3735_v62 = vld [vmem:[%s7946_s17 + $0x238] sm:$0xff] }
 0x6af   : > { %v3220_v0 = vpop.f32.mrb[4].mxu0 }
 0x6b0   : > { %v8936_v1 = vpop.f32.mrb[4].mxu1  ;;  %v3222_v2 = vpop.f32.mrb[5].mxu0  ;;  %v6635_v45 = vadd.f32 %v3220_v0, %v2490_v23  ;;  %v3716_v23 = vld [vmem:[%s7946_s17 + $0x1a0] sm:$0xff] }
 0x6b1   : > { %v6636_v3 = vadd.f32 %v3222_v2, %v2494_v35  ;;  %v3364_v4 = vpop.f32.mrb[5].mxu1  ;;  %v3712_v35 = vld [vmem:[%s7946_s17 + $0x180] sm:$0xff]  ;;  %v3725_v2 = vld [vmem:[%s7946_s17 + $0x1e8] sm:$0xff] }
 0x6b2   : > { %v6638_v24 = vadd.f32 %v3364_v4, %v2502_v30  ;;  %v6261_v0 = vpack.c.bf16 %v3716_v23, %v3712_v35  ;;  %v3721_v30 = vld [vmem:[%s7946_s17 + $0x1c8] sm:$0xff]  ;;  %v3720_v4 = vld [vmem:[%s7946_s17 + $0x1c0] sm:$0xff] }
 0x6b3   : > { %3522 = vmatprep.subr.mxu1 %v6636_v3  ;;  %v6263_v3 = vpack.c.bf16 %v3725_v2, %v3721_v30  ;;  %v3788_v35 = vld [vmem:[%s7946_s17 + $0x3e0] sm:$0xff]  ;;  %v2498_v30 = vrot.slane %v8928_v33, %v8216_v16  ;;  %v3667_v2 = vld [vmem:[%s7946_s17 + $0x18] sm:$0xff] }
 0x6b4   : > { %3523 = vmatpush1.msra.mxu1 %v6635_v45  ;;  %v3724_v45 = vld [vmem:[%s7946_s17 + $0x1e0] sm:$0xff]  ;;  %6262 = vmatpush1.bf16.msra.mxu0 %v6261_v0  ;;  %v6297_v23 = vpack.c.bf16 %v3788_v35, %v3784_v32  ;;  %v6395_v32 = vpack.c.bf16 %v3735_v62, %v3731_v13  ;;  %v3730_v35 = vld [vmem:[%s7946_s17 + $0x210] sm:$0xff]  ;;  %v3801_v62 = vld [vmem:[%s7946_s17 + $0x448] sm:$0xff] }
 0x6b5   : > { %3593 = vmatprep.subr.mxu1 %v6638_v24  ;;  %v6265_v24 = vpack.c.bf16 %v3724_v45, %v3720_v4  ;;  %6264 = vmatprep.subr.bf16.mxu0 %v6263_v3  ;;  %v3671_v3 = vld [vmem:[%s7946_s17 + $0x38] sm:$0xff]  ;;  %v3798_v13 = vld [vmem:[%s7946_s17 + $0x430] sm:$0xff] }
 0x6b8   : > { %6266 = vmatpush1.bf16.msra.mxu0 %v6265_v24  ;;  %v6363_v24 = vpack.c.bf16 %v3671_v3, %v3667_v2 }
 0x712   : > { %v3503_v5 = vpop.f32.mrb[6].mxu0 }
 0x713   : > { %v3505_v6 = vpop.f32.mrb[7].mxu0  ;;  %v3508_v7 = vsel %vm3507_vm1, %v3503_v5, -inf }
 0x714   : > { %3509 = vmax.xlane.f32.xlu1 %v3508_v7  ;;  %v3733_v6 = vld [vmem:[%s7946_s17 + $0x228] sm:$0xff] }
 0x7a1   : > { %v3510_v8 = vpop.xlane.xlu1 %3509 }
 0x7a2   : > { %v3511_v9 = vsub.f32 %v3503_v5, %v3510_v8  ;;  %v3729_v5 = vld [vmem:[%s7946_s17 + $0x208] sm:$0xff]  ;;  %v3728_v8 = vld [vmem:[%s7946_s17 + $0x200] sm:$0xff] }
 0x7a3   : > { %v6267_v7 = vpack.c.bf16 %v3733_v6, %v3729_v5  ;;  %v3666_v5 = vld [vmem:[%s7946_s17 + $0x10] sm:$0xff] }
 0x7a4   : > { %v3512_v10 = vmul.f32 1.442695, %v3511_v9  ;;  %v3732_v9 = vld [vmem:[%s7946_s17 + $0x220] sm:$0xff]  ;;  %v3670_v6 = vld [vmem:[%s7946_s17 + $0x30] sm:$0xff] }
 0x7a5   : > { %6268 = vmatprep.subr.bf16.mxu0 %v6267_v7  ;;  %v6637_v7 = vadd.f32 %v8936_v1, %v2498_v30  ;;  %v6365_v33 = vpack.c.bf16 %v3670_v6, %v3666_v5  ;;  %v3687_v1 = vld [vmem:[%s7946_s17 + $0xb8] sm:$0xff] }
 0x7a6   : > { %6797 = vpow2.f32 %v3512_v10  ;;  %v6269_v10 = vpack.c.bf16 %v3732_v9, %v3728_v8  ;;  %v3675_v8 = vld [vmem:[%s7946_s17 + $0x58] sm:$0xff] }
 0x7a7   : > { %v3679_v9 = vld [vmem:[%s7946_s17 + $0x78] sm:$0xff] }
 0x7a8   : > { %6270 = vmatpush1.bf16.msra.mxu0 %v6269_v10  ;;  %v3674_v10 = vld [vmem:[%s7946_s17 + $0x50] sm:$0xff]  ;;  %v3743_v30 = vld [vmem:[%s7946_s17 + $0x278] sm:$0xff] }
 0x7a9   : > { %v3751_v5 = vld [vmem:[%s7946_s17 + $0x2b8] sm:$0xff] }
 0x7b0   : > { %v8939_v11 = vpop.eup %6797 }
 0x7b1   : > { %v3514_v12 = vsel %vm3507_vm1, %v8939_v11, 0.0 }
 0x7b2   : > { %3515 = vadd.xlane.f32.xlu1 %v3514_v12  ;;  %v3737_v12 = vld [vmem:[%s7946_s17 + $0x248] sm:$0xff] }
 0x7b3   : > { %v6271_v50 = vpack.c.bf16 %v3741_v18, %v3737_v12  ;;  %v3678_v12 = vld [vmem:[%s7946_s17 + $0x70] sm:$0xff]  ;;  %v3683_v18 = vld [vmem:[%s7946_s17 + $0x98] sm:$0xff] }
 0x7b4   : > { %v6371_v19 = vpack.c.bf16 %v3687_v1, %v3683_v18  ;;  %v3754_v18 = vld [vmem:[%s7946_s17 + $0x2d0] sm:$0xff] }
 0x7b5   : > { %6272 = vmatprep.subr.bf16.mxu0 %v6271_v50  ;;  %v6369_v50 = vpack.c.bf16 %v3678_v12, %v3674_v10  ;;  %v3758_v1 = vld [vmem:[%s7946_s17 + $0x2f0] sm:$0xff] }
 0x7b6   : > { %6274 = vmatpush1.bf16.msra.mxu0 %v6273_v21  ;;  %v3686_v21 = vld [vmem:[%s7946_s17 + $0xb0] sm:$0xff] }
 0x7b7   : > { %6276 = vmatprep.subr.bf16.mxu0 %v6275_v26  ;;  %v6373_v26 = vpack.c.bf16 %v3686_v21, %v3682_v20  ;;  %v6409_v20 = vpack.c.bf16 %v3758_v1, %v3754_v18  ;;  %v3808_v18 = vld [vmem:[%s7946_s17 + $0x480] sm:$0xff] }
 0x7b8   : > { %v3812_v1 = vld [vmem:[%s7946_s17 + $0x4a0] sm:$0xff] }
 0x7ba   : > { %6278 = vmatpush1.bf16.msra.mxu0 %v6277_v34  ;;  %v3694_v34 = vld [vmem:[%s7946_s17 + $0xf0] sm:$0xff] }
 0x7bb   : > { %6280 = vmatprep.subr.bf16.mxu0 %v6279_v37  ;;  %v6377_v37 = vpack.c.bf16 %v3694_v34, %v3690_v28  ;;  %v6413_v28 = vpack.c.bf16 %v3766_v25, %v3762_v22  ;;  %v3814_v22 = vld [vmem:[%s7946_s17 + $0x4b0] sm:$0xff]  ;;  %v3817_v25 = vld [vmem:[%s7946_s17 + $0x4c8] sm:$0xff] }
 0x7be   : > { %6282 = vmatpush1.bf16.msra.mxu0 %v6281_v40  ;;  %v3702_v40 = vld [vmem:[%s7946_s17 + $0x130] sm:$0xff] }
 0x7bf   : > { %6284 = vmatprep.subr.bf16.mxu0 %v6283_v58  ;;  %v6381_v58 = vpack.c.bf16 %v3702_v40, %v3698_v39  ;;  %v6417_v39 = vpack.c.bf16 %v3774_v36, %v3770_v46  ;;  %v3816_v36 = vld [vmem:[%s7946_s17 + $0x4c0] sm:$0xff] }
 0x7c2   : > { %6286 = vmatpush1.bf16.msra.mxu0 %v6285_v43  ;;  %v3710_v43 = vld [vmem:[%s7946_s17 + $0x170] sm:$0xff] }
 0x7c3   : > { %6288 = vmatprep.subr.bf16.mxu0 %v6287_v29  ;;  %v6385_v29 = vpack.c.bf16 %v3710_v43, %v3706_v57  ;;  %v6421_v57 = vpack.c.bf16 %v3782_v41, %v3778_v63  ;;  %v3822_v63 = vld [vmem:[%s7946_s17 + $0x4f0] sm:$0xff]  ;;  %v3825_v41 = vld [vmem:[%s7946_s17 + $0x508] sm:$0xff] }
 0x7c6   : > { %6290 = vmatpush1.bf16.msra.mxu0 %v6289_v51  ;;  %v3718_v51 = vld [vmem:[%s7946_s17 + $0x1b0] sm:$0xff] }
 0x7c7   : > { %6292 = vmatprep.subr.bf16.mxu0 %v6291_v52  ;;  %v6389_v52 = vpack.c.bf16 %v3718_v51, %v3714_v47  ;;  %v3797_v47 = vld [vmem:[%s7946_s17 + $0x428] sm:$0xff]  ;;  %v3795_v51 = vld [vmem:[%s7946_s17 + $0x418] sm:$0xff] }
 0x7ca   : > { %6294 = vmatpush1.bf16.msra.mxu0 %v6293_v60  ;;  %v3726_v60 = vld [vmem:[%s7946_s17 + $0x1f0] sm:$0xff] }
 0x7cb   : > { %6296 = vmatprep.subr.bf16.mxu0 %v6295_v31  ;;  %v6393_v31 = vpack.c.bf16 %v3726_v60, %v3722_v54  ;;  %v3796_v54 = vld [vmem:[%s7946_s17 + $0x420] sm:$0xff]  ;;  %v3794_v60 = vld [vmem:[%s7946_s17 + $0x410] sm:$0xff] }
 0x7ce   : > { %6298 = vmatpush1.bf16.msra.mxu0 %v6297_v23  ;;  %v3734_v23 = vld [vmem:[%s7946_s17 + $0x230] sm:$0xff] }
 0x7cf   : > { %v6397_v2 = vpack.c.bf16 %v3734_v23, %v3730_v35  ;;  %v3807_v35 = vld [vmem:[%s7946_s17 + $0x478] sm:$0xff] }
 0x83f   : > { %v3516_v0 = vpop.xlane.xlu1 %3515 }
 0x840   : > { %6799 = vrcp.f32 %v3516_v0  ;;  %v3739_v0 = vld [vmem:[%s7946_s17 + $0x258] sm:$0xff] }
 0x841   : > { %v6399_v3 = vpack.c.bf16 %v3743_v30, %v3739_v0  ;;  %v6429_v30 = vpack.c.bf16 %v3798_v13, %v3794_v60 }
 0x84a   : > { %v6800_v4 = vpop.eup %6799 }
 0x84b   : > { %v3518_v45 = vmul.f32 %v6800_v4, %v8939_v11  ;;  %v6367_v11 = vpack.c.bf16 %v3679_v9, %v3675_v8  ;;  %v3738_v4 = vld [vmem:[%s7946_s17 + $0x250] sm:$0xff] }
 0x84c   : > { %v3746_v8 = vld [vmem:[%s7946_s17 + $0x290] sm:$0xff] }
 0x84d   : > { %5127 = vmatmul.mubr.msk.f32.vlgmr.msra.gmra.mrb[6].mxu1 %vm3507_vm1, %v3518_v45  ;;  %v3750_v9 = vld [vmem:[%s7946_s17 + $0x2b0] sm:$0xff] }
 0x84e   : > { %3594 = vmatpush1.msra.mxu1 %v6637_v7  ;;  %3657 = vmatprep.mubr.f32.mxu1 %v7338_v55  ;;  %v6405_v10 = vpack.c.bf16 %v3750_v9, %v3746_v8  ;;  %v3813_v8 = vld [vmem:[%s7946_s17 + $0x4a8] sm:$0xff]  ;;  %v3811_v9 = vld [vmem:[%s7946_s17 + $0x498] sm:$0xff] }
 0x84f   : > { %6364 = vmatprep.subr.bf16.mxu1 %v6363_v24  ;;  %v3747_v24 = vld [vmem:[%s7946_s17 + $0x298] sm:$0xff] }
 0x850   : > { %v6403_v7 = vpack.c.bf16 %v3751_v5, %v3747_v24  ;;  %v3802_v5 = vld [vmem:[%s7946_s17 + $0x450] sm:$0xff] }
 0x851   : > { %5128 = vmatmul.mubr.msk.f32.vlgmr.msra.gmra.mrb[8].mxu1 %vm3507_vm1, %v3518_v45  ;;  %v3742_v45 = vld [vmem:[%s7946_s17 + $0x270] sm:$0xff] }
 0x852   : > { %6366 = vmatpush1.bf16.msra.mxu1 %v6365_v33  ;;  %v6401_v6 = vpack.c.bf16 %v3742_v45, %v3738_v4  ;;  %v3755_v33 = vld [vmem:[%s7946_s17 + $0x2d8] sm:$0xff] }
 0x853   : > { %6368 = vmatprep.subr.bf16.mxu1 %v6367_v11  ;;  %v3759_v11 = vld [vmem:[%s7946_s17 + $0x2f8] sm:$0xff] }
 0x854   : > { %v6407_v12 = vpack.c.bf16 %v3759_v11, %v3755_v33  ;;  %v3815_v33 = vld [vmem:[%s7946_s17 + $0x4b8] sm:$0xff] }
 0x856   : > { %6370 = vmatpush1.bf16.msra.mxu1 %v6369_v50  ;;  %v3763_v50 = vld [vmem:[%s7946_s17 + $0x318] sm:$0xff] }
 0x857   : > { %6372 = vmatprep.subr.bf16.mxu1 %v6371_v19  ;;  %v3767_v19 = vld [vmem:[%s7946_s17 + $0x338] sm:$0xff] }
 0x858   : > { %v6411_v21 = vpack.c.bf16 %v3767_v19, %v3763_v50 }
 0x85a   : > { %6374 = vmatpush1.bf16.msra.mxu1 %v6373_v26  ;;  %v3771_v26 = vld [vmem:[%s7946_s17 + $0x358] sm:$0xff] }
 0x85b   : > { %6376 = vmatprep.subr.bf16.mxu1 %v6375_v27  ;;  %v3775_v27 = vld [vmem:[%s7946_s17 + $0x378] sm:$0xff] }
 0x85c   : > { %v6415_v34 = vpack.c.bf16 %v3775_v27, %v3771_v26  ;;  %v3821_v26 = vld [vmem:[%s7946_s17 + $0x4e8] sm:$0xff]  ;;  %v3819_v27 = vld [vmem:[%s7946_s17 + $0x4d8] sm:$0xff] }
 0x85e   : > { %6378 = vmatpush1.bf16.msra.mxu1 %v6377_v37  ;;  %v3779_v37 = vld [vmem:[%s7946_s17 + $0x398] sm:$0xff] }
 0x85f   : > { %6380 = vmatprep.subr.bf16.mxu1 %v6379_v38  ;;  %v3783_v38 = vld [vmem:[%s7946_s17 + $0x3b8] sm:$0xff] }
 0x860   : > { %v6419_v40 = vpack.c.bf16 %v3783_v38, %v3779_v37  ;;  %v3820_v37 = vld [vmem:[%s7946_s17 + $0x4e0] sm:$0xff]  ;;  %v6311_v38 = vpack.c.bf16 %v3821_v26, %v3817_v25  ;;  %v3850_v26 = vld [vmem:[%s7946_s17 + $0x5d0] sm:$0xff] }
 0x862   : > { %6382 = vmatpush1.bf16.msra.mxu1 %v6381_v58  ;;  %v3787_v58 = vld [vmem:[%s7946_s17 + $0x3d8] sm:$0xff] }
 0x863   : > { %6384 = vmatprep.subr.bf16.mxu1 %v6383_v42  ;;  %v3791_v42 = vld [vmem:[%s7946_s17 + $0x3f8] sm:$0xff] }
 0x864   : > { %v6423_v43 = vpack.c.bf16 %v3791_v42, %v3787_v58  ;;  %v3829_v58 = vld [vmem:[%s7946_s17 + $0x528] sm:$0xff]  ;;  %v3827_v42 = vld [vmem:[%s7946_s17 + $0x518] sm:$0xff] }
 0x866   : > { %6386 = vmatpush1.bf16.msra.mxu1 %v6385_v29  ;;  %v6425_v29 = vpack.c.bf16 %v3790_v61, %v3786_v44  ;;  %v3824_v61 = vld [vmem:[%s7946_s17 + $0x500] sm:$0xff] }
 0x867   : > { %6388 = vmatprep.subr.bf16.mxu1 %v6387_v59  ;;  %v3793_v59 = vld [vmem:[%s7946_s17 + $0x408] sm:$0xff] }
 0x868   : > { %v6299_v48 = vpack.c.bf16 %v3797_v47, %v3793_v59  ;;  %v6315_v59 = vpack.c.bf16 %v3829_v58, %v3825_v41  ;;  %v3858_v58 = vld [vmem:[%s7946_s17 + $0x610] sm:$0xff] }
 0x86a   : > { %6390 = vmatpush1.bf16.msra.mxu1 %v6389_v52  ;;  %v6427_v52 = vpack.c.bf16 %v3799_v49, %v3795_v51  ;;  %6300 = vmatprep.subr.bf16.mxu0 %v6299_v48  ;;  %v3826_v51 = vld [vmem:[%s7946_s17 + $0x510] sm:$0xff]  ;;  %v3833_v49 = vld [vmem:[%s7946_s17 + $0x548] sm:$0xff] }
 0x86b   : > { %6392 = vmatprep.subr.bf16.mxu1 %v6391_v53  ;;  %v3792_v53 = vld [vmem:[%s7946_s17 + $0x400] sm:$0xff]  ;;  %v3830_v48 = vld [vmem:[%s7946_s17 + $0x530] sm:$0xff] }
 0x86c   : > { %v6301_v0 = vpack.c.bf16 %v3796_v54, %v3792_v53  ;;  %v3835_v53 = vld [vmem:[%s7946_s17 + $0x558] sm:$0xff]  ;;  %v6445_v13 = vpack.c.bf16 %v3830_v48, %v3826_v51  ;;  %v3868_v51 = vld [vmem:[%s7946_s17 + $0x660] sm:$0xff] }
 0x86d   : > { %v3839_v54 = vld [vmem:[%s7946_s17 + $0x578] sm:$0xff] }
 0x86e   : > { %6394 = vmatpush1.bf16.msra.mxu1 %v6393_v31  ;;  %v3805_v31 = vld [vmem:[%s7946_s17 + $0x468] sm:$0xff] }
 0x86f   : > { %6396 = vmatprep.subr.bf16.mxu1 %v6395_v32  ;;  %v3803_v32 = vld [vmem:[%s7946_s17 + $0x458] sm:$0xff]  ;;  %v6303_v45 = vpack.c.bf16 %v3805_v31, %v3801_v62  ;;  %v3832_v62 = vld [vmem:[%s7946_s17 + $0x540] sm:$0xff] }
 0x870   : > { %v6431_v24 = vpack.c.bf16 %v3807_v35, %v3803_v32  ;;  %v3836_v31 = vld [vmem:[%s7946_s17 + $0x560] sm:$0xff]  ;;  %v6447_v35 = vpack.c.bf16 %v3839_v54, %v3835_v53  ;;  %v3870_v53 = vld [vmem:[%s7946_s17 + $0x670] sm:$0xff]  ;;  %v3873_v54 = vld [vmem:[%s7946_s17 + $0x688] sm:$0xff] }
 0x872   : > { %6398 = vmatpush1.bf16.msra.mxu1 %v6397_v2  ;;  %v3800_v2 = vld [vmem:[%s7946_s17 + $0x440] sm:$0xff] }
 0x873   : > { %6400 = vmatprep.subr.bf16.mxu1 %v6399_v3  ;;  %v3804_v3 = vld [vmem:[%s7946_s17 + $0x460] sm:$0xff] }
 0x876   : > { %6402 = vmatpush1.bf16.msra.mxu1 %v6401_v6  ;;  %v3806_v6 = vld [vmem:[%s7946_s17 + $0x470] sm:$0xff] }
 0x877   : > { %6404 = vmatprep.subr.bf16.mxu1 %v6403_v7  ;;  %v3809_v7 = vld [vmem:[%s7946_s17 + $0x488] sm:$0xff] }
 0x878   : > { %v6307_v19 = vpack.c.bf16 %v3813_v8, %v3809_v7 }
 0x87a   : > { %6406 = vmatpush1.bf16.msra.mxu1 %v6405_v10  ;;  %v6305_v10 = vpack.c.bf16 %v3804_v3, %v3800_v2  ;;  %v3845_v2 = vld [vmem:[%s7946_s17 + $0x5a8] sm:$0xff]  ;;  %v3843_v3 = vld [vmem:[%s7946_s17 + $0x598] sm:$0xff] }
 0x87b   : > { %6408 = vmatprep.subr.bf16.mxu1 %v6407_v12  ;;  %v6433_v12 = vpack.c.bf16 %v3806_v6, %v3802_v5  ;;  %v3840_v5 = vld [vmem:[%s7946_s17 + $0x580] sm:$0xff] }
 0x87c   : > { %v3844_v6 = vld [vmem:[%s7946_s17 + $0x5a0] sm:$0xff] }
 0x87e   : > { %6410 = vmatpush1.bf16.msra.mxu1 %v6409_v20  ;;  %v6435_v20 = vpack.c.bf16 %v3815_v33, %v3811_v9  ;;  %v3842_v9 = vld [vmem:[%s7946_s17 + $0x590] sm:$0xff] }
 0x87f   : > { %6412 = vmatprep.subr.bf16.mxu1 %v6411_v21  ;;  %v3810_v21 = vld [vmem:[%s7946_s17 + $0x490] sm:$0xff] }
 0x880   : > { %v6437_v46 = vpack.c.bf16 %v3814_v22, %v3810_v21  ;;  %v3846_v33 = vld [vmem:[%s7946_s17 + $0x5b0] sm:$0xff]  ;;  %v3852_v21 = vld [vmem:[%s7946_s17 + $0x5e0] sm:$0xff] }
 0x882   : > { %6414 = vmatpush1.bf16.msra.mxu1 %v6413_v28  ;;  %v3823_v28 = vld [vmem:[%s7946_s17 + $0x4f8] sm:$0xff] }
 0x883   : > { %6416 = vmatprep.subr.bf16.mxu1 %v6415_v34  ;;  %v6309_v34 = vpack.c.bf16 %v3812_v1, %v3808_v18  ;;  %v3851_v18 = vld [vmem:[%s7946_s17 + $0x5d8] sm:$0xff] }
 0x884   : > { %v3855_v1 = vld [vmem:[%s7946_s17 + $0x5f8] sm:$0xff] }
 0x885   : > { %v6455_v25 = vpack.c.bf16 %v3855_v1, %v3851_v18  ;;  %v3886_v18 = vld [vmem:[%s7946_s17 + $0x6f0] sm:$0xff]  ;;  %v3889_v1 = vld [vmem:[%s7946_s17 + $0x708] sm:$0xff] }
 0x886   : > { %6418 = vmatpush1.bf16.msra.mxu1 %v6417_v39  ;;  %v6439_v39 = vpack.c.bf16 %v3823_v28, %v3819_v27  ;;  %v3854_v27 = vld [vmem:[%s7946_s17 + $0x5f0] sm:$0xff]  ;;  %v3857_v28 = vld [vmem:[%s7946_s17 + $0x608] sm:$0xff] }
 0x887   : > { %6420 = vmatprep.subr.bf16.mxu1 %v6419_v40  ;;  %v3818_v40 = vld [vmem:[%s7946_s17 + $0x4d0] sm:$0xff] }
 0x888   : > { %v6441_v44 = vpack.c.bf16 %v3822_v63, %v3818_v40  ;;  %v3860_v40 = vld [vmem:[%s7946_s17 + $0x620] sm:$0xff] }
 0x88a   : > { %6422 = vmatpush1.bf16.msra.mxu1 %v6421_v57  ;;  %v3831_v57 = vld [vmem:[%s7946_s17 + $0x538] sm:$0xff] }
 0x88b   : > { %6424 = vmatprep.subr.bf16.mxu1 %v6423_v43  ;;  %v6313_v43 = vpack.c.bf16 %v3820_v37, %v3816_v36  ;;  %v6443_v47 = vpack.c.bf16 %v3831_v57, %v3827_v42  ;;  %v3863_v36 = vld [vmem:[%s7946_s17 + $0x638] sm:$0xff]  ;;  %v3862_v42 = vld [vmem:[%s7946_s17 + $0x630] sm:$0xff]  ;;  %v3865_v57 = vld [vmem:[%s7946_s17 + $0x648] sm:$0xff] }
 0x88e   : > { %6426 = vmatpush1.bf16.msra.mxu1 %v6425_v29  ;;  %v3828_v29 = vld [vmem:[%s7946_s17 + $0x520] sm:$0xff] }
 0x88f   : > { %6428 = vmatprep.subr.bf16.mxu1 %v6427_v52  ;;  %v3837_v52 = vld [vmem:[%s7946_s17 + $0x568] sm:$0xff]  ;;  %v6317_v60 = vpack.c.bf16 %v3828_v29, %v3824_v61  ;;  %v3871_v61 = vld [vmem:[%s7946_s17 + $0x678] sm:$0xff] }
 0x890   : > { %v6319_v32 = vpack.c.bf16 %v3837_v52, %v3833_v49  ;;  %v3866_v52 = vld [vmem:[%s7946_s17 + $0x650] sm:$0xff] }
 0x920   : > { %v3588_v23 = vpop.f32.mrb[6].mxu1 }
 0x921   : > { %v3590_v4 = vpop.f32.mrb[7].mxu1 }
 0x922   : > { %3984 = vmatprep.mubr.f32.mxu0 %v3590_v4  ;;  %4126 = vmatprep.mubr.f32.mxu1 %v3590_v4  ;;  %v3847_v4 = vld [vmem:[%s7946_s17 + $0x5b8] sm:$0xff] }
 0x923   : > { %3985 = vmatmul.mubr.f32.vlgmr.msra.gmra.mrb[8].mxu0 %v3588_v23  ;;  %4127 = vmatmul.mubr.f32.vlgmr.msra.gmra.mrb[10].mxu1 %v3588_v23  ;;  %v3834_v23 = vld [vmem:[%s7946_s17 + $0x550] sm:$0xff]  ;;  %v6451_v8 = vpack.c.bf16 %v3847_v4, %v3843_v3  ;;  %v3881_v4 = vld [vmem:[%s7946_s17 + $0x6c8] sm:$0xff] }
 0x924   : > { %6302 = vmatpush1.bf16.msra.mxu0 %v6301_v0  ;;  %6430 = vmatpush1.bf16.msra.mxu1 %v6429_v30  ;;  %v9098_v11 = vpop.f32.mrb[8].mxu1  ;;  %v3838_v0 = vld [vmem:[%s7946_s17 + $0x570] sm:$0xff]  ;;  %v3841_v30 = vld [vmem:[%s7946_s17 + $0x588] sm:$0xff] }
 0x925   : > { %v3661_v50 = vpop.f32.mrb[9].mxu1  ;;  %6304 = vmatprep.subr.bf16.mxu0 %v6303_v45  ;;  %6432 = vmatprep.subr.bf16.mxu1 %v6431_v24  ;;  %v6321_v45 = vpack.c.bf16 %v3836_v31, %v3832_v62  ;;  %v6449_v24 = vpack.c.bf16 %v3838_v0, %v3834_v23  ;;  %v6323_v7 = vpack.c.bf16 %v3845_v2, %v3841_v30  ;;  %v3879_v62 = vld [vmem:[%s7946_s17 + $0x6b8] sm:$0xff]  ;;  %v3876_v23 = vld [vmem:[%s7946_s17 + $0x6a0] sm:$0xff]  ;;  %v3874_v2 = vld [vmem:[%s7946_s17 + $0x690] sm:$0xff] }
 0x926   : > { %4055 = vmatprep.mubr.f32.mxu0 %v3661_v50  ;;  %4197 = vmatprep.mubr.f32.mxu1 %v3661_v50  ;;  %v6325_v50 = vpack.c.bf16 %v3844_v6, %v3840_v5  ;;  %v3878_v3 = vld [vmem:[%s7946_s17 + $0x6b0] sm:$0xff]  ;;  %v3887_v5 = vld [vmem:[%s7946_s17 + $0x6f8] sm:$0xff] }
 0x928   : > { %6306 = vmatpush1.bf16.msra.mxu0 %v6305_v10  ;;  %6434 = vmatpush1.bf16.msra.mxu1 %v6433_v12  ;;  %v3849_v10 = vld [vmem:[%s7946_s17 + $0x5c8] sm:$0xff] }
 0x929   : > { %6308 = vmatprep.subr.bf16.mxu0 %v6307_v19  ;;  %6436 = vmatprep.subr.bf16.mxu1 %v6435_v20  ;;  %v3853_v12 = vld [vmem:[%s7946_s17 + $0x5e8] sm:$0xff]  ;;  %v6453_v19 = vpack.c.bf16 %v3846_v33, %v3842_v9  ;;  %v3848_v20 = vld [vmem:[%s7946_s17 + $0x5c0] sm:$0xff] }
 0x92a   : > { %v6327_v22 = vpack.c.bf16 %v3853_v12, %v3849_v10  ;;  %v6329_v37 = vpack.c.bf16 %v3852_v21, %v3848_v20  ;;  %v3884_v9 = vld [vmem:[%s7946_s17 + $0x6e0] sm:$0xff]  ;;  %v3882_v12 = vld [vmem:[%s7946_s17 + $0x6d0] sm:$0xff]  ;;  %v3895_v20 = vld [vmem:[%s7946_s17 + $0x738] sm:$0xff] }
 0x92c   : > { %6310 = vmatpush1.bf16.msra.mxu0 %v6309_v34  ;;  %6438 = vmatpush1.bf16.msra.mxu1 %v6437_v46  ;;  %v3861_v34 = vld [vmem:[%s7946_s17 + $0x628] sm:$0xff]  ;;  %v3859_v46 = vld [vmem:[%s7946_s17 + $0x618] sm:$0xff] }
 0x92d   : > { %6312 = vmatprep.subr.bf16.mxu0 %v6311_v38  ;;  %6440 = vmatprep.subr.bf16.mxu1 %v6439_v39  ;;  %v6457_v38 = vpack.c.bf16 %v3854_v27, %v3850_v26  ;;  %v3856_v39 = vld [vmem:[%s7946_s17 + $0x600] sm:$0xff]  ;;  %v6331_v63 = vpack.c.bf16 %v3861_v34, %v3857_v28  ;;  %v6459_v41 = vpack.c.bf16 %v3863_v36, %v3859_v46  ;;  %v3890_v34 = vld [vmem:[%s7946_s17 + $0x710] sm:$0xff]  ;;  %v3897_v36 = vld [vmem:[%s7946_s17 + $0x748] sm:$0xff] }
 0x92e   : > { %v6333_v29 = vpack.c.bf16 %v3860_v40, %v3856_v39  ;;  %v3892_v26 = vld [vmem:[%s7946_s17 + $0x720] sm:$0xff]  ;;  %v3894_v46 = vld [vmem:[%s7946_s17 + $0x730] sm:$0xff]  ;;  %v3903_v39 = vld [vmem:[%s7946_s17 + $0x778] sm:$0xff] }
 0x930   : > { %6314 = vmatpush1.bf16.msra.mxu0 %v6313_v43  ;;  %6442 = vmatpush1.bf16.msra.mxu1 %v6441_v44  ;;  %v3869_v43 = vld [vmem:[%s7946_s17 + $0x668] sm:$0xff]  ;;  %v3867_v44 = vld [vmem:[%s7946_s17 + $0x658] sm:$0xff] }
 0x931   : > { %6316 = vmatprep.subr.bf16.mxu0 %v6315_v59  ;;  %6444 = vmatprep.subr.bf16.mxu1 %v6443_v47  ;;  %v6461_v59 = vpack.c.bf16 %v3862_v42, %v3858_v58  ;;  %v3864_v47 = vld [vmem:[%s7946_s17 + $0x640] sm:$0xff]  ;;  %v6335_v48 = vpack.c.bf16 %v3869_v43, %v3865_v57  ;;  %v6463_v49 = vpack.c.bf16 %v3871_v61, %v3867_v44  ;;  %v3898_v43 = vld [vmem:[%s7946_s17 + $0x750] sm:$0xff]  ;;  %v3905_v61 = vld [vmem:[%s7946_s17 + $0x788] sm:$0xff] }
 0x932   : > { %v6337_v31 = vpack.c.bf16 %v3868_v51, %v3864_v47  ;;  %v3900_v58 = vld [vmem:[%s7946_s17 + $0x760] sm:$0xff]  ;;  %v3902_v44 = vld [vmem:[%s7946_s17 + $0x770] sm:$0xff]  ;;  %v3911_v47 = vld [vmem:[%s7946_s17 + $0x7b8] sm:$0xff] }
 0x934   : > { %6318 = vmatpush1.bf16.msra.mxu0 %v6317_v60  ;;  %6446 = vmatpush1.bf16.msra.mxu1 %v6445_v13  ;;  %v3877_v60 = vld [vmem:[%s7946_s17 + $0x6a8] sm:$0xff]  ;;  %v3875_v13 = vld [vmem:[%s7946_s17 + $0x698] sm:$0xff] }
 0x935   : > { %6320 = vmatprep.subr.bf16.mxu0 %v6319_v32  ;;  %6448 = vmatprep.subr.bf16.mxu1 %v6447_v35  ;;  %v6465_v32 = vpack.c.bf16 %v3870_v53, %v3866_v52  ;;  %v3872_v35 = vld [vmem:[%s7946_s17 + $0x680] sm:$0xff]  ;;  %v6339_v0 = vpack.c.bf16 %v3877_v60, %v3873_v54  ;;  %v6467_v30 = vpack.c.bf16 %v3879_v62, %v3875_v13  ;;  %v3906_v60 = vld [vmem:[%s7946_s17 + $0x790] sm:$0xff]  ;;  %v3913_v62 = vld [vmem:[%s7946_s17 + $0x7c8] sm:$0xff] }
 0x936   : > { %v6341_v6 = vpack.c.bf16 %v3876_v23, %v3872_v35  ;;  %v3908_v52 = vld [vmem:[%s7946_s17 + $0x7a0] sm:$0xff]  ;;  %v3910_v13 = vld [vmem:[%s7946_s17 + $0x7b0] sm:$0xff]  ;;  %v3919_v35 = vld [vmem:[%s7946_s17 + $0x7f8] sm:$0xff] }
 0x938   : > { %6322 = vmatpush1.bf16.msra.mxu0 %v6321_v45  ;;  %6450 = vmatpush1.bf16.msra.mxu1 %v6449_v24  ;;  %v3885_v45 = vld [vmem:[%s7946_s17 + $0x6e8] sm:$0xff]  ;;  %v3883_v24 = vld [vmem:[%s7946_s17 + $0x6d8] sm:$0xff] }
 0x939   : > { %6324 = vmatprep.subr.bf16.mxu0 %v6323_v7  ;;  %6452 = vmatprep.subr.bf16.mxu1 %v6451_v8  ;;  %v6469_v7 = vpack.c.bf16 %v3878_v3, %v3874_v2  ;;  %v3880_v8 = vld [vmem:[%s7946_s17 + $0x6c0] sm:$0xff]  ;;  %v6343_v33 = vpack.c.bf16 %v3885_v45, %v3881_v4  ;;  %v6471_v10 = vpack.c.bf16 %v3887_v5, %v3883_v24  ;;  %v3914_v45 = vld [vmem:[%s7946_s17 + $0x7d0] sm:$0xff] }
 0x93a   : > { %v6345_v21 = vpack.c.bf16 %v3884_v9, %v3880_v8  ;;  %v3916_v4 = vld [vmem:[%s7946_s17 + $0x7e0] sm:$0xff]  ;;  %v3918_v24 = vld [vmem:[%s7946_s17 + $0x7f0] sm:$0xff] }
 0x93c   : > { %6326 = vmatpush1.bf16.msra.mxu0 %v6325_v50  ;;  %6454 = vmatpush1.bf16.msra.mxu1 %v6453_v19  ;;  %v3893_v50 = vld [vmem:[%s7946_s17 + $0x728] sm:$0xff]  ;;  %v3891_v19 = vld [vmem:[%s7946_s17 + $0x718] sm:$0xff] }
 0x93d   : > { %6328 = vmatprep.subr.bf16.mxu0 %v6327_v22  ;;  %6456 = vmatprep.subr.bf16.mxu1 %v6455_v25  ;;  %v6473_v22 = vpack.c.bf16 %v3886_v18, %v3882_v12  ;;  %v3888_v25 = vld [vmem:[%s7946_s17 + $0x700] sm:$0xff]  ;;  %v6347_v27 = vpack.c.bf16 %v3893_v50, %v3889_v1  ;;  %v6475_v28 = vpack.c.bf16 %v3895_v20, %v3891_v19  ;;  %v6806_v19 = vld [vmem:[%s9570_s15 + $0x10] sm:$0xff] }
 0x93e   : > { %v6349_v40 = vpack.c.bf16 %v3892_v26, %v3888_v25  ;;  %v6805_v12 = vld [vmem:[%s9570_s15] sm:$0xff] }
 0x940   : > { %6330 = vmatpush1.bf16.msra.mxu0 %v6329_v37  ;;  %6458 = vmatpush1.bf16.msra.mxu1 %v6457_v38  ;;  %v3901_v37 = vld [vmem:[%s7946_s17 + $0x768] sm:$0xff]  ;;  %v3899_v38 = vld [vmem:[%s7946_s17 + $0x758] sm:$0xff] }
 0x941   : > { %6332 = vmatprep.subr.bf16.mxu0 %v6331_v63  ;;  %6460 = vmatprep.subr.bf16.mxu1 %v6459_v41  ;;  %v6477_v63 = vpack.c.bf16 %v3894_v46, %v3890_v34  ;;  %v3896_v41 = vld [vmem:[%s7946_s17 + $0x740] sm:$0xff]  ;;  %v6351_v42 = vpack.c.bf16 %v3901_v37, %v3897_v36  ;;  %v6479_v57 = vpack.c.bf16 %v3903_v39, %v3899_v38 }
 0x942   : > { %v6353_v51 = vpack.c.bf16 %v3900_v58, %v3896_v41  ;;  %v4364_v41 = vld [vmem:[%s7972_s6 + $0x180] sm:$0xff] }
 0x944   : > { %6334 = vmatpush1.bf16.msra.mxu0 %v6333_v29  ;;  %6462 = vmatpush1.bf16.msra.mxu1 %v6461_v59  ;;  %v3909_v29 = vld [vmem:[%s7946_s17 + $0x7a8] sm:$0xff]  ;;  %v3907_v59 = vld [vmem:[%s7946_s17 + $0x798] sm:$0xff] }
 0x945   : > { %6336 = vmatprep.subr.bf16.mxu0 %v6335_v48  ;;  %6464 = vmatprep.subr.bf16.mxu1 %v6463_v49  ;;  %v6481_v48 = vpack.c.bf16 %v3902_v44, %v3898_v43  ;;  %v3904_v49 = vld [vmem:[%s7946_s17 + $0x780] sm:$0xff]  ;;  %v6355_v53 = vpack.c.bf16 %v3909_v29, %v3905_v61  ;;  %v6483_v54 = vpack.c.bf16 %v3911_v47, %v3907_v59  ;;  %v4317_v43 = vld [vmem:[%s7972_s6 + $0x8] sm:$0xff]  ;;  %v4348_v29 = vld [vmem:[%s7972_s6 + $0x100] sm:$0xff] }
 0x946   : > { %v6357_v23 = vpack.c.bf16 %v3908_v52, %v3904_v49  ;;  %v4349_v59 = vld [vmem:[%s7972_s6 + $0x108] sm:$0xff]  ;;  %v4334_v47 = vld [vmem:[%s7972_s6 + $0x90] sm:$0xff]  ;;  %v4367_v52 = vld [vmem:[%s7972_s6 + $0x198] sm:$0xff] }
 0x947   : > { %v4366_v49 = vld [vmem:[%s7972_s6 + $0x190] sm:$0xff] }
 0x948   : > { %6338 = vmatpush1.bf16.msra.mxu0 %v6337_v31  ;;  %6466 = vmatpush1.bf16.msra.mxu1 %v6465_v32  ;;  %v3917_v31 = vld [vmem:[%s7946_s17 + $0x7e8] sm:$0xff]  ;;  %v3915_v32 = vld [vmem:[%s7946_s17 + $0x7d8] sm:$0xff] }
 0x949   : > { %6340 = vmatprep.subr.bf16.mxu0 %v6339_v0  ;;  %6468 = vmatprep.subr.bf16.mxu1 %v6467_v30  ;;  %v6485_v0 = vpack.c.bf16 %v3910_v13, %v3906_v60  ;;  %v3912_v30 = vld [vmem:[%s7946_s17 + $0x7c0] sm:$0xff]  ;;  %v6359_v2 = vpack.c.bf16 %v3917_v31, %v3913_v62  ;;  %v6487_v3 = vpack.c.bf16 %v3919_v35, %v3915_v32  ;;  %v4318_v60 = vld [vmem:[%s7972_s6 + $0x10] sm:$0xff]  ;;  %v4336_v35 = vld [vmem:[%s7972_s6 + $0xa0] sm:$0xff] }
 0x94a   : > { %v6361_v5 = vpack.c.bf16 %v3916_v4, %v3912_v30  ;;  %v4319_v13 = vld [vmem:[%s7972_s6 + $0x18] sm:$0xff]  ;;  %v4350_v62 = vld [vmem:[%s7972_s6 + $0x110] sm:$0xff]  ;;  %v4320_v4 = vld [vmem:[%s7972_s6 + $0x20] sm:$0xff] }
 0x94b   : > { %v6497_v31 = vpack.c.bf16 %v4319_v13, %v4318_v60  ;;  %v4351_v32 = vld [vmem:[%s7972_s6 + $0x118] sm:$0xff]  ;;  %v4342_v60 = vld [vmem:[%s7972_s6 + $0xd0] sm:$0xff] }
 0x94c   : > { %6342 = vmatpush1.bf16.msra.mxu0 %v6341_v6  ;;  %6470 = vmatpush1.bf16.msra.mxu1 %v6469_v7  ;;  %v6489_v6 = vpack.c.bf16 %v3918_v24, %v3914_v45  ;;  %v4208_v7 = vld [vmem:[%s9572_s21] sm:$0xf]  ;;  %v4321_v24 = vld [vmem:[%s7972_s6 + $0x28] sm:$0xff] }
 0x94d   : > { %6344 = vmatprep.subr.bf16.mxu0 %v6343_v33  ;;  %6472 = vmatprep.subr.bf16.mxu1 %v6471_v10  ;;  %v4213_v8 = vrot.slane %v4208_v7, %v8210_v14  ;;  %v4217_v10 = vrot.slane %v4208_v7, %v8213_v15  ;;  %v4221_v20 = vrot.slane %v4208_v7, %v8216_v16 }
 0x94e   : > { %v4225_v34 = vrot.slane %v4208_v7, %v8219_v17  ;;  %v6501_v7 = vpack.c.bf16 %v4321_v24, %v4320_v4  ;;  %v4359_v4 = vld [vmem:[%s7972_s6 + $0x158] sm:$0xff]  ;;  %v4345_v24 = vld [vmem:[%s7972_s6 + $0xe8] sm:$0xff] }
 0x950   : > { %6346 = vmatpush1.bf16.msra.mxu0 %v6345_v21  ;;  %6474 = vmatpush1.bf16.msra.mxu1 %v6473_v22  ;;  %v6807_v21 = vld [vmem:[%s9570_s15 + $0x8] sm:$0xff] }
 0x951   : > { %6348 = vmatprep.subr.bf16.mxu0 %v6347_v27  ;;  %6476 = vmatprep.subr.bf16.mxu1 %v6475_v28  ;;  %v6808_v27 = vld [vmem:[%s9570_s15 + $0x18] sm:$0xff] }
 0x954   : > { %6350 = vmatpush1.bf16.msra.mxu0 %v6349_v40  ;;  %6478 = vmatpush1.bf16.msra.mxu1 %v6477_v63  ;;  %v4332_v40 = vld [vmem:[%s7972_s6 + $0x80] sm:$0xff]  ;;  %v4333_v63 = vld [vmem:[%s7972_s6 + $0x88] sm:$0xff] }
 0x955   : > { %6352 = vmatprep.subr.bf16.mxu0 %v6351_v42  ;;  %6480 = vmatprep.subr.bf16.mxu1 %v6479_v57  ;;  %v6491_v58 = vpack.c.bf16 %v4333_v63, %v4332_v40  ;;  %v4365_v42 = vld [vmem:[%s7972_s6 + $0x188] sm:$0xff]  ;;  %v4316_v57 = vld [vmem:[%s7972_s6] sm:$0xff]  ;;  %v4322_v40 = vld [vmem:[%s7972_s6 + $0x30] sm:$0xff] }
 0x956   : > { %v6523_v44 = vpack.c.bf16 %v4365_v42, %v4364_v41  ;;  %v6493_v61 = vpack.c.bf16 %v4317_v43, %v4316_v57  ;;  %v4323_v63 = vld [vmem:[%s7972_s6 + $0x38] sm:$0xff]  ;;  %v4354_v42 = vld [vmem:[%s7972_s6 + $0x130] sm:$0xff] }
 0x957   : > { %v4355_v57 = vld [vmem:[%s7972_s6 + $0x138] sm:$0xff] }
 0x958   : > { %6354 = vmatpush1.bf16.msra.mxu0 %v6353_v51  ;;  %6482 = vmatpush1.bf16.msra.mxu1 %v6481_v48  ;;  %v6525_v51 = vpack.c.bf16 %v4349_v59, %v4348_v29  ;;  %v4335_v48 = vld [vmem:[%s7972_s6 + $0x98] sm:$0xff]  ;;  %v6537_v43 = vpack.c.bf16 %v4355_v57, %v4354_v42  ;;  %v4372_v29 = vld [vmem:[%s7972_s6 + $0x1c0] sm:$0xff]  ;;  %v4533_v42 = vld [vmem:[%s7980_s24 + $0x8] sm:$0xff] }
 0x959   : > { %6356 = vmatprep.subr.bf16.mxu0 %v6355_v53  ;;  %6484 = vmatprep.subr.bf16.mxu1 %v6483_v54  ;;  %v6495_v53 = vpack.c.bf16 %v4335_v48, %v4334_v47  ;;  %v6527_v54 = vpack.c.bf16 %v4367_v52, %v4366_v49  ;;  %v4373_v47 = vld [vmem:[%s7972_s6 + $0x1c8] sm:$0xff] }
 0x95a   : > { %v4325_v48 = vld [vmem:[%s7972_s6 + $0x48] sm:$0xff]  ;;  %v6539_v49 = vpack.c.bf16 %v4373_v47, %v4372_v29 }
 0x95b   : > { %v4537_v57 = vld [vmem:[%s7980_s24 + $0x28] sm:$0xff] }
 0x95c   : > { %6358 = vmatpush1.bf16.msra.mxu0 %v6357_v23  ;;  %6486 = vmatpush1.bf16.msra.mxu1 %v6485_v0  ;;  %v4337_v23 = vld [vmem:[%s7972_s6 + $0xa8] sm:$0xff]  ;;  %v6529_v0 = vpack.c.bf16 %v4351_v32, %v4350_v62  ;;  %v4343_v62 = vld [vmem:[%s7972_s6 + $0xd8] sm:$0xff] }
 0x95d   : > { %6360 = vmatprep.subr.bf16.mxu0 %v6359_v2  ;;  %6488 = vmatprep.subr.bf16.mxu1 %v6487_v3  ;;  %v6499_v30 = vpack.c.bf16 %v4337_v23, %v4336_v35  ;;  %v4368_v2 = vld [vmem:[%s7972_s6 + $0x1a0] sm:$0xff]  ;;  %v4369_v3 = vld [vmem:[%s7972_s6 + $0x1a8] sm:$0xff]  ;;  %v4375_v32 = vld [vmem:[%s7972_s6 + $0x1d8] sm:$0xff]  ;;  %v6511_v35 = vpack.c.bf16 %v4343_v62, %v4342_v60 }
 0x95e   : > { %v6531_v45 = vpack.c.bf16 %v4369_v3, %v4368_v2  ;;  %v4358_v2 = vld [vmem:[%s7972_s6 + $0x150] sm:$0xff] }
 0x960   : > { %6362 = vmatpush1.bf16.msra.mxu0 %v6361_v5  ;;  %6490 = vmatpush1.bf16.msra.mxu1 %v6489_v6  ;;  %v4352_v5 = vld [vmem:[%s7972_s6 + $0x120] sm:$0xff]  ;;  %v4353_v6 = vld [vmem:[%s7972_s6 + $0x128] sm:$0xff] }
 0x961   : > { %6492 = vmatprep.subr.bf16.mxu0 %v6491_v58  ;;  %6524 = vmatprep.subr.bf16.mxu1 %v6523_v44  ;;  %v6505_v58 = vpack.c.bf16 %v4323_v63, %v4322_v40  ;;  %v4340_v44 = vld [vmem:[%s7972_s6 + $0xc0] sm:$0xff]  ;;  %v4362_v40 = vld [vmem:[%s7972_s6 + $0x170] sm:$0xff]  ;;  %v4363_v63 = vld [vmem:[%s7972_s6 + $0x178] sm:$0xff] }
 0x963   : > { %4056 = vmatmul.mubr.f32.vlgmr.msra.gmra.mrb[8].mxu0 %v9098_v11  ;;  %4198 = vmatmul.mubr.f32.vlgmr.msra.gmra.mrb[10].mxu1 %v9098_v11 }
 0x964   : > { %6494 = vmatpush3.bf16.msra.mxu0 %v6493_v61  ;;  %6526 = vmatpush3.bf16.msra.mxu1 %v6525_v51  ;;  %v4341_v61 = vld [vmem:[%s7972_s6 + $0xc8] sm:$0xff]  ;;  %v4324_v51 = vld [vmem:[%s7972_s6 + $0x40] sm:$0xff] }
 0x965   : > { %6496 = vmatprep.subr.bf16.mxu0 %v6495_v53  ;;  %6528 = vmatprep.subr.bf16.mxu1 %v6527_v54  ;;  %v6507_v59 = vpack.c.bf16 %v4341_v61, %v4340_v44  ;;  %v6509_v52 = vpack.c.bf16 %v4325_v48, %v4324_v51  ;;  %v4356_v53 = vld [vmem:[%s7972_s6 + $0x140] sm:$0xff]  ;;  %v4357_v54 = vld [vmem:[%s7972_s6 + $0x148] sm:$0xff]  ;;  %v6555_v44 = vpack.c.bf16 %v4537_v57, %v4533_v42 }
 0x966   : > { %v6541_v13 = vpack.c.bf16 %v4357_v54, %v4356_v53  ;;  %v4539_v61 = vld [vmem:[%s7980_s24 + $0x38] sm:$0xff]  ;;  %v4548_v42 = vld [vmem:[%s7980_s24 + $0x80] sm:$0xff] }
 0x968   : > { %6498 = vmatpush3.bf16.msra.mxu0 %v6497_v31  ;;  %6530 = vmatpush3.bf16.msra.mxu1 %v6529_v0  ;;  %v4374_v31 = vld [vmem:[%s7972_s6 + $0x1d0] sm:$0xff] }
 0x969   : > { %6500 = vmatprep.subr.bf16.mxu0 %v6499_v30  ;;  %6532 = vmatprep.subr.bf16.mxu1 %v6531_v45  ;;  %v6543_v23 = vpack.c.bf16 %v4375_v32, %v4374_v31  ;;  %v4326_v0 = vld [vmem:[%s7972_s6 + $0x50] sm:$0xff]  ;;  %v4327_v30 = vld [vmem:[%s7972_s6 + $0x58] sm:$0xff]  ;;  %v4344_v45 = vld [vmem:[%s7972_s6 + $0xe0] sm:$0xff] }
 0x96a   : > { %v6513_v3 = vpack.c.bf16 %v4327_v30, %v4326_v0 }
 0x96c   : > { %6502 = vmatpush3.bf16.msra.mxu0 %v6501_v7  ;;  %v4376_v7 = vld [vmem:[%s7972_s6 + $0x1e0] sm:$0xff] }
 0xa36   : > { %v4057_v9 = vpop.f32.mrb[8].mxu0  ;;  %v4199_v33 = vpop.f32.mrb[10].mxu1 }
 0xa37   : > { %v4204_v18 = vadd.f32 %v6805_v12, %v4057_v9  ;;  %v4059_v1 = vpop.f32.mrb[9].mxu0  ;;  %v4201_v50 = vpop.f32.mrb[11].mxu1  ;;  %v4206_v11 = vadd.f32 %v6806_v19, %v4199_v33 }
 0xa38   : > { %v4205_v22 = vadd.f32 %v6807_v21, %v4059_v1  ;;  %v4207_v28 = vadd.f32 %v6808_v27, %v4201_v50 }
 0xa39   : > { %v9224_v25 = vadd.f32 %v4213_v8, %v4204_v18  ;;  %v9232_v46 = vadd.f32 %v4221_v20, %v4206_v11  ;;  %v6533_v8 = vpack.c.bf16 %v4353_v6, %v4352_v5  ;;  %v6545_v5 = vpack.c.bf16 %v4359_v4, %v4358_v2  ;;  %v4536_v4 = vld [vmem:[%s7980_s24 + $0x20] sm:$0xff] }
 0xa3a   : > { %v9226_v26 = vadd.f32 %v4217_v10, %v4205_v22  ;;  %v9236_v37 = vadd.f32 %v4225_v34, %v4207_v28  ;;  %v4339_v34 = vld [vmem:[%s7972_s6 + $0xb8] sm:$0xff]  ;;  %v6515_v6 = vpack.c.bf16 %v4345_v24, %v4344_v45 }
 0xa3b   : > { %6534 = vmatpush3.bf16.msra.mxu1 %v6533_v8  ;;  %v4377_v8 = vld [vmem:[%s7972_s6 + $0x1e8] sm:$0xff]  ;;  %v4534_v45 = vld [vmem:[%s7980_s24 + $0x10] sm:$0xff] }
 0xa3c   : > { %v4236_v36 = vadd.f32 %v9226_v26, %v9224_v25  ;;  %v4538_v24 = vld [vmem:[%s7980_s24 + $0x30] sm:$0xff] }
 0xa3e   : > { %v4237_v38 = vadd.f32 %v4236_v36, %v9232_v46  ;;  %v4370_v36 = vld [vmem:[%s7972_s6 + $0x1b0] sm:$0xff] }
 0xa40   : > { %v4238_v39 = vadd.f32 %v4237_v38, %v9236_v37 }
 0xa42   : > { %4239 = vadd.xlane.f32.xlu0 %v4238_v39  ;;  %v4371_v39 = vld [vmem:[%s7972_s6 + $0x1b8] sm:$0xff] }
 0xa43   : > { %v6535_v41 = vpack.c.bf16 %v4371_v39, %v4370_v36  ;;  %v4330_v36 = vld [vmem:[%s7972_s6 + $0x70] sm:$0xff] }
 0xa45   : > { %6536 = vmatprep.subr.bf16.mxu1 %v6535_v41 }
 0xa46   : > { %6538 = vmatpush3.bf16.msra.mxu1 %v6537_v43  ;;  %v4535_v43 = vld [vmem:[%s7980_s24 + $0x18] sm:$0xff] }
 0xa47   : > { %6540 = vmatprep.subr.bf16.mxu1 %v6539_v49  ;;  %v6587_v29 = vpack.c.bf16 %v4539_v61, %v4535_v43  ;;  %v4235_v49 = vld [vmem:[%s9574_s27] sm:$0xf]  ;;  %v4552_v43 = vld [vmem:[%s7980_s24 + $0xa0] sm:$0xff] }
 0xa48   : > { %v4299_v62 = vrot.slane %v4235_v49, %v8213_v15  ;;  %v4307_v31 = vrot.slane %v4235_v49, %v8219_v17  ;;  %v4295_v32 = vrot.slane %v4235_v49, %v8210_v14  ;;  %v4554_v61 = vld [vmem:[%s7980_s24 + $0xb0] sm:$0xff] }
 0xa4a   : > { %6542 = vmatpush3.bf16.msra.mxu1 %v6541_v13 }
 0xa4b   : > { %6544 = vmatprep.subr.bf16.mxu1 %v6543_v23  ;;  %v4532_v23 = vld [vmem:[%s7980_s24] sm:$0xff] }
 0xa4e   : > { %6546 = vmatpush3.bf16.msra.mxu1 %v6545_v5  ;;  %v4541_v5 = vld [vmem:[%s7980_s24 + $0x48] sm:$0xff] }
 0xacf   : > { %v4240_v9 = vpop.xlane.xlu0 %4239 }
 0xad0   : > { %v4241_v33 = vmul.f32 0.0025, %v4240_v9  ;;  %v4328_v9 = vld [vmem:[%s7972_s6 + $0x60] sm:$0xff] }
 0xad2   : > { %v9265_v10 = vsub.f32 %v9224_v25, %v4241_v33  ;;  %v9268_v12 = vsub.f32 %v9226_v26, %v4241_v33  ;;  %v9271_v18 = vsub.f32 %v9232_v46, %v4241_v33  ;;  %v4245_v1 = vsub.f32 %v9236_v37, %v4241_v33 }
 0xad3   : > { %v6547_v33 = vpack.c.bf16 %v4377_v8, %v4376_v7 }
 0xad4   : > { %v9275_v50 = vmul.f32 %v8139_v56, %v4245_v1  ;;  %v4250_v19 = vmul.f32 %v9265_v10, %v9265_v10  ;;  %v4251_v11 = vmul.f32 %v9268_v12, %v9268_v12  ;;  %v4252_v20 = vmul.f32 %v9271_v18, %v9271_v18  ;;  %v4338_v56 = vld [vmem:[%s7972_s6 + $0xb0] sm:$0xff]  ;;  %v4329_v1 = vld [vmem:[%s7972_s6 + $0x68] sm:$0xff] }
 0xad5   : > { %v6503_v38 = vpack.c.bf16 %v4339_v34, %v4338_v56  ;;  %v4379_v34 = vld [vmem:[%s7972_s6 + $0x1f8] sm:$0xff]  ;;  %6548 = vmatprep.subr.bf16.mxu1 %v6547_v33  ;;  %v4545_v33 = vld [vmem:[%s7980_s24 + $0x68] sm:$0xff] }
 0xad6   : > { %v4254_v21 = vadd.f32 %v4251_v11, %v4250_v19  ;;  %v4253_v22 = vmul.f32 %v9275_v50, %v9275_v50  ;;  %v4360_v19 = vld [vmem:[%s7972_s6 + $0x160] sm:$0xff]  ;;  %v4361_v11 = vld [vmem:[%s7972_s6 + $0x168] sm:$0xff] }
 0xad7   : > { %6504 = vmatprep.subr.bf16.mxu0 %v6503_v38  ;;  %v4331_v38 = vld [vmem:[%s7972_s6 + $0x78] sm:$0xff] }
 0xad8   : > { %v4255_v27 = vadd.f32 %v4254_v21, %v4252_v20  ;;  %6506 = vmatpush3.bf16.msra.mxu0 %v6505_v58  ;;  %v6517_v20 = vpack.c.bf16 %v4329_v1, %v4328_v9  ;;  %v4346_v21 = vld [vmem:[%s7972_s6 + $0xf0] sm:$0xff]  ;;  %v6521_v41 = vpack.c.bf16 %v4331_v38, %v4330_v36  ;;  %v6553_v58 = vpack.c.bf16 %v4363_v63, %v4362_v40  ;;  %v4547_v1 = vld [vmem:[%s7980_s24 + $0x78] sm:$0xff] }
 0xad9   : > { %6508 = vmatprep.subr.bf16.mxu0 %v6507_v59  ;;  %v4553_v40 = vld [vmem:[%s7980_s24 + $0xa8] sm:$0xff]  ;;  %v4551_v63 = vld [vmem:[%s7980_s24 + $0x98] sm:$0xff] }
 0xada   : > { %v4256_v28 = vadd.f32 %v4255_v27, %v4253_v22  ;;  %v4347_v22 = vld [vmem:[%s7972_s6 + $0xf8] sm:$0xff]  ;;  %v4378_v27 = vld [vmem:[%s7972_s6 + $0x1f0] sm:$0xff]  ;;  %s9573_s6 = scalar_lea.vmem [#allocation16], %s7953_s1 }
 0xadb   : > { %v6519_v56 = vpack.c.bf16 %v4347_v22, %v4346_v21  ;;  %v6551_v39 = vpack.c.bf16 %v4379_v34, %v4378_v27  ;;  %v4234_v48 = vld [vmem:[%s9573_s6] sm:$0xf]  ;;  %v4540_v21 = vld [vmem:[%s7980_s24 + $0x40] sm:$0xff]  ;;  %v6559_v22 = vpack.c.bf16 %v4545_v33, %v4541_v5 }
 0xadc   : > { %4257 = vadd.xlane.f32.xlu1 %v4256_v28  ;;  %6510 = vmatpush3.bf16.msra.mxu0 %v6509_v52  ;;  %v6549_v28 = vpack.c.bf16 %v4361_v11, %v4360_v19  ;;  %v4274_v52 = vrot.slane %v4234_v48, %v8213_v15  ;;  %v4282_v53 = vrot.slane %v4234_v48, %v8219_v17  ;;  %v4546_v34 = vld [vmem:[%s7980_s24 + $0x70] sm:$0xff] }
 0xadd   : > { %6512 = vmatprep.subr.bf16.mxu0 %v6511_v35  ;;  %v4270_v54 = vrot.slane %v4234_v48, %v8210_v14  ;;  %v4278_v60 = vrot.slane %v4234_v48, %v8216_v16  ;;  %v4303_v35 = vrot.slane %v4235_v49, %v8216_v16  ;;  %v6589_v19 = vpack.c.bf16 %v4538_v24, %v4534_v45  ;;  %v4563_v49 = vld [vmem:[%s7980_s24 + $0xf8] sm:$0xff]  ;;  %v4566_v24 = vld [vmem:[%s7980_s24 + $0x110] sm:$0xff] }
 0xade   : > { %6550 = vmatpush3.bf16.msra.mxu1 %v6549_v28  ;;  %v4544_v28 = vld [vmem:[%s7980_s24 + $0x60] sm:$0xff]  ;;  %v4570_v5 = vld [vmem:[%s7980_s24 + $0x130] sm:$0xff] }
 0xadf   : > { %6552 = vmatprep.subr.bf16.mxu1 %v6551_v39  ;;  %v6561_v36 = vpack.c.bf16 %v4544_v28, %v4540_v21  ;;  %v4549_v39 = vld [vmem:[%s7980_s24 + $0x88] sm:$0xff] }
 0xae0   : > { %6514 = vmatpush3.bf16.msra.mxu0 %v6513_v3  ;;  %v4581_v21 = vld [vmem:[%s7980_s24 + $0x188] sm:$0xff] }
 0xae1   : > { %6516 = vmatprep.subr.bf16.mxu0 %v6515_v6 }
 0xae2   : > { %6554 = vmatpush3.bf16.msra.mxu1 %v6553_v58  ;;  %v4555_v58 = vld [vmem:[%s7980_s24 + $0xb8] sm:$0xff] }
 0xae3   : > { %6588 = vmatprep.subr.bf16.mxu1 %v6587_v29  ;;  %v6595_v57 = vpack.c.bf16 %v4555_v58, %v4551_v63  ;;  %v4586_v63 = vld [vmem:[%s7980_s24 + $0x1b0] sm:$0xff]  ;;  %v4589_v58 = vld [vmem:[%s7980_s24 + $0x1c8] sm:$0xff] }
 0xae4   : > { %6518 = vmatpush3.bf16.msra.mxu0 %v6517_v20 }
 0xae5   : > { %6520 = vmatprep.subr.bf16.mxu0 %v6519_v56  ;;  %v4542_v56 = vld [vmem:[%s7980_s24 + $0x50] sm:$0xff] }
 0xae6   : > { %v6593_v38 = vpack.c.bf16 %v4546_v34, %v4542_v56  ;;  %v4587_v56 = vld [vmem:[%s7980_s24 + $0x1b8] sm:$0xff]  ;;  %v4580_v34 = vld [vmem:[%s7980_s24 + $0x180] sm:$0xff] }
 0xae8   : > { %6522 = vmatpush3.bf16.msra.mxu0 %v6521_v41  ;;  %v6563_v41 = vpack.c.bf16 %v4553_v40, %v4549_v39  ;;  %v4582_v40 = vld [vmem:[%s7980_s24 + $0x190] sm:$0xff] }
 0xae9   : > { %6556 = vmatprep.subr.bf16.mxu0 %v6555_v44  ;;  %v4550_v44 = vld [vmem:[%s7980_s24 + $0x90] sm:$0xff] }
 0xaea   : > { %v6597_v29 = vpack.c.bf16 %v4554_v61, %v4550_v44  ;;  %v4595_v44 = vld [vmem:[%s7980_s24 + $0x1f8] sm:$0xff]  ;;  %v4588_v61 = vld [vmem:[%s7980_s24 + $0x1c0] sm:$0xff] }
 0xb69   : > { %v4258_v59 = vpop.xlane.xlu1 %4257 }
 0xb6a   : > { %v4259_v47 = vmul.f32 0.0025, %v4258_v59  ;;  %v4557_v59 = vld [vmem:[%s7980_s24 + $0xc8] sm:$0xff] }
 0xb6c   : > { %v4260_v51 = vadd.f32 1e-05, %v4259_v47  ;;  %v4561_v47 = vld [vmem:[%s7980_s24 + $0xe8] sm:$0xff] }
 0xb6d   : > { %v6567_v48 = vpack.c.bf16 %v4561_v47, %v4557_v59  ;;  %v4590_v47 = vld [vmem:[%s7980_s24 + $0x1d0] sm:$0xff] }
 0xb6e   : > { %6801 = vrsqrt.f32 %v4260_v51  ;;  %v4559_v51 = vld [vmem:[%s7980_s24 + $0xd8] sm:$0xff] }
 0xb78   : > { %v6802_v13 = vpop.eup %6801 }
 0xb79   : > { %v4263_v0 = vmul.f32 %v6802_v13, %v9268_v12  ;;  %v4265_v30 = vmul.f32 %v6802_v13, %v9275_v50  ;;  %v4262_v2 = vmul.f32 %v6802_v13, %v9265_v10  ;;  %v4264_v3 = vmul.f32 %v6802_v13, %v9271_v18  ;;  %v4543_v12 = vld [vmem:[%s7980_s24 + $0x58] sm:$0xff]  ;;  %v4558_v13 = vld [vmem:[%s7980_s24 + $0xd0] sm:$0xff] }
 0xb7a   : > { %v6557_v50 = vpack.c.bf16 %v4536_v4, %v4532_v23  ;;  %v6591_v27 = vpack.c.bf16 %v4547_v1, %v4543_v12  ;;  %v4567_v23 = vld [vmem:[%s7980_s24 + $0x118] sm:$0xff]  ;;  %v4572_v1 = vld [vmem:[%s7980_s24 + $0x140] sm:$0xff] }
 0xb7b   : > { %v4288_v6 = vmul.f32 %v4274_v52, %v4263_v0  ;;  %v4290_v7 = vmul.f32 %v4282_v53, %v4265_v30  ;;  %v4287_v8 = vmul.f32 %v4270_v54, %v4262_v2  ;;  %v4289_v9 = vmul.f32 %v4278_v60, %v4264_v3  ;;  %v4556_v52 = vld [vmem:[%s7980_s24 + $0xc0] sm:$0xff]  ;;  %v4571_v30 = vld [vmem:[%s7980_s24 + $0x138] sm:$0xff] }
 0xb7c   : > { %v4560_v53 = vld [vmem:[%s7980_s24 + $0xe0] sm:$0xff]  ;;  %v6599_v54 = vpack.c.bf16 %v4563_v49, %v4559_v51  ;;  %v6603_v4 = vpack.c.bf16 %v4571_v30, %v4567_v23  ;;  %v4579_v12 = vld [vmem:[%s7980_s24 + $0x178] sm:$0xff]  ;;  %v4594_v51 = vld [vmem:[%s7980_s24 + $0x1f0] sm:$0xff] }
 0xb7d   : > { %v4313_v10 = vadd.f32 %v4299_v62, %v4288_v6  ;;  %v4315_v11 = vadd.f32 %v4307_v31, %v4290_v7  ;;  %v4312_v18 = vadd.f32 %v4295_v32, %v4287_v8  ;;  %v4314_v20 = vadd.f32 %v4303_v35, %v4289_v9  ;;  %v4562_v62 = vld [vmem:[%s7980_s24 + $0xf0] sm:$0xff]  ;;  %v4565_v32 = vld [vmem:[%s7980_s24 + $0x108] sm:$0xff]  ;;  %v4564_v2 = vld [vmem:[%s7980_s24 + $0x100] sm:$0xff] }
 0xb7e   : > { %v6569_v60 = vpack.c.bf16 %v4560_v53, %v4556_v52  ;;  %v6601_v31 = vpack.c.bf16 %v4562_v62, %v4558_v13  ;;  %v4569_v35 = vld [vmem:[%s7980_s24 + $0x128] sm:$0xff]  ;;  %v4568_v3 = vld [vmem:[%s7980_s24 + $0x120] sm:$0xff]  ;;  %v6605_v6 = vpack.c.bf16 %v4570_v5, %v4566_v24  ;;  %v4575_v9 = vld [vmem:[%s7980_s24 + $0x158] sm:$0xff] }
 0xb7f   : > { %4451 = vmatprep.mubr.f32.mxu0 %v4313_v10  ;;  %4521 = vmatprep.mubr.f32.mxu1 %v4315_v11  ;;  %v6571_v0 = vpack.c.bf16 %v4569_v35, %v4565_v32  ;;  %v6573_v45 = vpack.c.bf16 %v4568_v3, %v4564_v2  ;;  %v4573_v7 = vld [vmem:[%s7980_s24 + $0x148] sm:$0xff]  ;;  %v4574_v11 = vld [vmem:[%s7980_s24 + $0x150] sm:$0xff]  ;;  %v5129_v53 = vld [vmem:[%s9575_s23] ss:$0 sm:$0xff] }
 0xb80   : > { %4452 = vmatmul.mubr.f32.vlgmr.msra.gmra.mrb[10].mxu0 %v4312_v18  ;;  %4522 = vmatmul.mubr.f32.vlgmr.msra.gmra.mrb[12].mxu1 %v4314_v20  ;;  %v4577_v8 = vld [vmem:[%s7980_s24 + $0x168] sm:$0xff]  ;;  %v4578_v18 = vld [vmem:[%s7980_s24 + $0x170] sm:$0xff] }
 0xb81   : > { %6558 = vmatpush1.bf16.msra.mxu0 %v6557_v50  ;;  %6590 = vmatpush1.bf16.msra.mxu1 %v6589_v19  ;;  %v6575_v33 = vpack.c.bf16 %v4577_v8, %v4573_v7  ;;  %v4576_v50 = vld [vmem:[%s7980_s24 + $0x160] sm:$0xff]  ;;  %v6607_v19 = vpack.c.bf16 %v4579_v12, %v4575_v9  ;;  %v6609_v20 = vpack.c.bf16 %v4578_v18, %v4574_v11 }
 0xb82   : > { %6560 = vmatprep.subr.bf16.mxu0 %v6559_v22  ;;  %6592 = vmatprep.subr.bf16.mxu1 %v6591_v27  ;;  %v6577_v10 = vpack.c.bf16 %v4576_v50, %v4572_v1  ;;  %v4585_v22 = vld [vmem:[%s7980_s24 + $0x1a8] sm:$0xff]  ;;  %v4583_v27 = vld [vmem:[%s7980_s24 + $0x198] sm:$0xff] }
 0xb83   : > { %4682 = vmatprep.mubr.f32.mxu0 %v7338_v55  ;;  %4753 = vmatprep.mubr.f32.mxu1 %v7338_v55  ;;  %v6565_v55 = vpack.c.bf16 %v4552_v43, %v4548_v42  ;;  %v6579_v28 = vpack.c.bf16 %v4585_v22, %v4581_v21  ;;  %v4593_v42 = vld [vmem:[%s7980_s24 + $0x1e8] sm:$0xff] }
 0xb84   : > { %v6583_v43 = vpack.c.bf16 %v4593_v42, %v4589_v58 }
 0xb85   : > { %6562 = vmatpush1.bf16.msra.mxu0 %v6561_v36  ;;  %6594 = vmatpush1.bf16.msra.mxu1 %v6593_v38  ;;  %v4584_v36 = vld [vmem:[%s7980_s24 + $0x1a0] sm:$0xff]  ;;  %v6611_v38 = vpack.c.bf16 %v4587_v56, %v4583_v27 }
 0xb86   : > { %6564 = vmatprep.subr.bf16.mxu0 %v6563_v41  ;;  %6596 = vmatprep.subr.bf16.mxu1 %v6595_v57  ;;  %v6581_v39 = vpack.c.bf16 %v4584_v36, %v4580_v34  ;;  %v6613_v41 = vpack.c.bf16 %v4586_v63, %v4582_v40  ;;  %v4591_v57 = vld [vmem:[%s7980_s24 + $0x1d8] sm:$0xff] }
 0xb89   : > { %6566 = vmatpush1.bf16.msra.mxu0 %v6565_v55  ;;  %6598 = vmatpush1.bf16.msra.mxu1 %v6597_v29  ;;  %v4592_v55 = vld [vmem:[%s7980_s24 + $0x1e0] sm:$0xff]  ;;  %v6615_v29 = vpack.c.bf16 %v4595_v44, %v4591_v57  ;;  %s9576_s24 = scalar_lea.vmem [#allocation24], %s7953_s1 }
 0xb8a   : > { %6568 = vmatprep.subr.bf16.mxu0 %v6567_v48  ;;  %6600 = vmatprep.subr.bf16.mxu1 %v6599_v54  ;;  %v6585_v59 = vpack.c.bf16 %v4592_v55, %v4588_v61  ;;  %v6617_v48 = vpack.c.bf16 %v4594_v51, %v4590_v47  ;;  %v4596_v3 = vld [vmem:[%s9576_s24] sm:$0xf] }
 0xb8b   : > { %v4605_v24 = vrot.slane %v4596_v3, %v8213_v15  ;;  %v4613_v5 = vrot.slane %v4596_v3, %v8219_v17 }
 0xb8d   : > { %6570 = vmatpush1.bf16.msra.mxu0 %v6569_v60  ;;  %6602 = vmatpush1.bf16.msra.mxu1 %v6601_v31 }
 0xb8e   : > { %6572 = vmatprep.subr.bf16.mxu0 %v6571_v0  ;;  %6604 = vmatprep.subr.bf16.mxu1 %v6603_v4  ;;  %v4601_v4 = vrot.slane %v4596_v3, %v8210_v14 }
 0xb91   : > { %6574 = vmatpush1.bf16.msra.mxu0 %v6573_v45  ;;  %6606 = vmatpush1.bf16.msra.mxu1 %v6605_v6  ;;  %v4609_v45 = vrot.slane %v4596_v3, %v8216_v16 }
 0xb92   : > { %6576 = vmatprep.subr.bf16.mxu0 %v6575_v33  ;;  %6608 = vmatprep.subr.bf16.mxu1 %v6607_v19 }
 0xb95   : > { %6578 = vmatpush1.bf16.msra.mxu0 %v6577_v10  ;;  %6610 = vmatpush1.bf16.msra.mxu1 %v6609_v20 }
 0xb96   : > { %6580 = vmatprep.subr.bf16.mxu0 %v6579_v28  ;;  %6612 = vmatprep.subr.bf16.mxu1 %v6611_v38 }
 0xb99   : > { %6582 = vmatpush1.bf16.msra.mxu0 %v6581_v39  ;;  %6614 = vmatpush1.bf16.msra.mxu1 %v6613_v41 }
 0xb9a   : > { %6584 = vmatprep.subr.bf16.mxu0 %v6583_v43  ;;  %6616 = vmatprep.subr.bf16.mxu1 %v6615_v29 }
 0xb9d   : > { %6586 = vmatpush1.bf16.msra.mxu0 %v6585_v59  ;;  %6618 = vmatpush1.bf16.msra.mxu1 %v6617_v48 }
 0xc53   : > { %v5173_v49 = vpop.f32.mrb[10].mxu0  ;;  %v5208_v52 = vpop.f32.mrb[12].mxu1 }
 0xc54   : > { %v5174_v54 = vpop.f32.mrb[11].mxu0  ;;  %v5209_v60 = vpop.f32.mrb[13].mxu1 }
 0xc55   : > { %v5175_v13 = vadd.f32 %v5174_v54, %v5173_v49  ;;  %v5210_v62 = vadd.f32 %v5209_v60, %v5208_v52 }
 0xc57   : > { %v4454_v31 = vadd.f32 %v5175_v13, %v5129_v53 }
 0xc59   : > { %v4524_v32 = vadd.f32 %v5210_v62, %v4454_v31 }
 0xc5b   : > { %v4528_v35 = vmul.f32 0.70710677, %v4524_v32  ;;  %v4527_v0 = vmul.f32 0.5, %v4524_v32 }
 0xc5d   : > { %6803 = verf.f32 %v4528_v35 }
 0xc67   : > { %v6804_v23 = vpop.eup %6803 }
 0xc68   : > { %v4530_v30 = vadd.f32 1.0, %v6804_v23 }
 0xc6a   : > { %v4531_v2 = vmul.f32 %v4530_v30, %v4527_v0 }
 0xc6c   : > { %4683 = vmatmul.mubr.f32.vlgmr.msra.gmra.mrb[12].mxu0 %v4531_v2  ;;  %4754 = vmatmul.mubr.f32.vlgmr.msra.gmra.mrb[14].mxu1 %v4531_v2 }
 0xd3f   : > { %v4684_v6 = vpop.f32.mrb[12].mxu0  ;;  %v4755_v7 = vpop.f32.mrb[14].mxu1 }
 0xd40   : > { %v4685_v8 = vadd.f32 %v4684_v6, %v4601_v4  ;;  %v4756_v9 = vadd.f32 %v4755_v7, %v4609_v45  ;;  %v4686_v33 = vpop.f32.mrb[13].mxu0  ;;  %v4757_v12 = vpop.f32.mrb[15].mxu1 }
 0xd41   : > { %v4687_v1 = vadd.f32 %v4686_v33, %v4605_v24  ;;  %v4758_v50 = vadd.f32 %v4757_v12, %v4613_v5 }
 0xd42   : > { %v4760_v19 = vadd.f32 %v4685_v8, %v9224_v25  ;;  %v4762_v10 = vadd.f32 %v4756_v9, %v9232_v46 }
 0xd43   : > { %v4761_v14 = vadd.f32 %v4687_v1, %v9226_v26  ;;  %v4763_v16 = vadd.f32 %v4758_v50, %v9236_v37 }
 0xd44   : > { %4764 = vst [vmem:[%s9570_s15] sm:$0xff] %v4760_v19  ;;  %4766 = vst [vmem:[%s9570_s15 + $0x10] sm:$0xff] %v4762_v10 }
 0xd45   : > { %4765 = vst [vmem:[%s9570_s15 + $0x8] sm:$0xff] %v4761_v14  ;;  %4767 = vst [vmem:[%s9570_s15 + $0x18] sm:$0xff] %v4763_v16 }
 0xd46 PF: > { %s9577_s27 = sld [smem:[#allocation36_spill]]  ;;  %s9578_s24 = sld [smem:[#allocation33_spill]] }
 0xd47   : > { %s9579_s25 = sld [smem:[#allocation34_spill]]  ;;  %s9580_s26 = sld [smem:[#allocation37_spill]] }
 0xd4c   : > { %p45_p7 = scmp.ge.s32.totalorder %s9577_s27, 6  }
 0xd4e   :  { %47 = sbr.rel (!%p45_p7) target bundleno = 29 (0x1d), region = 276 }
 0xd55   :  { %4785 = vsyncpa [#allocation3], 1 }
 0xd56   :  { %4787 = vsyncpa [#allocation3 + $0x1], 1 }
 0xd57   :  { %4788 = vsyncpa [#allocation5], 1 }
 0xd58   :  { %4789 = vsyncpa [#allocation8], 1 }
 0xd59   :  { %4791 = vsyncpa [#allocation8 + $0x1], 1 }
 0xd5a   :  { %4792 = vsyncpa [#allocation11], 1 }
 0xd5b   :  { %4794 = vsyncpa [#allocation11 + $0x1], 1 }
 0xd5c   :  { %4795 = vsyncpa [#allocation14], 1 }
 0xd5d   :  { %4797 = vsyncpa [#allocation14 + $0x1], 1 }
 0xd5e   :  { %4798 = vsyncpa [#allocation17], 1 }
 0xd5f   :  { %4800 = vsyncpa [#allocation17 + $0x1], 1 }
 0xd60   :  { %4801 = vsyncpa [#allocation20], 1 }
 0xd61   :  { %4803 = vsyncpa [#allocation20 + $0x1], 1 }
 0xd62   :  { %4804 = vsyncpa [#allocation23], 1 }
 0xd63   :  { %4806 = vsyncpa [#allocation23 + $0x1], 1 }

</bundles_post_ra>
